<compile_context>
chip_gen: v6e
topology: v6e:2x2x1
jax: 0.10.0
libtpu: 0.0.40
codegen_flags: <defaults>
</compile_context>

<pallas_src>
import functools
import math

import jax
import jax.numpy as jnp
from jax import lax
from jax.experimental import pallas as pl
from jax.experimental.pallas import tpu as pltpu


_SQRT_HALF = 1.0 / math.sqrt(2.0)


# ---------------------------------------------------------------------------
# In-kernel helpers (pure jnp, traced inside the Pallas kernels)
# ---------------------------------------------------------------------------

def _erf_approx(x):
    # Abramowitz & Stegun 7.1.26 rational approximation, |abs err| <= 1.5e-7
    # (float32-level accuracy), built only from exp/VPU ops that lower to Mosaic.
    # TODO(synk): switch to lax.erf once its Mosaic lowering is guaranteed.
    a1, a2, a3, a4, a5 = (0.254829592, -0.284496736, 1.421413741,
                          -1.453152027, 1.061405429)
    p = 0.3275911
    ax = jnp.abs(x)
    t = 1.0 / (1.0 + p * ax)
    poly = ((((a5 * t + a4) * t + a3) * t + a2) * t + a1) * t
    y = 1.0 - poly * jnp.exp(-(ax * ax))
    return jnp.where(x < 0.0, -y, y)


def _gelu_exact(x):
    # nn.GELU() default (erf-based), computed in-kernel.
    return 0.5 * x * (1.0 + _erf_approx(x * _SQRT_HALF))


def _layer_norm(x, gamma, beta, eps):
    # torch.Tensor.std is unbiased (n-1); reference normalizes by (std + eps).
    n = float(x.shape[-1])
    mean = jnp.mean(x, axis=-1, keepdims=True)
    d = x - mean
    var = jnp.sum(d * d, axis=-1, keepdims=True) / (n - 1.0)
    return gamma * d / (jnp.sqrt(var) + eps) + beta


# ---------------------------------------------------------------------------
# Fused EncoderLayer kernel: QKV + attention + proj + add&norm + FFN + add&norm
# ---------------------------------------------------------------------------

def _encoder_layer_kernel(x_ref, m_ref, wqkv_ref, bqkv_ref, wproj_ref, bproj_ref,
                          g_ref, be_ref, w1_ref, b1_ref, w2_ref, b2_ref, o_ref,
                          *, nhead, eps):
    x = x_ref[0]                        # [S, E]
    m = m_ref[0]                        # [1, S]  (key mask)
    E = x.shape[-1]
    dh = E // nhead
    scale = 1.0 / math.sqrt(dh)

    # --- self attention: all heads in one grid step, split on the lane axis ---
    qkv = jnp.dot(x, wqkv_ref[...], preferred_element_type=jnp.float32) + bqkv_ref[...]
    heads = []
    for h in range(nhead):              # static loop, static lane slices
        qh = qkv[:, h * dh:(h + 1) * dh]
        kh = qkv[:, E + h * dh:E + (h + 1) * dh]
        vh = qkv[:, 2 * E + h * dh:2 * E + (h + 1) * dh]
        # q @ k^T without materializing k.T (contract last dims on the MXU)
        s = lax.dot_general(qh, kh, (((1,), (1,)), ((), ())),
                            preferred_element_type=jnp.float32) * scale
        s = jnp.where(m == 0.0, -10000.0, s)      # masked_fill(attmask == 0, -10000)
        s = s - jnp.max(s, axis=-1, keepdims=True)
        p = jnp.exp(s)
        p = p / jnp.sum(p, axis=-1, keepdims=True)
        heads.append(jnp.dot(p, vh, preferred_element_type=jnp.float32))
    y = jnp.concatenate(heads, axis=-1)           # [S, E], head-merged, lane dense
    y = jnp.dot(y, wproj_ref[...], preferred_element_type=jnp.float32) + bproj_ref[...]

    # --- add & norm (dropout == identity in eval) ---
    x = _layer_norm(x + y, g_ref[...], be_ref[...], eps)

    # --- FFN with in-kernel exact GELU ---
    h1 = jnp.dot(x, w1_ref[...], preferred_element_type=jnp.float32) + b1_ref[...]
    h1 = _gelu_exact(h1)
    h2 = jnp.dot(h1, w2_ref[...], preferred_element_type=jnp.float32) + b2_ref[...]

    # --- add & norm ---
    o_ref[0] = _layer_norm(x + h2, g_ref[...], be_ref[...], eps)


def encoder_layer(x, mask, p, nhead, eps=1e-6):
    """x: [B, S, E], mask: [B, S] -> [B, S, E].  One fused kernel, grid=(B,)."""
    B, S, E = x.shape
    mask3 = mask.reshape(B, 1, S).astype(jnp.float32)
    kern = functools.partial(_encoder_layer_kernel, nhead=nhead, eps=eps)
    const2 = lambda b: (0, 0)
    return pl.pallas_call(
        kern,
        out_shape=jax.ShapeDtypeStruct((B, S, E), jnp.float32),
        grid=(B,),
        in_specs=[
            pl.BlockSpec((1, S, E), lambda b: (b, 0, 0)),       # x
            pl.BlockSpec((1, 1, S), lambda b: (b, 0, 0)),       # mask
            pl.BlockSpec((E, 3 * E), const2),                   # wqkv
            pl.BlockSpec((1, 3 * E), const2),                   # bqkv
            pl.BlockSpec((E, E), const2),                       # wproj
            pl.BlockSpec((1, E), const2),                       # bproj
            pl.BlockSpec((1, E), const2),                       # gamma
            pl.BlockSpec((1, E), const2),                       # beta
            pl.BlockSpec((E, 4 * E), const2),                   # w1
            pl.BlockSpec((1, 4 * E), const2),                   # b1
            pl.BlockSpec((4 * E, E), const2),                   # w2
            pl.BlockSpec((1, E), const2),                       # b2
        ],
        out_specs=pl.BlockSpec((1, S, E), lambda b: (b, 0, 0)),
        compiler_params=pltpu.CompilerParams(
            dimension_semantics=("parallel",),
            vmem_limit_bytes=32 * 1024 * 1024),
    )(x, mask3, p['wqkv'], p['bqkv'].reshape(1, -1), p['wproj'],
      p['bproj'].reshape(1, -1), p['gamma'].reshape(1, -1),
      p['beta'].reshape(1, -1), p['w1'], p['b1'].reshape(1, -1),
      p['w2'], p['b2'].reshape(1, -1))


# ---------------------------------------------------------------------------
# Cross-attention (QANet-style similarity) kernel
# ---------------------------------------------------------------------------

def _cross_kernel(c_ref, q_ref, wa_ref, wb_ref, wc_ref, bias_ref,
                  qm_ref, cm_ref, a_ref, b_ref):
    # One batch element: c [Sc, E], q [Sq, E]  (Sq == Sc in the reference module).
    c = c_ref[0]
    q = q_ref[0]
    wa = wa_ref[...]                      # [1, E]
    wb = wb_ref[...]                      # [1, E]
    wc = wc_ref[...]                      # [1, E]
    qm = qm_ref[0]                        # [1, Sq]
    cm = cm_ref[0]                        # [Sc, 1]

    # S[i, j] = c_i.wa + c_j.wb + (c_i*c_j).wc + bias
    # fold the row term: (c_i*wc + wb) . c_j = (c_i*c_j).wc + c_j.wb  -> one matmul
    t1 = jnp.sum(c * wa, axis=-1, keepdims=True)                        # [Sc, 1]
    pair = lax.dot_general(c * wc + wb, c, (((1,), (1,)), ((), ())),
                           preferred_element_type=jnp.float32)          # [Sc, Sc]
    s = t1 + pair + bias_ref[...]

    # Row mask (q_mask along key axis) + softmax over last dim.
    s_rowm = jnp.where(qm == 0.0, -10000.0, s)
    sr = s_rowm - jnp.max(s_rowm, axis=-1, keepdims=True)
    pr = jnp.exp(sr)
    s_row = pr / jnp.sum(pr, axis=-1, keepdims=True)
    a_ref[0] = jnp.dot(s_row, q, preferred_element_type=jnp.float32)

    # Column mask applied on top of already row-masked S (masked_fill_ is in-place),
    # softmax over dim=1 (the c_len axis -> axis 0 per batch).
    s_colm = jnp.where(cm == 0.0, -10000.0, s_rowm)
    sc_ = s_colm - jnp.max(s_colm, axis=0, keepdims=True)
    pc = jnp.exp(sc_)
    s_col = pc / jnp.sum(pc, axis=0, keepdims=True)
    # (S_col @ S_row^T) @ c, contracting last dims (no explicit transpose)
    b_mat = lax.dot_general(s_col, s_row, (((1,), (1,)), ((), ())),
                            preferred_element_type=jnp.float32)          # [Sc, Sc]
    b_ref[0] = jnp.dot(b_mat, c, preferred_element_type=jnp.float32)


def cross_attention(c, q, wa, wb, wc, wbias, q_mask, c_mask):
    B, Sc, E = c.shape
    Sq = q.shape[1]
    assert Sq == Sc, "original module's broadcast requires q_len == c_len"
    qm = q_mask.reshape(B, 1, Sq).astype(jnp.float32)
    cm = c_mask.reshape(B, Sc, 1).astype(jnp.float32)
    const2 = lambda b: (0, 0)
    out_shape = (jax.ShapeDtypeStruct((B, Sc, E), jnp.float32),
                 jax.ShapeDtypeStruct((B, Sc, E), jnp.float32))
    return pl.pallas_call(
        _cross_kernel,
        out_shape=out_shape,
        grid=(B,),
        in_specs=[pl.BlockSpec((1, Sc, E), lambda b: (b, 0, 0)),
                  pl.BlockSpec((1, Sq, E), lambda b: (b, 0, 0)),
                  pl.BlockSpec((1, E), const2),
                  pl.BlockSpec((1, E), const2),
                  pl.BlockSpec((1, E), const2),
                  pl.BlockSpec((1, 1), const2),
                  pl.BlockSpec((1, 1, Sq), lambda b: (b, 0, 0)),
                  pl.BlockSpec((1, Sc, 1), lambda b: (b, 0, 0))],
        out_specs=(pl.BlockSpec((1, Sc, E), lambda b: (b, 0, 0)),
                   pl.BlockSpec((1, Sc, E), lambda b: (b, 0, 0))),
        compiler_params=pltpu.CompilerParams(dimension_semantics=("parallel",)),
    )(c, q, wa, wb, wc, wbias, qm, cm)


# ---------------------------------------------------------------------------
# Fused classification head: Whead1 (K-tiled reduction) + Whead2
# ---------------------------------------------------------------------------

def _head_kernel(x_ref, w1_ref, b1_ref, w2_ref, b2_ref, o_ref, acc_ref):
    k = pl.program_id(0)

    @pl.when(k == 0)
    def _():
        acc_ref[...] = jnp.zeros_like(acc_ref)

    acc_ref[...] += jnp.dot(x_ref[...], w1_ref[...],
                            preferred_element_type=jnp.float32)

    @pl.when(k == pl.num_programs(0) - 1)
    def _():
        h = acc_ref[...] + b1_ref[...]                      # out1 (dropout == identity)
        o_ref[...] = jnp.dot(h, w2_ref[...],
                             preferred_element_type=jnp.float32) + b2_ref[...]


def head(flat, w1, b1, w2, b2):
    """flat: [B, K] -> [B, 2].  K-tiled reduction so the Whead1 weight never has to
    sit whole in VMEM (scales with c_len*4*embed; fits v7x's 64 MiB budget)."""
    B, K = flat.shape
    E = w1.shape[1]
    N2 = w2.shape[1]
    tk = K
    for cand in (512, 256, 128):
        if K % cand == 0:
            tk = cand
            break
    return pl.pallas_call(
        _head_kernel,
        out_shape=jax.ShapeDtypeStruct((B, N2), jnp.float32),
        grid=(K // tk,),
        in_specs=[pl.BlockSpec((B, tk), lambda k: (0, k)),
                  pl.BlockSpec((tk, E), lambda k: (k, 0)),
                  pl.BlockSpec((1, E), lambda k: (0, 0)),
                  pl.BlockSpec((E, N2), lambda k: (0, 0)),
                  pl.BlockSpec((1, N2), lambda k: (0, 0))],
        out_specs=pl.BlockSpec((B, N2), lambda k: (0, 0)),
        scratch_shapes=[pltpu.VMEM((B, E), jnp.float32)],
        compiler_params=pltpu.CompilerParams(
            dimension_semantics=("arbitrary",),
            vmem_limit_bytes=32 * 1024 * 1024),
    )(flat, w1, b1.reshape(1, E), w2, b2.reshape(1, N2))


# ---------------------------------------------------------------------------
# Model glue (thin JAX around the fused kernels)
# ---------------------------------------------------------------------------

def transformer_enc(params, c, q, q_mask, c_mask, nhead):
    for lp in params['qencoder']:
        q = encoder_layer(q, q_mask, lp, nhead)
    for lp in params['qencoder']:   # reference reuses qencoder for the context pass
        c = encoder_layer(c, c_mask, lp, nhead)
    A, Bmat = cross_attention(c, q, params['wsim_a'], params['wsim_b'],
                              params['wsim_c'], params['wsim_bias'],
                              q_mask, c_mask)
    distil = jnp.concatenate([c, A, c * A, c * Bmat], axis=-1)
    for lp in params['synin4']:
        distil = encoder_layer(distil, c_mask, lp, nhead)
    flat = distil.reshape(c.shape[0], -1)
    return head(flat, params['whead1'], params['bhead1'],
                params['whead2'], params['bhead2'])


# ---------------------------------------------------------------------------
# Deterministic parameter initialization (synthetic weights)
# ---------------------------------------------------------------------------

def init_linear(key, fan_in, fan_out):
    kw, kb = jax.random.split(key)
    bw = math.sqrt(6.0 / (fan_in + fan_out))            # xavier_uniform
    w = jax.random.uniform(kw, (fan_in, fan_out), jnp.float32, -bw, bw)
    bb = 1.0 / math.sqrt(fan_in)
    b = jax.random.uniform(kb, (fan_out,), jnp.float32, -bb, bb)
    return w, b


def init_encoder_layer(key, embed):
    ks = jax.random.split(key, 4)
    wqkv, bqkv = init_linear(ks[0], embed, 3 * embed)
    wproj, bproj = init_linear(ks[1], embed, embed)
    w1, b1 = init_linear(ks[2], embed, 4 * embed)
    w2, b2 = init_linear(ks[3], 4 * embed, embed)
    return dict(wqkv=wqkv, bqkv=bqkv, wproj=wproj, bproj=bproj,
                w1=w1, b1=b1, w2=w2, b2=b2,
                gamma=jnp.ones((embed,), jnp.float32),
                beta=jnp.zeros((embed,), jnp.float32))


def init_model(key, embed, num_layers, c_len):
    ks = jax.random.split(key, 2 * num_layers + 3)
    qenc = [init_encoder_layer(ks[i], embed) for i in range(num_layers)]
    syn4 = [init_encoder_layer(ks[num_layers + i], 4 * embed)
            for i in range(num_layers)]
    # cencoder and Wdistil are created in the reference __init__ but never used
    # in forward -> not instantiated here.
    wsim, bsim = init_linear(ks[2 * num_layers], 3 * embed, 1)
    whead1, bhead1 = init_linear(ks[2 * num_layers + 1], c_len * 4 * embed, embed)
    whead2, bhead2 = init_linear(ks[2 * num_layers + 2], embed, 2)
    return dict(
        qencoder=qenc, synin4=syn4,
        wsim_a=wsim[:embed, 0].reshape(1, embed),
        wsim_b=wsim[embed:2 * embed, 0].reshape(1, embed),
        wsim_c=wsim[2 * embed:, 0].reshape(1, embed),
        wsim_bias=bsim.reshape(1, 1),
        whead1=whead1, bhead1=bhead1,
        whead2=whead2, bhead2=bhead2,
    )


# ---------------------------------------------------------------------------

if __name__ == "__main__":
    embed_size, nhead, num_layers = 32, 4, 2
    bs, c_len, q_len = 2, 8, 8          # q_len must equal c_len (module quirk)

    key = jax.random.PRNGKey(0)
    kp, kc, kq = jax.random.split(key, 3)
    params = init_model(kp, embed_size, num_layers, c_len)

    c = jax.random.normal(kc, (bs, c_len, embed_size), jnp.float32)
    q = jax.random.normal(kq, (bs, q_len, embed_size), jnp.float32)
    q_mask = jnp.concatenate(
        [jnp.ones((bs, q_len - 2), jnp.float32), jnp.zeros((bs, 2), jnp.float32)],
        axis=-1)
    c_mask = jnp.concatenate(
        [jnp.ones((bs, c_len - 1), jnp.float32), jnp.zeros((bs, 1), jnp.float32)],
        axis=-1)

    fwd = jax.jit(functools.partial(transformer_enc, nhead=nhead))
    out = jax.block_until_ready(fwd(params, c, q, q_mask, c_mask))
    assert out.shape == (bs, 2), out.shape
    assert bool(jnp.all(jnp.isfinite(out)))
    print("KERNEL_OK")
</pallas_src>

<mosaic_0001>
module attributes {stable_mosaic.version = 11 : i64} {
  func.func @_cross_kernel(%arg0: i32, %arg1: memref<1x8x32xf32, #tpu.memory_space<vmem>>, %arg2: memref<1x8x32xf32, #tpu.memory_space<vmem>>, %arg3: memref<1x32xf32, #tpu.memory_space<vmem>>, %arg4: memref<1x32xf32, #tpu.memory_space<vmem>>, %arg5: memref<1x32xf32, #tpu.memory_space<vmem>>, %arg6: memref<1x1xf32, #tpu.memory_space<vmem>>, %arg7: memref<1x1x8xf32, #tpu.memory_space<vmem>>, %arg8: memref<1x8x1xf32, #tpu.memory_space<vmem>>, %arg9: memref<1x8x32xf32, #tpu.memory_space<vmem>>, %arg10: memref<1x8x32xf32, #tpu.memory_space<vmem>>) attributes {dimension_semantics = [#tpu.dimension_semantics<parallel>], iteration_bounds = array<i64: 2>, scalar_prefetch = 0 : i64, scratch_operands = 0 : i64, tpu.core_type = #tpu.core_type<tc>, window_params = [{transform_indices = @transform_0, window_bounds = array<i64: 1, 8, 32>}, {transform_indices = @transform_1, window_bounds = array<i64: 1, 8, 32>}, {pipeline_mode = #tpu.pipeline_mode<synchronous>, transform_indices = @transform_2, window_bounds = array<i64: 1, 32>}, {pipeline_mode = #tpu.pipeline_mode<synchronous>, transform_indices = @transform_3, window_bounds = array<i64: 1, 32>}, {pipeline_mode = #tpu.pipeline_mode<synchronous>, transform_indices = @transform_4, window_bounds = array<i64: 1, 32>}, {pipeline_mode = #tpu.pipeline_mode<synchronous>, transform_indices = @transform_5, window_bounds = array<i64: 1, 1>}, {transform_indices = @transform_6, window_bounds = array<i64: 1, 1, 8>}, {transform_indices = @transform_7, window_bounds = array<i64: 1, 8, 1>}, {transform_indices = @transform_8, window_bounds = array<i64: 1, 8, 32>}, {transform_indices = @transform_9, window_bounds = array<i64: 1, 8, 32>}]} {
    %c0 = arith.constant 0 : index
    %c0_0 = arith.constant 0 : index
    %c0_1 = arith.constant 0 : index
    %0 = vector.load %arg1[%c0, %c0_0, %c0_1] : memref<1x8x32xf32, #tpu.memory_space<vmem>>, vector<1x8x32xf32>
    %1 = vector.shape_cast %0 : vector<1x8x32xf32> to vector<8x32xf32>
    %c0_2 = arith.constant 0 : index
    %c0_3 = arith.constant 0 : index
    %c0_4 = arith.constant 0 : index
    %2 = vector.load %arg2[%c0_2, %c0_3, %c0_4] : memref<1x8x32xf32, #tpu.memory_space<vmem>>, vector<1x8x32xf32>
    %3 = vector.shape_cast %2 : vector<1x8x32xf32> to vector<8x32xf32>
    %c0_5 = arith.constant 0 : index
    %c0_6 = arith.constant 0 : index
    %4 = vector.load %arg3[%c0_5, %c0_6] : memref<1x32xf32, #tpu.memory_space<vmem>>, vector<1x32xf32>
    %c0_7 = arith.constant 0 : index
    %c0_8 = arith.constant 0 : index
    %5 = vector.load %arg4[%c0_7, %c0_8] : memref<1x32xf32, #tpu.memory_space<vmem>>, vector<1x32xf32>
    %c0_9 = arith.constant 0 : index
    %c0_10 = arith.constant 0 : index
    %6 = vector.load %arg5[%c0_9, %c0_10] : memref<1x32xf32, #tpu.memory_space<vmem>>, vector<1x32xf32>
    %c0_11 = arith.constant 0 : index
    %c0_12 = arith.constant 0 : index
    %c0_13 = arith.constant 0 : index
    %7 = vector.load %arg7[%c0_11, %c0_12, %c0_13] : memref<1x1x8xf32, #tpu.memory_space<vmem>>, vector<1x1x8xf32>
    %8 = vector.shape_cast %7 : vector<1x1x8xf32> to vector<1x8xf32>
    %c0_14 = arith.constant 0 : index
    %c0_15 = arith.constant 0 : index
    %c0_16 = arith.constant 0 : index
    %9 = vector.load %arg8[%c0_14, %c0_15, %c0_16] : memref<1x8x1xf32, #tpu.memory_space<vmem>>, vector<1x8x1xf32>
    %10 = vector.shape_cast %9 : vector<1x8x1xf32> to vector<8x1xf32>
    %11 = vector.broadcast %4 : vector<1x32xf32> to vector<8x32xf32>
    %12 = arith.mulf %1, %11 : vector<8x32xf32>
    %cst = arith.constant dense<0.000000e+00> : vector<8xf32>
    %13 = vector.multi_reduction <add>, %12, %cst [1] : vector<8x32xf32> to vector<8xf32>
    %14 = vector.shape_cast %13 : vector<8xf32> to vector<8x1xf32>
    %15 = vector.broadcast %6 : vector<1x32xf32> to vector<8x32xf32>
    %16 = arith.mulf %1, %15 : vector<8x32xf32>
    %17 = vector.broadcast %5 : vector<1x32xf32> to vector<8x32xf32>
    %18 = arith.addf %16, %17 : vector<8x32xf32>
    %cst_17 = arith.constant dense<0.000000e+00> : vector<8x8xf32>
    %19 = tpu.matmul %18, %1, %cst_17 {dimension_numbers = #tpu.dot_dimension_numbers<[1], [1], [0], [0], [0, 0, 1, 0], [], []>} : vector<8x32xf32>, vector<8x32xf32>, vector<8x8xf32> -> vector<8x8xf32>
    %20 = vector.broadcast %14 : vector<8x1xf32> to vector<8x8xf32>
    %21 = arith.addf %20, %19 : vector<8x8xf32>
    %c0_18 = arith.constant 0 : index
    %c0_19 = arith.constant 0 : index
    %22 = vector.load %arg6[%c0_18, %c0_19] : memref<1x1xf32, #tpu.memory_space<vmem>>, vector<1x1xf32>
    %23 = vector.broadcast %22 : vector<1x1xf32> to vector<8x8xf32>
    %24 = arith.addf %21, %23 : vector<8x8xf32>
    %cst_20 = arith.constant 0.000000e+00 : f32
    %25 = vector.broadcast %cst_20 : f32 to vector<1x8xf32>
    %26 = arith.cmpf oeq, %8, %25 : vector<1x8xf32>
    %cst_21 = arith.constant -1.000000e+04 : f32
    %27 = vector.shape_cast %26 : vector<1x8xi1> to vector<1x8xi1>
    %28 = vector.broadcast %27 : vector<1x8xi1> to vector<8x8xi1>
    %29 = vector.broadcast %cst_21 : f32 to vector<8x8xf32>
    %30 = arith.select %28, %29, %24 : vector<8x8xi1>, vector<8x8xf32>
    %cst_22 = arith.constant dense<0xFF800000> : vector<8xf32>
    %31 = vector.multi_reduction <maximumf>, %30, %cst_22 [1] : vector<8x8xf32> to vector<8xf32>
    %32 = vector.shape_cast %31 : vector<8xf32> to vector<8x1xf32>
    %33 = vector.broadcast %32 : vector<8x1xf32> to vector<8x8xf32>
    %34 = arith.subf %30, %33 : vector<8x8xf32>
    %35 = math.exp %34 : vector<8x8xf32>
    %cst_23 = arith.constant dense<0.000000e+00> : vector<8xf32>
    %36 = vector.multi_reduction <add>, %35, %cst_23 [1] : vector<8x8xf32> to vector<8xf32>
    %37 = vector.shape_cast %36 : vector<8xf32> to vector<8x1xf32>
    %38 = vector.broadcast %37 : vector<8x1xf32> to vector<8x8xf32>
    %39 = arith.divf %35, %38 : vector<8x8xf32>
    %cst_24 = arith.constant dense<0.000000e+00> : vector<8x32xf32>
    %40 = tpu.matmul %39, %3, %cst_24 {dimension_numbers = #tpu.dot_dimension_numbers<[1], [0], [0], [1], [0, 0, 1, 1], [], []>} : vector<8x8xf32>, vector<8x32xf32>, vector<8x32xf32> -> vector<8x32xf32>
    %c0_25 = arith.constant 0 : index
    %c0_26 = arith.constant 0 : index
    %c0_27 = arith.constant 0 : index
    %41 = vector.load %arg9[%c0_25, %c0_26, %c0_27] : memref<1x8x32xf32, #tpu.memory_space<vmem>>, vector<1x8x32xf32>
    %42 = vector.shape_cast %41 : vector<1x8x32xf32> to vector<8x32xf32>
    %43 = vector.shape_cast %40 : vector<8x32xf32> to vector<1x8x32xf32>
    tpu.vector_store %arg9[%c0_25, %c0_26, %c0_27], %43 {strides = array<i32>} : memref<1x8x32xf32, #tpu.memory_space<vmem>>, vector<1x8x32xf32>,
    %cst_28 = arith.constant 0.000000e+00 : f32
    %44 = vector.broadcast %cst_28 : f32 to vector<8x1xf32>
    %45 = arith.cmpf oeq, %10, %44 : vector<8x1xf32>
    %cst_29 = arith.constant -1.000000e+04 : f32
    %46 = vector.shape_cast %45 : vector<8x1xi1> to vector<8x1xi1>
    %47 = vector.broadcast %46 : vector<8x1xi1> to vector<8x8xi1>
    %48 = vector.broadcast %cst_29 : f32 to vector<8x8xf32>
    %49 = arith.select %47, %48, %30 : vector<8x8xi1>, vector<8x8xf32>
    %cst_30 = arith.constant dense<0xFF800000> : vector<8xf32>
    %50 = vector.multi_reduction <maximumf>, %49, %cst_30 [0] : vector<8x8xf32> to vector<8xf32>
    %51 = vector.shape_cast %50 : vector<8xf32> to vector<1x8xf32>
    %52 = vector.broadcast %51 : vector<1x8xf32> to vector<8x8xf32>
    %53 = arith.subf %49, %52 : vector<8x8xf32>
    %54 = math.exp %53 : vector<8x8xf32>
    %cst_31 = arith.constant dense<0.000000e+00> : vector<8xf32>
    %55 = vector.multi_reduction <add>, %54, %cst_31 [0] : vector<8x8xf32> to vector<8xf32>
    %56 = vector.shape_cast %55 : vector<8xf32> to vector<1x8xf32>
    %57 = vector.broadcast %56 : vector<1x8xf32> to vector<8x8xf32>
    %58 = arith.divf %54, %57 : vector<8x8xf32>
    %cst_32 = arith.constant dense<0.000000e+00> : vector<8x8xf32>
    %59 = tpu.matmul %58, %39, %cst_32 {dimension_numbers = #tpu.dot_dimension_numbers<[1], [1], [0], [0], [0, 0, 1, 0], [], []>} : vector<8x8xf32>, vector<8x8xf32>, vector<8x8xf32> -> vector<8x8xf32>
    %cst_33 = arith.constant dense<0.000000e+00> : vector<8x32xf32>
    %60 = tpu.matmul %59, %1, %cst_33 {dimension_numbers = #tpu.dot_dimension_numbers<[1], [0], [0], [1], [0, 0, 1, 1], [], []>} : vector<8x8xf32>, vector<8x32xf32>, vector<8x32xf32> -> vector<8x32xf32>
    %c0_34 = arith.constant 0 : index
    %c0_35 = arith.constant 0 : index
    %c0_36 = arith.constant 0 : index
    %61 = vector.load %arg10[%c0_34, %c0_35, %c0_36] : memref<1x8x32xf32, #tpu.memory_space<vmem>>, vector<1x8x32xf32>
    %62 = vector.shape_cast %61 : vector<1x8x32xf32> to vector<8x32xf32>
    %63 = vector.shape_cast %60 : vector<8x32xf32> to vector<1x8x32xf32>
    tpu.vector_store %arg10[%c0_34, %c0_35, %c0_36], %63 {strides = array<i32>} : memref<1x8x32xf32, #tpu.memory_space<vmem>>, vector<1x8x32xf32>,
    return
  }
  func.func @transform_0(%arg0: i32) -> (i32, i32, i32) {
    %c0_i32 = arith.constant 0 : i32
    %c0_i32_0 = arith.constant 0 : i32
    %c0_i32_1 = arith.constant 0 : i32
    return %arg0, %c0_i32, %c0_i32_0 : i32, i32, i32
  }
  func.func @transform_1(%arg0: i32) -> (i32, i32, i32) {
    %c0_i32 = arith.constant 0 : i32
    %c0_i32_0 = arith.constant 0 : i32
    %c0_i32_1 = arith.constant 0 : i32
    return %arg0, %c0_i32, %c0_i32_0 : i32, i32, i32
  }
  func.func @transform_2(%arg0: i32) -> (i32, i32) {
    %c0_i32 = arith.constant 0 : i32
    %c0_i32_0 = arith.constant 0 : i32
    %c0_i32_1 = arith.constant 0 : i32
    return %c0_i32, %c0_i32_0 : i32, i32
  }
  func.func @transform_3(%arg0: i32) -> (i32, i32) {
    %c0_i32 = arith.constant 0 : i32
    %c0_i32_0 = arith.constant 0 : i32
    %c0_i32_1 = arith.constant 0 : i32
    return %c0_i32, %c0_i32_0 : i32, i32
  }
  func.func @transform_4(%arg0: i32) -> (i32, i32) {
    %c0_i32 = arith.constant 0 : i32
    %c0_i32_0 = arith.constant 0 : i32
    %c0_i32_1 = arith.constant 0 : i32
    return %c0_i32, %c0_i32_0 : i32, i32
  }
  func.func @transform_5(%arg0: i32) -> (i32, i32) {
    %c0_i32 = arith.constant 0 : i32
    %c0_i32_0 = arith.constant 0 : i32
    %c0_i32_1 = arith.constant 0 : i32
    return %c0_i32, %c0_i32_0 : i32, i32
  }
  func.func @transform_6(%arg0: i32) -> (i32, i32, i32) {
    %c0_i32 = arith.constant 0 : i32
    %c0_i32_0 = arith.constant 0 : i32
    %c0_i32_1 = arith.constant 0 : i32
    return %arg0, %c0_i32, %c0_i32_0 : i32, i32, i32
  }
  func.func @transform_7(%arg0: i32) -> (i32, i32, i32) {
    %c0_i32 = arith.constant 0 : i32
    %c0_i32_0 = arith.constant 0 : i32
    %c0_i32_1 = arith.constant 0 : i32
    return %arg0, %c0_i32, %c0_i32_0 : i32, i32, i32
  }
  func.func @transform_8(%arg0: i32) -> (i32, i32, i32) {
    %c0_i32 = arith.constant 0 : i32
    %c0_i32_0 = arith.constant 0 : i32
    %c0_i32_1 = arith.constant 0 : i32
    return %arg0, %c0_i32, %c0_i32_0 : i32, i32, i32
  }
  func.func @transform_9(%arg0: i32) -> (i32, i32, i32) {
    %c0_i32 = arith.constant 0 : i32
    %c0_i32_0 = arith.constant 0 : i32
    %c0_i32_1 = arith.constant 0 : i32
    return %arg0, %c0_i32, %c0_i32_0 : i32, i32, i32
  }
}

module attributes {stable_mosaic.version = 11 : i64} {
  func.func @_encoder_layer_kernel(%arg0: i32, %arg1: memref<1x8x32xf32, #tpu.memory_space<vmem>>, %arg2: memref<1x1x8xf32, #tpu.memory_space<vmem>>, %arg3: memref<32x96xf32, #tpu.memory_space<vmem>>, %arg4: memref<1x96xf32, #tpu.memory_space<vmem>>, %arg5: memref<32x32xf32, #tpu.memory_space<vmem>>, %arg6: memref<1x32xf32, #tpu.memory_space<vmem>>, %arg7: memref<1x32xf32, #tpu.memory_space<vmem>>, %arg8: memref<1x32xf32, #tpu.memory_space<vmem>>, %arg9: memref<32x128xf32, #tpu.memory_space<vmem>>, %arg10: memref<1x128xf32, #tpu.memory_space<vmem>>, %arg11: memref<128x32xf32, #tpu.memory_space<vmem>>, %arg12: memref<1x32xf32, #tpu.memory_space<vmem>>, %arg13: memref<1x8x32xf32, #tpu.memory_space<vmem>>) attributes {dimension_semantics = [#tpu.dimension_semantics<parallel>], iteration_bounds = array<i64: 2>, scalar_prefetch = 0 : i64, scratch_operands = 0 : i64, tpu.core_type = #tpu.core_type<tc>, window_params = [{transform_indices = @transform_0, window_bounds = array<i64: 1, 8, 32>}, {transform_indices = @transform_1, window_bounds = array<i64: 1, 1, 8>}, {pipeline_mode = #tpu.pipeline_mode<synchronous>, transform_indices = @transform_2, window_bounds = array<i64: 32, 96>}, {pipeline_mode = #tpu.pipeline_mode<synchronous>, transform_indices = @transform_3, window_bounds = array<i64: 1, 96>}, {pipeline_mode = #tpu.pipeline_mode<synchronous>, transform_indices = @transform_4, window_bounds = array<i64: 32, 32>}, {pipeline_mode = #tpu.pipeline_mode<synchronous>, transform_indices = @transform_5, window_bounds = array<i64: 1, 32>}, {pipeline_mode = #tpu.pipeline_mode<synchronous>, transform_indices = @transform_6, window_bounds = array<i64: 1, 32>}, {pipeline_mode = #tpu.pipeline_mode<synchronous>, transform_indices = @transform_7, window_bounds = array<i64: 1, 32>}, {pipeline_mode = #tpu.pipeline_mode<synchronous>, transform_indices = @transform_8, window_bounds = array<i64: 32, 128>}, {pipeline_mode = #tpu.pipeline_mode<synchronous>, transform_indices = @transform_9, window_bounds = array<i64: 1, 128>}, {pipeline_mode = #tpu.pipeline_mode<synchronous>, transform_indices = @transform_10, window_bounds = array<i64: 128, 32>}, {pipeline_mode = #tpu.pipeline_mode<synchronous>, transform_indices = @transform_11, window_bounds = array<i64: 1, 32>}, {transform_indices = @transform_12, window_bounds = array<i64: 1, 8, 32>}]} {
    %c0 = arith.constant 0 : index
    %c0_0 = arith.constant 0 : index
    %c0_1 = arith.constant 0 : index
    %0 = vector.load %arg1[%c0, %c0_0, %c0_1] : memref<1x8x32xf32, #tpu.memory_space<vmem>>, vector<1x8x32xf32>
    %1 = vector.shape_cast %0 : vector<1x8x32xf32> to vector<8x32xf32>
    %c0_2 = arith.constant 0 : index
    %c0_3 = arith.constant 0 : index
    %c0_4 = arith.constant 0 : index
    %2 = vector.load %arg2[%c0_2, %c0_3, %c0_4] : memref<1x1x8xf32, #tpu.memory_space<vmem>>, vector<1x1x8xf32>
    %3 = vector.shape_cast %2 : vector<1x1x8xf32> to vector<1x8xf32>
    %c0_5 = arith.constant 0 : index
    %c0_6 = arith.constant 0 : index
    %4 = vector.load %arg3[%c0_5, %c0_6] : memref<32x96xf32, #tpu.memory_space<vmem>>, vector<32x96xf32>
    %cst = arith.constant dense<0.000000e+00> : vector<8x96xf32>
    %5 = tpu.matmul %1, %4, %cst {dimension_numbers = #tpu.dot_dimension_numbers<[1], [0], [0], [1], [0, 0, 1, 1], [], []>} : vector<8x32xf32>, vector<32x96xf32>, vector<8x96xf32> -> vector<8x96xf32>
    %c0_7 = arith.constant 0 : index
    %c0_8 = arith.constant 0 : index
    %6 = vector.load %arg4[%c0_7, %c0_8] : memref<1x96xf32, #tpu.memory_space<vmem>>, vector<1x96xf32>
    %7 = vector.broadcast %6 : vector<1x96xf32> to vector<8x96xf32>
    %8 = arith.addf %5, %7 : vector<8x96xf32>
    %9 = vector.extract_strided_slice %8 {offsets = [0, 0], sizes = [8, 8], strides = [1, 1]} : vector<8x96xf32> to vector<8x8xf32>
    %10 = vector.extract_strided_slice %8 {offsets = [0, 32], sizes = [8, 8], strides = [1, 1]} : vector<8x96xf32> to vector<8x8xf32>
    %11 = vector.extract_strided_slice %8 {offsets = [0, 64], sizes = [8, 8], strides = [1, 1]} : vector<8x96xf32> to vector<8x8xf32>
    %cst_9 = arith.constant dense<0.000000e+00> : vector<8x8xf32>
    %12 = tpu.matmul %9, %10, %cst_9 {dimension_numbers = #tpu.dot_dimension_numbers<[1], [1], [0], [0], [0, 0, 1, 0], [], []>} : vector<8x8xf32>, vector<8x8xf32>, vector<8x8xf32> -> vector<8x8xf32>
    %cst_10 = arith.constant 0.353553385 : f32
    %13 = vector.broadcast %cst_10 : f32 to vector<8x8xf32>
    %14 = arith.mulf %12, %13 : vector<8x8xf32>
    %cst_11 = arith.constant 0.000000e+00 : f32
    %15 = vector.broadcast %cst_11 : f32 to vector<1x8xf32>
    %16 = arith.cmpf oeq, %3, %15 : vector<1x8xf32>
    %cst_12 = arith.constant -1.000000e+04 : f32
    %17 = vector.shape_cast %16 : vector<1x8xi1> to vector<1x8xi1>
    %18 = vector.broadcast %17 : vector<1x8xi1> to vector<8x8xi1>
    %19 = vector.broadcast %cst_12 : f32 to vector<8x8xf32>
    %20 = arith.select %18, %19, %14 : vector<8x8xi1>, vector<8x8xf32>
    %cst_13 = arith.constant dense<0xFF800000> : vector<8xf32>
    %21 = vector.multi_reduction <maximumf>, %20, %cst_13 [1] : vector<8x8xf32> to vector<8xf32>
    %22 = vector.shape_cast %21 : vector<8xf32> to vector<8x1xf32>
    %23 = vector.broadcast %22 : vector<8x1xf32> to vector<8x8xf32>
    %24 = arith.subf %20, %23 : vector<8x8xf32>
    %25 = math.exp %24 : vector<8x8xf32>
    %cst_14 = arith.constant dense<0.000000e+00> : vector<8xf32>
    %26 = vector.multi_reduction <add>, %25, %cst_14 [1] : vector<8x8xf32> to vector<8xf32>
    %27 = vector.shape_cast %26 : vector<8xf32> to vector<8x1xf32>
    %28 = vector.broadcast %27 : vector<8x1xf32> to vector<8x8xf32>
    %29 = arith.divf %25, %28 : vector<8x8xf32>
    %cst_15 = arith.constant dense<0.000000e+00> : vector<8x8xf32>
    %30 = tpu.matmul %29, %11, %cst_15 {dimension_numbers = #tpu.dot_dimension_numbers<[1], [0], [0], [1], [0, 0, 1, 1], [], []>} : vector<8x8xf32>, vector<8x8xf32>, vector<8x8xf32> -> vector<8x8xf32>
    %31 = vector.extract_strided_slice %8 {offsets = [0, 8], sizes = [8, 8], strides = [1, 1]} : vector<8x96xf32> to vector<8x8xf32>
    %32 = vector.extract_strided_slice %8 {offsets = [0, 40], sizes = [8, 8], strides = [1, 1]} : vector<8x96xf32> to vector<8x8xf32>
    %33 = vector.extract_strided_slice %8 {offsets = [0, 72], sizes = [8, 8], strides = [1, 1]} : vector<8x96xf32> to vector<8x8xf32>
    %cst_16 = arith.constant dense<0.000000e+00> : vector<8x8xf32>
    %34 = tpu.matmul %31, %32, %cst_16 {dimension_numbers = #tpu.dot_dimension_numbers<[1], [1], [0], [0], [0, 0, 1, 0], [], []>} : vector<8x8xf32>, vector<8x8xf32>, vector<8x8xf32> -> vector<8x8xf32>
    %cst_17 = arith.constant 0.353553385 : f32
    %35 = vector.broadcast %cst_17 : f32 to vector<8x8xf32>
    %36 = arith.mulf %34, %35 : vector<8x8xf32>
    %cst_18 = arith.constant 0.000000e+00 : f32
    %37 = vector.broadcast %cst_18 : f32 to vector<1x8xf32>
    %38 = arith.cmpf oeq, %3, %37 : vector<1x8xf32>
    %cst_19 = arith.constant -1.000000e+04 : f32
    %39 = vector.shape_cast %38 : vector<1x8xi1> to vector<1x8xi1>
    %40 = vector.broadcast %39 : vector<1x8xi1> to vector<8x8xi1>
    %41 = vector.broadcast %cst_19 : f32 to vector<8x8xf32>
    %42 = arith.select %40, %41, %36 : vector<8x8xi1>, vector<8x8xf32>
    %cst_20 = arith.constant dense<0xFF800000> : vector<8xf32>
    %43 = vector.multi_reduction <maximumf>, %42, %cst_20 [1] : vector<8x8xf32> to vector<8xf32>
    %44 = vector.shape_cast %43 : vector<8xf32> to vector<8x1xf32>
    %45 = vector.broadcast %44 : vector<8x1xf32> to vector<8x8xf32>
    %46 = arith.subf %42, %45 : vector<8x8xf32>
    %47 = math.exp %46 : vector<8x8xf32>
    %cst_21 = arith.constant dense<0.000000e+00> : vector<8xf32>
    %48 = vector.multi_reduction <add>, %47, %cst_21 [1] : vector<8x8xf32> to vector<8xf32>
    %49 = vector.shape_cast %48 : vector<8xf32> to vector<8x1xf32>
    %50 = vector.broadcast %49 : vector<8x1xf32> to vector<8x8xf32>
    %51 = arith.divf %47, %50 : vector<8x8xf32>
    %cst_22 = arith.constant dense<0.000000e+00> : vector<8x8xf32>
    %52 = tpu.matmul %51, %33, %cst_22 {dimension_numbers = #tpu.dot_dimension_numbers<[1], [0], [0], [1], [0, 0, 1, 1], [], []>} : vector<8x8xf32>, vector<8x8xf32>, vector<8x8xf32> -> vector<8x8xf32>
    %53 = vector.extract_strided_slice %8 {offsets = [0, 16], sizes = [8, 8], strides = [1, 1]} : vector<8x96xf32> to vector<8x8xf32>
    %54 = vector.extract_strided_slice %8 {offsets = [0, 48], sizes = [8, 8], strides = [1, 1]} : vector<8x96xf32> to vector<8x8xf32>
    %55 = vector.extract_strided_slice %8 {offsets = [0, 80], sizes = [8, 8], strides = [1, 1]} : vector<8x96xf32> to vector<8x8xf32>
    %cst_23 = arith.constant dense<0.000000e+00> : vector<8x8xf32>
    %56 = tpu.matmul %53, %54, %cst_23 {dimension_numbers = #tpu.dot_dimension_numbers<[1], [1], [0], [0], [0, 0, 1, 0], [], []>} : vector<8x8xf32>, vector<8x8xf32>, vector<8x8xf32> -> vector<8x8xf32>
    %cst_24 = arith.constant 0.353553385 : f32
    %57 = vector.broadcast %cst_24 : f32 to vector<8x8xf32>
    %58 = arith.mulf %56, %57 : vector<8x8xf32>
    %cst_25 = arith.constant 0.000000e+00 : f32
    %59 = vector.broadcast %cst_25 : f32 to vector<1x8xf32>
    %60 = arith.cmpf oeq, %3, %59 : vector<1x8xf32>
    %cst_26 = arith.constant -1.000000e+04 : f32
    %61 = vector.shape_cast %60 : vector<1x8xi1> to vector<1x8xi1>
    %62 = vector.broadcast %61 : vector<1x8xi1> to vector<8x8xi1>
    %63 = vector.broadcast %cst_26 : f32 to vector<8x8xf32>
    %64 = arith.select %62, %63, %58 : vector<8x8xi1>, vector<8x8xf32>
    %cst_27 = arith.constant dense<0xFF800000> : vector<8xf32>
    %65 = vector.multi_reduction <maximumf>, %64, %cst_27 [1] : vector<8x8xf32> to vector<8xf32>
    %66 = vector.shape_cast %65 : vector<8xf32> to vector<8x1xf32>
    %67 = vector.broadcast %66 : vector<8x1xf32> to vector<8x8xf32>
    %68 = arith.subf %64, %67 : vector<8x8xf32>
    %69 = math.exp %68 : vector<8x8xf32>
    %cst_28 = arith.constant dense<0.000000e+00> : vector<8xf32>
    %70 = vector.multi_reduction <add>, %69, %cst_28 [1] : vector<8x8xf32> to vector<8xf32>
    %71 = vector.shape_cast %70 : vector<8xf32> to vector<8x1xf32>
    %72 = vector.broadcast %71 : vector<8x1xf32> to vector<8x8xf32>
    %73 = arith.divf %69, %72 : vector<8x8xf32>
    %cst_29 = arith.constant dense<0.000000e+00> : vector<8x8xf32>
    %74 = tpu.matmul %73, %55, %cst_29 {dimension_numbers = #tpu.dot_dimension_numbers<[1], [0], [0], [1], [0, 0, 1, 1], [], []>} : vector<8x8xf32>, vector<8x8xf32>, vector<8x8xf32> -> vector<8x8xf32>
    %75 = vector.extract_strided_slice %8 {offsets = [0, 24], sizes = [8, 8], strides = [1, 1]} : vector<8x96xf32> to vector<8x8xf32>
    %76 = vector.extract_strided_slice %8 {offsets = [0, 56], sizes = [8, 8], strides = [1, 1]} : vector<8x96xf32> to vector<8x8xf32>
    %77 = vector.extract_strided_slice %8 {offsets = [0, 88], sizes = [8, 8], strides = [1, 1]} : vector<8x96xf32> to vector<8x8xf32>
    %cst_30 = arith.constant dense<0.000000e+00> : vector<8x8xf32>
    %78 = tpu.matmul %75, %76, %cst_30 {dimension_numbers = #tpu.dot_dimension_numbers<[1], [1], [0], [0], [0, 0, 1, 0], [], []>} : vector<8x8xf32>, vector<8x8xf32>, vector<8x8xf32> -> vector<8x8xf32>
    %cst_31 = arith.constant 0.353553385 : f32
    %79 = vector.broadcast %cst_31 : f32 to vector<8x8xf32>
    %80 = arith.mulf %78, %79 : vector<8x8xf32>
    %cst_32 = arith.constant 0.000000e+00 : f32
    %81 = vector.broadcast %cst_32 : f32 to vector<1x8xf32>
    %82 = arith.cmpf oeq, %3, %81 : vector<1x8xf32>
    %cst_33 = arith.constant -1.000000e+04 : f32
    %83 = vector.shape_cast %82 : vector<1x8xi1> to vector<1x8xi1>
    %84 = vector.broadcast %83 : vector<1x8xi1> to vector<8x8xi1>
    %85 = vector.broadcast %cst_33 : f32 to vector<8x8xf32>
    %86 = arith.select %84, %85, %80 : vector<8x8xi1>, vector<8x8xf32>
    %cst_34 = arith.constant dense<0xFF800000> : vector<8xf32>
    %87 = vector.multi_reduction <maximumf>, %86, %cst_34 [1] : vector<8x8xf32> to vector<8xf32>
    %88 = vector.shape_cast %87 : vector<8xf32> to vector<8x1xf32>
    %89 = vector.broadcast %88 : vector<8x1xf32> to vector<8x8xf32>
    %90 = arith.subf %86, %89 : vector<8x8xf32>
    %91 = math.exp %90 : vector<8x8xf32>
    %cst_35 = arith.constant dense<0.000000e+00> : vector<8xf32>
    %92 = vector.multi_reduction <add>, %91, %cst_35 [1] : vector<8x8xf32> to vector<8xf32>
    %93 = vector.shape_cast %92 : vector<8xf32> to vector<8x1xf32>
    %94 = vector.broadcast %93 : vector<8x1xf32> to vector<8x8xf32>
    %95 = arith.divf %91, %94 : vector<8x8xf32>
    %cst_36 = arith.constant dense<0.000000e+00> : vector<8x8xf32>
    %96 = tpu.matmul %95, %77, %cst_36 {dimension_numbers = #tpu.dot_dimension_numbers<[1], [0], [0], [1], [0, 0, 1, 1], [], []>} : vector<8x8xf32>, vector<8x8xf32>, vector<8x8xf32> -> vector<8x8xf32>
    %97 = tpu.concatenate %30, %52, %74, %96 in 1 : vector<8x8xf32>, vector<8x8xf32>, vector<8x8xf32>, vector<8x8xf32> -> vector<8x32xf32>
    %c0_37 = arith.constant 0 : index
    %c0_38 = arith.constant 0 : index
    %98 = vector.load %arg5[%c0_37, %c0_38] : memref<32x32xf32, #tpu.memory_space<vmem>>, vector<32x32xf32>
    %cst_39 = arith.constant dense<0.000000e+00> : vector<8x32xf32>
    %99 = tpu.matmul %97, %98, %cst_39 {dimension_numbers = #tpu.dot_dimension_numbers<[1], [0], [0], [1], [0, 0, 1, 1], [], []>} : vector<8x32xf32>, vector<32x32xf32>, vector<8x32xf32> -> vector<8x32xf32>
    %c0_40 = arith.constant 0 : index
    %c0_41 = arith.constant 0 : index
    %100 = vector.load %arg6[%c0_40, %c0_41] : memref<1x32xf32, #tpu.memory_space<vmem>>, vector<1x32xf32>
    %101 = vector.broadcast %100 : vector<1x32xf32> to vector<8x32xf32>
    %102 = arith.addf %99, %101 : vector<8x32xf32>
    %103 = arith.addf %1, %102 : vector<8x32xf32>
    %c0_42 = arith.constant 0 : index
    %c0_43 = arith.constant 0 : index
    %104 = vector.load %arg7[%c0_42, %c0_43] : memref<1x32xf32, #tpu.memory_space<vmem>>, vector<1x32xf32>
    %c0_44 = arith.constant 0 : index
    %c0_45 = arith.constant 0 : index
    %105 = vector.load %arg8[%c0_44, %c0_45] : memref<1x32xf32, #tpu.memory_space<vmem>>, vector<1x32xf32>
    %cst_46 = arith.constant dense<0.000000e+00> : vector<8xf32>
    %106 = vector.multi_reduction <add>, %103, %cst_46 [1] : vector<8x32xf32> to vector<8xf32>
    %107 = vector.shape_cast %106 : vector<8xf32> to vector<8x1xf32>
    %cst_47 = arith.constant 3.200000e+01 : f32
    %108 = vector.broadcast %cst_47 : f32 to vector<8x1xf32>
    %109 = arith.divf %107, %108 : vector<8x1xf32>
    %110 = vector.broadcast %109 : vector<8x1xf32> to vector<8x32xf32>
    %111 = arith.subf %103, %110 : vector<8x32xf32>
    %112 = arith.mulf %111, %111 : vector<8x32xf32>
    %cst_48 = arith.constant dense<0.000000e+00> : vector<8xf32>
    %113 = vector.multi_reduction <add>, %112, %cst_48 [1] : vector<8x32xf32> to vector<8xf32>
    %114 = vector.shape_cast %113 : vector<8xf32> to vector<8x1xf32>
    %cst_49 = arith.constant 3.100000e+01 : f32
    %115 = vector.broadcast %cst_49 : f32 to vector<8x1xf32>
    %116 = arith.divf %114, %115 : vector<8x1xf32>
    %117 = vector.broadcast %104 : vector<1x32xf32> to vector<8x32xf32>
    %118 = arith.mulf %117, %111 : vector<8x32xf32>
    %119 = math.sqrt %116 : vector<8x1xf32>
    %cst_50 = arith.constant 9.99999997E-7 : f32
    %120 = vector.broadcast %cst_50 : f32 to vector<8x1xf32>
    %121 = arith.addf %119, %120 : vector<8x1xf32>
    %122 = vector.broadcast %121 : vector<8x1xf32> to vector<8x32xf32>
    %123 = arith.divf %118, %122 : vector<8x32xf32>
    %124 = vector.broadcast %105 : vector<1x32xf32> to vector<8x32xf32>
    %125 = arith.addf %123, %124 : vector<8x32xf32>
    %c0_51 = arith.constant 0 : index
    %c0_52 = arith.constant 0 : index
    %126 = vector.load %arg9[%c0_51, %c0_52] : memref<32x128xf32, #tpu.memory_space<vmem>>, vector<32x128xf32>
    %cst_53 = arith.constant dense<0.000000e+00> : vector<8x128xf32>
    %127 = tpu.matmul %125, %126, %cst_53 {dimension_numbers = #tpu.dot_dimension_numbers<[1], [0], [0], [1], [0, 0, 1, 1], [], []>} : vector<8x32xf32>, vector<32x128xf32>, vector<8x128xf32> -> vector<8x128xf32>
    %c0_54 = arith.constant 0 : index
    %c0_55 = arith.constant 0 : index
    %128 = vector.load %arg10[%c0_54, %c0_55] : memref<1x128xf32, #tpu.memory_space<vmem>>, vector<1x128xf32>
    %129 = vector.broadcast %128 : vector<1x128xf32> to vector<8x128xf32>
    %130 = arith.addf %127, %129 : vector<8x128xf32>
    %cst_56 = arith.constant 5.000000e-01 : f32
    %131 = vector.broadcast %cst_56 : f32 to vector<8x128xf32>
    %132 = arith.mulf %131, %130 : vector<8x128xf32>
    %cst_57 = arith.constant 0.707106769 : f32
    %133 = vector.broadcast %cst_57 : f32 to vector<8x128xf32>
    %134 = arith.mulf %130, %133 : vector<8x128xf32>
    %135 = math.absf %134 : vector<8x128xf32>
    %cst_58 = arith.constant 0.327591091 : f32
    %136 = vector.broadcast %cst_58 : f32 to vector<8x128xf32>
    %137 = arith.mulf %136, %135 : vector<8x128xf32>
    %cst_59 = arith.constant 1.000000e+00 : f32
    %138 = vector.broadcast %cst_59 : f32 to vector<8x128xf32>
    %139 = arith.addf %138, %137 : vector<8x128xf32>
    %cst_60 = arith.constant 1.000000e+00 : f32
    %140 = vector.broadcast %cst_60 : f32 to vector<8x128xf32>
    %141 = arith.divf %140, %139 : vector<8x128xf32>
    %cst_61 = arith.constant 1.06140542 : f32
    %142 = vector.broadcast %cst_61 : f32 to vector<8x128xf32>
    %143 = arith.mulf %142, %141 : vector<8x128xf32>
    %cst_62 = arith.constant -1.45315206 : f32
    %144 = vector.broadcast %cst_62 : f32 to vector<8x128xf32>
    %145 = arith.addf %143, %144 : vector<8x128xf32>
    %146 = arith.mulf %145, %141 : vector<8x128xf32>
    %cst_63 = arith.constant 1.42141378 : f32
    %147 = vector.broadcast %cst_63 : f32 to vector<8x128xf32>
    %148 = arith.addf %146, %147 : vector<8x128xf32>
    %149 = arith.mulf %148, %141 : vector<8x128xf32>
    %cst_64 = arith.constant -0.284496725 : f32
    %150 = vector.broadcast %cst_64 : f32 to vector<8x128xf32>
    %151 = arith.addf %149, %150 : vector<8x128xf32>
    %152 = arith.mulf %151, %141 : vector<8x128xf32>
    %cst_65 = arith.constant 0.254829586 : f32
    %153 = vector.broadcast %cst_65 : f32 to vector<8x128xf32>
    %154 = arith.addf %152, %153 : vector<8x128xf32>
    %155 = arith.mulf %154, %141 : vector<8x128xf32>
    %156 = arith.mulf %135, %135 : vector<8x128xf32>
    %cst_66 = arith.constant 0.000000e+00 : f32
    %157 = vector.broadcast %cst_66 : f32 to vector<8x128xf32>
    %158 = arith.subf %157, %156 : vector<8x128xf32>
    %159 = math.exp %158 : vector<8x128xf32>
    %160 = arith.mulf %155, %159 : vector<8x128xf32>
    %cst_67 = arith.constant 1.000000e+00 : f32
    %161 = vector.broadcast %cst_67 : f32 to vector<8x128xf32>
    %162 = arith.subf %161, %160 : vector<8x128xf32>
    %cst_68 = arith.constant 0.000000e+00 : f32
    %163 = vector.broadcast %cst_68 : f32 to vector<8x128xf32>
    %164 = arith.cmpf olt, %134, %163 : vector<8x128xf32>
    %cst_69 = arith.constant 0.000000e+00 : f32
    %165 = vector.broadcast %cst_69 : f32 to vector<8x128xf32>
    %166 = arith.subf %165, %162 : vector<8x128xf32>
    %167 = arith.select %164, %166, %162 : vector<8x128xi1>, vector<8x128xf32>
    %cst_70 = arith.constant 1.000000e+00 : f32
    %168 = vector.broadcast %cst_70 : f32 to vector<8x128xf32>
    %169 = arith.addf %168, %167 : vector<8x128xf32>
    %170 = arith.mulf %132, %169 : vector<8x128xf32>
    %c0_71 = arith.constant 0 : index
    %c0_72 = arith.constant 0 : index
    %171 = vector.load %arg11[%c0_71, %c0_72] : memref<128x32xf32, #tpu.memory_space<vmem>>, vector<128x32xf32>
    %cst_73 = arith.constant dense<0.000000e+00> : vector<8x32xf32>
    %172 = tpu.matmul %170, %171, %cst_73 {dimension_numbers = #tpu.dot_dimension_numbers<[1], [0], [0], [1], [0, 0, 1, 1], [], []>} : vector<8x128xf32>, vector<128x32xf32>, vector<8x32xf32> -> vector<8x32xf32>
    %c0_74 = arith.constant 0 : index
    %c0_75 = arith.constant 0 : index
    %173 = vector.load %arg12[%c0_74, %c0_75] : memref<1x32xf32, #tpu.memory_space<vmem>>, vector<1x32xf32>
    %174 = vector.broadcast %173 : vector<1x32xf32> to vector<8x32xf32>
    %175 = arith.addf %172, %174 : vector<8x32xf32>
    %176 = arith.addf %125, %175 : vector<8x32xf32>
    %c0_76 = arith.constant 0 : index
    %c0_77 = arith.constant 0 : index
    %177 = vector.load %arg7[%c0_76, %c0_77] : memref<1x32xf32, #tpu.memory_space<vmem>>, vector<1x32xf32>
    %c0_78 = arith.constant 0 : index
    %c0_79 = arith.constant 0 : index
    %178 = vector.load %arg8[%c0_78, %c0_79] : memref<1x32xf32, #tpu.memory_space<vmem>>, vector<1x32xf32>
    %cst_80 = arith.constant dense<0.000000e+00> : vector<8xf32>
    %179 = vector.multi_reduction <add>, %176, %cst_80 [1] : vector<8x32xf32> to vector<8xf32>
    %180 = vector.shape_cast %179 : vector<8xf32> to vector<8x1xf32>
    %cst_81 = arith.constant 3.200000e+01 : f32
    %181 = vector.broadcast %cst_81 : f32 to vector<8x1xf32>
    %182 = arith.divf %180, %181 : vector<8x1xf32>
    %183 = vector.broadcast %182 : vector<8x1xf32> to vector<8x32xf32>
    %184 = arith.subf %176, %183 : vector<8x32xf32>
    %185 = arith.mulf %184, %184 : vector<8x32xf32>
    %cst_82 = arith.constant dense<0.000000e+00> : vector<8xf32>
    %186 = vector.multi_reduction <add>, %185, %cst_82 [1] : vector<8x32xf32> to vector<8xf32>
    %187 = vector.shape_cast %186 : vector<8xf32> to vector<8x1xf32>
    %cst_83 = arith.constant 3.100000e+01 : f32
    %188 = vector.broadcast %cst_83 : f32 to vector<8x1xf32>
    %189 = arith.divf %187, %188 : vector<8x1xf32>
    %190 = vector.broadcast %177 : vector<1x32xf32> to vector<8x32xf32>
    %191 = arith.mulf %190, %184 : vector<8x32xf32>
    %192 = math.sqrt %189 : vector<8x1xf32>
    %cst_84 = arith.constant 9.99999997E-7 : f32
    %193 = vector.broadcast %cst_84 : f32 to vector<8x1xf32>
    %194 = arith.addf %192, %193 : vector<8x1xf32>
    %195 = vector.broadcast %194 : vector<8x1xf32> to vector<8x32xf32>
    %196 = arith.divf %191, %195 : vector<8x32xf32>
    %197 = vector.broadcast %178 : vector<1x32xf32> to vector<8x32xf32>
    %198 = arith.addf %196, %197 : vector<8x32xf32>
    %c0_85 = arith.constant 0 : index
    %c0_86 = arith.constant 0 : index
    %c0_87 = arith.constant 0 : index
    %199 = vector.load %arg13[%c0_85, %c0_86, %c0_87] : memref<1x8x32xf32, #tpu.memory_space<vmem>>, vector<1x8x32xf32>
    %200 = vector.shape_cast %199 : vector<1x8x32xf32> to vector<8x32xf32>
    %201 = vector.shape_cast %198 : vector<8x32xf32> to vector<1x8x32xf32>
    tpu.vector_store %arg13[%c0_85, %c0_86, %c0_87], %201 {strides = array<i32>} : memref<1x8x32xf32, #tpu.memory_space<vmem>>, vector<1x8x32xf32>,
    return
  }
  func.func @transform_0(%arg0: i32) -> (i32, i32, i32) {
    %c0_i32 = arith.constant 0 : i32
    %c0_i32_0 = arith.constant 0 : i32
    %c0_i32_1 = arith.constant 0 : i32
    return %arg0, %c0_i32, %c0_i32_0 : i32, i32, i32
  }
  func.func @transform_1(%arg0: i32) -> (i32, i32, i32) {
    %c0_i32 = arith.constant 0 : i32
    %c0_i32_0 = arith.constant 0 : i32
    %c0_i32_1 = arith.constant 0 : i32
    return %arg0, %c0_i32, %c0_i32_0 : i32, i32, i32
  }
  func.func @transform_2(%arg0: i32) -> (i32, i32) {
    %c0_i32 = arith.constant 0 : i32
    %c0_i32_0 = arith.constant 0 : i32
    %c0_i32_1 = arith.constant 0 : i32
    return %c0_i32, %c0_i32_0 : i32, i32
  }
  func.func @transform_3(%arg0: i32) -> (i32, i32) {
    %c0_i32 = arith.constant 0 : i32
    %c0_i32_0 = arith.constant 0 : i32
    %c0_i32_1 = arith.constant 0 : i32
    return %c0_i32, %c0_i32_0 : i32, i32
  }
  func.func @transform_4(%arg0: i32) -> (i32, i32) {
    %c0_i32 = arith.constant 0 : i32
    %c0_i32_0 = arith.constant 0 : i32
    %c0_i32_1 = arith.constant 0 : i32
    return %c0_i32, %c0_i32_0 : i32, i32
  }
  func.func @transform_5(%arg0: i32) -> (i32, i32) {
    %c0_i32 = arith.constant 0 : i32
    %c0_i32_0 = arith.constant 0 : i32
    %c0_i32_1 = arith.constant 0 : i32
    return %c0_i32, %c0_i32_0 : i32, i32
  }
  func.func @transform_6(%arg0: i32) -> (i32, i32) {
    %c0_i32 = arith.constant 0 : i32
    %c0_i32_0 = arith.constant 0 : i32
    %c0_i32_1 = arith.constant 0 : i32
    return %c0_i32, %c0_i32_0 : i32, i32
  }
  func.func @transform_7(%arg0: i32) -> (i32, i32) {
    %c0_i32 = arith.constant 0 : i32
    %c0_i32_0 = arith.constant 0 : i32
    %c0_i32_1 = arith.constant 0 : i32
    return %c0_i32, %c0_i32_0 : i32, i32
  }
  func.func @transform_8(%arg0: i32) -> (i32, i32) {
    %c0_i32 = arith.constant 0 : i32
    %c0_i32_0 = arith.constant 0 : i32
    %c0_i32_1 = arith.constant 0 : i32
    return %c0_i32, %c0_i32_0 : i32, i32
  }
  func.func @transform_9(%arg0: i32) -> (i32, i32) {
    %c0_i32 = arith.constant 0 : i32
    %c0_i32_0 = arith.constant 0 : i32
    %c0_i32_1 = arith.constant 0 : i32
    return %c0_i32, %c0_i32_0 : i32, i32
  }
  func.func @transform_10(%arg0: i32) -> (i32, i32) {
    %c0_i32 = arith.constant 0 : i32
    %c0_i32_0 = arith.constant 0 : i32
    %c0_i32_1 = arith.constant 0 : i32
    return %c0_i32, %c0_i32_0 : i32, i32
  }
  func.func @transform_11(%arg0: i32) -> (i32, i32) {
    %c0_i32 = arith.constant 0 : i32
    %c0_i32_0 = arith.constant 0 : i32
    %c0_i32_1 = arith.constant 0 : i32
    return %c0_i32, %c0_i32_0 : i32, i32
  }
  func.func @transform_12(%arg0: i32) -> (i32, i32, i32) {
    %c0_i32 = arith.constant 0 : i32
    %c0_i32_0 = arith.constant 0 : i32
    %c0_i32_1 = arith.constant 0 : i32
    return %arg0, %c0_i32, %c0_i32_0 : i32, i32, i32
  }
}

module attributes {stable_mosaic.version = 11 : i64} {
  func.func @_encoder_layer_kernel(%arg0: i32, %arg1: memref<1x8x32xf32, #tpu.memory_space<vmem>>, %arg2: memref<1x1x8xf32, #tpu.memory_space<vmem>>, %arg3: memref<32x96xf32, #tpu.memory_space<vmem>>, %arg4: memref<1x96xf32, #tpu.memory_space<vmem>>, %arg5: memref<32x32xf32, #tpu.memory_space<vmem>>, %arg6: memref<1x32xf32, #tpu.memory_space<vmem>>, %arg7: memref<1x32xf32, #tpu.memory_space<vmem>>, %arg8: memref<1x32xf32, #tpu.memory_space<vmem>>, %arg9: memref<32x128xf32, #tpu.memory_space<vmem>>, %arg10: memref<1x128xf32, #tpu.memory_space<vmem>>, %arg11: memref<128x32xf32, #tpu.memory_space<vmem>>, %arg12: memref<1x32xf32, #tpu.memory_space<vmem>>, %arg13: memref<1x8x32xf32, #tpu.memory_space<vmem>>) attributes {dimension_semantics = [#tpu.dimension_semantics<parallel>], iteration_bounds = array<i64: 2>, scalar_prefetch = 0 : i64, scratch_operands = 0 : i64, tpu.core_type = #tpu.core_type<tc>, window_params = [{transform_indices = @transform_0, window_bounds = array<i64: 1, 8, 32>}, {transform_indices = @transform_1, window_bounds = array<i64: 1, 1, 8>}, {pipeline_mode = #tpu.pipeline_mode<synchronous>, transform_indices = @transform_2, window_bounds = array<i64: 32, 96>}, {pipeline_mode = #tpu.pipeline_mode<synchronous>, transform_indices = @transform_3, window_bounds = array<i64: 1, 96>}, {pipeline_mode = #tpu.pipeline_mode<synchronous>, transform_indices = @transform_4, window_bounds = array<i64: 32, 32>}, {pipeline_mode = #tpu.pipeline_mode<synchronous>, transform_indices = @transform_5, window_bounds = array<i64: 1, 32>}, {pipeline_mode = #tpu.pipeline_mode<synchronous>, transform_indices = @transform_6, window_bounds = array<i64: 1, 32>}, {pipeline_mode = #tpu.pipeline_mode<synchronous>, transform_indices = @transform_7, window_bounds = array<i64: 1, 32>}, {pipeline_mode = #tpu.pipeline_mode<synchronous>, transform_indices = @transform_8, window_bounds = array<i64: 32, 128>}, {pipeline_mode = #tpu.pipeline_mode<synchronous>, transform_indices = @transform_9, window_bounds = array<i64: 1, 128>}, {pipeline_mode = #tpu.pipeline_mode<synchronous>, transform_indices = @transform_10, window_bounds = array<i64: 128, 32>}, {pipeline_mode = #tpu.pipeline_mode<synchronous>, transform_indices = @transform_11, window_bounds = array<i64: 1, 32>}, {transform_indices = @transform_12, window_bounds = array<i64: 1, 8, 32>}]} {
    %c0 = arith.constant 0 : index
    %c0_0 = arith.constant 0 : index
    %c0_1 = arith.constant 0 : index
    %0 = vector.load %arg1[%c0, %c0_0, %c0_1] : memref<1x8x32xf32, #tpu.memory_space<vmem>>, vector<1x8x32xf32>
    %1 = vector.shape_cast %0 : vector<1x8x32xf32> to vector<8x32xf32>
    %c0_2 = arith.constant 0 : index
    %c0_3 = arith.constant 0 : index
    %c0_4 = arith.constant 0 : index
    %2 = vector.load %arg2[%c0_2, %c0_3, %c0_4] : memref<1x1x8xf32, #tpu.memory_space<vmem>>, vector<1x1x8xf32>
    %3 = vector.shape_cast %2 : vector<1x1x8xf32> to vector<1x8xf32>
    %c0_5 = arith.constant 0 : index
    %c0_6 = arith.constant 0 : index
    %4 = vector.load %arg3[%c0_5, %c0_6] : memref<32x96xf32, #tpu.memory_space<vmem>>, vector<32x96xf32>
    %cst = arith.constant dense<0.000000e+00> : vector<8x96xf32>
    %5 = tpu.matmul %1, %4, %cst {dimension_numbers = #tpu.dot_dimension_numbers<[1], [0], [0], [1], [0, 0, 1, 1], [], []>} : vector<8x32xf32>, vector<32x96xf32>, vector<8x96xf32> -> vector<8x96xf32>
    %c0_7 = arith.constant 0 : index
    %c0_8 = arith.constant 0 : index
    %6 = vector.load %arg4[%c0_7, %c0_8] : memref<1x96xf32, #tpu.memory_space<vmem>>, vector<1x96xf32>
    %7 = vector.broadcast %6 : vector<1x96xf32> to vector<8x96xf32>
    %8 = arith.addf %5, %7 : vector<8x96xf32>
    %9 = vector.extract_strided_slice %8 {offsets = [0, 0], sizes = [8, 8], strides = [1, 1]} : vector<8x96xf32> to vector<8x8xf32>
    %10 = vector.extract_strided_slice %8 {offsets = [0, 32], sizes = [8, 8], strides = [1, 1]} : vector<8x96xf32> to vector<8x8xf32>
    %11 = vector.extract_strided_slice %8 {offsets = [0, 64], sizes = [8, 8], strides = [1, 1]} : vector<8x96xf32> to vector<8x8xf32>
    %cst_9 = arith.constant dense<0.000000e+00> : vector<8x8xf32>
    %12 = tpu.matmul %9, %10, %cst_9 {dimension_numbers = #tpu.dot_dimension_numbers<[1], [1], [0], [0], [0, 0, 1, 0], [], []>} : vector<8x8xf32>, vector<8x8xf32>, vector<8x8xf32> -> vector<8x8xf32>
    %cst_10 = arith.constant 0.353553385 : f32
    %13 = vector.broadcast %cst_10 : f32 to vector<8x8xf32>
    %14 = arith.mulf %12, %13 : vector<8x8xf32>
    %cst_11 = arith.constant 0.000000e+00 : f32
    %15 = vector.broadcast %cst_11 : f32 to vector<1x8xf32>
    %16 = arith.cmpf oeq, %3, %15 : vector<1x8xf32>
    %cst_12 = arith.constant -1.000000e+04 : f32
    %17 = vector.shape_cast %16 : vector<1x8xi1> to vector<1x8xi1>
    %18 = vector.broadcast %17 : vector<1x8xi1> to vector<8x8xi1>
    %19 = vector.broadcast %cst_12 : f32 to vector<8x8xf32>
    %20 = arith.select %18, %19, %14 : vector<8x8xi1>, vector<8x8xf32>
    %cst_13 = arith.constant dense<0xFF800000> : vector<8xf32>
    %21 = vector.multi_reduction <maximumf>, %20, %cst_13 [1] : vector<8x8xf32> to vector<8xf32>
    %22 = vector.shape_cast %21 : vector<8xf32> to vector<8x1xf32>
    %23 = vector.broadcast %22 : vector<8x1xf32> to vector<8x8xf32>
    %24 = arith.subf %20, %23 : vector<8x8xf32>
    %25 = math.exp %24 : vector<8x8xf32>
    %cst_14 = arith.constant dense<0.000000e+00> : vector<8xf32>
    %26 = vector.multi_reduction <add>, %25, %cst_14 [1] : vector<8x8xf32> to vector<8xf32>
    %27 = vector.shape_cast %26 : vector<8xf32> to vector<8x1xf32>
    %28 = vector.broadcast %27 : vector<8x1xf32> to vector<8x8xf32>
    %29 = arith.divf %25, %28 : vector<8x8xf32>
    %cst_15 = arith.constant dense<0.000000e+00> : vector<8x8xf32>
    %30 = tpu.matmul %29, %11, %cst_15 {dimension_numbers = #tpu.dot_dimension_numbers<[1], [0], [0], [1], [0, 0, 1, 1], [], []>} : vector<8x8xf32>, vector<8x8xf32>, vector<8x8xf32> -> vector<8x8xf32>
    %31 = vector.extract_strided_slice %8 {offsets = [0, 8], sizes = [8, 8], strides = [1, 1]} : vector<8x96xf32> to vector<8x8xf32>
    %32 = vector.extract_strided_slice %8 {offsets = [0, 40], sizes = [8, 8], strides = [1, 1]} : vector<8x96xf32> to vector<8x8xf32>
    %33 = vector.extract_strided_slice %8 {offsets = [0, 72], sizes = [8, 8], strides = [1, 1]} : vector<8x96xf32> to vector<8x8xf32>
    %cst_16 = arith.constant dense<0.000000e+00> : vector<8x8xf32>
    %34 = tpu.matmul %31, %32, %cst_16 {dimension_numbers = #tpu.dot_dimension_numbers<[1], [1], [0], [0], [0, 0, 1, 0], [], []>} : vector<8x8xf32>, vector<8x8xf32>, vector<8x8xf32> -> vector<8x8xf32>
    %cst_17 = arith.constant 0.353553385 : f32
    %35 = vector.broadcast %cst_17 : f32 to vector<8x8xf32>
    %36 = arith.mulf %34, %35 : vector<8x8xf32>
    %cst_18 = arith.constant 0.000000e+00 : f32
    %37 = vector.broadcast %cst_18 : f32 to vector<1x8xf32>
    %38 = arith.cmpf oeq, %3, %37 : vector<1x8xf32>
    %cst_19 = arith.constant -1.000000e+04 : f32
    %39 = vector.shape_cast %38 : vector<1x8xi1> to vector<1x8xi1>
    %40 = vector.broadcast %39 : vector<1x8xi1> to vector<8x8xi1>
    %41 = vector.broadcast %cst_19 : f32 to vector<8x8xf32>
    %42 = arith.select %40, %41, %36 : vector<8x8xi1>, vector<8x8xf32>
    %cst_20 = arith.constant dense<0xFF800000> : vector<8xf32>
    %43 = vector.multi_reduction <maximumf>, %42, %cst_20 [1] : vector<8x8xf32> to vector<8xf32>
    %44 = vector.shape_cast %43 : vector<8xf32> to vector<8x1xf32>
    %45 = vector.broadcast %44 : vector<8x1xf32> to vector<8x8xf32>
    %46 = arith.subf %42, %45 : vector<8x8xf32>
    %47 = math.exp %46 : vector<8x8xf32>
    %cst_21 = arith.constant dense<0.000000e+00> : vector<8xf32>
    %48 = vector.multi_reduction <add>, %47, %cst_21 [1] : vector<8x8xf32> to vector<8xf32>
    %49 = vector.shape_cast %48 : vector<8xf32> to vector<8x1xf32>
    %50 = vector.broadcast %49 : vector<8x1xf32> to vector<8x8xf32>
    %51 = arith.divf %47, %50 : vector<8x8xf32>
    %cst_22 = arith.constant dense<0.000000e+00> : vector<8x8xf32>
    %52 = tpu.matmul %51, %33, %cst_22 {dimension_numbers = #tpu.dot_dimension_numbers<[1], [0], [0], [1], [0, 0, 1, 1], [], []>} : vector<8x8xf32>, vector<8x8xf32>, vector<8x8xf32> -> vector<8x8xf32>
    %53 = vector.extract_strided_slice %8 {offsets = [0, 16], sizes = [8, 8], strides = [1, 1]} : vector<8x96xf32> to vector<8x8xf32>
    %54 = vector.extract_strided_slice %8 {offsets = [0, 48], sizes = [8, 8], strides = [1, 1]} : vector<8x96xf32> to vector<8x8xf32>
    %55 = vector.extract_strided_slice %8 {offsets = [0, 80], sizes = [8, 8], strides = [1, 1]} : vector<8x96xf32> to vector<8x8xf32>
    %cst_23 = arith.constant dense<0.000000e+00> : vector<8x8xf32>
    %56 = tpu.matmul %53, %54, %cst_23 {dimension_numbers = #tpu.dot_dimension_numbers<[1], [1], [0], [0], [0, 0, 1, 0], [], []>} : vector<8x8xf32>, vector<8x8xf32>, vector<8x8xf32> -> vector<8x8xf32>
    %cst_24 = arith.constant 0.353553385 : f32
    %57 = vector.broadcast %cst_24 : f32 to vector<8x8xf32>
    %58 = arith.mulf %56, %57 : vector<8x8xf32>
    %cst_25 = arith.constant 0.000000e+00 : f32
    %59 = vector.broadcast %cst_25 : f32 to vector<1x8xf32>
    %60 = arith.cmpf oeq, %3, %59 : vector<1x8xf32>
    %cst_26 = arith.constant -1.000000e+04 : f32
    %61 = vector.shape_cast %60 : vector<1x8xi1> to vector<1x8xi1>
    %62 = vector.broadcast %61 : vector<1x8xi1> to vector<8x8xi1>
    %63 = vector.broadcast %cst_26 : f32 to vector<8x8xf32>
    %64 = arith.select %62, %63, %58 : vector<8x8xi1>, vector<8x8xf32>
    %cst_27 = arith.constant dense<0xFF800000> : vector<8xf32>
    %65 = vector.multi_reduction <maximumf>, %64, %cst_27 [1] : vector<8x8xf32> to vector<8xf32>
    %66 = vector.shape_cast %65 : vector<8xf32> to vector<8x1xf32>
    %67 = vector.broadcast %66 : vector<8x1xf32> to vector<8x8xf32>
    %68 = arith.subf %64, %67 : vector<8x8xf32>
    %69 = math.exp %68 : vector<8x8xf32>
    %cst_28 = arith.constant dense<0.000000e+00> : vector<8xf32>
    %70 = vector.multi_reduction <add>, %69, %cst_28 [1] : vector<8x8xf32> to vector<8xf32>
    %71 = vector.shape_cast %70 : vector<8xf32> to vector<8x1xf32>
    %72 = vector.broadcast %71 : vector<8x1xf32> to vector<8x8xf32>
    %73 = arith.divf %69, %72 : vector<8x8xf32>
    %cst_29 = arith.constant dense<0.000000e+00> : vector<8x8xf32>
    %74 = tpu.matmul %73, %55, %cst_29 {dimension_numbers = #tpu.dot_dimension_numbers<[1], [0], [0], [1], [0, 0, 1, 1], [], []>} : vector<8x8xf32>, vector<8x8xf32>, vector<8x8xf32> -> vector<8x8xf32>
    %75 = vector.extract_strided_slice %8 {offsets = [0, 24], sizes = [8, 8], strides = [1, 1]} : vector<8x96xf32> to vector<8x8xf32>
    %76 = vector.extract_strided_slice %8 {offsets = [0, 56], sizes = [8, 8], strides = [1, 1]} : vector<8x96xf32> to vector<8x8xf32>
    %77 = vector.extract_strided_slice %8 {offsets = [0, 88], sizes = [8, 8], strides = [1, 1]} : vector<8x96xf32> to vector<8x8xf32>
    %cst_30 = arith.constant dense<0.000000e+00> : vector<8x8xf32>
    %78 = tpu.matmul %75, %76, %cst_30 {dimension_numbers = #tpu.dot_dimension_numbers<[1], [1], [0], [0], [0, 0, 1, 0], [], []>} : vector<8x8xf32>, vector<8x8xf32>, vector<8x8xf32> -> vector<8x8xf32>
    %cst_31 = arith.constant 0.353553385 : f32
    %79 = vector.broadcast %cst_31 : f32 to vector<8x8xf32>
    %80 = arith.mulf %78, %79 : vector<8x8xf32>
    %cst_32 = arith.constant 0.000000e+00 : f32
    %81 = vector.broadcast %cst_32 : f32 to vector<1x8xf32>
    %82 = arith.cmpf oeq, %3, %81 : vector<1x8xf32>
    %cst_33 = arith.constant -1.000000e+04 : f32
    %83 = vector.shape_cast %82 : vector<1x8xi1> to vector<1x8xi1>
    %84 = vector.broadcast %83 : vector<1x8xi1> to vector<8x8xi1>
    %85 = vector.broadcast %cst_33 : f32 to vector<8x8xf32>
    %86 = arith.select %84, %85, %80 : vector<8x8xi1>, vector<8x8xf32>
    %cst_34 = arith.constant dense<0xFF800000> : vector<8xf32>
    %87 = vector.multi_reduction <maximumf>, %86, %cst_34 [1] : vector<8x8xf32> to vector<8xf32>
    %88 = vector.shape_cast %87 : vector<8xf32> to vector<8x1xf32>
    %89 = vector.broadcast %88 : vector<8x1xf32> to vector<8x8xf32>
    %90 = arith.subf %86, %89 : vector<8x8xf32>
    %91 = math.exp %90 : vector<8x8xf32>
    %cst_35 = arith.constant dense<0.000000e+00> : vector<8xf32>
    %92 = vector.multi_reduction <add>, %91, %cst_35 [1] : vector<8x8xf32> to vector<8xf32>
    %93 = vector.shape_cast %92 : vector<8xf32> to vector<8x1xf32>
    %94 = vector.broadcast %93 : vector<8x1xf32> to vector<8x8xf32>
    %95 = arith.divf %91, %94 : vector<8x8xf32>
    %cst_36 = arith.constant dense<0.000000e+00> : vector<8x8xf32>
    %96 = tpu.matmul %95, %77, %cst_36 {dimension_numbers = #tpu.dot_dimension_numbers<[1], [0], [0], [1], [0, 0, 1, 1], [], []>} : vector<8x8xf32>, vector<8x8xf32>, vector<8x8xf32> -> vector<8x8xf32>
    %97 = tpu.concatenate %30, %52, %74, %96 in 1 : vector<8x8xf32>, vector<8x8xf32>, vector<8x8xf32>, vector<8x8xf32> -> vector<8x32xf32>
    %c0_37 = arith.constant 0 : index
    %c0_38 = arith.constant 0 : index
    %98 = vector.load %arg5[%c0_37, %c0_38] : memref<32x32xf32, #tpu.memory_space<vmem>>, vector<32x32xf32>
    %cst_39 = arith.constant dense<0.000000e+00> : vector<8x32xf32>
    %99 = tpu.matmul %97, %98, %cst_39 {dimension_numbers = #tpu.dot_dimension_numbers<[1], [0], [0], [1], [0, 0, 1, 1], [], []>} : vector<8x32xf32>, vector<32x32xf32>, vector<8x32xf32> -> vector<8x32xf32>
    %c0_40 = arith.constant 0 : index
    %c0_41 = arith.constant 0 : index
    %100 = vector.load %arg6[%c0_40, %c0_41] : memref<1x32xf32, #tpu.memory_space<vmem>>, vector<1x32xf32>
    %101 = vector.broadcast %100 : vector<1x32xf32> to vector<8x32xf32>
    %102 = arith.addf %99, %101 : vector<8x32xf32>
    %103 = arith.addf %1, %102 : vector<8x32xf32>
    %c0_42 = arith.constant 0 : index
    %c0_43 = arith.constant 0 : index
    %104 = vector.load %arg7[%c0_42, %c0_43] : memref<1x32xf32, #tpu.memory_space<vmem>>, vector<1x32xf32>
    %c0_44 = arith.constant 0 : index
    %c0_45 = arith.constant 0 : index
    %105 = vector.load %arg8[%c0_44, %c0_45] : memref<1x32xf32, #tpu.memory_space<vmem>>, vector<1x32xf32>
    %cst_46 = arith.constant dense<0.000000e+00> : vector<8xf32>
    %106 = vector.multi_reduction <add>, %103, %cst_46 [1] : vector<8x32xf32> to vector<8xf32>
    %107 = vector.shape_cast %106 : vector<8xf32> to vector<8x1xf32>
    %cst_47 = arith.constant 3.200000e+01 : f32
    %108 = vector.broadcast %cst_47 : f32 to vector<8x1xf32>
    %109 = arith.divf %107, %108 : vector<8x1xf32>
    %110 = vector.broadcast %109 : vector<8x1xf32> to vector<8x32xf32>
    %111 = arith.subf %103, %110 : vector<8x32xf32>
    %112 = arith.mulf %111, %111 : vector<8x32xf32>
    %cst_48 = arith.constant dense<0.000000e+00> : vector<8xf32>
    %113 = vector.multi_reduction <add>, %112, %cst_48 [1] : vector<8x32xf32> to vector<8xf32>
    %114 = vector.shape_cast %113 : vector<8xf32> to vector<8x1xf32>
    %cst_49 = arith.constant 3.100000e+01 : f32
    %115 = vector.broadcast %cst_49 : f32 to vector<8x1xf32>
    %116 = arith.divf %114, %115 : vector<8x1xf32>
    %117 = vector.broadcast %104 : vector<1x32xf32> to vector<8x32xf32>
    %118 = arith.mulf %117, %111 : vector<8x32xf32>
    %119 = math.sqrt %116 : vector<8x1xf32>
    %cst_50 = arith.constant 9.99999997E-7 : f32
    %120 = vector.broadcast %cst_50 : f32 to vector<8x1xf32>
    %121 = arith.addf %119, %120 : vector<8x1xf32>
    %122 = vector.broadcast %121 : vector<8x1xf32> to vector<8x32xf32>
    %123 = arith.divf %118, %122 : vector<8x32xf32>
    %124 = vector.broadcast %105 : vector<1x32xf32> to vector<8x32xf32>
    %125 = arith.addf %123, %124 : vector<8x32xf32>
    %c0_51 = arith.constant 0 : index
    %c0_52 = arith.constant 0 : index
    %126 = vector.load %arg9[%c0_51, %c0_52] : memref<32x128xf32, #tpu.memory_space<vmem>>, vector<32x128xf32>
    %cst_53 = arith.constant dense<0.000000e+00> : vector<8x128xf32>
    %127 = tpu.matmul %125, %126, %cst_53 {dimension_numbers = #tpu.dot_dimension_numbers<[1], [0], [0], [1], [0, 0, 1, 1], [], []>} : vector<8x32xf32>, vector<32x128xf32>, vector<8x128xf32> -> vector<8x128xf32>
    %c0_54 = arith.constant 0 : index
    %c0_55 = arith.constant 0 : index
    %128 = vector.load %arg10[%c0_54, %c0_55] : memref<1x128xf32, #tpu.memory_space<vmem>>, vector<1x128xf32>
    %129 = vector.broadcast %128 : vector<1x128xf32> to vector<8x128xf32>
    %130 = arith.addf %127, %129 : vector<8x128xf32>
    %cst_56 = arith.constant 5.000000e-01 : f32
    %131 = vector.broadcast %cst_56 : f32 to vector<8x128xf32>
    %132 = arith.mulf %131, %130 : vector<8x128xf32>
    %cst_57 = arith.constant 0.707106769 : f32
    %133 = vector.broadcast %cst_57 : f32 to vector<8x128xf32>
    %134 = arith.mulf %130, %133 : vector<8x128xf32>
    %135 = math.absf %134 : vector<8x128xf32>
    %cst_58 = arith.constant 0.327591091 : f32
    %136 = vector.broadcast %cst_58 : f32 to vector<8x128xf32>
    %137 = arith.mulf %136, %135 : vector<8x128xf32>
    %cst_59 = arith.constant 1.000000e+00 : f32
    %138 = vector.broadcast %cst_59 : f32 to vector<8x128xf32>
    %139 = arith.addf %138, %137 : vector<8x128xf32>
    %cst_60 = arith.constant 1.000000e+00 : f32
    %140 = vector.broadcast %cst_60 : f32 to vector<8x128xf32>
    %141 = arith.divf %140, %139 : vector<8x128xf32>
    %cst_61 = arith.constant 1.06140542 : f32
    %142 = vector.broadcast %cst_61 : f32 to vector<8x128xf32>
    %143 = arith.mulf %142, %141 : vector<8x128xf32>
    %cst_62 = arith.constant -1.45315206 : f32
    %144 = vector.broadcast %cst_62 : f32 to vector<8x128xf32>
    %145 = arith.addf %143, %144 : vector<8x128xf32>
    %146 = arith.mulf %145, %141 : vector<8x128xf32>
    %cst_63 = arith.constant 1.42141378 : f32
    %147 = vector.broadcast %cst_63 : f32 to vector<8x128xf32>
    %148 = arith.addf %146, %147 : vector<8x128xf32>
    %149 = arith.mulf %148, %141 : vector<8x128xf32>
    %cst_64 = arith.constant -0.284496725 : f32
    %150 = vector.broadcast %cst_64 : f32 to vector<8x128xf32>
    %151 = arith.addf %149, %150 : vector<8x128xf32>
    %152 = arith.mulf %151, %141 : vector<8x128xf32>
    %cst_65 = arith.constant 0.254829586 : f32
    %153 = vector.broadcast %cst_65 : f32 to vector<8x128xf32>
    %154 = arith.addf %152, %153 : vector<8x128xf32>
    %155 = arith.mulf %154, %141 : vector<8x128xf32>
    %156 = arith.mulf %135, %135 : vector<8x128xf32>
    %cst_66 = arith.constant 0.000000e+00 : f32
    %157 = vector.broadcast %cst_66 : f32 to vector<8x128xf32>
    %158 = arith.subf %157, %156 : vector<8x128xf32>
    %159 = math.exp %158 : vector<8x128xf32>
    %160 = arith.mulf %155, %159 : vector<8x128xf32>
    %cst_67 = arith.constant 1.000000e+00 : f32
    %161 = vector.broadcast %cst_67 : f32 to vector<8x128xf32>
    %162 = arith.subf %161, %160 : vector<8x128xf32>
    %cst_68 = arith.constant 0.000000e+00 : f32
    %163 = vector.broadcast %cst_68 : f32 to vector<8x128xf32>
    %164 = arith.cmpf olt, %134, %163 : vector<8x128xf32>
    %cst_69 = arith.constant 0.000000e+00 : f32
    %165 = vector.broadcast %cst_69 : f32 to vector<8x128xf32>
    %166 = arith.subf %165, %162 : vector<8x128xf32>
    %167 = arith.select %164, %166, %162 : vector<8x128xi1>, vector<8x128xf32>
    %cst_70 = arith.constant 1.000000e+00 : f32
    %168 = vector.broadcast %cst_70 : f32 to vector<8x128xf32>
    %169 = arith.addf %168, %167 : vector<8x128xf32>
    %170 = arith.mulf %132, %169 : vector<8x128xf32>
    %c0_71 = arith.constant 0 : index
    %c0_72 = arith.constant 0 : index
    %171 = vector.load %arg11[%c0_71, %c0_72] : memref<128x32xf32, #tpu.memory_space<vmem>>, vector<128x32xf32>
    %cst_73 = arith.constant dense<0.000000e+00> : vector<8x32xf32>
    %172 = tpu.matmul %170, %171, %cst_73 {dimension_numbers = #tpu.dot_dimension_numbers<[1], [0], [0], [1], [0, 0, 1, 1], [], []>} : vector<8x128xf32>, vector<128x32xf32>, vector<8x32xf32> -> vector<8x32xf32>
    %c0_74 = arith.constant 0 : index
    %c0_75 = arith.constant 0 : index
    %173 = vector.load %arg12[%c0_74, %c0_75] : memref<1x32xf32, #tpu.memory_space<vmem>>, vector<1x32xf32>
    %174 = vector.broadcast %173 : vector<1x32xf32> to vector<8x32xf32>
    %175 = arith.addf %172, %174 : vector<8x32xf32>
    %176 = arith.addf %125, %175 : vector<8x32xf32>
    %c0_76 = arith.constant 0 : index
    %c0_77 = arith.constant 0 : index
    %177 = vector.load %arg7[%c0_76, %c0_77] : memref<1x32xf32, #tpu.memory_space<vmem>>, vector<1x32xf32>
    %c0_78 = arith.constant 0 : index
    %c0_79 = arith.constant 0 : index
    %178 = vector.load %arg8[%c0_78, %c0_79] : memref<1x32xf32, #tpu.memory_space<vmem>>, vector<1x32xf32>
    %cst_80 = arith.constant dense<0.000000e+00> : vector<8xf32>
    %179 = vector.multi_reduction <add>, %176, %cst_80 [1] : vector<8x32xf32> to vector<8xf32>
    %180 = vector.shape_cast %179 : vector<8xf32> to vector<8x1xf32>
    %cst_81 = arith.constant 3.200000e+01 : f32
    %181 = vector.broadcast %cst_81 : f32 to vector<8x1xf32>
    %182 = arith.divf %180, %181 : vector<8x1xf32>
    %183 = vector.broadcast %182 : vector<8x1xf32> to vector<8x32xf32>
    %184 = arith.subf %176, %183 : vector<8x32xf32>
    %185 = arith.mulf %184, %184 : vector<8x32xf32>
    %cst_82 = arith.constant dense<0.000000e+00> : vector<8xf32>
    %186 = vector.multi_reduction <add>, %185, %cst_82 [1] : vector<8x32xf32> to vector<8xf32>
    %187 = vector.shape_cast %186 : vector<8xf32> to vector<8x1xf32>
    %cst_83 = arith.constant 3.100000e+01 : f32
    %188 = vector.broadcast %cst_83 : f32 to vector<8x1xf32>
    %189 = arith.divf %187, %188 : vector<8x1xf32>
    %190 = vector.broadcast %177 : vector<1x32xf32> to vector<8x32xf32>
    %191 = arith.mulf %190, %184 : vector<8x32xf32>
    %192 = math.sqrt %189 : vector<8x1xf32>
    %cst_84 = arith.constant 9.99999997E-7 : f32
    %193 = vector.broadcast %cst_84 : f32 to vector<8x1xf32>
    %194 = arith.addf %192, %193 : vector<8x1xf32>
    %195 = vector.broadcast %194 : vector<8x1xf32> to vector<8x32xf32>
    %196 = arith.divf %191, %195 : vector<8x32xf32>
    %197 = vector.broadcast %178 : vector<1x32xf32> to vector<8x32xf32>
    %198 = arith.addf %196, %197 : vector<8x32xf32>
    %c0_85 = arith.constant 0 : index
    %c0_86 = arith.constant 0 : index
    %c0_87 = arith.constant 0 : index
    %199 = vector.load %arg13[%c0_85, %c0_86, %c0_87] : memref<1x8x32xf32, #tpu.memory_space<vmem>>, vector<1x8x32xf32>
    %200 = vector.shape_cast %199 : vector<1x8x32xf32> to vector<8x32xf32>
    %201 = vector.shape_cast %198 : vector<8x32xf32> to vector<1x8x32xf32>
    tpu.vector_store %arg13[%c0_85, %c0_86, %c0_87], %201 {strides = array<i32>} : memref<1x8x32xf32, #tpu.memory_space<vmem>>, vector<1x8x32xf32>,
    return
  }
  func.func @transform_0(%arg0: i32) -> (i32, i32, i32) {
    %c0_i32 = arith.constant 0 : i32
    %c0_i32_0 = arith.constant 0 : i32
    %c0_i32_1 = arith.constant 0 : i32
    return %arg0, %c0_i32, %c0_i32_0 : i32, i32, i32
  }
  func.func @transform_1(%arg0: i32) -> (i32, i32, i32) {
    %c0_i32 = arith.constant 0 : i32
    %c0_i32_0 = arith.constant 0 : i32
    %c0_i32_1 = arith.constant 0 : i32
    return %arg0, %c0_i32, %c0_i32_0 : i32, i32, i32
  }
  func.func @transform_2(%arg0: i32) -> (i32, i32) {
    %c0_i32 = arith.constant 0 : i32
    %c0_i32_0 = arith.constant 0 : i32
    %c0_i32_1 = arith.constant 0 : i32
    return %c0_i32, %c0_i32_0 : i32, i32
  }
  func.func @transform_3(%arg0: i32) -> (i32, i32) {
    %c0_i32 = arith.constant 0 : i32
    %c0_i32_0 = arith.constant 0 : i32
    %c0_i32_1 = arith.constant 0 : i32
    return %c0_i32, %c0_i32_0 : i32, i32
  }
  func.func @transform_4(%arg0: i32) -> (i32, i32) {
    %c0_i32 = arith.constant 0 : i32
    %c0_i32_0 = arith.constant 0 : i32
    %c0_i32_1 = arith.constant 0 : i32
    return %c0_i32, %c0_i32_0 : i32, i32
  }
  func.func @transform_5(%arg0: i32) -> (i32, i32) {
    %c0_i32 = arith.constant 0 : i32
    %c0_i32_0 = arith.constant 0 : i32
    %c0_i32_1 = arith.constant 0 : i32
    return %c0_i32, %c0_i32_0 : i32, i32
  }
  func.func @transform_6(%arg0: i32) -> (i32, i32) {
    %c0_i32 = arith.constant 0 : i32
    %c0_i32_0 = arith.constant 0 : i32
    %c0_i32_1 = arith.constant 0 : i32
    return %c0_i32, %c0_i32_0 : i32, i32
  }
  func.func @transform_7(%arg0: i32) -> (i32, i32) {
    %c0_i32 = arith.constant 0 : i32
    %c0_i32_0 = arith.constant 0 : i32
    %c0_i32_1 = arith.constant 0 : i32
    return %c0_i32, %c0_i32_0 : i32, i32
  }
  func.func @transform_8(%arg0: i32) -> (i32, i32) {
    %c0_i32 = arith.constant 0 : i32
    %c0_i32_0 = arith.constant 0 : i32
    %c0_i32_1 = arith.constant 0 : i32
    return %c0_i32, %c0_i32_0 : i32, i32
  }
  func.func @transform_9(%arg0: i32) -> (i32, i32) {
    %c0_i32 = arith.constant 0 : i32
    %c0_i32_0 = arith.constant 0 : i32
    %c0_i32_1 = arith.constant 0 : i32
    return %c0_i32, %c0_i32_0 : i32, i32
  }
  func.func @transform_10(%arg0: i32) -> (i32, i32) {
    %c0_i32 = arith.constant 0 : i32
    %c0_i32_0 = arith.constant 0 : i32
    %c0_i32_1 = arith.constant 0 : i32
    return %c0_i32, %c0_i32_0 : i32, i32
  }
  func.func @transform_11(%arg0: i32) -> (i32, i32) {
    %c0_i32 = arith.constant 0 : i32
    %c0_i32_0 = arith.constant 0 : i32
    %c0_i32_1 = arith.constant 0 : i32
    return %c0_i32, %c0_i32_0 : i32, i32
  }
  func.func @transform_12(%arg0: i32) -> (i32, i32, i32) {
    %c0_i32 = arith.constant 0 : i32
    %c0_i32_0 = arith.constant 0 : i32
    %c0_i32_1 = arith.constant 0 : i32
    return %arg0, %c0_i32, %c0_i32_0 : i32, i32, i32
  }
}

module attributes {stable_mosaic.version = 11 : i64} {
  func.func @_encoder_layer_kernel(%arg0: i32, %arg1: memref<1x8x32xf32, #tpu.memory_space<vmem>>, %arg2: memref<1x1x8xf32, #tpu.memory_space<vmem>>, %arg3: memref<32x96xf32, #tpu.memory_space<vmem>>, %arg4: memref<1x96xf32, #tpu.memory_space<vmem>>, %arg5: memref<32x32xf32, #tpu.memory_space<vmem>>, %arg6: memref<1x32xf32, #tpu.memory_space<vmem>>, %arg7: memref<1x32xf32, #tpu.memory_space<vmem>>, %arg8: memref<1x32xf32, #tpu.memory_space<vmem>>, %arg9: memref<32x128xf32, #tpu.memory_space<vmem>>, %arg10: memref<1x128xf32, #tpu.memory_space<vmem>>, %arg11: memref<128x32xf32, #tpu.memory_space<vmem>>, %arg12: memref<1x32xf32, #tpu.memory_space<vmem>>, %arg13: memref<1x8x32xf32, #tpu.memory_space<vmem>>) attributes {dimension_semantics = [#tpu.dimension_semantics<parallel>], iteration_bounds = array<i64: 2>, scalar_prefetch = 0 : i64, scratch_operands = 0 : i64, tpu.core_type = #tpu.core_type<tc>, window_params = [{transform_indices = @transform_0, window_bounds = array<i64: 1, 8, 32>}, {transform_indices = @transform_1, window_bounds = array<i64: 1, 1, 8>}, {pipeline_mode = #tpu.pipeline_mode<synchronous>, transform_indices = @transform_2, window_bounds = array<i64: 32, 96>}, {pipeline_mode = #tpu.pipeline_mode<synchronous>, transform_indices = @transform_3, window_bounds = array<i64: 1, 96>}, {pipeline_mode = #tpu.pipeline_mode<synchronous>, transform_indices = @transform_4, window_bounds = array<i64: 32, 32>}, {pipeline_mode = #tpu.pipeline_mode<synchronous>, transform_indices = @transform_5, window_bounds = array<i64: 1, 32>}, {pipeline_mode = #tpu.pipeline_mode<synchronous>, transform_indices = @transform_6, window_bounds = array<i64: 1, 32>}, {pipeline_mode = #tpu.pipeline_mode<synchronous>, transform_indices = @transform_7, window_bounds = array<i64: 1, 32>}, {pipeline_mode = #tpu.pipeline_mode<synchronous>, transform_indices = @transform_8, window_bounds = array<i64: 32, 128>}, {pipeline_mode = #tpu.pipeline_mode<synchronous>, transform_indices = @transform_9, window_bounds = array<i64: 1, 128>}, {pipeline_mode = #tpu.pipeline_mode<synchronous>, transform_indices = @transform_10, window_bounds = array<i64: 128, 32>}, {pipeline_mode = #tpu.pipeline_mode<synchronous>, transform_indices = @transform_11, window_bounds = array<i64: 1, 32>}, {transform_indices = @transform_12, window_bounds = array<i64: 1, 8, 32>}]} {
    %c0 = arith.constant 0 : index
    %c0_0 = arith.constant 0 : index
    %c0_1 = arith.constant 0 : index
    %0 = vector.load %arg1[%c0, %c0_0, %c0_1] : memref<1x8x32xf32, #tpu.memory_space<vmem>>, vector<1x8x32xf32>
    %1 = vector.shape_cast %0 : vector<1x8x32xf32> to vector<8x32xf32>
    %c0_2 = arith.constant 0 : index
    %c0_3 = arith.constant 0 : index
    %c0_4 = arith.constant 0 : index
    %2 = vector.load %arg2[%c0_2, %c0_3, %c0_4] : memref<1x1x8xf32, #tpu.memory_space<vmem>>, vector<1x1x8xf32>
    %3 = vector.shape_cast %2 : vector<1x1x8xf32> to vector<1x8xf32>
    %c0_5 = arith.constant 0 : index
    %c0_6 = arith.constant 0 : index
    %4 = vector.load %arg3[%c0_5, %c0_6] : memref<32x96xf32, #tpu.memory_space<vmem>>, vector<32x96xf32>
    %cst = arith.constant dense<0.000000e+00> : vector<8x96xf32>
    %5 = tpu.matmul %1, %4, %cst {dimension_numbers = #tpu.dot_dimension_numbers<[1], [0], [0], [1], [0, 0, 1, 1], [], []>} : vector<8x32xf32>, vector<32x96xf32>, vector<8x96xf32> -> vector<8x96xf32>
    %c0_7 = arith.constant 0 : index
    %c0_8 = arith.constant 0 : index
    %6 = vector.load %arg4[%c0_7, %c0_8] : memref<1x96xf32, #tpu.memory_space<vmem>>, vector<1x96xf32>
    %7 = vector.broadcast %6 : vector<1x96xf32> to vector<8x96xf32>
    %8 = arith.addf %5, %7 : vector<8x96xf32>
    %9 = vector.extract_strided_slice %8 {offsets = [0, 0], sizes = [8, 8], strides = [1, 1]} : vector<8x96xf32> to vector<8x8xf32>
    %10 = vector.extract_strided_slice %8 {offsets = [0, 32], sizes = [8, 8], strides = [1, 1]} : vector<8x96xf32> to vector<8x8xf32>
    %11 = vector.extract_strided_slice %8 {offsets = [0, 64], sizes = [8, 8], strides = [1, 1]} : vector<8x96xf32> to vector<8x8xf32>
    %cst_9 = arith.constant dense<0.000000e+00> : vector<8x8xf32>
    %12 = tpu.matmul %9, %10, %cst_9 {dimension_numbers = #tpu.dot_dimension_numbers<[1], [1], [0], [0], [0, 0, 1, 0], [], []>} : vector<8x8xf32>, vector<8x8xf32>, vector<8x8xf32> -> vector<8x8xf32>
    %cst_10 = arith.constant 0.353553385 : f32
    %13 = vector.broadcast %cst_10 : f32 to vector<8x8xf32>
    %14 = arith.mulf %12, %13 : vector<8x8xf32>
    %cst_11 = arith.constant 0.000000e+00 : f32
    %15 = vector.broadcast %cst_11 : f32 to vector<1x8xf32>
    %16 = arith.cmpf oeq, %3, %15 : vector<1x8xf32>
    %cst_12 = arith.constant -1.000000e+04 : f32
    %17 = vector.shape_cast %16 : vector<1x8xi1> to vector<1x8xi1>
    %18 = vector.broadcast %17 : vector<1x8xi1> to vector<8x8xi1>
    %19 = vector.broadcast %cst_12 : f32 to vector<8x8xf32>
    %20 = arith.select %18, %19, %14 : vector<8x8xi1>, vector<8x8xf32>
    %cst_13 = arith.constant dense<0xFF800000> : vector<8xf32>
    %21 = vector.multi_reduction <maximumf>, %20, %cst_13 [1] : vector<8x8xf32> to vector<8xf32>
    %22 = vector.shape_cast %21 : vector<8xf32> to vector<8x1xf32>
    %23 = vector.broadcast %22 : vector<8x1xf32> to vector<8x8xf32>
    %24 = arith.subf %20, %23 : vector<8x8xf32>
    %25 = math.exp %24 : vector<8x8xf32>
    %cst_14 = arith.constant dense<0.000000e+00> : vector<8xf32>
    %26 = vector.multi_reduction <add>, %25, %cst_14 [1] : vector<8x8xf32> to vector<8xf32>
    %27 = vector.shape_cast %26 : vector<8xf32> to vector<8x1xf32>
    %28 = vector.broadcast %27 : vector<8x1xf32> to vector<8x8xf32>
    %29 = arith.divf %25, %28 : vector<8x8xf32>
    %cst_15 = arith.constant dense<0.000000e+00> : vector<8x8xf32>
    %30 = tpu.matmul %29, %11, %cst_15 {dimension_numbers = #tpu.dot_dimension_numbers<[1], [0], [0], [1], [0, 0, 1, 1], [], []>} : vector<8x8xf32>, vector<8x8xf32>, vector<8x8xf32> -> vector<8x8xf32>
    %31 = vector.extract_strided_slice %8 {offsets = [0, 8], sizes = [8, 8], strides = [1, 1]} : vector<8x96xf32> to vector<8x8xf32>
    %32 = vector.extract_strided_slice %8 {offsets = [0, 40], sizes = [8, 8], strides = [1, 1]} : vector<8x96xf32> to vector<8x8xf32>
    %33 = vector.extract_strided_slice %8 {offsets = [0, 72], sizes = [8, 8], strides = [1, 1]} : vector<8x96xf32> to vector<8x8xf32>
    %cst_16 = arith.constant dense<0.000000e+00> : vector<8x8xf32>
    %34 = tpu.matmul %31, %32, %cst_16 {dimension_numbers = #tpu.dot_dimension_numbers<[1], [1], [0], [0], [0, 0, 1, 0], [], []>} : vector<8x8xf32>, vector<8x8xf32>, vector<8x8xf32> -> vector<8x8xf32>
    %cst_17 = arith.constant 0.353553385 : f32
    %35 = vector.broadcast %cst_17 : f32 to vector<8x8xf32>
    %36 = arith.mulf %34, %35 : vector<8x8xf32>
    %cst_18 = arith.constant 0.000000e+00 : f32
    %37 = vector.broadcast %cst_18 : f32 to vector<1x8xf32>
    %38 = arith.cmpf oeq, %3, %37 : vector<1x8xf32>
    %cst_19 = arith.constant -1.000000e+04 : f32
    %39 = vector.shape_cast %38 : vector<1x8xi1> to vector<1x8xi1>
    %40 = vector.broadcast %39 : vector<1x8xi1> to vector<8x8xi1>
    %41 = vector.broadcast %cst_19 : f32 to vector<8x8xf32>
    %42 = arith.select %40, %41, %36 : vector<8x8xi1>, vector<8x8xf32>
    %cst_20 = arith.constant dense<0xFF800000> : vector<8xf32>
    %43 = vector.multi_reduction <maximumf>, %42, %cst_20 [1] : vector<8x8xf32> to vector<8xf32>
    %44 = vector.shape_cast %43 : vector<8xf32> to vector<8x1xf32>
    %45 = vector.broadcast %44 : vector<8x1xf32> to vector<8x8xf32>
    %46 = arith.subf %42, %45 : vector<8x8xf32>
    %47 = math.exp %46 : vector<8x8xf32>
    %cst_21 = arith.constant dense<0.000000e+00> : vector<8xf32>
    %48 = vector.multi_reduction <add>, %47, %cst_21 [1] : vector<8x8xf32> to vector<8xf32>
    %49 = vector.shape_cast %48 : vector<8xf32> to vector<8x1xf32>
    %50 = vector.broadcast %49 : vector<8x1xf32> to vector<8x8xf32>
    %51 = arith.divf %47, %50 : vector<8x8xf32>
    %cst_22 = arith.constant dense<0.000000e+00> : vector<8x8xf32>
    %52 = tpu.matmul %51, %33, %cst_22 {dimension_numbers = #tpu.dot_dimension_numbers<[1], [0], [0], [1], [0, 0, 1, 1], [], []>} : vector<8x8xf32>, vector<8x8xf32>, vector<8x8xf32> -> vector<8x8xf32>
    %53 = vector.extract_strided_slice %8 {offsets = [0, 16], sizes = [8, 8], strides = [1, 1]} : vector<8x96xf32> to vector<8x8xf32>
    %54 = vector.extract_strided_slice %8 {offsets = [0, 48], sizes = [8, 8], strides = [1, 1]} : vector<8x96xf32> to vector<8x8xf32>
    %55 = vector.extract_strided_slice %8 {offsets = [0, 80], sizes = [8, 8], strides = [1, 1]} : vector<8x96xf32> to vector<8x8xf32>
    %cst_23 = arith.constant dense<0.000000e+00> : vector<8x8xf32>
    %56 = tpu.matmul %53, %54, %cst_23 {dimension_numbers = #tpu.dot_dimension_numbers<[1], [1], [0], [0], [0, 0, 1, 0], [], []>} : vector<8x8xf32>, vector<8x8xf32>, vector<8x8xf32> -> vector<8x8xf32>
    %cst_24 = arith.constant 0.353553385 : f32
    %57 = vector.broadcast %cst_24 : f32 to vector<8x8xf32>
    %58 = arith.mulf %56, %57 : vector<8x8xf32>
    %cst_25 = arith.constant 0.000000e+00 : f32
    %59 = vector.broadcast %cst_25 : f32 to vector<1x8xf32>
    %60 = arith.cmpf oeq, %3, %59 : vector<1x8xf32>
    %cst_26 = arith.constant -1.000000e+04 : f32
    %61 = vector.shape_cast %60 : vector<1x8xi1> to vector<1x8xi1>
    %62 = vector.broadcast %61 : vector<1x8xi1> to vector<8x8xi1>
    %63 = vector.broadcast %cst_26 : f32 to vector<8x8xf32>
    %64 = arith.select %62, %63, %58 : vector<8x8xi1>, vector<8x8xf32>
    %cst_27 = arith.constant dense<0xFF800000> : vector<8xf32>
    %65 = vector.multi_reduction <maximumf>, %64, %cst_27 [1] : vector<8x8xf32> to vector<8xf32>
    %66 = vector.shape_cast %65 : vector<8xf32> to vector<8x1xf32>
    %67 = vector.broadcast %66 : vector<8x1xf32> to vector<8x8xf32>
    %68 = arith.subf %64, %67 : vector<8x8xf32>
    %69 = math.exp %68 : vector<8x8xf32>
    %cst_28 = arith.constant dense<0.000000e+00> : vector<8xf32>
    %70 = vector.multi_reduction <add>, %69, %cst_28 [1] : vector<8x8xf32> to vector<8xf32>
    %71 = vector.shape_cast %70 : vector<8xf32> to vector<8x1xf32>
    %72 = vector.broadcast %71 : vector<8x1xf32> to vector<8x8xf32>
    %73 = arith.divf %69, %72 : vector<8x8xf32>
    %cst_29 = arith.constant dense<0.000000e+00> : vector<8x8xf32>
    %74 = tpu.matmul %73, %55, %cst_29 {dimension_numbers = #tpu.dot_dimension_numbers<[1], [0], [0], [1], [0, 0, 1, 1], [], []>} : vector<8x8xf32>, vector<8x8xf32>, vector<8x8xf32> -> vector<8x8xf32>
    %75 = vector.extract_strided_slice %8 {offsets = [0, 24], sizes = [8, 8], strides = [1, 1]} : vector<8x96xf32> to vector<8x8xf32>
    %76 = vector.extract_strided_slice %8 {offsets = [0, 56], sizes = [8, 8], strides = [1, 1]} : vector<8x96xf32> to vector<8x8xf32>
    %77 = vector.extract_strided_slice %8 {offsets = [0, 88], sizes = [8, 8], strides = [1, 1]} : vector<8x96xf32> to vector<8x8xf32>
    %cst_30 = arith.constant dense<0.000000e+00> : vector<8x8xf32>
    %78 = tpu.matmul %75, %76, %cst_30 {dimension_numbers = #tpu.dot_dimension_numbers<[1], [1], [0], [0], [0, 0, 1, 0], [], []>} : vector<8x8xf32>, vector<8x8xf32>, vector<8x8xf32> -> vector<8x8xf32>
    %cst_31 = arith.constant 0.353553385 : f32
    %79 = vector.broadcast %cst_31 : f32 to vector<8x8xf32>
    %80 = arith.mulf %78, %79 : vector<8x8xf32>
    %cst_32 = arith.constant 0.000000e+00 : f32
    %81 = vector.broadcast %cst_32 : f32 to vector<1x8xf32>
    %82 = arith.cmpf oeq, %3, %81 : vector<1x8xf32>
    %cst_33 = arith.constant -1.000000e+04 : f32
    %83 = vector.shape_cast %82 : vector<1x8xi1> to vector<1x8xi1>
    %84 = vector.broadcast %83 : vector<1x8xi1> to vector<8x8xi1>
    %85 = vector.broadcast %cst_33 : f32 to vector<8x8xf32>
    %86 = arith.select %84, %85, %80 : vector<8x8xi1>, vector<8x8xf32>
    %cst_34 = arith.constant dense<0xFF800000> : vector<8xf32>
    %87 = vector.multi_reduction <maximumf>, %86, %cst_34 [1] : vector<8x8xf32> to vector<8xf32>
    %88 = vector.shape_cast %87 : vector<8xf32> to vector<8x1xf32>
    %89 = vector.broadcast %88 : vector<8x1xf32> to vector<8x8xf32>
    %90 = arith.subf %86, %89 : vector<8x8xf32>
    %91 = math.exp %90 : vector<8x8xf32>
    %cst_35 = arith.constant dense<0.000000e+00> : vector<8xf32>
    %92 = vector.multi_reduction <add>, %91, %cst_35 [1] : vector<8x8xf32> to vector<8xf32>
    %93 = vector.shape_cast %92 : vector<8xf32> to vector<8x1xf32>
    %94 = vector.broadcast %93 : vector<8x1xf32> to vector<8x8xf32>
    %95 = arith.divf %91, %94 : vector<8x8xf32>
    %cst_36 = arith.constant dense<0.000000e+00> : vector<8x8xf32>
    %96 = tpu.matmul %95, %77, %cst_36 {dimension_numbers = #tpu.dot_dimension_numbers<[1], [0], [0], [1], [0, 0, 1, 1], [], []>} : vector<8x8xf32>, vector<8x8xf32>, vector<8x8xf32> -> vector<8x8xf32>
    %97 = tpu.concatenate %30, %52, %74, %96 in 1 : vector<8x8xf32>, vector<8x8xf32>, vector<8x8xf32>, vector<8x8xf32> -> vector<8x32xf32>
    %c0_37 = arith.constant 0 : index
    %c0_38 = arith.constant 0 : index
    %98 = vector.load %arg5[%c0_37, %c0_38] : memref<32x32xf32, #tpu.memory_space<vmem>>, vector<32x32xf32>
    %cst_39 = arith.constant dense<0.000000e+00> : vector<8x32xf32>
    %99 = tpu.matmul %97, %98, %cst_39 {dimension_numbers = #tpu.dot_dimension_numbers<[1], [0], [0], [1], [0, 0, 1, 1], [], []>} : vector<8x32xf32>, vector<32x32xf32>, vector<8x32xf32> -> vector<8x32xf32>
    %c0_40 = arith.constant 0 : index
    %c0_41 = arith.constant 0 : index
    %100 = vector.load %arg6[%c0_40, %c0_41] : memref<1x32xf32, #tpu.memory_space<vmem>>, vector<1x32xf32>
    %101 = vector.broadcast %100 : vector<1x32xf32> to vector<8x32xf32>
    %102 = arith.addf %99, %101 : vector<8x32xf32>
    %103 = arith.addf %1, %102 : vector<8x32xf32>
    %c0_42 = arith.constant 0 : index
    %c0_43 = arith.constant 0 : index
    %104 = vector.load %arg7[%c0_42, %c0_43] : memref<1x32xf32, #tpu.memory_space<vmem>>, vector<1x32xf32>
    %c0_44 = arith.constant 0 : index
    %c0_45 = arith.constant 0 : index
    %105 = vector.load %arg8[%c0_44, %c0_45] : memref<1x32xf32, #tpu.memory_space<vmem>>, vector<1x32xf32>
    %cst_46 = arith.constant dense<0.000000e+00> : vector<8xf32>
    %106 = vector.multi_reduction <add>, %103, %cst_46 [1] : vector<8x32xf32> to vector<8xf32>
    %107 = vector.shape_cast %106 : vector<8xf32> to vector<8x1xf32>
    %cst_47 = arith.constant 3.200000e+01 : f32
    %108 = vector.broadcast %cst_47 : f32 to vector<8x1xf32>
    %109 = arith.divf %107, %108 : vector<8x1xf32>
    %110 = vector.broadcast %109 : vector<8x1xf32> to vector<8x32xf32>
    %111 = arith.subf %103, %110 : vector<8x32xf32>
    %112 = arith.mulf %111, %111 : vector<8x32xf32>
    %cst_48 = arith.constant dense<0.000000e+00> : vector<8xf32>
    %113 = vector.multi_reduction <add>, %112, %cst_48 [1] : vector<8x32xf32> to vector<8xf32>
    %114 = vector.shape_cast %113 : vector<8xf32> to vector<8x1xf32>
    %cst_49 = arith.constant 3.100000e+01 : f32
    %115 = vector.broadcast %cst_49 : f32 to vector<8x1xf32>
    %116 = arith.divf %114, %115 : vector<8x1xf32>
    %117 = vector.broadcast %104 : vector<1x32xf32> to vector<8x32xf32>
    %118 = arith.mulf %117, %111 : vector<8x32xf32>
    %119 = math.sqrt %116 : vector<8x1xf32>
    %cst_50 = arith.constant 9.99999997E-7 : f32
    %120 = vector.broadcast %cst_50 : f32 to vector<8x1xf32>
    %121 = arith.addf %119, %120 : vector<8x1xf32>
    %122 = vector.broadcast %121 : vector<8x1xf32> to vector<8x32xf32>
    %123 = arith.divf %118, %122 : vector<8x32xf32>
    %124 = vector.broadcast %105 : vector<1x32xf32> to vector<8x32xf32>
    %125 = arith.addf %123, %124 : vector<8x32xf32>
    %c0_51 = arith.constant 0 : index
    %c0_52 = arith.constant 0 : index
    %126 = vector.load %arg9[%c0_51, %c0_52] : memref<32x128xf32, #tpu.memory_space<vmem>>, vector<32x128xf32>
    %cst_53 = arith.constant dense<0.000000e+00> : vector<8x128xf32>
    %127 = tpu.matmul %125, %126, %cst_53 {dimension_numbers = #tpu.dot_dimension_numbers<[1], [0], [0], [1], [0, 0, 1, 1], [], []>} : vector<8x32xf32>, vector<32x128xf32>, vector<8x128xf32> -> vector<8x128xf32>
    %c0_54 = arith.constant 0 : index
    %c0_55 = arith.constant 0 : index
    %128 = vector.load %arg10[%c0_54, %c0_55] : memref<1x128xf32, #tpu.memory_space<vmem>>, vector<1x128xf32>
    %129 = vector.broadcast %128 : vector<1x128xf32> to vector<8x128xf32>
    %130 = arith.addf %127, %129 : vector<8x128xf32>
    %cst_56 = arith.constant 5.000000e-01 : f32
    %131 = vector.broadcast %cst_56 : f32 to vector<8x128xf32>
    %132 = arith.mulf %131, %130 : vector<8x128xf32>
    %cst_57 = arith.constant 0.707106769 : f32
    %133 = vector.broadcast %cst_57 : f32 to vector<8x128xf32>
    %134 = arith.mulf %130, %133 : vector<8x128xf32>
    %135 = math.absf %134 : vector<8x128xf32>
    %cst_58 = arith.constant 0.327591091 : f32
    %136 = vector.broadcast %cst_58 : f32 to vector<8x128xf32>
    %137 = arith.mulf %136, %135 : vector<8x128xf32>
    %cst_59 = arith.constant 1.000000e+00 : f32
    %138 = vector.broadcast %cst_59 : f32 to vector<8x128xf32>
    %139 = arith.addf %138, %137 : vector<8x128xf32>
    %cst_60 = arith.constant 1.000000e+00 : f32
    %140 = vector.broadcast %cst_60 : f32 to vector<8x128xf32>
    %141 = arith.divf %140, %139 : vector<8x128xf32>
    %cst_61 = arith.constant 1.06140542 : f32
    %142 = vector.broadcast %cst_61 : f32 to vector<8x128xf32>
    %143 = arith.mulf %142, %141 : vector<8x128xf32>
    %cst_62 = arith.constant -1.45315206 : f32
    %144 = vector.broadcast %cst_62 : f32 to vector<8x128xf32>
    %145 = arith.addf %143, %144 : vector<8x128xf32>
    %146 = arith.mulf %145, %141 : vector<8x128xf32>
    %cst_63 = arith.constant 1.42141378 : f32
    %147 = vector.broadcast %cst_63 : f32 to vector<8x128xf32>
    %148 = arith.addf %146, %147 : vector<8x128xf32>
    %149 = arith.mulf %148, %141 : vector<8x128xf32>
    %cst_64 = arith.constant -0.284496725 : f32
    %150 = vector.broadcast %cst_64 : f32 to vector<8x128xf32>
    %151 = arith.addf %149, %150 : vector<8x128xf32>
    %152 = arith.mulf %151, %141 : vector<8x128xf32>
    %cst_65 = arith.constant 0.254829586 : f32
    %153 = vector.broadcast %cst_65 : f32 to vector<8x128xf32>
    %154 = arith.addf %152, %153 : vector<8x128xf32>
    %155 = arith.mulf %154, %141 : vector<8x128xf32>
    %156 = arith.mulf %135, %135 : vector<8x128xf32>
    %cst_66 = arith.constant 0.000000e+00 : f32
    %157 = vector.broadcast %cst_66 : f32 to vector<8x128xf32>
    %158 = arith.subf %157, %156 : vector<8x128xf32>
    %159 = math.exp %158 : vector<8x128xf32>
    %160 = arith.mulf %155, %159 : vector<8x128xf32>
    %cst_67 = arith.constant 1.000000e+00 : f32
    %161 = vector.broadcast %cst_67 : f32 to vector<8x128xf32>
    %162 = arith.subf %161, %160 : vector<8x128xf32>
    %cst_68 = arith.constant 0.000000e+00 : f32
    %163 = vector.broadcast %cst_68 : f32 to vector<8x128xf32>
    %164 = arith.cmpf olt, %134, %163 : vector<8x128xf32>
    %cst_69 = arith.constant 0.000000e+00 : f32
    %165 = vector.broadcast %cst_69 : f32 to vector<8x128xf32>
    %166 = arith.subf %165, %162 : vector<8x128xf32>
    %167 = arith.select %164, %166, %162 : vector<8x128xi1>, vector<8x128xf32>
    %cst_70 = arith.constant 1.000000e+00 : f32
    %168 = vector.broadcast %cst_70 : f32 to vector<8x128xf32>
    %169 = arith.addf %168, %167 : vector<8x128xf32>
    %170 = arith.mulf %132, %169 : vector<8x128xf32>
    %c0_71 = arith.constant 0 : index
    %c0_72 = arith.constant 0 : index
    %171 = vector.load %arg11[%c0_71, %c0_72] : memref<128x32xf32, #tpu.memory_space<vmem>>, vector<128x32xf32>
    %cst_73 = arith.constant dense<0.000000e+00> : vector<8x32xf32>
    %172 = tpu.matmul %170, %171, %cst_73 {dimension_numbers = #tpu.dot_dimension_numbers<[1], [0], [0], [1], [0, 0, 1, 1], [], []>} : vector<8x128xf32>, vector<128x32xf32>, vector<8x32xf32> -> vector<8x32xf32>
    %c0_74 = arith.constant 0 : index
    %c0_75 = arith.constant 0 : index
    %173 = vector.load %arg12[%c0_74, %c0_75] : memref<1x32xf32, #tpu.memory_space<vmem>>, vector<1x32xf32>
    %174 = vector.broadcast %173 : vector<1x32xf32> to vector<8x32xf32>
    %175 = arith.addf %172, %174 : vector<8x32xf32>
    %176 = arith.addf %125, %175 : vector<8x32xf32>
    %c0_76 = arith.constant 0 : index
    %c0_77 = arith.constant 0 : index
    %177 = vector.load %arg7[%c0_76, %c0_77] : memref<1x32xf32, #tpu.memory_space<vmem>>, vector<1x32xf32>
    %c0_78 = arith.constant 0 : index
    %c0_79 = arith.constant 0 : index
    %178 = vector.load %arg8[%c0_78, %c0_79] : memref<1x32xf32, #tpu.memory_space<vmem>>, vector<1x32xf32>
    %cst_80 = arith.constant dense<0.000000e+00> : vector<8xf32>
    %179 = vector.multi_reduction <add>, %176, %cst_80 [1] : vector<8x32xf32> to vector<8xf32>
    %180 = vector.shape_cast %179 : vector<8xf32> to vector<8x1xf32>
    %cst_81 = arith.constant 3.200000e+01 : f32
    %181 = vector.broadcast %cst_81 : f32 to vector<8x1xf32>
    %182 = arith.divf %180, %181 : vector<8x1xf32>
    %183 = vector.broadcast %182 : vector<8x1xf32> to vector<8x32xf32>
    %184 = arith.subf %176, %183 : vector<8x32xf32>
    %185 = arith.mulf %184, %184 : vector<8x32xf32>
    %cst_82 = arith.constant dense<0.000000e+00> : vector<8xf32>
    %186 = vector.multi_reduction <add>, %185, %cst_82 [1] : vector<8x32xf32> to vector<8xf32>
    %187 = vector.shape_cast %186 : vector<8xf32> to vector<8x1xf32>
    %cst_83 = arith.constant 3.100000e+01 : f32
    %188 = vector.broadcast %cst_83 : f32 to vector<8x1xf32>
    %189 = arith.divf %187, %188 : vector<8x1xf32>
    %190 = vector.broadcast %177 : vector<1x32xf32> to vector<8x32xf32>
    %191 = arith.mulf %190, %184 : vector<8x32xf32>
    %192 = math.sqrt %189 : vector<8x1xf32>
    %cst_84 = arith.constant 9.99999997E-7 : f32
    %193 = vector.broadcast %cst_84 : f32 to vector<8x1xf32>
    %194 = arith.addf %192, %193 : vector<8x1xf32>
    %195 = vector.broadcast %194 : vector<8x1xf32> to vector<8x32xf32>
    %196 = arith.divf %191, %195 : vector<8x32xf32>
    %197 = vector.broadcast %178 : vector<1x32xf32> to vector<8x32xf32>
    %198 = arith.addf %196, %197 : vector<8x32xf32>
    %c0_85 = arith.constant 0 : index
    %c0_86 = arith.constant 0 : index
    %c0_87 = arith.constant 0 : index
    %199 = vector.load %arg13[%c0_85, %c0_86, %c0_87] : memref<1x8x32xf32, #tpu.memory_space<vmem>>, vector<1x8x32xf32>
    %200 = vector.shape_cast %199 : vector<1x8x32xf32> to vector<8x32xf32>
    %201 = vector.shape_cast %198 : vector<8x32xf32> to vector<1x8x32xf32>
    tpu.vector_store %arg13[%c0_85, %c0_86, %c0_87], %201 {strides = array<i32>} : memref<1x8x32xf32, #tpu.memory_space<vmem>>, vector<1x8x32xf32>,
    return
  }
  func.func @transform_0(%arg0: i32) -> (i32, i32, i32) {
    %c0_i32 = arith.constant 0 : i32
    %c0_i32_0 = arith.constant 0 : i32
    %c0_i32_1 = arith.constant 0 : i32
    return %arg0, %c0_i32, %c0_i32_0 : i32, i32, i32
  }
  func.func @transform_1(%arg0: i32) -> (i32, i32, i32) {
    %c0_i32 = arith.constant 0 : i32
    %c0_i32_0 = arith.constant 0 : i32
    %c0_i32_1 = arith.constant 0 : i32
    return %arg0, %c0_i32, %c0_i32_0 : i32, i32, i32
  }
  func.func @transform_2(%arg0: i32) -> (i32, i32) {
    %c0_i32 = arith.constant 0 : i32
    %c0_i32_0 = arith.constant 0 : i32
    %c0_i32_1 = arith.constant 0 : i32
    return %c0_i32, %c0_i32_0 : i32, i32
  }
  func.func @transform_3(%arg0: i32) -> (i32, i32) {
    %c0_i32 = arith.constant 0 : i32
    %c0_i32_0 = arith.constant 0 : i32
    %c0_i32_1 = arith.constant 0 : i32
    return %c0_i32, %c0_i32_0 : i32, i32
  }
  func.func @transform_4(%arg0: i32) -> (i32, i32) {
    %c0_i32 = arith.constant 0 : i32
    %c0_i32_0 = arith.constant 0 : i32
    %c0_i32_1 = arith.constant 0 : i32
    return %c0_i32, %c0_i32_0 : i32, i32
  }
  func.func @transform_5(%arg0: i32) -> (i32, i32) {
    %c0_i32 = arith.constant 0 : i32
    %c0_i32_0 = arith.constant 0 : i32
    %c0_i32_1 = arith.constant 0 : i32
    return %c0_i32, %c0_i32_0 : i32, i32
  }
  func.func @transform_6(%arg0: i32) -> (i32, i32) {
    %c0_i32 = arith.constant 0 : i32
    %c0_i32_0 = arith.constant 0 : i32
    %c0_i32_1 = arith.constant 0 : i32
    return %c0_i32, %c0_i32_0 : i32, i32
  }
  func.func @transform_7(%arg0: i32) -> (i32, i32) {
    %c0_i32 = arith.constant 0 : i32
    %c0_i32_0 = arith.constant 0 : i32
    %c0_i32_1 = arith.constant 0 : i32
    return %c0_i32, %c0_i32_0 : i32, i32
  }
  func.func @transform_8(%arg0: i32) -> (i32, i32) {
    %c0_i32 = arith.constant 0 : i32
    %c0_i32_0 = arith.constant 0 : i32
    %c0_i32_1 = arith.constant 0 : i32
    return %c0_i32, %c0_i32_0 : i32, i32
  }
  func.func @transform_9(%arg0: i32) -> (i32, i32) {
    %c0_i32 = arith.constant 0 : i32
    %c0_i32_0 = arith.constant 0 : i32
    %c0_i32_1 = arith.constant 0 : i32
    return %c0_i32, %c0_i32_0 : i32, i32
  }
  func.func @transform_10(%arg0: i32) -> (i32, i32) {
    %c0_i32 = arith.constant 0 : i32
    %c0_i32_0 = arith.constant 0 : i32
    %c0_i32_1 = arith.constant 0 : i32
    return %c0_i32, %c0_i32_0 : i32, i32
  }
  func.func @transform_11(%arg0: i32) -> (i32, i32) {
    %c0_i32 = arith.constant 0 : i32
    %c0_i32_0 = arith.constant 0 : i32
    %c0_i32_1 = arith.constant 0 : i32
    return %c0_i32, %c0_i32_0 : i32, i32
  }
  func.func @transform_12(%arg0: i32) -> (i32, i32, i32) {
    %c0_i32 = arith.constant 0 : i32
    %c0_i32_0 = arith.constant 0 : i32
    %c0_i32_1 = arith.constant 0 : i32
    return %arg0, %c0_i32, %c0_i32_0 : i32, i32, i32
  }
}

module attributes {stable_mosaic.version = 11 : i64} {
  func.func @_encoder_layer_kernel(%arg0: i32, %arg1: memref<1x8x128xf32, #tpu.memory_space<vmem>>, %arg2: memref<1x1x8xf32, #tpu.memory_space<vmem>>, %arg3: memref<128x384xf32, #tpu.memory_space<vmem>>, %arg4: memref<1x384xf32, #tpu.memory_space<vmem>>, %arg5: memref<128x128xf32, #tpu.memory_space<vmem>>, %arg6: memref<1x128xf32, #tpu.memory_space<vmem>>, %arg7: memref<1x128xf32, #tpu.memory_space<vmem>>, %arg8: memref<1x128xf32, #tpu.memory_space<vmem>>, %arg9: memref<128x512xf32, #tpu.memory_space<vmem>>, %arg10: memref<1x512xf32, #tpu.memory_space<vmem>>, %arg11: memref<512x128xf32, #tpu.memory_space<vmem>>, %arg12: memref<1x128xf32, #tpu.memory_space<vmem>>, %arg13: memref<1x8x128xf32, #tpu.memory_space<vmem>>) attributes {dimension_semantics = [#tpu.dimension_semantics<parallel>], iteration_bounds = array<i64: 2>, scalar_prefetch = 0 : i64, scratch_operands = 0 : i64, tpu.core_type = #tpu.core_type<tc>, window_params = [{transform_indices = @transform_0, window_bounds = array<i64: 1, 8, 128>}, {transform_indices = @transform_1, window_bounds = array<i64: 1, 1, 8>}, {pipeline_mode = #tpu.pipeline_mode<synchronous>, transform_indices = @transform_2, window_bounds = array<i64: 128, 384>}, {pipeline_mode = #tpu.pipeline_mode<synchronous>, transform_indices = @transform_3, window_bounds = array<i64: 1, 384>}, {pipeline_mode = #tpu.pipeline_mode<synchronous>, transform_indices = @transform_4, window_bounds = array<i64: 128, 128>}, {pipeline_mode = #tpu.pipeline_mode<synchronous>, transform_indices = @transform_5, window_bounds = array<i64: 1, 128>}, {pipeline_mode = #tpu.pipeline_mode<synchronous>, transform_indices = @transform_6, window_bounds = array<i64: 1, 128>}, {pipeline_mode = #tpu.pipeline_mode<synchronous>, transform_indices = @transform_7, window_bounds = array<i64: 1, 128>}, {pipeline_mode = #tpu.pipeline_mode<synchronous>, transform_indices = @transform_8, window_bounds = array<i64: 128, 512>}, {pipeline_mode = #tpu.pipeline_mode<synchronous>, transform_indices = @transform_9, window_bounds = array<i64: 1, 512>}, {pipeline_mode = #tpu.pipeline_mode<synchronous>, transform_indices = @transform_10, window_bounds = array<i64: 512, 128>}, {pipeline_mode = #tpu.pipeline_mode<synchronous>, transform_indices = @transform_11, window_bounds = array<i64: 1, 128>}, {transform_indices = @transform_12, window_bounds = array<i64: 1, 8, 128>}]} {
    %c0 = arith.constant 0 : index
    %c0_0 = arith.constant 0 : index
    %c0_1 = arith.constant 0 : index
    %0 = vector.load %arg1[%c0, %c0_0, %c0_1] : memref<1x8x128xf32, #tpu.memory_space<vmem>>, vector<1x8x128xf32>
    %1 = vector.shape_cast %0 : vector<1x8x128xf32> to vector<8x128xf32>
    %c0_2 = arith.constant 0 : index
    %c0_3 = arith.constant 0 : index
    %c0_4 = arith.constant 0 : index
    %2 = vector.load %arg2[%c0_2, %c0_3, %c0_4] : memref<1x1x8xf32, #tpu.memory_space<vmem>>, vector<1x1x8xf32>
    %3 = vector.shape_cast %2 : vector<1x1x8xf32> to vector<1x8xf32>
    %c0_5 = arith.constant 0 : index
    %c0_6 = arith.constant 0 : index
    %4 = vector.load %arg3[%c0_5, %c0_6] : memref<128x384xf32, #tpu.memory_space<vmem>>, vector<128x384xf32>
    %cst = arith.constant dense<0.000000e+00> : vector<8x384xf32>
    %5 = tpu.matmul %1, %4, %cst {dimension_numbers = #tpu.dot_dimension_numbers<[1], [0], [0], [1], [0, 0, 1, 1], [], []>} : vector<8x128xf32>, vector<128x384xf32>, vector<8x384xf32> -> vector<8x384xf32>
    %c0_7 = arith.constant 0 : index
    %c0_8 = arith.constant 0 : index
    %6 = vector.load %arg4[%c0_7, %c0_8] : memref<1x384xf32, #tpu.memory_space<vmem>>, vector<1x384xf32>
    %7 = vector.broadcast %6 : vector<1x384xf32> to vector<8x384xf32>
    %8 = arith.addf %5, %7 : vector<8x384xf32>
    %9 = vector.extract_strided_slice %8 {offsets = [0, 0], sizes = [8, 32], strides = [1, 1]} : vector<8x384xf32> to vector<8x32xf32>
    %10 = vector.extract_strided_slice %8 {offsets = [0, 128], sizes = [8, 32], strides = [1, 1]} : vector<8x384xf32> to vector<8x32xf32>
    %11 = vector.extract_strided_slice %8 {offsets = [0, 256], sizes = [8, 32], strides = [1, 1]} : vector<8x384xf32> to vector<8x32xf32>
    %cst_9 = arith.constant dense<0.000000e+00> : vector<8x8xf32>
    %12 = tpu.matmul %9, %10, %cst_9 {dimension_numbers = #tpu.dot_dimension_numbers<[1], [1], [0], [0], [0, 0, 1, 0], [], []>} : vector<8x32xf32>, vector<8x32xf32>, vector<8x8xf32> -> vector<8x8xf32>
    %cst_10 = arith.constant 0.176776692 : f32
    %13 = vector.broadcast %cst_10 : f32 to vector<8x8xf32>
    %14 = arith.mulf %12, %13 : vector<8x8xf32>
    %cst_11 = arith.constant 0.000000e+00 : f32
    %15 = vector.broadcast %cst_11 : f32 to vector<1x8xf32>
    %16 = arith.cmpf oeq, %3, %15 : vector<1x8xf32>
    %cst_12 = arith.constant -1.000000e+04 : f32
    %17 = vector.shape_cast %16 : vector<1x8xi1> to vector<1x8xi1>
    %18 = vector.broadcast %17 : vector<1x8xi1> to vector<8x8xi1>
    %19 = vector.broadcast %cst_12 : f32 to vector<8x8xf32>
    %20 = arith.select %18, %19, %14 : vector<8x8xi1>, vector<8x8xf32>
    %cst_13 = arith.constant dense<0xFF800000> : vector<8xf32>
    %21 = vector.multi_reduction <maximumf>, %20, %cst_13 [1] : vector<8x8xf32> to vector<8xf32>
    %22 = vector.shape_cast %21 : vector<8xf32> to vector<8x1xf32>
    %23 = vector.broadcast %22 : vector<8x1xf32> to vector<8x8xf32>
    %24 = arith.subf %20, %23 : vector<8x8xf32>
    %25 = math.exp %24 : vector<8x8xf32>
    %cst_14 = arith.constant dense<0.000000e+00> : vector<8xf32>
    %26 = vector.multi_reduction <add>, %25, %cst_14 [1] : vector<8x8xf32> to vector<8xf32>
    %27 = vector.shape_cast %26 : vector<8xf32> to vector<8x1xf32>
    %28 = vector.broadcast %27 : vector<8x1xf32> to vector<8x8xf32>
    %29 = arith.divf %25, %28 : vector<8x8xf32>
    %cst_15 = arith.constant dense<0.000000e+00> : vector<8x32xf32>
    %30 = tpu.matmul %29, %11, %cst_15 {dimension_numbers = #tpu.dot_dimension_numbers<[1], [0], [0], [1], [0, 0, 1, 1], [], []>} : vector<8x8xf32>, vector<8x32xf32>, vector<8x32xf32> -> vector<8x32xf32>
    %31 = vector.extract_strided_slice %8 {offsets = [0, 32], sizes = [8, 32], strides = [1, 1]} : vector<8x384xf32> to vector<8x32xf32>
    %32 = vector.extract_strided_slice %8 {offsets = [0, 160], sizes = [8, 32], strides = [1, 1]} : vector<8x384xf32> to vector<8x32xf32>
    %33 = vector.extract_strided_slice %8 {offsets = [0, 288], sizes = [8, 32], strides = [1, 1]} : vector<8x384xf32> to vector<8x32xf32>
    %cst_16 = arith.constant dense<0.000000e+00> : vector<8x8xf32>
    %34 = tpu.matmul %31, %32, %cst_16 {dimension_numbers = #tpu.dot_dimension_numbers<[1], [1], [0], [0], [0, 0, 1, 0], [], []>} : vector<8x32xf32>, vector<8x32xf32>, vector<8x8xf32> -> vector<8x8xf32>
    %cst_17 = arith.constant 0.176776692 : f32
    %35 = vector.broadcast %cst_17 : f32 to vector<8x8xf32>
    %36 = arith.mulf %34, %35 : vector<8x8xf32>
    %cst_18 = arith.constant 0.000000e+00 : f32
    %37 = vector.broadcast %cst_18 : f32 to vector<1x8xf32>
    %38 = arith.cmpf oeq, %3, %37 : vector<1x8xf32>
    %cst_19 = arith.constant -1.000000e+04 : f32
    %39 = vector.shape_cast %38 : vector<1x8xi1> to vector<1x8xi1>
    %40 = vector.broadcast %39 : vector<1x8xi1> to vector<8x8xi1>
    %41 = vector.broadcast %cst_19 : f32 to vector<8x8xf32>
    %42 = arith.select %40, %41, %36 : vector<8x8xi1>, vector<8x8xf32>
    %cst_20 = arith.constant dense<0xFF800000> : vector<8xf32>
    %43 = vector.multi_reduction <maximumf>, %42, %cst_20 [1] : vector<8x8xf32> to vector<8xf32>
    %44 = vector.shape_cast %43 : vector<8xf32> to vector<8x1xf32>
    %45 = vector.broadcast %44 : vector<8x1xf32> to vector<8x8xf32>
    %46 = arith.subf %42, %45 : vector<8x8xf32>
    %47 = math.exp %46 : vector<8x8xf32>
    %cst_21 = arith.constant dense<0.000000e+00> : vector<8xf32>
    %48 = vector.multi_reduction <add>, %47, %cst_21 [1] : vector<8x8xf32> to vector<8xf32>
    %49 = vector.shape_cast %48 : vector<8xf32> to vector<8x1xf32>
    %50 = vector.broadcast %49 : vector<8x1xf32> to vector<8x8xf32>
    %51 = arith.divf %47, %50 : vector<8x8xf32>
    %cst_22 = arith.constant dense<0.000000e+00> : vector<8x32xf32>
    %52 = tpu.matmul %51, %33, %cst_22 {dimension_numbers = #tpu.dot_dimension_numbers<[1], [0], [0], [1], [0, 0, 1, 1], [], []>} : vector<8x8xf32>, vector<8x32xf32>, vector<8x32xf32> -> vector<8x32xf32>
    %53 = vector.extract_strided_slice %8 {offsets = [0, 64], sizes = [8, 32], strides = [1, 1]} : vector<8x384xf32> to vector<8x32xf32>
    %54 = vector.extract_strided_slice %8 {offsets = [0, 192], sizes = [8, 32], strides = [1, 1]} : vector<8x384xf32> to vector<8x32xf32>
    %55 = vector.extract_strided_slice %8 {offsets = [0, 320], sizes = [8, 32], strides = [1, 1]} : vector<8x384xf32> to vector<8x32xf32>
    %cst_23 = arith.constant dense<0.000000e+00> : vector<8x8xf32>
    %56 = tpu.matmul %53, %54, %cst_23 {dimension_numbers = #tpu.dot_dimension_numbers<[1], [1], [0], [0], [0, 0, 1, 0], [], []>} : vector<8x32xf32>, vector<8x32xf32>, vector<8x8xf32> -> vector<8x8xf32>
    %cst_24 = arith.constant 0.176776692 : f32
    %57 = vector.broadcast %cst_24 : f32 to vector<8x8xf32>
    %58 = arith.mulf %56, %57 : vector<8x8xf32>
    %cst_25 = arith.constant 0.000000e+00 : f32
    %59 = vector.broadcast %cst_25 : f32 to vector<1x8xf32>
    %60 = arith.cmpf oeq, %3, %59 : vector<1x8xf32>
    %cst_26 = arith.constant -1.000000e+04 : f32
    %61 = vector.shape_cast %60 : vector<1x8xi1> to vector<1x8xi1>
    %62 = vector.broadcast %61 : vector<1x8xi1> to vector<8x8xi1>
    %63 = vector.broadcast %cst_26 : f32 to vector<8x8xf32>
    %64 = arith.select %62, %63, %58 : vector<8x8xi1>, vector<8x8xf32>
    %cst_27 = arith.constant dense<0xFF800000> : vector<8xf32>
    %65 = vector.multi_reduction <maximumf>, %64, %cst_27 [1] : vector<8x8xf32> to vector<8xf32>
    %66 = vector.shape_cast %65 : vector<8xf32> to vector<8x1xf32>
    %67 = vector.broadcast %66 : vector<8x1xf32> to vector<8x8xf32>
    %68 = arith.subf %64, %67 : vector<8x8xf32>
    %69 = math.exp %68 : vector<8x8xf32>
    %cst_28 = arith.constant dense<0.000000e+00> : vector<8xf32>
    %70 = vector.multi_reduction <add>, %69, %cst_28 [1] : vector<8x8xf32> to vector<8xf32>
    %71 = vector.shape_cast %70 : vector<8xf32> to vector<8x1xf32>
    %72 = vector.broadcast %71 : vector<8x1xf32> to vector<8x8xf32>
    %73 = arith.divf %69, %72 : vector<8x8xf32>
    %cst_29 = arith.constant dense<0.000000e+00> : vector<8x32xf32>
    %74 = tpu.matmul %73, %55, %cst_29 {dimension_numbers = #tpu.dot_dimension_numbers<[1], [0], [0], [1], [0, 0, 1, 1], [], []>} : vector<8x8xf32>, vector<8x32xf32>, vector<8x32xf32> -> vector<8x32xf32>
    %75 = vector.extract_strided_slice %8 {offsets = [0, 96], sizes = [8, 32], strides = [1, 1]} : vector<8x384xf32> to vector<8x32xf32>
    %76 = vector.extract_strided_slice %8 {offsets = [0, 224], sizes = [8, 32], strides = [1, 1]} : vector<8x384xf32> to vector<8x32xf32>
    %77 = vector.extract_strided_slice %8 {offsets = [0, 352], sizes = [8, 32], strides = [1, 1]} : vector<8x384xf32> to vector<8x32xf32>
    %cst_30 = arith.constant dense<0.000000e+00> : vector<8x8xf32>
    %78 = tpu.matmul %75, %76, %cst_30 {dimension_numbers = #tpu.dot_dimension_numbers<[1], [1], [0], [0], [0, 0, 1, 0], [], []>} : vector<8x32xf32>, vector<8x32xf32>, vector<8x8xf32> -> vector<8x8xf32>
    %cst_31 = arith.constant 0.176776692 : f32
    %79 = vector.broadcast %cst_31 : f32 to vector<8x8xf32>
    %80 = arith.mulf %78, %79 : vector<8x8xf32>
    %cst_32 = arith.constant 0.000000e+00 : f32
    %81 = vector.broadcast %cst_32 : f32 to vector<1x8xf32>
    %82 = arith.cmpf oeq, %3, %81 : vector<1x8xf32>
    %cst_33 = arith.constant -1.000000e+04 : f32
    %83 = vector.shape_cast %82 : vector<1x8xi1> to vector<1x8xi1>
    %84 = vector.broadcast %83 : vector<1x8xi1> to vector<8x8xi1>
    %85 = vector.broadcast %cst_33 : f32 to vector<8x8xf32>
    %86 = arith.select %84, %85, %80 : vector<8x8xi1>, vector<8x8xf32>
    %cst_34 = arith.constant dense<0xFF800000> : vector<8xf32>
    %87 = vector.multi_reduction <maximumf>, %86, %cst_34 [1] : vector<8x8xf32> to vector<8xf32>
    %88 = vector.shape_cast %87 : vector<8xf32> to vector<8x1xf32>
    %89 = vector.broadcast %88 : vector<8x1xf32> to vector<8x8xf32>
    %90 = arith.subf %86, %89 : vector<8x8xf32>
    %91 = math.exp %90 : vector<8x8xf32>
    %cst_35 = arith.constant dense<0.000000e+00> : vector<8xf32>
    %92 = vector.multi_reduction <add>, %91, %cst_35 [1] : vector<8x8xf32> to vector<8xf32>
    %93 = vector.shape_cast %92 : vector<8xf32> to vector<8x1xf32>
    %94 = vector.broadcast %93 : vector<8x1xf32> to vector<8x8xf32>
    %95 = arith.divf %91, %94 : vector<8x8xf32>
    %cst_36 = arith.constant dense<0.000000e+00> : vector<8x32xf32>
    %96 = tpu.matmul %95, %77, %cst_36 {dimension_numbers = #tpu.dot_dimension_numbers<[1], [0], [0], [1], [0, 0, 1, 1], [], []>} : vector<8x8xf32>, vector<8x32xf32>, vector<8x32xf32> -> vector<8x32xf32>
    %97 = tpu.concatenate %30, %52, %74, %96 in 1 : vector<8x32xf32>, vector<8x32xf32>, vector<8x32xf32>, vector<8x32xf32> -> vector<8x128xf32>
    %c0_37 = arith.constant 0 : index
    %c0_38 = arith.constant 0 : index
    %98 = vector.load %arg5[%c0_37, %c0_38] : memref<128x128xf32, #tpu.memory_space<vmem>>, vector<128x128xf32>
    %cst_39 = arith.constant dense<0.000000e+00> : vector<8x128xf32>
    %99 = tpu.matmul %97, %98, %cst_39 {dimension_numbers = #tpu.dot_dimension_numbers<[1], [0], [0], [1], [0, 0, 1, 1], [], []>} : vector<8x128xf32>, vector<128x128xf32>, vector<8x128xf32> -> vector<8x128xf32>
    %c0_40 = arith.constant 0 : index
    %c0_41 = arith.constant 0 : index
    %100 = vector.load %arg6[%c0_40, %c0_41] : memref<1x128xf32, #tpu.memory_space<vmem>>, vector<1x128xf32>
    %101 = vector.broadcast %100 : vector<1x128xf32> to vector<8x128xf32>
    %102 = arith.addf %99, %101 : vector<8x128xf32>
    %103 = arith.addf %1, %102 : vector<8x128xf32>
    %c0_42 = arith.constant 0 : index
    %c0_43 = arith.constant 0 : index
    %104 = vector.load %arg7[%c0_42, %c0_43] : memref<1x128xf32, #tpu.memory_space<vmem>>, vector<1x128xf32>
    %c0_44 = arith.constant 0 : index
    %c0_45 = arith.constant 0 : index
    %105 = vector.load %arg8[%c0_44, %c0_45] : memref<1x128xf32, #tpu.memory_space<vmem>>, vector<1x128xf32>
    %cst_46 = arith.constant dense<0.000000e+00> : vector<8xf32>
    %106 = vector.multi_reduction <add>, %103, %cst_46 [1] : vector<8x128xf32> to vector<8xf32>
    %107 = vector.shape_cast %106 : vector<8xf32> to vector<8x1xf32>
    %cst_47 = arith.constant 1.280000e+02 : f32
    %108 = vector.broadcast %cst_47 : f32 to vector<8x1xf32>
    %109 = arith.divf %107, %108 : vector<8x1xf32>
    %110 = vector.broadcast %109 : vector<8x1xf32> to vector<8x128xf32>
    %111 = arith.subf %103, %110 : vector<8x128xf32>
    %112 = arith.mulf %111, %111 : vector<8x128xf32>
    %cst_48 = arith.constant dense<0.000000e+00> : vector<8xf32>
    %113 = vector.multi_reduction <add>, %112, %cst_48 [1] : vector<8x128xf32> to vector<8xf32>
    %114 = vector.shape_cast %113 : vector<8xf32> to vector<8x1xf32>
    %cst_49 = arith.constant 1.270000e+02 : f32
    %115 = vector.broadcast %cst_49 : f32 to vector<8x1xf32>
    %116 = arith.divf %114, %115 : vector<8x1xf32>
    %117 = vector.broadcast %104 : vector<1x128xf32> to vector<8x128xf32>
    %118 = arith.mulf %117, %111 : vector<8x128xf32>
    %119 = math.sqrt %116 : vector<8x1xf32>
    %cst_50 = arith.constant 9.99999997E-7 : f32
    %120 = vector.broadcast %cst_50 : f32 to vector<8x1xf32>
    %121 = arith.addf %119, %120 : vector<8x1xf32>
    %122 = vector.broadcast %121 : vector<8x1xf32> to vector<8x128xf32>
    %123 = arith.divf %118, %122 : vector<8x128xf32>
    %124 = vector.broadcast %105 : vector<1x128xf32> to vector<8x128xf32>
    %125 = arith.addf %123, %124 : vector<8x128xf32>
    %c0_51 = arith.constant 0 : index
    %c0_52 = arith.constant 0 : index
    %126 = vector.load %arg9[%c0_51, %c0_52] : memref<128x512xf32, #tpu.memory_space<vmem>>, vector<128x512xf32>
    %cst_53 = arith.constant dense<0.000000e+00> : vector<8x512xf32>
    %127 = tpu.matmul %125, %126, %cst_53 {dimension_numbers = #tpu.dot_dimension_numbers<[1], [0], [0], [1], [0, 0, 1, 1], [], []>} : vector<8x128xf32>, vector<128x512xf32>, vector<8x512xf32> -> vector<8x512xf32>
    %c0_54 = arith.constant 0 : index
    %c0_55 = arith.constant 0 : index
    %128 = vector.load %arg10[%c0_54, %c0_55] : memref<1x512xf32, #tpu.memory_space<vmem>>, vector<1x512xf32>
    %129 = vector.broadcast %128 : vector<1x512xf32> to vector<8x512xf32>
    %130 = arith.addf %127, %129 : vector<8x512xf32>
    %cst_56 = arith.constant 5.000000e-01 : f32
    %131 = vector.broadcast %cst_56 : f32 to vector<8x512xf32>
    %132 = arith.mulf %131, %130 : vector<8x512xf32>
    %cst_57 = arith.constant 0.707106769 : f32
    %133 = vector.broadcast %cst_57 : f32 to vector<8x512xf32>
    %134 = arith.mulf %130, %133 : vector<8x512xf32>
    %135 = math.absf %134 : vector<8x512xf32>
    %cst_58 = arith.constant 0.327591091 : f32
    %136 = vector.broadcast %cst_58 : f32 to vector<8x512xf32>
    %137 = arith.mulf %136, %135 : vector<8x512xf32>
    %cst_59 = arith.constant 1.000000e+00 : f32
    %138 = vector.broadcast %cst_59 : f32 to vector<8x512xf32>
    %139 = arith.addf %138, %137 : vector<8x512xf32>
    %cst_60 = arith.constant 1.000000e+00 : f32
    %140 = vector.broadcast %cst_60 : f32 to vector<8x512xf32>
    %141 = arith.divf %140, %139 : vector<8x512xf32>
    %cst_61 = arith.constant 1.06140542 : f32
    %142 = vector.broadcast %cst_61 : f32 to vector<8x512xf32>
    %143 = arith.mulf %142, %141 : vector<8x512xf32>
    %cst_62 = arith.constant -1.45315206 : f32
    %144 = vector.broadcast %cst_62 : f32 to vector<8x512xf32>
    %145 = arith.addf %143, %144 : vector<8x512xf32>
    %146 = arith.mulf %145, %141 : vector<8x512xf32>
    %cst_63 = arith.constant 1.42141378 : f32
    %147 = vector.broadcast %cst_63 : f32 to vector<8x512xf32>
    %148 = arith.addf %146, %147 : vector<8x512xf32>
    %149 = arith.mulf %148, %141 : vector<8x512xf32>
    %cst_64 = arith.constant -0.284496725 : f32
    %150 = vector.broadcast %cst_64 : f32 to vector<8x512xf32>
    %151 = arith.addf %149, %150 : vector<8x512xf32>
    %152 = arith.mulf %151, %141 : vector<8x512xf32>
    %cst_65 = arith.constant 0.254829586 : f32
    %153 = vector.broadcast %cst_65 : f32 to vector<8x512xf32>
    %154 = arith.addf %152, %153 : vector<8x512xf32>
    %155 = arith.mulf %154, %141 : vector<8x512xf32>
    %156 = arith.mulf %135, %135 : vector<8x512xf32>
    %cst_66 = arith.constant 0.000000e+00 : f32
    %157 = vector.broadcast %cst_66 : f32 to vector<8x512xf32>
    %158 = arith.subf %157, %156 : vector<8x512xf32>
    %159 = math.exp %158 : vector<8x512xf32>
    %160 = arith.mulf %155, %159 : vector<8x512xf32>
    %cst_67 = arith.constant 1.000000e+00 : f32
    %161 = vector.broadcast %cst_67 : f32 to vector<8x512xf32>
    %162 = arith.subf %161, %160 : vector<8x512xf32>
    %cst_68 = arith.constant 0.000000e+00 : f32
    %163 = vector.broadcast %cst_68 : f32 to vector<8x512xf32>
    %164 = arith.cmpf olt, %134, %163 : vector<8x512xf32>
    %cst_69 = arith.constant 0.000000e+00 : f32
    %165 = vector.broadcast %cst_69 : f32 to vector<8x512xf32>
    %166 = arith.subf %165, %162 : vector<8x512xf32>
    %167 = arith.select %164, %166, %162 : vector<8x512xi1>, vector<8x512xf32>
    %cst_70 = arith.constant 1.000000e+00 : f32
    %168 = vector.broadcast %cst_70 : f32 to vector<8x512xf32>
    %169 = arith.addf %168, %167 : vector<8x512xf32>
    %170 = arith.mulf %132, %169 : vector<8x512xf32>
    %c0_71 = arith.constant 0 : index
    %c0_72 = arith.constant 0 : index
    %171 = vector.load %arg11[%c0_71, %c0_72] : memref<512x128xf32, #tpu.memory_space<vmem>>, vector<512x128xf32>
    %cst_73 = arith.constant dense<0.000000e+00> : vector<8x128xf32>
    %172 = tpu.matmul %170, %171, %cst_73 {dimension_numbers = #tpu.dot_dimension_numbers<[1], [0], [0], [1], [0, 0, 1, 1], [], []>} : vector<8x512xf32>, vector<512x128xf32>, vector<8x128xf32> -> vector<8x128xf32>
    %c0_74 = arith.constant 0 : index
    %c0_75 = arith.constant 0 : index
    %173 = vector.load %arg12[%c0_74, %c0_75] : memref<1x128xf32, #tpu.memory_space<vmem>>, vector<1x128xf32>
    %174 = vector.broadcast %173 : vector<1x128xf32> to vector<8x128xf32>
    %175 = arith.addf %172, %174 : vector<8x128xf32>
    %176 = arith.addf %125, %175 : vector<8x128xf32>
    %c0_76 = arith.constant 0 : index
    %c0_77 = arith.constant 0 : index
    %177 = vector.load %arg7[%c0_76, %c0_77] : memref<1x128xf32, #tpu.memory_space<vmem>>, vector<1x128xf32>
    %c0_78 = arith.constant 0 : index
    %c0_79 = arith.constant 0 : index
    %178 = vector.load %arg8[%c0_78, %c0_79] : memref<1x128xf32, #tpu.memory_space<vmem>>, vector<1x128xf32>
    %cst_80 = arith.constant dense<0.000000e+00> : vector<8xf32>
    %179 = vector.multi_reduction <add>, %176, %cst_80 [1] : vector<8x128xf32> to vector<8xf32>
    %180 = vector.shape_cast %179 : vector<8xf32> to vector<8x1xf32>
    %cst_81 = arith.constant 1.280000e+02 : f32
    %181 = vector.broadcast %cst_81 : f32 to vector<8x1xf32>
    %182 = arith.divf %180, %181 : vector<8x1xf32>
    %183 = vector.broadcast %182 : vector<8x1xf32> to vector<8x128xf32>
    %184 = arith.subf %176, %183 : vector<8x128xf32>
    %185 = arith.mulf %184, %184 : vector<8x128xf32>
    %cst_82 = arith.constant dense<0.000000e+00> : vector<8xf32>
    %186 = vector.multi_reduction <add>, %185, %cst_82 [1] : vector<8x128xf32> to vector<8xf32>
    %187 = vector.shape_cast %186 : vector<8xf32> to vector<8x1xf32>
    %cst_83 = arith.constant 1.270000e+02 : f32
    %188 = vector.broadcast %cst_83 : f32 to vector<8x1xf32>
    %189 = arith.divf %187, %188 : vector<8x1xf32>
    %190 = vector.broadcast %177 : vector<1x128xf32> to vector<8x128xf32>
    %191 = arith.mulf %190, %184 : vector<8x128xf32>
    %192 = math.sqrt %189 : vector<8x1xf32>
    %cst_84 = arith.constant 9.99999997E-7 : f32
    %193 = vector.broadcast %cst_84 : f32 to vector<8x1xf32>
    %194 = arith.addf %192, %193 : vector<8x1xf32>
    %195 = vector.broadcast %194 : vector<8x1xf32> to vector<8x128xf32>
    %196 = arith.divf %191, %195 : vector<8x128xf32>
    %197 = vector.broadcast %178 : vector<1x128xf32> to vector<8x128xf32>
    %198 = arith.addf %196, %197 : vector<8x128xf32>
    %c0_85 = arith.constant 0 : index
    %c0_86 = arith.constant 0 : index
    %c0_87 = arith.constant 0 : index
    %199 = vector.load %arg13[%c0_85, %c0_86, %c0_87] : memref<1x8x128xf32, #tpu.memory_space<vmem>>, vector<1x8x128xf32>
    %200 = vector.shape_cast %199 : vector<1x8x128xf32> to vector<8x128xf32>
    %201 = vector.shape_cast %198 : vector<8x128xf32> to vector<1x8x128xf32>
    tpu.vector_store %arg13[%c0_85, %c0_86, %c0_87], %201 {strides = array<i32>} : memref<1x8x128xf32, #tpu.memory_space<vmem>>, vector<1x8x128xf32>,
    return
  }
  func.func @transform_0(%arg0: i32) -> (i32, i32, i32) {
    %c0_i32 = arith.constant 0 : i32
    %c0_i32_0 = arith.constant 0 : i32
    %c0_i32_1 = arith.constant 0 : i32
    return %arg0, %c0_i32, %c0_i32_0 : i32, i32, i32
  }
  func.func @transform_1(%arg0: i32) -> (i32, i32, i32) {
    %c0_i32 = arith.constant 0 : i32
    %c0_i32_0 = arith.constant 0 : i32
    %c0_i32_1 = arith.constant 0 : i32
    return %arg0, %c0_i32, %c0_i32_0 : i32, i32, i32
  }
  func.func @transform_2(%arg0: i32) -> (i32, i32) {
    %c0_i32 = arith.constant 0 : i32
    %c0_i32_0 = arith.constant 0 : i32
    %c0_i32_1 = arith.constant 0 : i32
    return %c0_i32, %c0_i32_0 : i32, i32
  }
  func.func @transform_3(%arg0: i32) -> (i32, i32) {
    %c0_i32 = arith.constant 0 : i32
    %c0_i32_0 = arith.constant 0 : i32
    %c0_i32_1 = arith.constant 0 : i32
    return %c0_i32, %c0_i32_0 : i32, i32
  }
  func.func @transform_4(%arg0: i32) -> (i32, i32) {
    %c0_i32 = arith.constant 0 : i32
    %c0_i32_0 = arith.constant 0 : i32
    %c0_i32_1 = arith.constant 0 : i32
    return %c0_i32, %c0_i32_0 : i32, i32
  }
  func.func @transform_5(%arg0: i32) -> (i32, i32) {
    %c0_i32 = arith.constant 0 : i32
    %c0_i32_0 = arith.constant 0 : i32
    %c0_i32_1 = arith.constant 0 : i32
    return %c0_i32, %c0_i32_0 : i32, i32
  }
  func.func @transform_6(%arg0: i32) -> (i32, i32) {
    %c0_i32 = arith.constant 0 : i32
    %c0_i32_0 = arith.constant 0 : i32
    %c0_i32_1 = arith.constant 0 : i32
    return %c0_i32, %c0_i32_0 : i32, i32
  }
  func.func @transform_7(%arg0: i32) -> (i32, i32) {
    %c0_i32 = arith.constant 0 : i32
    %c0_i32_0 = arith.constant 0 : i32
    %c0_i32_1 = arith.constant 0 : i32
    return %c0_i32, %c0_i32_0 : i32, i32
  }
  func.func @transform_8(%arg0: i32) -> (i32, i32) {
    %c0_i32 = arith.constant 0 : i32
    %c0_i32_0 = arith.constant 0 : i32
    %c0_i32_1 = arith.constant 0 : i32
    return %c0_i32, %c0_i32_0 : i32, i32
  }
  func.func @transform_9(%arg0: i32) -> (i32, i32) {
    %c0_i32 = arith.constant 0 : i32
    %c0_i32_0 = arith.constant 0 : i32
    %c0_i32_1 = arith.constant 0 : i32
    return %c0_i32, %c0_i32_0 : i32, i32
  }
  func.func @transform_10(%arg0: i32) -> (i32, i32) {
    %c0_i32 = arith.constant 0 : i32
    %c0_i32_0 = arith.constant 0 : i32
    %c0_i32_1 = arith.constant 0 : i32
    return %c0_i32, %c0_i32_0 : i32, i32
  }
  func.func @transform_11(%arg0: i32) -> (i32, i32) {
    %c0_i32 = arith.constant 0 : i32
    %c0_i32_0 = arith.constant 0 : i32
    %c0_i32_1 = arith.constant 0 : i32
    return %c0_i32, %c0_i32_0 : i32, i32
  }
  func.func @transform_12(%arg0: i32) -> (i32, i32, i32) {
    %c0_i32 = arith.constant 0 : i32
    %c0_i32_0 = arith.constant 0 : i32
    %c0_i32_1 = arith.constant 0 : i32
    return %arg0, %c0_i32, %c0_i32_0 : i32, i32, i32
  }
}

module attributes {stable_mosaic.version = 11 : i64} {
  func.func @_head_kernel(%arg0: i32, %arg1: memref<2x512xf32, #tpu.memory_space<vmem>>, %arg2: memref<512x32xf32, #tpu.memory_space<vmem>>, %arg3: memref<1x32xf32, #tpu.memory_space<vmem>>, %arg4: memref<32x2xf32, #tpu.memory_space<vmem>>, %arg5: memref<1x2xf32, #tpu.memory_space<vmem>>, %arg6: memref<2x2xf32, #tpu.memory_space<vmem>>, %arg7: memref<2x32xf32, #tpu.memory_space<vmem>>) attributes {dimension_semantics = [#tpu.dimension_semantics<arbitrary>], iteration_bounds = array<i64: 2>, scalar_prefetch = 0 : i64, scratch_operands = 1 : i64, tpu.core_type = #tpu.core_type<tc>, window_params = [{transform_indices = @transform_0, window_bounds = array<i64: 2, 512>}, {transform_indices = @transform_1, window_bounds = array<i64: 512, 32>}, {pipeline_mode = #tpu.pipeline_mode<synchronous>, transform_indices = @transform_2, window_bounds = array<i64: 1, 32>}, {pipeline_mode = #tpu.pipeline_mode<synchronous>, transform_indices = @transform_3, window_bounds = array<i64: 32, 2>}, {pipeline_mode = #tpu.pipeline_mode<synchronous>, transform_indices = @transform_4, window_bounds = array<i64: 1, 2>}, {pipeline_mode = #tpu.pipeline_mode<synchronous>, transform_indices = @transform_5, window_bounds = array<i64: 2, 2>}]} {
    %c0_i32 = arith.constant 0 : i32
    %0 = arith.cmpi eq, %arg0, %c0_i32 : i32
    %1 = arith.extui %0 : i1 to i32
    %c0_i32_0 = arith.constant 0 : i32
    %2 = arith.cmpi ne, %1, %c0_i32_0 : i32
    scf.if %2 {
      %cst_9 = arith.constant 0.000000e+00 : f32
      %12 = vector.broadcast %cst_9 : f32 to vector<2x32xf32>
      %c0_10 = arith.constant 0 : index
      %c0_11 = arith.constant 0 : index
      %13 = vector.load %arg7[%c0_10, %c0_11] : memref<2x32xf32, #tpu.memory_space<vmem>>, vector<2x32xf32>
      tpu.vector_store %arg7[%c0_10, %c0_11], %12 {strides = array<i32>} : memref<2x32xf32, #tpu.memory_space<vmem>>, vector<2x32xf32>,
    } else {
    }
    %c0 = arith.constant 0 : index
    %c0_1 = arith.constant 0 : index
    %3 = vector.load %arg7[%c0, %c0_1] : memref<2x32xf32, #tpu.memory_space<vmem>>, vector<2x32xf32>
    %c0_2 = arith.constant 0 : index
    %c0_3 = arith.constant 0 : index
    %4 = vector.load %arg1[%c0_2, %c0_3] : memref<2x512xf32, #tpu.memory_space<vmem>>, vector<2x512xf32>
    %c0_4 = arith.constant 0 : index
    %c0_5 = arith.constant 0 : index
    %5 = vector.load %arg2[%c0_4, %c0_5] : memref<512x32xf32, #tpu.memory_space<vmem>>, vector<512x32xf32>
    %cst = arith.constant dense<0.000000e+00> : vector<2x32xf32>
    %6 = tpu.matmul %4, %5, %cst {dimension_numbers = #tpu.dot_dimension_numbers<[1], [0], [0], [1], [0, 0, 1, 1], [], []>} : vector<2x512xf32>, vector<512x32xf32>, vector<2x32xf32> -> vector<2x32xf32>
    %7 = arith.addf %3, %6 : vector<2x32xf32>
    %c0_6 = arith.constant 0 : index
    %c0_7 = arith.constant 0 : index
    %8 = vector.load %arg7[%c0_6, %c0_7] : memref<2x32xf32, #tpu.memory_space<vmem>>, vector<2x32xf32>
    tpu.vector_store %arg7[%c0_6, %c0_7], %7 {strides = array<i32>} : memref<2x32xf32, #tpu.memory_space<vmem>>, vector<2x32xf32>,
    %c1_i32 = arith.constant 1 : i32
    %9 = arith.cmpi eq, %arg0, %c1_i32 : i32
    %10 = arith.extui %9 : i1 to i32
    %c0_i32_8 = arith.constant 0 : i32
    %11 = arith.cmpi ne, %10, %c0_i32_8 : i32
    scf.if %11 {
      %c0_9 = arith.constant 0 : index
      %c0_10 = arith.constant 0 : index
      %12 = vector.load %arg7[%c0_9, %c0_10] : memref<2x32xf32, #tpu.memory_space<vmem>>, vector<2x32xf32>
      %c0_11 = arith.constant 0 : index
      %c0_12 = arith.constant 0 : index
      %13 = vector.load %arg3[%c0_11, %c0_12] : memref<1x32xf32, #tpu.memory_space<vmem>>, vector<1x32xf32>
      %14 = vector.broadcast %13 : vector<1x32xf32> to vector<2x32xf32>
      %15 = arith.addf %12, %14 : vector<2x32xf32>
      %c0_13 = arith.constant 0 : index
      %c0_14 = arith.constant 0 : index
      %16 = vector.load %arg4[%c0_13, %c0_14] : memref<32x2xf32, #tpu.memory_space<vmem>>, vector<32x2xf32>
      %cst_15 = arith.constant dense<0.000000e+00> : vector<2x2xf32>
      %17 = tpu.matmul %15, %16, %cst_15 {dimension_numbers = #tpu.dot_dimension_numbers<[1], [0], [0], [1], [0, 0, 1, 1], [], []>} : vector<2x32xf32>, vector<32x2xf32>, vector<2x2xf32> -> vector<2x2xf32>
      %c0_16 = arith.constant 0 : index
      %c0_17 = arith.constant 0 : index
      %18 = vector.load %arg5[%c0_16, %c0_17] : memref<1x2xf32, #tpu.memory_space<vmem>>, vector<1x2xf32>
      %19 = vector.broadcast %18 : vector<1x2xf32> to vector<2x2xf32>
      %20 = arith.addf %17, %19 : vector<2x2xf32>
      %c0_18 = arith.constant 0 : index
      %c0_19 = arith.constant 0 : index
      %21 = vector.load %arg6[%c0_18, %c0_19] : memref<2x2xf32, #tpu.memory_space<vmem>>, vector<2x2xf32>
      tpu.vector_store %arg6[%c0_18, %c0_19], %20 {strides = array<i32>} : memref<2x2xf32, #tpu.memory_space<vmem>>, vector<2x2xf32>,
    } else {
    }
    return
  }
  func.func @transform_0(%arg0: i32) -> (i32, i32) {
    %c0_i32 = arith.constant 0 : i32
    %c0_i32_0 = arith.constant 0 : i32
    return %c0_i32, %arg0 : i32, i32
  }
  func.func @transform_1(%arg0: i32) -> (i32, i32) {
    %c0_i32 = arith.constant 0 : i32
    %c0_i32_0 = arith.constant 0 : i32
    return %arg0, %c0_i32 : i32, i32
  }
  func.func @transform_2(%arg0: i32) -> (i32, i32) {
    %c0_i32 = arith.constant 0 : i32
    %c0_i32_0 = arith.constant 0 : i32
    %c0_i32_1 = arith.constant 0 : i32
    return %c0_i32, %c0_i32_0 : i32, i32
  }
  func.func @transform_3(%arg0: i32) -> (i32, i32) {
    %c0_i32 = arith.constant 0 : i32
    %c0_i32_0 = arith.constant 0 : i32
    %c0_i32_1 = arith.constant 0 : i32
    return %c0_i32, %c0_i32_0 : i32, i32
  }
  func.func @transform_4(%arg0: i32) -> (i32, i32) {
    %c0_i32 = arith.constant 0 : i32
    %c0_i32_0 = arith.constant 0 : i32
    %c0_i32_1 = arith.constant 0 : i32
    return %c0_i32, %c0_i32_0 : i32, i32
  }
  func.func @transform_5(%arg0: i32) -> (i32, i32) {
    %c0_i32 = arith.constant 0 : i32
    %c0_i32_0 = arith.constant 0 : i32
    %c0_i32_1 = arith.constant 0 : i32
    return %c0_i32, %c0_i32_0 : i32, i32
  }
}

module attributes {stable_mosaic.version = 11 : i64} {
  func.func @_encoder_layer_kernel(%arg0: i32, %arg1: memref<1x8x128xf32, #tpu.memory_space<vmem>>, %arg2: memref<1x1x8xf32, #tpu.memory_space<vmem>>, %arg3: memref<128x384xf32, #tpu.memory_space<vmem>>, %arg4: memref<1x384xf32, #tpu.memory_space<vmem>>, %arg5: memref<128x128xf32, #tpu.memory_space<vmem>>, %arg6: memref<1x128xf32, #tpu.memory_space<vmem>>, %arg7: memref<1x128xf32, #tpu.memory_space<vmem>>, %arg8: memref<1x128xf32, #tpu.memory_space<vmem>>, %arg9: memref<128x512xf32, #tpu.memory_space<vmem>>, %arg10: memref<1x512xf32, #tpu.memory_space<vmem>>, %arg11: memref<512x128xf32, #tpu.memory_space<vmem>>, %arg12: memref<1x128xf32, #tpu.memory_space<vmem>>, %arg13: memref<1x8x128xf32, #tpu.memory_space<vmem>>) attributes {dimension_semantics = [#tpu.dimension_semantics<parallel>], iteration_bounds = array<i64: 2>, scalar_prefetch = 0 : i64, scratch_operands = 0 : i64, tpu.core_type = #tpu.core_type<tc>, window_params = [{transform_indices = @transform_0, window_bounds = array<i64: 1, 8, 128>}, {transform_indices = @transform_1, window_bounds = array<i64: 1, 1, 8>}, {pipeline_mode = #tpu.pipeline_mode<synchronous>, transform_indices = @transform_2, window_bounds = array<i64: 128, 384>}, {pipeline_mode = #tpu.pipeline_mode<synchronous>, transform_indices = @transform_3, window_bounds = array<i64: 1, 384>}, {pipeline_mode = #tpu.pipeline_mode<synchronous>, transform_indices = @transform_4, window_bounds = array<i64: 128, 128>}, {pipeline_mode = #tpu.pipeline_mode<synchronous>, transform_indices = @transform_5, window_bounds = array<i64: 1, 128>}, {pipeline_mode = #tpu.pipeline_mode<synchronous>, transform_indices = @transform_6, window_bounds = array<i64: 1, 128>}, {pipeline_mode = #tpu.pipeline_mode<synchronous>, transform_indices = @transform_7, window_bounds = array<i64: 1, 128>}, {pipeline_mode = #tpu.pipeline_mode<synchronous>, transform_indices = @transform_8, window_bounds = array<i64: 128, 512>}, {pipeline_mode = #tpu.pipeline_mode<synchronous>, transform_indices = @transform_9, window_bounds = array<i64: 1, 512>}, {pipeline_mode = #tpu.pipeline_mode<synchronous>, transform_indices = @transform_10, window_bounds = array<i64: 512, 128>}, {pipeline_mode = #tpu.pipeline_mode<synchronous>, transform_indices = @transform_11, window_bounds = array<i64: 1, 128>}, {transform_indices = @transform_12, window_bounds = array<i64: 1, 8, 128>}]} {
    %c0 = arith.constant 0 : index
    %c0_0 = arith.constant 0 : index
    %c0_1 = arith.constant 0 : index
    %0 = vector.load %arg1[%c0, %c0_0, %c0_1] : memref<1x8x128xf32, #tpu.memory_space<vmem>>, vector<1x8x128xf32>
    %1 = vector.shape_cast %0 : vector<1x8x128xf32> to vector<8x128xf32>
    %c0_2 = arith.constant 0 : index
    %c0_3 = arith.constant 0 : index
    %c0_4 = arith.constant 0 : index
    %2 = vector.load %arg2[%c0_2, %c0_3, %c0_4] : memref<1x1x8xf32, #tpu.memory_space<vmem>>, vector<1x1x8xf32>
    %3 = vector.shape_cast %2 : vector<1x1x8xf32> to vector<1x8xf32>
    %c0_5 = arith.constant 0 : index
    %c0_6 = arith.constant 0 : index
    %4 = vector.load %arg3[%c0_5, %c0_6] : memref<128x384xf32, #tpu.memory_space<vmem>>, vector<128x384xf32>
    %cst = arith.constant dense<0.000000e+00> : vector<8x384xf32>
    %5 = tpu.matmul %1, %4, %cst {dimension_numbers = #tpu.dot_dimension_numbers<[1], [0], [0], [1], [0, 0, 1, 1], [], []>} : vector<8x128xf32>, vector<128x384xf32>, vector<8x384xf32> -> vector<8x384xf32>
    %c0_7 = arith.constant 0 : index
    %c0_8 = arith.constant 0 : index
    %6 = vector.load %arg4[%c0_7, %c0_8] : memref<1x384xf32, #tpu.memory_space<vmem>>, vector<1x384xf32>
    %7 = vector.broadcast %6 : vector<1x384xf32> to vector<8x384xf32>
    %8 = arith.addf %5, %7 : vector<8x384xf32>
    %9 = vector.extract_strided_slice %8 {offsets = [0, 0], sizes = [8, 32], strides = [1, 1]} : vector<8x384xf32> to vector<8x32xf32>
    %10 = vector.extract_strided_slice %8 {offsets = [0, 128], sizes = [8, 32], strides = [1, 1]} : vector<8x384xf32> to vector<8x32xf32>
    %11 = vector.extract_strided_slice %8 {offsets = [0, 256], sizes = [8, 32], strides = [1, 1]} : vector<8x384xf32> to vector<8x32xf32>
    %cst_9 = arith.constant dense<0.000000e+00> : vector<8x8xf32>
    %12 = tpu.matmul %9, %10, %cst_9 {dimension_numbers = #tpu.dot_dimension_numbers<[1], [1], [0], [0], [0, 0, 1, 0], [], []>} : vector<8x32xf32>, vector<8x32xf32>, vector<8x8xf32> -> vector<8x8xf32>
    %cst_10 = arith.constant 0.176776692 : f32
    %13 = vector.broadcast %cst_10 : f32 to vector<8x8xf32>
    %14 = arith.mulf %12, %13 : vector<8x8xf32>
    %cst_11 = arith.constant 0.000000e+00 : f32
    %15 = vector.broadcast %cst_11 : f32 to vector<1x8xf32>
    %16 = arith.cmpf oeq, %3, %15 : vector<1x8xf32>
    %cst_12 = arith.constant -1.000000e+04 : f32
    %17 = vector.shape_cast %16 : vector<1x8xi1> to vector<1x8xi1>
    %18 = vector.broadcast %17 : vector<1x8xi1> to vector<8x8xi1>
    %19 = vector.broadcast %cst_12 : f32 to vector<8x8xf32>
    %20 = arith.select %18, %19, %14 : vector<8x8xi1>, vector<8x8xf32>
    %cst_13 = arith.constant dense<0xFF800000> : vector<8xf32>
    %21 = vector.multi_reduction <maximumf>, %20, %cst_13 [1] : vector<8x8xf32> to vector<8xf32>
    %22 = vector.shape_cast %21 : vector<8xf32> to vector<8x1xf32>
    %23 = vector.broadcast %22 : vector<8x1xf32> to vector<8x8xf32>
    %24 = arith.subf %20, %23 : vector<8x8xf32>
    %25 = math.exp %24 : vector<8x8xf32>
    %cst_14 = arith.constant dense<0.000000e+00> : vector<8xf32>
    %26 = vector.multi_reduction <add>, %25, %cst_14 [1] : vector<8x8xf32> to vector<8xf32>
    %27 = vector.shape_cast %26 : vector<8xf32> to vector<8x1xf32>
    %28 = vector.broadcast %27 : vector<8x1xf32> to vector<8x8xf32>
    %29 = arith.divf %25, %28 : vector<8x8xf32>
    %cst_15 = arith.constant dense<0.000000e+00> : vector<8x32xf32>
    %30 = tpu.matmul %29, %11, %cst_15 {dimension_numbers = #tpu.dot_dimension_numbers<[1], [0], [0], [1], [0, 0, 1, 1], [], []>} : vector<8x8xf32>, vector<8x32xf32>, vector<8x32xf32> -> vector<8x32xf32>
    %31 = vector.extract_strided_slice %8 {offsets = [0, 32], sizes = [8, 32], strides = [1, 1]} : vector<8x384xf32> to vector<8x32xf32>
    %32 = vector.extract_strided_slice %8 {offsets = [0, 160], sizes = [8, 32], strides = [1, 1]} : vector<8x384xf32> to vector<8x32xf32>
    %33 = vector.extract_strided_slice %8 {offsets = [0, 288], sizes = [8, 32], strides = [1, 1]} : vector<8x384xf32> to vector<8x32xf32>
    %cst_16 = arith.constant dense<0.000000e+00> : vector<8x8xf32>
    %34 = tpu.matmul %31, %32, %cst_16 {dimension_numbers = #tpu.dot_dimension_numbers<[1], [1], [0], [0], [0, 0, 1, 0], [], []>} : vector<8x32xf32>, vector<8x32xf32>, vector<8x8xf32> -> vector<8x8xf32>
    %cst_17 = arith.constant 0.176776692 : f32
    %35 = vector.broadcast %cst_17 : f32 to vector<8x8xf32>
    %36 = arith.mulf %34, %35 : vector<8x8xf32>
    %cst_18 = arith.constant 0.000000e+00 : f32
    %37 = vector.broadcast %cst_18 : f32 to vector<1x8xf32>
    %38 = arith.cmpf oeq, %3, %37 : vector<1x8xf32>
    %cst_19 = arith.constant -1.000000e+04 : f32
    %39 = vector.shape_cast %38 : vector<1x8xi1> to vector<1x8xi1>
    %40 = vector.broadcast %39 : vector<1x8xi1> to vector<8x8xi1>
    %41 = vector.broadcast %cst_19 : f32 to vector<8x8xf32>
    %42 = arith.select %40, %41, %36 : vector<8x8xi1>, vector<8x8xf32>
    %cst_20 = arith.constant dense<0xFF800000> : vector<8xf32>
    %43 = vector.multi_reduction <maximumf>, %42, %cst_20 [1] : vector<8x8xf32> to vector<8xf32>
    %44 = vector.shape_cast %43 : vector<8xf32> to vector<8x1xf32>
    %45 = vector.broadcast %44 : vector<8x1xf32> to vector<8x8xf32>
    %46 = arith.subf %42, %45 : vector<8x8xf32>
    %47 = math.exp %46 : vector<8x8xf32>
    %cst_21 = arith.constant dense<0.000000e+00> : vector<8xf32>
    %48 = vector.multi_reduction <add>, %47, %cst_21 [1] : vector<8x8xf32> to vector<8xf32>
    %49 = vector.shape_cast %48 : vector<8xf32> to vector<8x1xf32>
    %50 = vector.broadcast %49 : vector<8x1xf32> to vector<8x8xf32>
    %51 = arith.divf %47, %50 : vector<8x8xf32>
    %cst_22 = arith.constant dense<0.000000e+00> : vector<8x32xf32>
    %52 = tpu.matmul %51, %33, %cst_22 {dimension_numbers = #tpu.dot_dimension_numbers<[1], [0], [0], [1], [0, 0, 1, 1], [], []>} : vector<8x8xf32>, vector<8x32xf32>, vector<8x32xf32> -> vector<8x32xf32>
    %53 = vector.extract_strided_slice %8 {offsets = [0, 64], sizes = [8, 32], strides = [1, 1]} : vector<8x384xf32> to vector<8x32xf32>
    %54 = vector.extract_strided_slice %8 {offsets = [0, 192], sizes = [8, 32], strides = [1, 1]} : vector<8x384xf32> to vector<8x32xf32>
    %55 = vector.extract_strided_slice %8 {offsets = [0, 320], sizes = [8, 32], strides = [1, 1]} : vector<8x384xf32> to vector<8x32xf32>
    %cst_23 = arith.constant dense<0.000000e+00> : vector<8x8xf32>
    %56 = tpu.matmul %53, %54, %cst_23 {dimension_numbers = #tpu.dot_dimension_numbers<[1], [1], [0], [0], [0, 0, 1, 0], [], []>} : vector<8x32xf32>, vector<8x32xf32>, vector<8x8xf32> -> vector<8x8xf32>
    %cst_24 = arith.constant 0.176776692 : f32
    %57 = vector.broadcast %cst_24 : f32 to vector<8x8xf32>
    %58 = arith.mulf %56, %57 : vector<8x8xf32>
    %cst_25 = arith.constant 0.000000e+00 : f32
    %59 = vector.broadcast %cst_25 : f32 to vector<1x8xf32>
    %60 = arith.cmpf oeq, %3, %59 : vector<1x8xf32>
    %cst_26 = arith.constant -1.000000e+04 : f32
    %61 = vector.shape_cast %60 : vector<1x8xi1> to vector<1x8xi1>
    %62 = vector.broadcast %61 : vector<1x8xi1> to vector<8x8xi1>
    %63 = vector.broadcast %cst_26 : f32 to vector<8x8xf32>
    %64 = arith.select %62, %63, %58 : vector<8x8xi1>, vector<8x8xf32>
    %cst_27 = arith.constant dense<0xFF800000> : vector<8xf32>
    %65 = vector.multi_reduction <maximumf>, %64, %cst_27 [1] : vector<8x8xf32> to vector<8xf32>
    %66 = vector.shape_cast %65 : vector<8xf32> to vector<8x1xf32>
    %67 = vector.broadcast %66 : vector<8x1xf32> to vector<8x8xf32>
    %68 = arith.subf %64, %67 : vector<8x8xf32>
    %69 = math.exp %68 : vector<8x8xf32>
    %cst_28 = arith.constant dense<0.000000e+00> : vector<8xf32>
    %70 = vector.multi_reduction <add>, %69, %cst_28 [1] : vector<8x8xf32> to vector<8xf32>
    %71 = vector.shape_cast %70 : vector<8xf32> to vector<8x1xf32>
    %72 = vector.broadcast %71 : vector<8x1xf32> to vector<8x8xf32>
    %73 = arith.divf %69, %72 : vector<8x8xf32>
    %cst_29 = arith.constant dense<0.000000e+00> : vector<8x32xf32>
    %74 = tpu.matmul %73, %55, %cst_29 {dimension_numbers = #tpu.dot_dimension_numbers<[1], [0], [0], [1], [0, 0, 1, 1], [], []>} : vector<8x8xf32>, vector<8x32xf32>, vector<8x32xf32> -> vector<8x32xf32>
    %75 = vector.extract_strided_slice %8 {offsets = [0, 96], sizes = [8, 32], strides = [1, 1]} : vector<8x384xf32> to vector<8x32xf32>
    %76 = vector.extract_strided_slice %8 {offsets = [0, 224], sizes = [8, 32], strides = [1, 1]} : vector<8x384xf32> to vector<8x32xf32>
    %77 = vector.extract_strided_slice %8 {offsets = [0, 352], sizes = [8, 32], strides = [1, 1]} : vector<8x384xf32> to vector<8x32xf32>
    %cst_30 = arith.constant dense<0.000000e+00> : vector<8x8xf32>
    %78 = tpu.matmul %75, %76, %cst_30 {dimension_numbers = #tpu.dot_dimension_numbers<[1], [1], [0], [0], [0, 0, 1, 0], [], []>} : vector<8x32xf32>, vector<8x32xf32>, vector<8x8xf32> -> vector<8x8xf32>
    %cst_31 = arith.constant 0.176776692 : f32
    %79 = vector.broadcast %cst_31 : f32 to vector<8x8xf32>
    %80 = arith.mulf %78, %79 : vector<8x8xf32>
    %cst_32 = arith.constant 0.000000e+00 : f32
    %81 = vector.broadcast %cst_32 : f32 to vector<1x8xf32>
    %82 = arith.cmpf oeq, %3, %81 : vector<1x8xf32>
    %cst_33 = arith.constant -1.000000e+04 : f32
    %83 = vector.shape_cast %82 : vector<1x8xi1> to vector<1x8xi1>
    %84 = vector.broadcast %83 : vector<1x8xi1> to vector<8x8xi1>
    %85 = vector.broadcast %cst_33 : f32 to vector<8x8xf32>
    %86 = arith.select %84, %85, %80 : vector<8x8xi1>, vector<8x8xf32>
    %cst_34 = arith.constant dense<0xFF800000> : vector<8xf32>
    %87 = vector.multi_reduction <maximumf>, %86, %cst_34 [1] : vector<8x8xf32> to vector<8xf32>
    %88 = vector.shape_cast %87 : vector<8xf32> to vector<8x1xf32>
    %89 = vector.broadcast %88 : vector<8x1xf32> to vector<8x8xf32>
    %90 = arith.subf %86, %89 : vector<8x8xf32>
    %91 = math.exp %90 : vector<8x8xf32>
    %cst_35 = arith.constant dense<0.000000e+00> : vector<8xf32>
    %92 = vector.multi_reduction <add>, %91, %cst_35 [1] : vector<8x8xf32> to vector<8xf32>
    %93 = vector.shape_cast %92 : vector<8xf32> to vector<8x1xf32>
    %94 = vector.broadcast %93 : vector<8x1xf32> to vector<8x8xf32>
    %95 = arith.divf %91, %94 : vector<8x8xf32>
    %cst_36 = arith.constant dense<0.000000e+00> : vector<8x32xf32>
    %96 = tpu.matmul %95, %77, %cst_36 {dimension_numbers = #tpu.dot_dimension_numbers<[1], [0], [0], [1], [0, 0, 1, 1], [], []>} : vector<8x8xf32>, vector<8x32xf32>, vector<8x32xf32> -> vector<8x32xf32>
    %97 = tpu.concatenate %30, %52, %74, %96 in 1 : vector<8x32xf32>, vector<8x32xf32>, vector<8x32xf32>, vector<8x32xf32> -> vector<8x128xf32>
    %c0_37 = arith.constant 0 : index
    %c0_38 = arith.constant 0 : index
    %98 = vector.load %arg5[%c0_37, %c0_38] : memref<128x128xf32, #tpu.memory_space<vmem>>, vector<128x128xf32>
    %cst_39 = arith.constant dense<0.000000e+00> : vector<8x128xf32>
    %99 = tpu.matmul %97, %98, %cst_39 {dimension_numbers = #tpu.dot_dimension_numbers<[1], [0], [0], [1], [0, 0, 1, 1], [], []>} : vector<8x128xf32>, vector<128x128xf32>, vector<8x128xf32> -> vector<8x128xf32>
    %c0_40 = arith.constant 0 : index
    %c0_41 = arith.constant 0 : index
    %100 = vector.load %arg6[%c0_40, %c0_41] : memref<1x128xf32, #tpu.memory_space<vmem>>, vector<1x128xf32>
    %101 = vector.broadcast %100 : vector<1x128xf32> to vector<8x128xf32>
    %102 = arith.addf %99, %101 : vector<8x128xf32>
    %103 = arith.addf %1, %102 : vector<8x128xf32>
    %c0_42 = arith.constant 0 : index
    %c0_43 = arith.constant 0 : index
    %104 = vector.load %arg7[%c0_42, %c0_43] : memref<1x128xf32, #tpu.memory_space<vmem>>, vector<1x128xf32>
    %c0_44 = arith.constant 0 : index
    %c0_45 = arith.constant 0 : index
    %105 = vector.load %arg8[%c0_44, %c0_45] : memref<1x128xf32, #tpu.memory_space<vmem>>, vector<1x128xf32>
    %cst_46 = arith.constant dense<0.000000e+00> : vector<8xf32>
    %106 = vector.multi_reduction <add>, %103, %cst_46 [1] : vector<8x128xf32> to vector<8xf32>
    %107 = vector.shape_cast %106 : vector<8xf32> to vector<8x1xf32>
    %cst_47 = arith.constant 1.280000e+02 : f32
    %108 = vector.broadcast %cst_47 : f32 to vector<8x1xf32>
    %109 = arith.divf %107, %108 : vector<8x1xf32>
    %110 = vector.broadcast %109 : vector<8x1xf32> to vector<8x128xf32>
    %111 = arith.subf %103, %110 : vector<8x128xf32>
    %112 = arith.mulf %111, %111 : vector<8x128xf32>
    %cst_48 = arith.constant dense<0.000000e+00> : vector<8xf32>
    %113 = vector.multi_reduction <add>, %112, %cst_48 [1] : vector<8x128xf32> to vector<8xf32>
    %114 = vector.shape_cast %113 : vector<8xf32> to vector<8x1xf32>
    %cst_49 = arith.constant 1.270000e+02 : f32
    %115 = vector.broadcast %cst_49 : f32 to vector<8x1xf32>
    %116 = arith.divf %114, %115 : vector<8x1xf32>
    %117 = vector.broadcast %104 : vector<1x128xf32> to vector<8x128xf32>
    %118 = arith.mulf %117, %111 : vector<8x128xf32>
    %119 = math.sqrt %116 : vector<8x1xf32>
    %cst_50 = arith.constant 9.99999997E-7 : f32
    %120 = vector.broadcast %cst_50 : f32 to vector<8x1xf32>
    %121 = arith.addf %119, %120 : vector<8x1xf32>
    %122 = vector.broadcast %121 : vector<8x1xf32> to vector<8x128xf32>
    %123 = arith.divf %118, %122 : vector<8x128xf32>
    %124 = vector.broadcast %105 : vector<1x128xf32> to vector<8x128xf32>
    %125 = arith.addf %123, %124 : vector<8x128xf32>
    %c0_51 = arith.constant 0 : index
    %c0_52 = arith.constant 0 : index
    %126 = vector.load %arg9[%c0_51, %c0_52] : memref<128x512xf32, #tpu.memory_space<vmem>>, vector<128x512xf32>
    %cst_53 = arith.constant dense<0.000000e+00> : vector<8x512xf32>
    %127 = tpu.matmul %125, %126, %cst_53 {dimension_numbers = #tpu.dot_dimension_numbers<[1], [0], [0], [1], [0, 0, 1, 1], [], []>} : vector<8x128xf32>, vector<128x512xf32>, vector<8x512xf32> -> vector<8x512xf32>
    %c0_54 = arith.constant 0 : index
    %c0_55 = arith.constant 0 : index
    %128 = vector.load %arg10[%c0_54, %c0_55] : memref<1x512xf32, #tpu.memory_space<vmem>>, vector<1x512xf32>
    %129 = vector.broadcast %128 : vector<1x512xf32> to vector<8x512xf32>
    %130 = arith.addf %127, %129 : vector<8x512xf32>
    %cst_56 = arith.constant 5.000000e-01 : f32
    %131 = vector.broadcast %cst_56 : f32 to vector<8x512xf32>
    %132 = arith.mulf %131, %130 : vector<8x512xf32>
    %cst_57 = arith.constant 0.707106769 : f32
    %133 = vector.broadcast %cst_57 : f32 to vector<8x512xf32>
    %134 = arith.mulf %130, %133 : vector<8x512xf32>
    %135 = math.absf %134 : vector<8x512xf32>
    %cst_58 = arith.constant 0.327591091 : f32
    %136 = vector.broadcast %cst_58 : f32 to vector<8x512xf32>
    %137 = arith.mulf %136, %135 : vector<8x512xf32>
    %cst_59 = arith.constant 1.000000e+00 : f32
    %138 = vector.broadcast %cst_59 : f32 to vector<8x512xf32>
    %139 = arith.addf %138, %137 : vector<8x512xf32>
    %cst_60 = arith.constant 1.000000e+00 : f32
    %140 = vector.broadcast %cst_60 : f32 to vector<8x512xf32>
    %141 = arith.divf %140, %139 : vector<8x512xf32>
    %cst_61 = arith.constant 1.06140542 : f32
    %142 = vector.broadcast %cst_61 : f32 to vector<8x512xf32>
    %143 = arith.mulf %142, %141 : vector<8x512xf32>
    %cst_62 = arith.constant -1.45315206 : f32
    %144 = vector.broadcast %cst_62 : f32 to vector<8x512xf32>
    %145 = arith.addf %143, %144 : vector<8x512xf32>
    %146 = arith.mulf %145, %141 : vector<8x512xf32>
    %cst_63 = arith.constant 1.42141378 : f32
    %147 = vector.broadcast %cst_63 : f32 to vector<8x512xf32>
    %148 = arith.addf %146, %147 : vector<8x512xf32>
    %149 = arith.mulf %148, %141 : vector<8x512xf32>
    %cst_64 = arith.constant -0.284496725 : f32
    %150 = vector.broadcast %cst_64 : f32 to vector<8x512xf32>
    %151 = arith.addf %149, %150 : vector<8x512xf32>
    %152 = arith.mulf %151, %141 : vector<8x512xf32>
    %cst_65 = arith.constant 0.254829586 : f32
    %153 = vector.broadcast %cst_65 : f32 to vector<8x512xf32>
    %154 = arith.addf %152, %153 : vector<8x512xf32>
    %155 = arith.mulf %154, %141 : vector<8x512xf32>
    %156 = arith.mulf %135, %135 : vector<8x512xf32>
    %cst_66 = arith.constant 0.000000e+00 : f32
    %157 = vector.broadcast %cst_66 : f32 to vector<8x512xf32>
    %158 = arith.subf %157, %156 : vector<8x512xf32>
    %159 = math.exp %158 : vector<8x512xf32>
    %160 = arith.mulf %155, %159 : vector<8x512xf32>
    %cst_67 = arith.constant 1.000000e+00 : f32
    %161 = vector.broadcast %cst_67 : f32 to vector<8x512xf32>
    %162 = arith.subf %161, %160 : vector<8x512xf32>
    %cst_68 = arith.constant 0.000000e+00 : f32
    %163 = vector.broadcast %cst_68 : f32 to vector<8x512xf32>
    %164 = arith.cmpf olt, %134, %163 : vector<8x512xf32>
    %cst_69 = arith.constant 0.000000e+00 : f32
    %165 = vector.broadcast %cst_69 : f32 to vector<8x512xf32>
    %166 = arith.subf %165, %162 : vector<8x512xf32>
    %167 = arith.select %164, %166, %162 : vector<8x512xi1>, vector<8x512xf32>
    %cst_70 = arith.constant 1.000000e+00 : f32
    %168 = vector.broadcast %cst_70 : f32 to vector<8x512xf32>
    %169 = arith.addf %168, %167 : vector<8x512xf32>
    %170 = arith.mulf %132, %169 : vector<8x512xf32>
    %c0_71 = arith.constant 0 : index
    %c0_72 = arith.constant 0 : index
    %171 = vector.load %arg11[%c0_71, %c0_72] : memref<512x128xf32, #tpu.memory_space<vmem>>, vector<512x128xf32>
    %cst_73 = arith.constant dense<0.000000e+00> : vector<8x128xf32>
    %172 = tpu.matmul %170, %171, %cst_73 {dimension_numbers = #tpu.dot_dimension_numbers<[1], [0], [0], [1], [0, 0, 1, 1], [], []>} : vector<8x512xf32>, vector<512x128xf32>, vector<8x128xf32> -> vector<8x128xf32>
    %c0_74 = arith.constant 0 : index
    %c0_75 = arith.constant 0 : index
    %173 = vector.load %arg12[%c0_74, %c0_75] : memref<1x128xf32, #tpu.memory_space<vmem>>, vector<1x128xf32>
    %174 = vector.broadcast %173 : vector<1x128xf32> to vector<8x128xf32>
    %175 = arith.addf %172, %174 : vector<8x128xf32>
    %176 = arith.addf %125, %175 : vector<8x128xf32>
    %c0_76 = arith.constant 0 : index
    %c0_77 = arith.constant 0 : index
    %177 = vector.load %arg7[%c0_76, %c0_77] : memref<1x128xf32, #tpu.memory_space<vmem>>, vector<1x128xf32>
    %c0_78 = arith.constant 0 : index
    %c0_79 = arith.constant 0 : index
    %178 = vector.load %arg8[%c0_78, %c0_79] : memref<1x128xf32, #tpu.memory_space<vmem>>, vector<1x128xf32>
    %cst_80 = arith.constant dense<0.000000e+00> : vector<8xf32>
    %179 = vector.multi_reduction <add>, %176, %cst_80 [1] : vector<8x128xf32> to vector<8xf32>
    %180 = vector.shape_cast %179 : vector<8xf32> to vector<8x1xf32>
    %cst_81 = arith.constant 1.280000e+02 : f32
    %181 = vector.broadcast %cst_81 : f32 to vector<8x1xf32>
    %182 = arith.divf %180, %181 : vector<8x1xf32>
    %183 = vector.broadcast %182 : vector<8x1xf32> to vector<8x128xf32>
    %184 = arith.subf %176, %183 : vector<8x128xf32>
    %185 = arith.mulf %184, %184 : vector<8x128xf32>
    %cst_82 = arith.constant dense<0.000000e+00> : vector<8xf32>
    %186 = vector.multi_reduction <add>, %185, %cst_82 [1] : vector<8x128xf32> to vector<8xf32>
    %187 = vector.shape_cast %186 : vector<8xf32> to vector<8x1xf32>
    %cst_83 = arith.constant 1.270000e+02 : f32
    %188 = vector.broadcast %cst_83 : f32 to vector<8x1xf32>
    %189 = arith.divf %187, %188 : vector<8x1xf32>
    %190 = vector.broadcast %177 : vector<1x128xf32> to vector<8x128xf32>
    %191 = arith.mulf %190, %184 : vector<8x128xf32>
    %192 = math.sqrt %189 : vector<8x1xf32>
    %cst_84 = arith.constant 9.99999997E-7 : f32
    %193 = vector.broadcast %cst_84 : f32 to vector<8x1xf32>
    %194 = arith.addf %192, %193 : vector<8x1xf32>
    %195 = vector.broadcast %194 : vector<8x1xf32> to vector<8x128xf32>
    %196 = arith.divf %191, %195 : vector<8x128xf32>
    %197 = vector.broadcast %178 : vector<1x128xf32> to vector<8x128xf32>
    %198 = arith.addf %196, %197 : vector<8x128xf32>
    %c0_85 = arith.constant 0 : index
    %c0_86 = arith.constant 0 : index
    %c0_87 = arith.constant 0 : index
    %199 = vector.load %arg13[%c0_85, %c0_86, %c0_87] : memref<1x8x128xf32, #tpu.memory_space<vmem>>, vector<1x8x128xf32>
    %200 = vector.shape_cast %199 : vector<1x8x128xf32> to vector<8x128xf32>
    %201 = vector.shape_cast %198 : vector<8x128xf32> to vector<1x8x128xf32>
    tpu.vector_store %arg13[%c0_85, %c0_86, %c0_87], %201 {strides = array<i32>} : memref<1x8x128xf32, #tpu.memory_space<vmem>>, vector<1x8x128xf32>,
    return
  }
  func.func @transform_0(%arg0: i32) -> (i32, i32, i32) {
    %c0_i32 = arith.constant 0 : i32
    %c0_i32_0 = arith.constant 0 : i32
    %c0_i32_1 = arith.constant 0 : i32
    return %arg0, %c0_i32, %c0_i32_0 : i32, i32, i32
  }
  func.func @transform_1(%arg0: i32) -> (i32, i32, i32) {
    %c0_i32 = arith.constant 0 : i32
    %c0_i32_0 = arith.constant 0 : i32
    %c0_i32_1 = arith.constant 0 : i32
    return %arg0, %c0_i32, %c0_i32_0 : i32, i32, i32
  }
  func.func @transform_2(%arg0: i32) -> (i32, i32) {
    %c0_i32 = arith.constant 0 : i32
    %c0_i32_0 = arith.constant 0 : i32
    %c0_i32_1 = arith.constant 0 : i32
    return %c0_i32, %c0_i32_0 : i32, i32
  }
  func.func @transform_3(%arg0: i32) -> (i32, i32) {
    %c0_i32 = arith.constant 0 : i32
    %c0_i32_0 = arith.constant 0 : i32
    %c0_i32_1 = arith.constant 0 : i32
    return %c0_i32, %c0_i32_0 : i32, i32
  }
  func.func @transform_4(%arg0: i32) -> (i32, i32) {
    %c0_i32 = arith.constant 0 : i32
    %c0_i32_0 = arith.constant 0 : i32
    %c0_i32_1 = arith.constant 0 : i32
    return %c0_i32, %c0_i32_0 : i32, i32
  }
  func.func @transform_5(%arg0: i32) -> (i32, i32) {
    %c0_i32 = arith.constant 0 : i32
    %c0_i32_0 = arith.constant 0 : i32
    %c0_i32_1 = arith.constant 0 : i32
    return %c0_i32, %c0_i32_0 : i32, i32
  }
  func.func @transform_6(%arg0: i32) -> (i32, i32) {
    %c0_i32 = arith.constant 0 : i32
    %c0_i32_0 = arith.constant 0 : i32
    %c0_i32_1 = arith.constant 0 : i32
    return %c0_i32, %c0_i32_0 : i32, i32
  }
  func.func @transform_7(%arg0: i32) -> (i32, i32) {
    %c0_i32 = arith.constant 0 : i32
    %c0_i32_0 = arith.constant 0 : i32
    %c0_i32_1 = arith.constant 0 : i32
    return %c0_i32, %c0_i32_0 : i32, i32
  }
  func.func @transform_8(%arg0: i32) -> (i32, i32) {
    %c0_i32 = arith.constant 0 : i32
    %c0_i32_0 = arith.constant 0 : i32
    %c0_i32_1 = arith.constant 0 : i32
    return %c0_i32, %c0_i32_0 : i32, i32
  }
  func.func @transform_9(%arg0: i32) -> (i32, i32) {
    %c0_i32 = arith.constant 0 : i32
    %c0_i32_0 = arith.constant 0 : i32
    %c0_i32_1 = arith.constant 0 : i32
    return %c0_i32, %c0_i32_0 : i32, i32
  }
  func.func @transform_10(%arg0: i32) -> (i32, i32) {
    %c0_i32 = arith.constant 0 : i32
    %c0_i32_0 = arith.constant 0 : i32
    %c0_i32_1 = arith.constant 0 : i32
    return %c0_i32, %c0_i32_0 : i32, i32
  }
  func.func @transform_11(%arg0: i32) -> (i32, i32) {
    %c0_i32 = arith.constant 0 : i32
    %c0_i32_0 = arith.constant 0 : i32
    %c0_i32_1 = arith.constant 0 : i32
    return %c0_i32, %c0_i32_0 : i32, i32
  }
  func.func @transform_12(%arg0: i32) -> (i32, i32, i32) {
    %c0_i32 = arith.constant 0 : i32
    %c0_i32_0 = arith.constant 0 : i32
    %c0_i32_1 = arith.constant 0 : i32
    return %arg0, %c0_i32, %c0_i32_0 : i32, i32, i32
  }
}

</mosaic_0001>

<bundles_post_ra>
// kernel: transformer_enc.12
= control target key start
LH: loop header
LB: loop body
LE: loop exit
PB: predicated region body
PF: predicated region fallthrough
CT: control target
= control target key end

     0   :  { %s1272_s0 = inlined_call_operand.vmem [shape: f32[2,8,32], index: 0, kind: input, shape index: {}]   ;;  %s1273_s1 = inlined_call_operand.vmem [shape: f32[2,8,32], index: 1, kind: input, shape index: {}]   ;;  %s1274_s2 = inlined_call_operand.vmem [shape: f32[1,32], index: 2, kind: input, shape index: {}]   ;;  %s1275_s3 = inlined_call_operand.hbm [shape: f32[1,32], index: 3, kind: input, shape index: {}]   ;;  %s1276_s4 = inlined_call_operand.hbm [shape: f32[1,32], index: 4, kind: input, shape index: {}]   ;;  %s1277_s5 = inlined_call_operand.<no memory space> [shape: f32[1,1], index: 5, kind: input, shape index: {}]   ;;  %s1278_s6 = inlined_call_operand.vmem [shape: f32[2,1,8], index: 6, kind: input, shape index: {}]   ;;  %s1279_s7 = inlined_call_operand.vmem [shape: f32[2,8,1], index: 7, kind: input, shape index: {}]   ;;  %s1280_s8 = inlined_call_operand.vmem [shape: f32[2,8,32], index: 8, kind: output, shape index: {0}]   ;;  %s1281_s9 = inlined_call_operand.vmem [shape: f32[2,8,32], index: 9, kind: output, shape index: {1}]  }
   0x1   :  { %v15_v0 = vstv %s1277_s5 }
   0x2   :  { %16 = vst [vmem:[#allocation2] sm:$0x1] %v15_v0 }
   0x3   :  { %17 = vsyncpa [#allocation4], 0 }
   0x4   :  { %18 = vsyncpa [#allocation6], 0  ;;  %s1163_s11 = smov 0  }
   0x5 LB: > { %s1169_s12 = sadd.s32 4294967295, %s1103_s11   ;;  %p943_p0 = scmp.ge.s32.totalorder %s1103_s11, 1  ;;  %s1103_s11 = sphi %s1163_s11, %s24_s11  }
   0x6   : > { %p269_p1 = scmp.lt.s32.totalorder %s1103_s11, 3  ;;  %p1282_p2 = scmp.eq.s32.totalorder %s1169_s12, 0 }
   0x7   : > { %s1105_s13 = smov [#allocation3]   ;;  %s1106_s15 = smov [#allocation5]  }
   0x8   : > { %p1174_p3 = pnand %p943_p0, %p269_p1  ;;  %s285_s14 = sshll.u32 %s1105_s13, 4  ;;  %s286_s14 = int_to_ptr.vmem [resolvable:$true] %s285_s14 }
   0x9   : > { %s296_s16 = sshll.u32 %s1106_s15, 4  ;;  %s1048_s18 = scalar_lea.vmem %s286_s14, 16  ;;  %s297_s16 = int_to_ptr.vmem [resolvable:$true] %s296_s16 }
   0xa   : > { %p1003_p4 = pneg %p1174_p3  ;;  %p1049_p7 = scmp.ne.s32.totalorder %s286_s14, %s1048_s18 }
   0xb   : > { %s1055_s19 = scalar_lea.vmem %s286_s14, 32  ;;  %p1056_p10 = scmp.lt.s32.totalorder %s286_s14, %s286_s14 }
   0xc   : > { %p1182_p5 = pnand %p1282_p2, %p1003_p4  ;;  %p1057_p11 = scmp.lt.s32.totalorder %s1055_s19, %s1048_s18 }
   0xe   : > { %p1039_p6 = pneg %p1182_p5  ;;  %p1058_p12 = por %p1057_p11, %p1056_p10 }
  0x10   : > { %p1051_p8 = pnand %p1049_p7, %p1039_p6 }
  0x12   : > { %p1052_p9 = pneg %p1051_p8 }
  0x14   : > { %p1059_p13 = pnand %p1058_p12, %p1052_p9 }
  0x16   : > { %1062 = shalt.err (!%p1059_p13)
}
  0x17   : > { %1006 = dma.hbm_to_vmem [thread:$0]  (!%p1182_p5), %s1275_s3, 16, %s286_s14, [#allocation4]  }
  0x18   : > { %s1074_s22 = scalar_lea.vmem %s297_s16, 16  ;;  %s1081_s23 = scalar_lea.vmem %s297_s16, 32 }
  0x19   : > { %p1075_p0 = scmp.ne.s32.totalorder %s297_s16, %s1074_s22  ;;  %p1082_p7 = scmp.lt.s32.totalorder %s297_s16, %s297_s16 }
  0x1a   : > { %p1083_p8 = scmp.lt.s32.totalorder %s1081_s23, %s1074_s22 }
  0x1b   : > { %p1077_p1 = pnand %p1075_p0, %p1039_p6 }
  0x1c   : > { %p1084_p2 = por %p1083_p8, %p1082_p7 }
  0x1d   : > { %p1078_p4 = pneg %p1077_p1 }
  0x1f   : > { %p1085_p10 = pnand %p1084_p2, %p1078_p4 }
  0x21   : > { %1088 = shalt.err (!%p1085_p10)
}
  0x22   : > { %1009 = dma.hbm_to_vmem [thread:$0]  (!%p1182_p5), %s1276_s4, 16, %s297_s16, [#allocation6]  }
  0x23   : > { %339 = sbr.rel (%p1174_p3) target bundleno = 957 (0x3bd), region = 52  ;;  %p1285_p9 = scmp.eq.s32.totalorder (!%p1174_p3), %s1169_s12, 0 }
  0x28   : > { %1094 = dma.done.wait (%p1285_p9), [#allocation4], 16   ;;  %p1286_p6 = pmov %p1285_p9 }
  0x2a   : > { %1096 = vsyncadd (%p1286_p6), [#allocation4], 4294967280  ;;  %p1287_p11 = pmov %p1286_p6 }
  0x2b   : > { %p1288_p2 = pmov %p1286_p6 }
  0x2c   : > { %1098 = dma.done.wait (%p1287_p11), [#allocation6], 16  }
  0x2d   : > { %1100 = vsyncadd (%p1288_p2), [#allocation6], 4294967280  ;;  %p392_p12 = scmp.lt.s32.totalorder %s1169_s12, 1  ;;  %v1107_v1 = vmov 0.0   ;;  %vm1108_vm0 = vmmov 0   ;;  %v1109_v2 = vmov 0   ;;  %v537_v12 = vlaneseq }
  0x2e   : > { %975 = vmatprep.subr.mxu0 %v1107_v1  ;;  %977 = vmatprep.mubr.msk.f32.mxu0 %vm1108_vm0, %v1107_v1  ;;  %vm429_vm1 = vcmask 261120   ;;  %v956_v4 = vld [vmem:[#allocation5] ss:$0 sm:$0xff]  ;;  %v957_v5 = vld [vmem:[#allocation3] ss:$0 sm:$0xff]  ;;  %vm543_vm4 = vcmask 64512  }
  0x2f   : > { %s1290_s12 = smov (!%p392_p12, %s1169_s12), 1  ;;  %1027 = vset.pattern.permute.xlu0 %v1109_v2  ;;  %1028 = vset.pattern.permute.xlu1 %v1109_v2  ;;  %v955_v7 = vld [vmem:[%s1274_s2] ss:$0 sm:$0xff]  ;;  %v538_v14 = vshrl.u32 %v537_v12, 7 }
  0x30   : > { %980 = vmatprep.subr.mxu1 %v1107_v1  ;;  %982 = vmatprep.mubr.msk.f32.mxu1 %vm1108_vm0, %v1107_v1  ;;  %s1222_s26 = sshll.u32 %s1290_s12, 3  ;;  %v960_v11 = vld [vmem:[#allocation2] ss:$0 sm:$0xff]  ;;  %s402_s14 = scalar_lea.vmem %s1278_s6, %s1290_s12 }
  0x31   : > { %s395_s29 = scalar_lea.vmem %s1272_s0, %s1222_s26  ;;  %v420_v13 = vld [vmem:[%s402_s14] sm:$0x1]  ;;  %v539_v15 = vsub.s32 0, %v538_v14  ;;  %s406_s16 = scalar_lea.vmem %s1279_s7, %s1222_s26 }
  0x32   : > { %v415_v3 = vld [vmem:[%s395_s29] sm:$0xff]  ;;  %vm535_vm2 = vcmp.eq.f32.partialorder %v420_v13, 0.0  ;;  %s399_s19 = scalar_lea.vmem %s1273_s1, %s1222_s26  ;;  %s410_s22 = scalar_lea.vmem %s1280_s8, %s1222_s26 }
  0x33   : > { %v439_v6 = vmul.f32 %v956_v4, %v415_v3  ;;  %976 = vmatpush3.xpose.msk.msra.mxu0 %vm429_vm1, %v415_v3  ;;  %v428_v8 = vmul.f32 %v955_v7, %v415_v3  ;;  %v536_v16 = vsel %vm535_vm2, 1, %v1109_v2  ;;  %v421_v26 = vld [vmem:[%s406_s16] sm:$0xff]  ;;  %s414_s25 = scalar_lea.vmem %s1281_s9, %s1222_s26 }
  0x34   : > { %990 = vmatprep.subr.mxu0 %v1107_v1  ;;  %v540_v18 = vrot.slane %v536_v16, %v539_v15  ;;  %vm629_vm5 = vcmp.eq.f32.partialorder %v421_v26, 0.0  ;;  %v416_v33 = vld [vmem:[%s399_s19] sm:$0xff] }
  0x35   : > { %v446_v9 = vadd.f32 %v957_v5, %v439_v6  ;;  %v430_v10 = vsel %vm429_vm1, %v428_v8, 0.0  ;;  %v630_v27 = vsel %vm629_vm5, 1, %v1109_v2  ;;  %981 = vmatpush3.msra.mxu1 %v416_v33 }
  0x36   : > { %431 = vadd.xlane.f32.xlu0 %v430_v10  ;;  %vm541_vm3 = vcmp.eq.s32.totalorder %v540_v18, 1  ;;  %985 = vmatprep.subr.mxu1 %v1107_v1 }
  0x37   : > { %978 = vmatmul.mubr.msk.f32.vlgmr.msra.gmra.mxu0 %vm429_vm1, %v446_v9 }
  0x38   : > { %991 = vmatpush3.msra.mxu0 %v415_v3  ;;  %992 = vmatprep.mubr.msk.f32.mxu0 %vm1108_vm0, %v1107_v1 }
  0x4c   : > { %531 = vperm.xlu0 %1027, %v960_v11  }
  0xbf   : > { %v432_v17 = vpop.xlane.xlu0 %431 }
  0xc7   : > { %v532_v20 = vpop.permute.xlu0 %531 }
  0xf7   : > { %v519_v19 = vpop.f32.mrf.mxu0 }
  0xf8   : > { %v523_v21 = vadd.f32 %v519_v19, %v432_v17 }
  0xf9   : > { %v979_v22 = vpop.f32.mrf.mxu0 }
  0xfa   : > { %v534_v23 = vadd.f32 %v532_v20, %v523_v21 }
  0xfc   : > { %v542_v24 = vsel %vm541_vm3, -10000.0, %v534_v23 }
  0xfd   : > { %v544_v25 = vsel %vm543_vm4, %v542_v24, -inf }
  0xfe   : > { %545 = vmax.xlane.f32.xlu1 %v544_v25 }
 0x10f   : > { %632 = vperm.xlu1 %1028, %v630_v27  }
 0x187   : > { %v546_v28 = vpop.xlane.xlu1 %545 }
 0x188   : > { %v547_v29 = vsub.f32 %v542_v24, %v546_v28 }
 0x18a   : > { %v548_v30 = vmul.f32 1.442695, %v547_v29 }
 0x18b   : > { %v633_v34 = vpop.permute.xlu1 %632 }
 0x18c   : > { %1029 = vpow2.f32 %v548_v30  ;;  %vm634_vm6 = vcmp.eq.s32.totalorder %v633_v34, 1 }
 0x18d   : > { %v635_v35 = vsel %vm634_vm6, -10000.0, %v542_v24 }
 0x18e   : > { %v636_v36 = vsel %vm543_vm4, %v635_v35, -inf }
 0x18f   : > { %v637_v37 = vrot.slane %v636_v36, 4 }
 0x191   : > { %v638_v38 = vmax.f32 %v636_v36, %v637_v37 }
 0x193   : > { %v639_v39 = vrot.slane %v638_v38, 2 }
 0x195   : > { %v640_v40 = vmax.f32 %v638_v38, %v639_v39 }
 0x197   : > { %v641_v41 = vrot.slane %v640_v40, 1 }
 0x199   : > { %v1030_v31 = vpop.eup %1029  ;;  %v642_v42 = vmax.f32 %v640_v40, %v641_v41 }
 0x19a   : > { %v550_v32 = vsel %vm543_vm4, %v1030_v31, 0.0 }
 0x19b   : > { %551 = vadd.xlane.f32.xlu1 %v550_v32  ;;  %v643_v43 = vsub.f32 %v635_v35, %v642_v42 }
 0x19d   : > { %v644_v44 = vmul.f32 1.442695, %v643_v43 }
 0x19f   : > { %1031 = vpow2.f32 %v644_v44 }
 0x1ac   : > { %v1032_v45 = vpop.eup %1031 }
 0x1ad   : > { %v646_v46 = vsel %vm543_vm4, %v1032_v45, 0.0 }
 0x1ae   : > { %v647_v47 = vrot.slane %v646_v46, 4 }
 0x1b0   : > { %v648_v48 = vadd.f32 %v647_v47, %v646_v46 }
 0x1b2   : > { %v649_v49 = vrot.slane %v648_v48, 2 }
 0x1b4   : > { %v650_v50 = vadd.f32 %v649_v49, %v648_v48 }
 0x1b6   : > { %v651_v51 = vrot.slane %v650_v50, 1 }
 0x1b8   : > { %v652_v52 = vadd.f32 %v651_v51, %v650_v50 }
 0x224   : > { %v552_v53 = vpop.xlane.xlu1 %551 }
 0x225   : > { %1033 = vrcp.f32 %v552_v53 }
 0x226   : > { %1035 = vrcp.f32 %v652_v52 }
 0x232   : > { %v1034_v54 = vpop.eup %1033 }
 0x233   : > { %v554_v55 = vmul.f32 %v1034_v54, %v1030_v31  ;;  %v1036_v56 = vpop.eup %1035 }
 0x234   : > { %v654_v57 = vmul.f32 %v1036_v56, %v1032_v45 }
 0x235   : > { %983 = vmatmul.mubr.msk.f32.vlgmr.msra.gmra.mxu1 %vm543_vm4, %v554_v55 }
 0x236   : > { %986 = vmatpush3.xpose.msk.msra.mxu1 %vm543_vm4, %v554_v55  ;;  %987 = vmatprep.mubr.msk.f32.mxu1 %vm1108_vm0, %v1107_v1 }
 0x239   : > { %988 = vmatmul.mubr.msk.f32.vlgmr.msra.gmra.mxu1 %vm543_vm4, %v654_v57 }
 0x2f5   : > { %v624_v58 = vpop.f32.mrf.mxu1 }
 0x2f6   : > { %628 = vst.msk [vmem:[%s410_s22] sm:$0xff] %vm429_vm1, %v624_v58 }
 0x2f7   : > { %v984_v59 = vpop.f32.mrf.mxu1 }
 0x2f9   : > { %v724_v60 = vpop.f32.mrf.mxu1 }
 0x2fa   : > { %993 = vmatmul.mubr.msk.f32.vlgmr.msra.gmra.mxu0 %vm543_vm4, %v724_v60 }
 0x2fb   : > { %v989_v61 = vpop.f32.mrf.mxu1 }
 0x3ba   : > { %v797_v62 = vpop.f32.mrf.mxu0 }
 0x3bb   : > { %801 = vst.msk [vmem:[%s414_s25] sm:$0xff] %vm429_vm1, %v797_v62 }
 0x3bc   : > { %v994_v63 = vpop.f32.mrf.mxu0 }
 0x3bd PF: > { %s24_s11 = sadd.s32 1, %s1103_s11  }
 0x3be   : > { %p21_p3 = scmp.ge.s32.totalorder %s24_s11, 4  }
 0x3c0   :  { %23 = sbr.rel (!%p21_p3) target bundleno = 5 (0x5), region = 112 }
 0x3c5   :  { %835 = vsyncpa [#allocation4], 1 }
 0x3c6   :  { %837 = vsyncpa [#allocation4 + $0x1], 1 }
 0x3c7   :  { %838 = vsyncpa [#allocation6], 1 }

// kernel: transformer_enc.8
= control target key start
LH: loop header
LB: loop body
LE: loop exit
PB: predicated region body
PF: predicated region fallthrough
CT: control target
= control target key end

     0   :  { %17 = vsyncpa [#allocation3], 0  ;;  %s2673_s0 = inlined_call_operand.vmem [shape: f32[2,8,32], index: 0, kind: input, shape index: {}]   ;;  %s2674_s1 = inlined_call_operand.vmem [shape: f32[2,1,8], index: 1, kind: input, shape index: {}]   ;;  %s2675_s2 = inlined_call_operand.vmem [shape: f32[32,96], index: 2, kind: input, shape index: {}]   ;;  %s2676_s3 = inlined_call_operand.hbm [shape: f32[1,96], index: 3, kind: input, shape index: {}]   ;;  %s2677_s4 = inlined_call_operand.vmem [shape: f32[32,32], index: 4, kind: input, shape index: {}]   ;;  %s2678_s5 = inlined_call_operand.hbm [shape: f32[1,32], index: 5, kind: input, shape index: {}]   ;;  %s2679_s6 = inlined_call_operand.hbm [shape: f32[1,32], index: 6, kind: input, shape index: {}]   ;;  %s2680_s7 = inlined_call_operand.hbm [shape: f32[1,32], index: 7, kind: input, shape index: {}]   ;;  %s2681_s8 = inlined_call_operand.vmem [shape: f32[32,128], index: 8, kind: input, shape index: {}]   ;;  %s2682_s9 = inlined_call_operand.hbm [shape: f32[1,128], index: 9, kind: input, shape index: {}]   ;;  %s2683_s10 = inlined_call_operand.vmem [shape: f32[128,32], index: 10, kind: input, shape index: {}]   ;;  %s2684_s11 = inlined_call_operand.hbm [shape: f32[1,32], index: 11, kind: input, shape index: {}]   ;;  %s2685_s12 = inlined_call_operand.vmem [shape: f32[2,8,32], index: 12, kind: output, shape index: {}]  }
   0x1   :  { %18 = vsyncpa [#allocation5], 0 }
   0x2   :  { %19 = vsyncpa [#allocation8], 0 }
   0x3   :  { %20 = vsyncpa [#allocation11], 0  ;;  %s2331_s21 = smov 0  }
   0x4 LB: > { %s2243_s22 = smov [#allocation4]   ;;  %s2337_s24 = sadd.s32 4294967295, %s2241_s21   ;;  %s2241_s21 = sphi %s2331_s21, %s26_s21  }
   0x5   : > { %s349_s23 = sshll.u32 %s2243_s22, 4  ;;  %p1753_p0 = scmp.ge.s32.totalorder %s2241_s21, 1  ;;  %s350_s23 = int_to_ptr.vmem [resolvable:$true] %s349_s23 }
   0x6   : > { %p319_p1 = scmp.lt.s32.totalorder %s2241_s21, 3  ;;  %p2686_p2 = scmp.eq.s32.totalorder %s2337_s24, 0 }
   0x7   : > { %s2244_s26 = smov [#allocation7]   ;;  %s2245_s28 = smov [#allocation2]  }
   0x8   : > { %p2342_p3 = pnand %p1753_p0, %p319_p1  ;;  %s371_s27 = sshll.u32 %s2244_s26, 4  ;;  %s2348_s27 = int_to_ptr.vmem [resolvable:$true] %s371_s27 }
   0x9   : > { %s335_s29 = sshll.u32 %s2245_s28, 4  ;;  %s2246_s13 = smov [#allocation6]   ;;  %s2356_s29 = int_to_ptr.vmem [resolvable:$true] %s335_s29 }
   0xa   : > { %p1973_p4 = pneg %p2342_p3  ;;  %s360_s14 = sshll.u32 %s2246_s13, 4  ;;  %s2358_s14 = int_to_ptr.vmem [resolvable:$true] %s360_s14 }
   0xb   : > { %s2074_s16 = scalar_lea.vmem %s350_s23, 16  ;;  %s2081_s17 = scalar_lea.vmem %s350_s23, 32 }
   0xc   : > { %p2352_p5 = pnand %p2686_p2, %p1973_p4  ;;  %p2075_p7 = scmp.ne.s32.totalorder %s350_s23, %s2074_s16 }
   0xd   : > { %p2082_p10 = scmp.lt.s32.totalorder %s350_s23, %s350_s23  ;;  %p2083_p11 = scmp.lt.s32.totalorder %s2081_s17, %s2074_s16 }
   0xe   : > { %p2362_p6 = pneg %p2352_p5 }
   0xf   : > { %p2084_p12 = por %p2083_p11, %p2082_p10 }
  0x10   : > { %p2077_p8 = pnand %p2075_p7, %p2362_p6 }
  0x12   : > { %p2078_p9 = pneg %p2077_p8 }
  0x14   : > { %p2085_p13 = pnand %p2084_p12, %p2078_p9 }
  0x16   : > { %2088 = shalt.err (!%p2085_p13)
}
  0x17   : > { %1979 = dma.hbm_to_vmem [thread:$0]  (!%p2352_p5), %s2678_s5, 16, %s350_s23, [#allocation5]  }
  0x18   : > { %s2100_s20 = scalar_lea.vmem %s2348_s27, 16  ;;  %s2107_s22 = scalar_lea.vmem %s2348_s27, 32 }
  0x19   : > { %p2101_p0 = scmp.ne.s32.totalorder %s2348_s27, %s2100_s20  ;;  %p2108_p7 = scmp.lt.s32.totalorder %s2348_s27, %s2348_s27 }
  0x1a   : > { %p2109_p8 = scmp.lt.s32.totalorder %s2107_s22, %s2100_s20 }
  0x1b   : > { %p2103_p1 = pnand %p2101_p0, %p2362_p6 }
  0x1c   : > { %p2110_p9 = por %p2109_p8, %p2108_p7 }
  0x1d   : > { %p2104_p4 = pneg %p2103_p1 }
  0x1f   : > { %p2111_p10 = pnand %p2110_p9, %p2104_p4 }
  0x21   : > { %2114 = shalt.err (!%p2111_p10)
}
  0x22   : > { %1985 = dma.hbm_to_vmem [thread:$0]  (!%p2352_p5), %s2680_s7, 16, %s2348_s27, [#allocation8]  }
  0x23   : > { %s2126_s23 = scalar_lea.vmem %s2356_s29, 16  ;;  %s2133_s13 = scalar_lea.vmem %s2356_s29, 32 }
  0x24   : > { %p2127_p11 = scmp.ne.s32.totalorder %s2356_s29, %s2126_s23  ;;  %p2134_p0 = scmp.lt.s32.totalorder %s2356_s29, %s2356_s29 }
  0x25   : > { %p2135_p1 = scmp.lt.s32.totalorder %s2133_s13, %s2126_s23 }
  0x26   : > { %p2129_p12 = pnand %p2127_p11, %p2362_p6 }
  0x27   : > { %p2136_p4 = por %p2135_p1, %p2134_p0 }
  0x28   : > { %p2130_p13 = pneg %p2129_p12 }
  0x2a   : > { %p2137_p7 = pnand %p2136_p4, %p2130_p13 }
  0x2c   : > { %2140 = shalt.err (!%p2137_p7)
}
  0x2d   : > { %1976 = dma.hbm_to_vmem [thread:$0]  (!%p2352_p5), %s2676_s3, 16, %s2356_s29, [#allocation3]  }
  0x2e   : > { %s2152_s27 = scalar_lea.vmem %s2358_s14, 16  ;;  %s2159_s18 = scalar_lea.vmem %s2358_s14, 32 }
  0x2f   : > { %p2153_p8 = scmp.ne.s32.totalorder %s2358_s14, %s2152_s27  ;;  %p2160_p11 = scmp.lt.s32.totalorder %s2358_s14, %s2358_s14 }
  0x30   : > { %p2161_p12 = scmp.lt.s32.totalorder %s2159_s18, %s2152_s27 }
  0x31   : > { %p2155_p9 = pnand %p2153_p8, %p2362_p6 }
  0x32   : > { %p2162_p13 = por %p2161_p12, %p2160_p11 }
  0x33   : > { %p2156_p10 = pneg %p2155_p9 }
  0x35   : > { %p2163_p0 = pnand %p2162_p13, %p2156_p10 }
  0x37   : > { %2166 = shalt.err (!%p2163_p0)
}
  0x38   : > { %1982 = dma.hbm_to_vmem [thread:$0]  (!%p2352_p5), %s2679_s6, 16, %s2358_s14, [#allocation5]  }
  0x39   : > { %s2247_s29 = smov [#allocation9]   ;;  %s2248_s26 = smov [#allocation10]  }
  0x3a   : > { %s385_s22 = sshll.u32 %s2247_s29, 4  ;;  %s399_s28 = sshll.u32 %s2248_s26, 4  ;;  %s386_s22 = int_to_ptr.vmem [resolvable:$true] %s385_s22  ;;  %s400_s28 = int_to_ptr.vmem [resolvable:$true] %s399_s28 }
  0x3b   : > { %s2178_s23 = scalar_lea.vmem %s386_s22, 16  ;;  %s2185_s13 = scalar_lea.vmem %s386_s22, 32 }
  0x3c   : > { %p2179_p1 = scmp.ne.s32.totalorder %s386_s22, %s2178_s23  ;;  %p2186_p8 = scmp.lt.s32.totalorder %s386_s22, %s386_s22 }
  0x3d   : > { %p2187_p9 = scmp.lt.s32.totalorder %s2185_s13, %s2178_s23 }
  0x3e   : > { %p2181_p4 = pnand %p2179_p1, %p2362_p6 }
  0x3f   : > { %p2188_p10 = por %p2187_p9, %p2186_p8 }
  0x40   : > { %p2182_p7 = pneg %p2181_p4 }
  0x42   : > { %p2189_p11 = pnand %p2188_p10, %p2182_p7 }
  0x44   : > { %2192 = shalt.err (!%p2189_p11)
}
  0x45   : > { %1988 = dma.hbm_to_vmem [thread:$0]  (!%p2352_p5), %s2682_s9, 16, %s386_s22, [#allocation8]  }
  0x46   : > { %s2204_s17 = scalar_lea.vmem %s400_s28, 16  ;;  %s2211_s27 = scalar_lea.vmem %s400_s28, 32 }
  0x47   : > { %p2205_p12 = scmp.ne.s32.totalorder %s400_s28, %s2204_s17  ;;  %p2212_p1 = scmp.lt.s32.totalorder %s400_s28, %s400_s28 }
  0x48   : > { %p2213_p4 = scmp.lt.s32.totalorder %s2211_s27, %s2204_s17 }
  0x49   : > { %p2207_p13 = pnand %p2205_p12, %p2362_p6 }
  0x4a   : > { %p2214_p2 = por %p2213_p4, %p2212_p1 }
  0x4b   : > { %p2208_p0 = pneg %p2207_p13 }
  0x4d   : > { %p2215_p8 = pnand %p2214_p2, %p2208_p0 }
  0x4f   : > { %2218 = shalt.err (!%p2215_p8)
}
  0x50   : > { %1991 = dma.hbm_to_vmem [thread:$0]  (!%p2352_p5), %s2684_s11, 16, %s400_s28, [#allocation11]  }
  0x51   : > { %425 = sbr.rel (%p2342_p3) target bundleno = 2583 (0xa17), region = 68  ;;  %p2690_p7 = scmp.eq.s32.totalorder (!%p2342_p3), %s2337_s24, 0 }
  0x56   : > { %2224 = dma.done.wait (%p2690_p7), [#allocation3], 16   ;;  %p2691_p6 = pmov %p2690_p7 }
  0x58   : > { %2226 = vsyncadd (%p2691_p6), [#allocation3], 4294967280  ;;  %p2692_p9 = pmov %p2691_p6 }
  0x59   : > { %p2693_p2 = pmov %p2691_p6 }
  0x5a   : > { %2228 = dma.done.wait (%p2692_p9), [#allocation5], 32  }
  0x5b   : > { %2230 = vsyncadd (%p2693_p2), [#allocation5], 4294967264  ;;  %p2694_p10 = pmov %p2693_p2 }
  0x5c   : > { %p2695_p5 = pmov %p2693_p2 }
  0x5d   : > { %2232 = dma.done.wait (%p2694_p10), [#allocation8], 32  }
  0x5e   : > { %2234 = vsyncadd (%p2695_p5), [#allocation8], 4294967264  ;;  %p2696_p3 = pmov %p2693_p2 }
  0x5f   : > { %p2697_p11 = pmov %p2693_p2 }
  0x60   : > { %2236 = dma.done.wait (%p2696_p3), [#allocation11], 16  }
  0x61   : > { %2238 = vsyncadd (%p2697_p11), [#allocation11], 4294967280  ;;  %p488_p12 = scmp.lt.s32.totalorder %s2337_s24, 1  ;;  %v2249_v0 = vmov 0.0   ;;  %vm2250_vm0 = vmmov 0   ;;  %v504_v1 = vld [vmem:[%s2675_s2 + $0x18] sm:$0xff]  ;;  %v667_v17 = vlaneseq }
  0x62   : > { %1841 = vmatprep.subr.mxu1 %v2249_v0  ;;  %1849 = vmatprep.mubr.msk.f32.mxu1 %vm2250_vm0, %v2249_v0  ;;  %v503_v2 = vld [vmem:[%s2675_s2 + $0x10] sm:$0xff]  ;;  %v502_v3 = vld [vmem:[%s2675_s2 + $0x8] sm:$0xff]  ;;  %v501_v4 = vld [vmem:[%s2675_s2] sm:$0xff]  ;;  %vm512_vm1 = vcmask 261120   ;;  %s2251_s17 = smov 120   ;;  %s2252_s27 = smov 96  }
  0x63   : > { %s2699_s24 = smov (!%p488_p12, %s2337_s24), 1  ;;  %1862 = vmatprep.subr.mxu0 %v2249_v0  ;;  %1864 = vmatprep.mubr.msk.f32.mxu0 %vm2250_vm0, %v2249_v0  ;;  %v1770_v6 = vld [vmem:[#allocation2] ss:$0 sm:$0xff]  ;;  %s2253_s18 = smov 80   ;;  %vm589_vm2 = vcmask 64512   ;;  %v668_v19 = vshrl.u32 %v667_v17, 7 }
  0x64   : > { %s1768_s25 = sshll.u32 %s2699_s24, 3  ;;  %1842 = vmatpush3.msra.mxu1 %v504_v1  ;;  %s2254_s19 = smov 88   ;;  %v2258_v21 = vmov 0   ;;  %vm1274_vm5 = vcmask 130048   ;;  %vm1276_vm6 = vcmask 195584  }
  0x65   : > { %1843 = vmatprep.subr.mxu1 %v2249_v0  ;;  %s491_s13 = scalar_lea.vmem %s2673_s0, %s1768_s25  ;;  %s2255_s30 = smov 72   ;;  %v669_v20 = vsub.s32 0, %v668_v19 }
  0x66   : > { %1844 = vmatpush3.msra.mxu1 %v503_v2  ;;  %v2474_v5 = vld [vmem:[%s491_s13] sm:$0xff]  ;;  %s2256_s15 = smov 112   ;;  %s2257_s20 = smov 104  }
  0x67   : > { %1845 = vmatprep.subr.mxu1 %v2249_v0  ;;  %s494_s26 = scalar_lea.vmem %s2674_s1, %s2699_s24  ;;  %s2259_s28 = smov 56  }
  0x68   : > { %1846 = vmatpush3.msra.mxu1 %v502_v3  ;;  %v500_v18 = vld [vmem:[%s494_s26] sm:$0x1]  ;;  %s2260_s23 = smov 64   ;;  %s2261_s13 = smov 48  }
  0x69   : > { %1847 = vmatprep.subr.mxu1 %v2249_v0  ;;  %vm665_vm3 = vcmp.eq.f32.partialorder %v500_v18, 0.0  ;;  %s2262_s16 = smov 40   ;;  %v1281_v18 = vld [vmem:[%s2677_s4 + $0x18] sm:$0xff]  ;;  %s2264_s22 = smov 16  }
  0x6a   : > { %1848 = vmatpush3.msra.mxu1 %v501_v4  ;;  %v666_v22 = vsel %vm665_vm3, 1, %v2258_v21  ;;  %s2265_s26 = smov 24   ;;  %s498_s29 = scalar_lea.vmem %s2685_s12, %s1768_s25 }
  0x6b   : > { %1850 = vmatmul.mubr.msk.f32.vlgmr.msra.gmra.mxu1 %vm512_vm1, %v2474_v5  ;;  %1852 = vmatprep.subr.mxu1 %v2249_v0  ;;  %v670_v23 = vrot.slane %v666_v22, %v669_v20 }
  0x6c   : > { %1854 = vmatprep.mubr.msk.f32.mxu1 %vm2250_vm0, %v2249_v0 }
  0x6d   : > { %vm671_vm4 = vcmp.eq.s32.totalorder %v670_v23, 1  ;;  %v1280_v23 = vld [vmem:[%s2677_s4 + $0x10] sm:$0xff] }
 0x12b   : > { %v582_v7 = vpop.f32.mrf.mxu1 }
 0x12c   : > { %v2482_v8 = vadd.f32 %v1770_v6, %v582_v7 }
 0x12d   : > { %v1851_v9 = vpop.f32.mrf.mxu1 }
 0x12e   : > { %760 = vrot.lane.b32.xlu1 %v2482_v8, %s2251_s17  ;;  %587 = vrot.lane.b32.xlu0 %v2482_v8, %s2252_s27  ;;  %s2263_s27 = smov 8  }
 0x132   : > { %929 = vrot.lane.b32.xlu1 %v2482_v8, %s2253_s18  ;;  %762 = vrot.lane.b32.xlu0 %v2482_v8, %s2254_s19 }
 0x136   : > { %1096 = vrot.lane.b32.xlu1 %v2482_v8, %s2255_s30  ;;  %927 = vrot.lane.b32.xlu0 %v2482_v8, %s2256_s15 }
 0x13a   : > { %1094 = vrot.lane.b32.xlu0 %v2482_v8, %s2257_s20 }
 0x1a0   : > { %v761_v10 = vpop.permute.xlu1 %760  ;;  %v588_v11 = vpop.permute.xlu0 %587 }
 0x1a1   : > { %1853 = vmatpush3.xpose.msk.msra.mxu1 %vm589_vm2, %v588_v11 }
 0x1a2   : > { %1857 = vmatprep.subr.mxu1 %v2249_v0 }
 0x1a4   : > { %1855 = vmatmul.mubr.msk.f32.vlgmr.msra.gmra.mxu1 %vm589_vm2, %v2482_v8  ;;  %v763_v12 = vpop.permute.xlu0 %762  ;;  %v930_v13 = vpop.permute.xlu1 %929 }
 0x1a5   : > { %1863 = vmatpush3.xpose.msk.msra.mxu0 %vm589_vm2, %v763_v12  ;;  %1859 = vmatprep.mubr.msk.f32.mxu1 %vm2250_vm0, %v2249_v0 }
 0x1a6   : > { %1872 = vmatprep.subr.mxu0 %v2249_v0 }
 0x1a8   : > { %1865 = vmatmul.mubr.msk.f32.vlgmr.msra.gmra.mxu0 %vm589_vm2, %v761_v10  ;;  %v928_v14 = vpop.permute.xlu0 %927  ;;  %v1097_v15 = vpop.permute.xlu1 %1096 }
 0x1a9   : > { %1873 = vmatpush3.xpose.msk.msra.mxu0 %vm589_vm2, %v930_v13  ;;  %1874 = vmatprep.mubr.msk.f32.mxu0 %vm2250_vm0, %v2249_v0 }
 0x1aa   : > { %1882 = vmatprep.subr.mxu0 %v2249_v0 }
 0x1ac   : > { %1875 = vmatmul.mubr.msk.f32.vlgmr.msra.gmra.mxu0 %vm589_vm2, %v928_v14  ;;  %v1095_v16 = vpop.permute.xlu0 %1094 }
 0x1ad   : > { %1883 = vmatpush3.xpose.msk.msra.mxu0 %vm589_vm2, %v1097_v15  ;;  %1884 = vmatprep.mubr.msk.f32.mxu0 %vm2250_vm0, %v2249_v0 }
 0x1ae   : > { %1914 = vmatprep.subr.mxu0 %v2249_v0 }
 0x1b0   : > { %1885 = vmatmul.mubr.msk.f32.vlgmr.msra.gmra.mxu0 %vm589_vm2, %v1095_v16 }
 0x1b1   : > { %1946 = vmatprep.mubr.msk.f32.mxu0 %vm2250_vm0, %v2249_v0 }
 0x264   : > { %v660_v24 = vpop.f32.mrf.mxu1 }
 0x265   : > { %v664_v25 = vmul.f32 0.35355338, %v660_v24  ;;  %v1279_v24 = vld [vmem:[%s2677_s4 + $0x8] sm:$0xff] }
 0x266   : > { %v1856_v26 = vpop.f32.mrf.mxu1 }
 0x267   : > { %v672_v27 = vsel %vm671_vm4, -10000.0, %v664_v25  ;;  %v1278_v25 = vld [vmem:[%s2677_s4] sm:$0xff] }
 0x268   : > { %v834_v28 = vpop.f32.mrf.mxu0  ;;  %v673_v29 = vsel %vm589_vm2, %v672_v27, -inf }
 0x269   : > { %v838_v30 = vmul.f32 0.35355338, %v834_v28  ;;  %674 = vmax.xlane.f32.xlu1 %v673_v29 }
 0x26a   : > { %v1866_v31 = vpop.f32.mrf.mxu0 }
 0x26b   : > { %v839_v32 = vsel %vm671_vm4, -10000.0, %v838_v30 }
 0x26c   : > { %v1001_v33 = vpop.f32.mrf.mxu0  ;;  %v840_v34 = vsel %vm589_vm2, %v839_v32, -inf }
 0x26d   : > { %v1005_v35 = vmul.f32 0.35355338, %v1001_v33  ;;  %841 = vmax.xlane.f32.xlu0 %v840_v34 }
 0x26e   : > { %v1876_v36 = vpop.f32.mrf.mxu0 }
 0x26f   : > { %v1006_v37 = vsel %vm671_vm4, -10000.0, %v1005_v35  ;;  %v1784_v36 = vld [vmem:[#allocation4] ss:$0 sm:$0xff] }
 0x270   : > { %v1168_v38 = vpop.f32.mrf.mxu0  ;;  %v1007_v39 = vsel %vm589_vm2, %v1006_v37, -inf }
 0x271   : > { %v1172_v40 = vmul.f32 0.35355338, %v1168_v38  ;;  %1008 = vmax.xlane.f32.xlu0 %v1007_v39 }
 0x272   : > { %v1886_v41 = vpop.f32.mrf.mxu0 }
 0x273   : > { %v1173_v42 = vsel %vm671_vm4, -10000.0, %v1172_v40 }
 0x274   : > { %v1174_v43 = vsel %vm589_vm2, %v1173_v42, -inf }
 0x275   : > { %1175 = vmax.xlane.f32.xlu1 %v1174_v43 }
 0x286   : > { %851 = vrot.lane.b32.xlu1 %v2482_v8, %s2259_s28 }
 0x2f2   : > { %v675_v44 = vpop.xlane.xlu1 %674 }
 0x2f3   : > { %v676_v45 = vsub.f32 %v672_v27, %v675_v44 }
 0x2f5   : > { %v677_v46 = vmul.f32 1.442695, %v676_v45 }
 0x2f6   : > { %v842_v47 = vpop.xlane.xlu0 %841 }
 0x2f7   : > { %2035 = vpow2.f32 %v677_v46  ;;  %v843_v48 = vsub.f32 %v839_v32, %v842_v47  ;;  %v1404_v47 = vld [vmem:[%s2681_s8 + $0x18] sm:$0xff] }
 0x2f9   : > { %v844_v49 = vmul.f32 1.442695, %v843_v48  ;;  %v1403_v48 = vld [vmem:[%s2681_s8 + $0x10] sm:$0xff] }
 0x2fa   : > { %v1009_v59 = vpop.xlane.xlu0 %1008 }
 0x2fb   : > { %2037 = vpow2.f32 %v844_v49  ;;  %v1010_v60 = vsub.f32 %v1006_v37, %v1009_v59  ;;  %v1401_v49 = vld [vmem:[%s2681_s8] sm:$0xff] }
 0x2fd   : > { %v1011_v61 = vmul.f32 1.442695, %v1010_v60 }
 0x2fe   : > { %v1176_v50 = vpop.xlane.xlu1 %1175 }
 0x2ff   : > { %v1177_v51 = vsub.f32 %v1173_v42, %v1176_v50 }
 0x301   : > { %v1178_v52 = vmul.f32 1.442695, %v1177_v51 }
 0x302   : > { %v852_v1 = vpop.permute.xlu1 %851 }
 0x303   : > { %2039 = vpow2.f32 %v1178_v52 }
 0x304   : > { %v2036_v53 = vpop.eup %2035  ;;  %2041 = vpow2.f32 %v1011_v61  ;;  %v2589_v61 = vld [vmem:[#allocation7] ss:$0 sm:$0xff] }
 0x305   : > { %v679_v54 = vsel %vm589_vm2, %v2036_v53, 0.0 }
 0x306   : > { %680 = vadd.xlane.f32.xlu0 %v679_v54 }
 0x308   : > { %v2038_v55 = vpop.eup %2037 }
 0x309   : > { %v846_v56 = vsel %vm589_vm2, %v2038_v55, 0.0 }
 0x30a   : > { %847 = vadd.xlane.f32.xlu1 %v846_v56 }
 0x310   : > { %v2040_v57 = vpop.eup %2039 }
 0x311   : > { %v1180_v58 = vsel %vm589_vm2, %v2040_v57, 0.0  ;;  %v2042_v62 = vpop.eup %2041 }
 0x312   : > { %1181 = vadd.xlane.f32.xlu1 %v1180_v58  ;;  %v1013_v63 = vsel %vm589_vm2, %v2042_v62, 0.0  ;;  %v2586_v58 = vld [vmem:[#allocation6] ss:$0 sm:$0xff] }
 0x31c   : > { %684 = vrot.lane.b32.xlu0 %v2482_v8, %s2260_s23 }
 0x323   : > { %1018 = vrot.lane.b32.xlu1 %v2482_v8, %s2261_s13 }
 0x33b   : > { %1014 = vadd.xlane.f32.xlu0 %v1013_v63 }
 0x351   : > { %1185 = vrot.lane.b32.xlu0 %v2482_v8, %s2262_s16 }
 0x38f   : > { %v681_v2 = vpop.xlane.xlu0 %680 }
 0x390   : > { %2043 = vrcp.f32 %v681_v2  ;;  %v1526_v2 = vld [vmem:[%s2683_s10 + $0x70] sm:$0xff] }
 0x393   : > { %v685_v3 = vpop.permute.xlu0 %684  ;;  %v848_v4 = vpop.xlane.xlu1 %847 }
 0x394   : > { %2045 = vrcp.f32 %v848_v4  ;;  %1858 = vmatpush3.msra.mxu1 %v685_v3  ;;  %v1525_v3 = vld [vmem:[%s2683_s10 + $0x68] sm:$0xff]  ;;  %v1524_v4 = vld [vmem:[%s2683_s10 + $0x60] sm:$0xff] }
 0x395   : > { %1867 = vmatprep.subr.mxu1 %v2249_v0 }
 0x39b   : > { %v1182_v7 = vpop.xlane.xlu1 %1181 }
 0x39d   : > { %v2044_v6 = vpop.eup %2043 }
 0x39e   : > { %v683_v9 = vmul.f32 %v2044_v6, %v2036_v53  ;;  %v1523_v6 = vld [vmem:[%s2683_s10 + $0x58] sm:$0xff] }
 0x39f   : > { %v1019_v11 = vpop.permute.xlu1 %1018 }
 0x3a0   : > { %1860 = vmatmul.mubr.msk.f32.vlgmr.msra.gmra.mxu1 %vm589_vm2, %v683_v9  ;;  %v1521_v9 = vld [vmem:[%s2683_s10 + $0x48] sm:$0xff] }
 0x3a1   : > { %v2046_v10 = vpop.eup %2045  ;;  %1868 = vmatpush3.msra.mxu1 %v852_v1  ;;  %1869 = vmatprep.mubr.msk.f32.mxu1 %vm2250_vm0, %v2249_v0  ;;  %v1527_v1 = vld [vmem:[%s2683_s10 + $0x78] sm:$0xff] }
 0x3a2   : > { %1877 = vmatprep.subr.mxu1 %v2249_v0  ;;  %v850_v8 = vmul.f32 %v2046_v10, %v2038_v55  ;;  %1915 = vmatpush3.msra.mxu0 %v1527_v1  ;;  %v1520_v10 = vld [vmem:[%s2683_s10 + $0x40] sm:$0xff] }
 0x3a3   : > { %1916 = vmatprep.subr.mxu0 %v2249_v0 }
 0x3a4   : > { %1870 = vmatmul.mubr.msk.f32.vlgmr.msra.gmra.mxu1 %vm589_vm2, %v850_v8  ;;  %1917 = vmatpush3.msra.mxu0 %v1526_v2  ;;  %v1519_v8 = vld [vmem:[%s2683_s10 + $0x38] sm:$0xff] }
 0x3a5   : > { %1878 = vmatpush3.msra.mxu1 %v1019_v11  ;;  %1879 = vmatprep.mubr.msk.f32.mxu1 %vm2250_vm0, %v2249_v0  ;;  %v1518_v11 = vld [vmem:[%s2683_s10 + $0x30] sm:$0xff] }
 0x3a6   : > { %1887 = vmatprep.subr.mxu1 %v2249_v0  ;;  %1918 = vmatprep.subr.mxu0 %v2249_v0 }
 0x3a7   : > { %1919 = vmatpush3.msra.mxu0 %v1525_v3 }
 0x3a8   : > { %1920 = vmatprep.subr.mxu0 %v2249_v0 }
 0x3a9   : > { %1921 = vmatpush3.msra.mxu0 %v1524_v4 }
 0x3aa   : > { %1922 = vmatprep.subr.mxu0 %v2249_v0 }
 0x3ab   : > { %1923 = vmatpush3.msra.mxu0 %v1523_v6 }
 0x3ac   : > { %1924 = vmatprep.subr.mxu0 %v2249_v0 }
 0x3c4   : > { %v1015_v12 = vpop.xlane.xlu0 %1014 }
 0x3c5   : > { %2047 = vrcp.f32 %v1015_v12  ;;  %v1517_v12 = vld [vmem:[%s2683_s10 + $0x28] sm:$0xff] }
 0x3c6   : > { %2049 = vrcp.f32 %v1182_v7  ;;  %v1522_v7 = vld [vmem:[%s2683_s10 + $0x50] sm:$0xff] }
 0x3c7   : > { %1925 = vmatpush3.msra.mxu0 %v1522_v7 }
 0x3c8   : > { %v1186_v16 = vpop.permute.xlu0 %1185  ;;  %1926 = vmatprep.subr.mxu0 %v2249_v0 }
 0x3c9   : > { %1927 = vmatpush3.msra.mxu0 %v1521_v9 }
 0x3ca   : > { %1928 = vmatprep.subr.mxu0 %v2249_v0 }
 0x3cb   : > { %1929 = vmatpush3.msra.mxu0 %v1520_v10 }
 0x3cc   : > { %1930 = vmatprep.subr.mxu0 %v2249_v0 }
 0x3cd   : > { %1931 = vmatpush3.msra.mxu0 %v1519_v8 }
 0x3ce   : > { %1932 = vmatprep.subr.mxu0 %v2249_v0 }
 0x3cf   : > { %1933 = vmatpush3.msra.mxu0 %v1518_v11 }
 0x3d0   : > { %1934 = vmatprep.subr.mxu0 %v2249_v0 }
 0x3d1   : > { %1935 = vmatpush3.msra.mxu0 %v1517_v12 }
 0x3d2   : > { %v2048_v13 = vpop.eup %2047  ;;  %1936 = vmatprep.subr.mxu0 %v2249_v0 }
 0x3d3   : > { %v1017_v14 = vmul.f32 %v2048_v13, %v2042_v62  ;;  %v2050_v15 = vpop.eup %2049  ;;  %v1516_v13 = vld [vmem:[%s2683_s10 + $0x20] sm:$0xff] }
 0x3d4   : > { %v1184_v17 = vmul.f32 %v2050_v15, %v2040_v57  ;;  %1937 = vmatpush3.msra.mxu0 %v1516_v13  ;;  %v1514_v15 = vld [vmem:[%s2683_s10 + $0x10] sm:$0xff] }
 0x3d5   : > { %1880 = vmatmul.mubr.msk.f32.vlgmr.msra.gmra.mxu1 %vm589_vm2, %v1017_v14  ;;  %1938 = vmatprep.subr.mxu0 %v2249_v0  ;;  %v1515_v14 = vld [vmem:[%s2683_s10 + $0x18] sm:$0xff] }
 0x3d6   : > { %1888 = vmatpush3.msra.mxu1 %v1186_v16  ;;  %1889 = vmatprep.mubr.msk.f32.mxu1 %vm2250_vm0, %v2249_v0  ;;  %v1513_v16 = vld [vmem:[%s2683_s10 + $0x8] sm:$0xff] }
 0x3d7   : > { %1892 = vmatprep.subr.mxu1 %v2249_v0  ;;  %1939 = vmatpush3.msra.mxu0 %v1515_v14 }
 0x3d8   : > { %1940 = vmatprep.subr.mxu0 %v2249_v0 }
 0x3d9   : > { %1890 = vmatmul.mubr.msk.f32.vlgmr.msra.gmra.mxu1 %vm589_vm2, %v1184_v17  ;;  %1941 = vmatpush3.msra.mxu0 %v1514_v15  ;;  %v1512_v17 = vld [vmem:[%s2683_s10] sm:$0xff] }
 0x3da   : > { %1900 = vmatprep.mubr.msk.f32.mxu1 %vm2250_vm0, %v2249_v0  ;;  %1893 = vmatpush3.msra.mxu1 %v1281_v18  ;;  %v1788_v18 = vld [vmem:[#allocation9] ss:$0 sm:$0xff] }
 0x3db   : > { %1894 = vmatprep.subr.mxu1 %v2249_v0  ;;  %1942 = vmatprep.subr.mxu0 %v2249_v0 }
 0x3dc   : > { %1895 = vmatpush3.msra.mxu1 %v1280_v23  ;;  %1943 = vmatpush3.msra.mxu0 %v1513_v16 }
 0x3dd   : > { %1896 = vmatprep.subr.mxu1 %v2249_v0  ;;  %1944 = vmatprep.subr.mxu0 %v2249_v0 }
 0x3de   : > { %1897 = vmatpush3.msra.mxu1 %v1279_v24  ;;  %1945 = vmatpush3.msra.mxu0 %v1512_v17 }
 0x3df   : > { %1898 = vmatprep.subr.mxu1 %v2249_v0 }
 0x3e0   : > { %1899 = vmatpush3.msra.mxu1 %v1278_v25 }
 0x3e1   : > { %1903 = vmatprep.subr.mxu1 %v2249_v0 }
 0x460   : > { %v756_v19 = vpop.f32.mrf.mxu1 }
 0x462   : > { %v1861_v20 = vpop.f32.mrf.mxu1 }
 0x464   : > { %v923_v21 = vpop.f32.mrf.mxu1 }
 0x465   : > { %1262 = vrot.lane.b32.xlu1 %v923_v21, %s2263_s27 }
 0x466   : > { %v1871_v22 = vpop.f32.mrf.mxu1 }
 0x495   : > { %v1090_v26 = vpop.f32.mrf.mxu1 }
 0x496   : > { %1266 = vrot.lane.b32.xlu0 %v1090_v26, %s2264_s22 }
 0x497   : > { %v1881_v27 = vpop.f32.mrf.mxu1 }
 0x499   : > { %v1257_v28 = vpop.f32.mrf.mxu1 }
 0x49a   : > { %1270 = vrot.lane.b32.xlu1 %v1257_v28, %s2265_s26 }
 0x49b   : > { %v1891_v29 = vpop.f32.mrf.mxu1 }
 0x4d7   : > { %v1263_v30 = vpop.permute.xlu1 %1262 }
 0x4d8   : > { %v1273_v32 = vsel %vm589_vm2, %v756_v19, %v1263_v30 }
 0x508   : > { %v1267_v31 = vpop.permute.xlu0 %1266 }
 0x509   : > { %v1275_v33 = vsel %vm1274_vm5, %v1273_v32, %v1267_v31 }
 0x50c   : > { %v1271_v34 = vpop.permute.xlu1 %1270 }
 0x50d   : > { %v1277_v35 = vsel %vm1276_vm6, %v1275_v33, %v1271_v34 }
 0x50e   : > { %1901 = vmatmul.mubr.msk.f32.vlgmr.msra.gmra.mxu1 %vm512_vm1, %v1277_v35 }
 0x50f   : > { %1911 = vmatprep.mubr.msk.f32.mxu1 %vm2250_vm0, %v2249_v0  ;;  %1904 = vmatpush3.msra.mxu1 %v1404_v47 }
 0x510   : > { %1905 = vmatprep.subr.mxu1 %v2249_v0 }
 0x511   : > { %1906 = vmatpush3.msra.mxu1 %v1403_v48 }
 0x512   : > { %1907 = vmatprep.subr.mxu1 %v2249_v0 }
 0x5ce   : > { %v1358_v37 = vpop.f32.mrf.mxu1 }
 0x5cf   : > { %v1359_v38 = vadd.f32 %v1784_v36, %v1358_v37 }
 0x5d0   : > { %v1902_v39 = vpop.f32.mrf.mxu1 }
 0x5d1   : > { %v1362_v40 = vadd.f32 %v1359_v38, %v2474_v5  ;;  %v1402_v5 = vld [vmem:[%s2681_s8 + $0x8] sm:$0xff] }
 0x5d2   : > { %1908 = vmatpush3.msra.mxu1 %v1402_v5 }
 0x5d3   : > { %v1365_v41 = vsel %vm512_vm1, %v1362_v40, 0.0  ;;  %1909 = vmatprep.subr.mxu1 %v2249_v0 }
 0x5d4   : > { %1366 = vadd.xlane.f32.xlu0 %v1365_v41  ;;  %1910 = vmatpush3.msra.mxu1 %v1401_v49 }
 0x65d   : > { %v1367_v42 = vpop.xlane.xlu0 %1366 }
 0x65e   : > { %v1369_v43 = vmul.f32 0.03125, %v1367_v42 }
 0x660   : > { %v1370_v44 = vsub.f32 %v1362_v40, %v1369_v43 }
 0x662   : > { %v1371_v45 = vmul.f32 %v1370_v44, %v1370_v44  ;;  %v1383_v59 = vmul.f32 %v2586_v58, %v1370_v44 }
 0x664   : > { %v1372_v46 = vsel %vm512_vm1, %v1371_v45, 0.0 }
 0x665   : > { %1373 = vadd.xlane.f32.xlu1 %v1372_v46  ;;  %v1790_v46 = vld [vmem:[#allocation10] ss:$0 sm:$0xff] }
 0x6ee   : > { %v1374_v50 = vpop.xlane.xlu1 %1373 }
 0x6ef   : > { %v1376_v51 = vmul.f32 0.032258064, %v1374_v50 }
 0x6f1   : > { %2051 = vrsqrt.f32 %v1376_v51  ;;  %vm1386_vm7 = vcmp.eq.f32.partialorder %v1376_v51, inf  ;;  %v1389_v54 = vand.u32 2147483648, %v1376_v51  ;;  %vm1388_vm8 = vcmp.eq.f32.partialorder %v1376_v51, 0.0 }
 0x6fe   : > { %v2052_v52 = vpop.eup %2051 }
 0x6ff   : > { %v1385_v53 = vmul.f32 %v2052_v52, %v1376_v51 }
 0x701   : > { %v1387_v55 = vsel %vm1386_vm7, %v1376_v51, %v1385_v53 }
 0x702   : > { %v1390_v56 = vsel %vm1388_vm8, %v1389_v54, %v1387_v55 }
 0x703   : > { %v1391_v57 = vadd.f32 1e-06, %v1390_v56 }
 0x705   : > { %2053 = vrcp.f32 %v1391_v57 }
 0x712   : > { %v2054_v60 = vpop.eup %2053 }
 0x713   : > { %v1393_v62 = vmul.f32 %v2054_v60, %v1383_v59 }
 0x715   : > { %v2592_v63 = vadd.f32 %v2589_v61, %v1393_v62 }
 0x717   : > { %1912 = vmatmul.mubr.msk.f32.vlgmr.msra.gmra.mxu1 %vm512_vm1, %v2592_v63 }
 0x7d7   : > { %v1481_v19 = vpop.f32.mrf.mxu1 }
 0x7d8   : > { %v1482_v20 = vadd.f32 %v1788_v18, %v1481_v19 }
 0x7d9   : > { %v1913_v21 = vpop.f32.mrf.mxu1 }
 0x7da   : > { %v1486_v22 = vmul.f32 0.70710677, %v1482_v20  ;;  %v1485_v43 = vmul.f32 0.5, %v1482_v20 }
 0x7dc   : > { %v1487_v23 = vand.u32 2147483647, %v1486_v22  ;;  %vm1507_vm9 = vcmp.lt.f32.partialorder %v1486_v22, 0.0 }
 0x7de   : > { %v1488_v24 = vmul.f32 0.3275911, %v1487_v23  ;;  %v1501_v26 = vmul.f32 %v1487_v23, %v1487_v23 }
 0x7e0   : > { %v1489_v25 = vadd.f32 1.0, %v1488_v24  ;;  %v1502_v27 = vsub.f32 0.0, %v1501_v26 }
 0x7e2   : > { %2055 = vrcp.f32 %v1489_v25  ;;  %v1503_v30 = vmul.f32 1.442695, %v1502_v27 }
 0x7e4   : > { %2057 = vpow2.f32 %v1503_v30 }
 0x7ef   : > { %v2056_v28 = vpop.eup %2055 }
 0x7f0   : > { %v1492_v29 = vmul.f32 1.0614054, %v2056_v28 }
 0x7f1   : > { %v2058_v38 = vpop.eup %2057 }
 0x7f2   : > { %v1493_v31 = vadd.f32 -1.4531521, %v1492_v29 }
 0x7f4   : > { %v1494_v32 = vmul.f32 %v2056_v28, %v1493_v31 }
 0x7f6   : > { %v1495_v33 = vadd.f32 1.4214138, %v1494_v32 }
 0x7f8   : > { %v1496_v0 = vmul.f32 %v2056_v28, %v1495_v33 }
 0x7fa   : > { %v1497_v34 = vadd.f32 -0.28449672, %v1496_v0 }
 0x7fc   : > { %v1498_v35 = vmul.f32 %v2056_v28, %v1497_v34 }
 0x7fe   : > { %v1499_v36 = vadd.f32 0.2548296, %v1498_v35 }
 0x800   : > { %v1500_v37 = vmul.f32 %v2056_v28, %v1499_v36 }
 0x802   : > { %v1505_v39 = vmul.f32 %v2058_v38, %v1500_v37 }
 0x804   : > { %v1506_v40 = vsub.f32 1.0, %v1505_v39 }
 0x806   : > { %v1508_v41 = vsub.f32 0.0, %v1506_v40 }
 0x808   : > { %v1509_v42 = vsel %vm1507_vm9, %v1508_v41, %v1506_v40 }
 0x809   : > { %v1510_v44 = vadd.f32 1.0, %v1509_v42 }
 0x80b   : > { %v1511_v45 = vmul.f32 %v1510_v44, %v1485_v43 }
 0x80d   : > { %1947 = vmatmul.mubr.f32.vlgmr.msra.gmra.mxu0 %v1511_v45 }
 0x8cd   : > { %v1601_v47 = vpop.f32.mrf.mxu0 }
 0x8ce   : > { %v1602_v48 = vadd.f32 %v1790_v46, %v1601_v47 }
 0x8cf   : > { %v1948_v5 = vpop.f32.mrf.mxu0 }
 0x8d0   : > { %v1605_v49 = vadd.f32 %v1602_v48, %v2592_v63 }
 0x8d2   : > { %v1606_v50 = vsel %vm512_vm1, %v1605_v49, 0.0 }
 0x8d3   : > { %1607 = vadd.xlane.f32.xlu0 %v1606_v50 }
 0x95c   : > { %v1608_v51 = vpop.xlane.xlu0 %1607 }
 0x95d   : > { %v1609_v52 = vmul.f32 0.03125, %v1608_v51 }
 0x95f   : > { %v1610_v53 = vsub.f32 %v1605_v49, %v1609_v52 }
 0x961   : > { %v1611_v54 = vmul.f32 %v1610_v53, %v1610_v53  ;;  %v1616_v3 = vmul.f32 %v2586_v58, %v1610_v53 }
 0x963   : > { %v1612_v55 = vsel %vm512_vm1, %v1611_v54, 0.0 }
 0x964   : > { %1613 = vadd.xlane.f32.xlu0 %v1612_v55 }
 0x9ed   : > { %v1614_v56 = vpop.xlane.xlu0 %1613 }
 0x9ee   : > { %v1615_v57 = vmul.f32 0.032258064, %v1614_v56 }
 0x9f0   : > { %2059 = vrsqrt.f32 %v1615_v57  ;;  %vm1619_vm10 = vcmp.eq.f32.partialorder %v1615_v57, inf  ;;  %v1622_v62 = vand.u32 2147483648, %v1615_v57  ;;  %vm1621_vm11 = vcmp.eq.f32.partialorder %v1615_v57, 0.0 }
 0x9fd   : > { %v2060_v59 = vpop.eup %2059 }
 0x9fe   : > { %v1618_v60 = vmul.f32 %v2060_v59, %v1615_v57 }
 0xa00   : > { %v1620_v1 = vsel %vm1619_vm10, %v1615_v57, %v1618_v60 }
 0xa01   : > { %v1623_v63 = vsel %vm1621_vm11, %v1622_v62, %v1620_v1 }
 0xa02   : > { %v1624_v2 = vadd.f32 1e-06, %v1623_v63 }
 0xa04   : > { %2061 = vrcp.f32 %v1624_v2 }
 0xa11   : > { %v2062_v4 = vpop.eup %2061 }
 0xa12   : > { %v1626_v6 = vmul.f32 %v2062_v4, %v1616_v3 }
 0xa14   : > { %v1627_v7 = vadd.f32 %v2589_v61, %v1626_v6 }
 0xa16   : > { %1628 = vst.msk [vmem:[%s498_s29] sm:$0xff] %vm512_vm1, %v1627_v7 }
 0xa17 PF: > { %s26_s21 = sadd.s32 1, %s2241_s21  }
 0xa18   : > { %p23_p13 = scmp.ge.s32.totalorder %s26_s21, 4  }
 0xa1a   :  { %25 = sbr.rel (!%p23_p13) target bundleno = 4 (0x4), region = 126 }
 0xa1f   :  { %1648 = vsyncpa [#allocation3], 1 }
 0xa20   :  { %1650 = vsyncpa [#allocation3 + $0x1], 1 }
 0xa21   :  { %1651 = vsyncpa [#allocation5], 1 }
 0xa22   :  { %1652 = vsyncpa [#allocation8], 1 }
 0xa23   :  { %1653 = vsyncpa [#allocation11], 1 }

// kernel: transformer_enc.10
= control target key start
LH: loop header
LB: loop body
LE: loop exit
PB: predicated region body
PF: predicated region fallthrough
CT: control target
= control target key end

     0   :  { %s1944_s21 = smov 0   ;;  %s2197_s0 = inlined_call_operand.vmem [shape: f32[2,8,32], index: 0, kind: input, shape index: {}]   ;;  %s2198_s1 = inlined_call_operand.vmem [shape: f32[2,1,8], index: 1, kind: input, shape index: {}]   ;;  %s2199_s2 = inlined_call_operand.vmem [shape: f32[32,96], index: 2, kind: input, shape index: {}]   ;;  %s2200_s3 = inlined_call_operand.vmem [shape: f32[1,96], index: 3, kind: input, shape index: {}]   ;;  %s2201_s4 = inlined_call_operand.vmem [shape: f32[32,32], index: 4, kind: input, shape index: {}]   ;;  %s2202_s5 = inlined_call_operand.vmem [shape: f32[1,32], index: 5, kind: input, shape index: {}]   ;;  %s2203_s6 = inlined_call_operand.vmem [shape: f32[1,32], index: 6, kind: input, shape index: {}]   ;;  %s2204_s7 = inlined_call_operand.vmem [shape: f32[1,32], index: 7, kind: input, shape index: {}]   ;;  %s2205_s8 = inlined_call_operand.vmem [shape: f32[32,128], index: 8, kind: input, shape index: {}]   ;;  %s2206_s9 = inlined_call_operand.vmem [shape: f32[1,128], index: 9, kind: input, shape index: {}]   ;;  %s2207_s10 = inlined_call_operand.vmem [shape: f32[128,32], index: 10, kind: input, shape index: {}]   ;;  %s2208_s11 = inlined_call_operand.vmem [shape: f32[1,32], index: 11, kind: input, shape index: {}]   ;;  %s2209_s12 = inlined_call_operand.vmem [shape: f32[2,8,32], index: 12, kind: output, shape index: {}]  }
   0x1 LB: > { %s1615_s22 = sadd.s32 4294967295, %s1860_s21   ;;  %p1619_p0 = scmp.ge.s32.totalorder %s1860_s21, 1  ;;  %s1860_s21 = sphi %s1944_s21, %s22_s21  }
   0x2   : > { %p369_p1 = scmp.lt.s32.totalorder %s1860_s21, 3 }
   0x4   : > { %p370_p2 = pnand %p1619_p0, %p369_p1 }
   0x5   : > { %p412_p3 = scmp.lt.s32.totalorder (!%p370_p2), %s1615_s22, 1  ;;  %s1864_s19 = smov (!%p370_p2), 120  }
   0x6   : > { %373 = sbr.rel (%p370_p2) target bundleno = 2496 (0x9c0), region = 68  ;;  %s1865_s20 = smov (!%p370_p2), 96  }
   0x7   : > { %s1866_s23 = smov (!%p370_p2), 80   ;;  %s1867_s24 = smov (!%p370_p2), 88  }
   0x8   : > { %s1868_s25 = smov (!%p370_p2), 72   ;;  %s1869_s26 = smov (!%p370_p2), 112  }
   0x9   : > { %s1870_s27 = smov (!%p370_p2), 104   ;;  %s1872_s14 = smov (!%p370_p2), 56  }
   0xa   : > { %s1873_s15 = smov (!%p370_p2), 64   ;;  %s1875_s17 = smov (!%p370_p2), 40  }
   0xb   : > { %v428_v0 = vld [vmem:[%s2199_s2 + $0x18] sm:$0xff]  ;;  %v1862_v1 = vmov 0.0   ;;  %v427_v2 = vld [vmem:[%s2199_s2 + $0x10] sm:$0xff]  ;;  %vm1863_vm0 = vmmov 0   ;;  %s2211_s22 = smov (!%p412_p3, %s1615_s22), 1  ;;  %v426_v3 = vld [vmem:[%s2199_s2 + $0x8] sm:$0xff]  ;;  %v591_v17 = vlaneseq }
   0xc   : > { %1693 = vmatprep.subr.mxu1 %v1862_v1  ;;  %1701 = vmatprep.mubr.msk.f32.mxu1 %vm1863_vm0, %v1862_v1  ;;  %s1620_s29 = sshll.u32 %s2211_s22, 3  ;;  %v425_v4 = vld [vmem:[%s2199_s2] sm:$0xff]  ;;  %vm436_vm1 = vcmask 261120   ;;  %vm513_vm2 = vcmask 64512   ;;  %s418_s13 = scalar_lea.vmem %s2198_s1, %s2211_s22  ;;  %v1871_v21 = vmov 0   ;;  %vm1198_vm5 = vcmask 130048  }
   0xd   : > { %1694 = vmatpush3.msra.mxu1 %v428_v0  ;;  %1714 = vmatprep.subr.mxu0 %v1862_v1  ;;  %s415_s16 = scalar_lea.vmem %s2197_s0, %s1620_s29  ;;  %v1622_v6 = vld [vmem:[%s2200_s3] ss:$0 sm:$0xff]  ;;  %v592_v19 = vshrl.u32 %v591_v17, 7  ;;  %s1877_s30 = smov 16   ;;  %vm1200_vm6 = vcmask 195584  }
   0xe   : > { %1695 = vmatprep.subr.mxu1 %v1862_v1  ;;  %1716 = vmatprep.mubr.msk.f32.mxu0 %vm1863_vm0, %v1862_v1  ;;  %v1980_v5 = vld [vmem:[%s415_s16] sm:$0xff]  ;;  %s1874_s16 = smov 48  }
   0xf   : > { %1696 = vmatpush3.msra.mxu1 %v427_v2  ;;  %v424_v18 = vld [vmem:[%s418_s13] sm:$0x1]  ;;  %v593_v20 = vsub.s32 0, %v592_v19  ;;  %s1878_s13 = smov 24  }
  0x10   : > { %1697 = vmatprep.subr.mxu1 %v1862_v1  ;;  %vm589_vm3 = vcmp.eq.f32.partialorder %v424_v18, 0.0  ;;  %v1205_v18 = vld [vmem:[%s2201_s4 + $0x18] sm:$0xff] }
  0x11   : > { %1698 = vmatpush3.msra.mxu1 %v426_v3  ;;  %v590_v22 = vsel %vm589_vm3, 1, %v1871_v21 }
  0x12   : > { %1699 = vmatprep.subr.mxu1 %v1862_v1  ;;  %v594_v23 = vrot.slane %v590_v22, %v593_v20 }
  0x13   : > { %1700 = vmatpush3.msra.mxu1 %v425_v4 }
  0x14   : > { %1702 = vmatmul.mubr.msk.f32.vlgmr.msra.gmra.mxu1 %vm436_vm1, %v1980_v5  ;;  %1704 = vmatprep.subr.mxu1 %v1862_v1  ;;  %vm595_vm4 = vcmp.eq.s32.totalorder %v594_v23, 1  ;;  %v1204_v23 = vld [vmem:[%s2201_s4 + $0x10] sm:$0xff] }
  0x15   : > { %1706 = vmatprep.mubr.msk.f32.mxu1 %vm1863_vm0, %v1862_v1 }
  0xd4   : > { %v506_v7 = vpop.f32.mrf.mxu1 }
  0xd5   : > { %v1991_v8 = vadd.f32 %v1622_v6, %v506_v7 }
  0xd6   : > { %v1703_v9 = vpop.f32.mrf.mxu1 }
  0xd7   : > { %684 = vrot.lane.b32.xlu1 %v1991_v8, %s1864_s19  ;;  %511 = vrot.lane.b32.xlu0 %v1991_v8, %s1865_s20  ;;  %s1876_s20 = smov 8  }
  0xdb   : > { %853 = vrot.lane.b32.xlu1 %v1991_v8, %s1866_s23  ;;  %686 = vrot.lane.b32.xlu0 %v1991_v8, %s1867_s24  ;;  %s422_s23 = scalar_lea.vmem %s2209_s12, %s1620_s29 }
  0xdf   : > { %1020 = vrot.lane.b32.xlu1 %v1991_v8, %s1868_s25  ;;  %851 = vrot.lane.b32.xlu0 %v1991_v8, %s1869_s26 }
  0xe3   : > { %1018 = vrot.lane.b32.xlu0 %v1991_v8, %s1870_s27 }
 0x149   : > { %v685_v10 = vpop.permute.xlu1 %684  ;;  %v512_v11 = vpop.permute.xlu0 %511 }
 0x14a   : > { %1705 = vmatpush3.xpose.msk.msra.mxu1 %vm513_vm2, %v512_v11 }
 0x14b   : > { %1709 = vmatprep.subr.mxu1 %v1862_v1 }
 0x14d   : > { %1707 = vmatmul.mubr.msk.f32.vlgmr.msra.gmra.mxu1 %vm513_vm2, %v1991_v8  ;;  %v687_v12 = vpop.permute.xlu0 %686  ;;  %v854_v13 = vpop.permute.xlu1 %853 }
 0x14e   : > { %1715 = vmatpush3.xpose.msk.msra.mxu0 %vm513_vm2, %v687_v12  ;;  %1711 = vmatprep.mubr.msk.f32.mxu1 %vm1863_vm0, %v1862_v1 }
 0x14f   : > { %1724 = vmatprep.subr.mxu0 %v1862_v1 }
 0x151   : > { %1717 = vmatmul.mubr.msk.f32.vlgmr.msra.gmra.mxu0 %vm513_vm2, %v685_v10  ;;  %v852_v14 = vpop.permute.xlu0 %851  ;;  %v1021_v15 = vpop.permute.xlu1 %1020 }
 0x152   : > { %1725 = vmatpush3.xpose.msk.msra.mxu0 %vm513_vm2, %v854_v13  ;;  %1726 = vmatprep.mubr.msk.f32.mxu0 %vm1863_vm0, %v1862_v1 }
 0x153   : > { %1734 = vmatprep.subr.mxu0 %v1862_v1 }
 0x155   : > { %1727 = vmatmul.mubr.msk.f32.vlgmr.msra.gmra.mxu0 %vm513_vm2, %v852_v14  ;;  %v1019_v16 = vpop.permute.xlu0 %1018 }
 0x156   : > { %1735 = vmatpush3.xpose.msk.msra.mxu0 %vm513_vm2, %v1021_v15  ;;  %1736 = vmatprep.mubr.msk.f32.mxu0 %vm1863_vm0, %v1862_v1 }
 0x157   : > { %1766 = vmatprep.subr.mxu0 %v1862_v1 }
 0x159   : > { %1737 = vmatmul.mubr.msk.f32.vlgmr.msra.gmra.mxu0 %vm513_vm2, %v1019_v16 }
 0x15a   : > { %1798 = vmatprep.mubr.msk.f32.mxu0 %vm1863_vm0, %v1862_v1 }
 0x20d   : > { %v584_v24 = vpop.f32.mrf.mxu1 }
 0x20e   : > { %v588_v25 = vmul.f32 0.35355338, %v584_v24  ;;  %v1203_v24 = vld [vmem:[%s2201_s4 + $0x8] sm:$0xff] }
 0x20f   : > { %v1708_v26 = vpop.f32.mrf.mxu1 }
 0x210   : > { %v596_v27 = vsel %vm595_vm4, -10000.0, %v588_v25  ;;  %v1202_v25 = vld [vmem:[%s2201_s4] sm:$0xff] }
 0x211   : > { %v758_v28 = vpop.f32.mrf.mxu0  ;;  %v597_v29 = vsel %vm513_vm2, %v596_v27, -inf }
 0x212   : > { %v762_v30 = vmul.f32 0.35355338, %v758_v28  ;;  %598 = vmax.xlane.f32.xlu1 %v597_v29 }
 0x213   : > { %v1718_v31 = vpop.f32.mrf.mxu0 }
 0x214   : > { %v763_v32 = vsel %vm595_vm4, -10000.0, %v762_v30 }
 0x215   : > { %v925_v33 = vpop.f32.mrf.mxu0  ;;  %v764_v34 = vsel %vm513_vm2, %v763_v32, -inf }
 0x216   : > { %v929_v35 = vmul.f32 0.35355338, %v925_v33  ;;  %765 = vmax.xlane.f32.xlu0 %v764_v34 }
 0x217   : > { %v1728_v36 = vpop.f32.mrf.mxu0 }
 0x218   : > { %v930_v37 = vsel %vm595_vm4, -10000.0, %v929_v35  ;;  %v1636_v36 = vld [vmem:[%s2202_s5] ss:$0 sm:$0xff] }
 0x219   : > { %v1092_v38 = vpop.f32.mrf.mxu0  ;;  %v931_v39 = vsel %vm513_vm2, %v930_v37, -inf }
 0x21a   : > { %v1096_v40 = vmul.f32 0.35355338, %v1092_v38  ;;  %932 = vmax.xlane.f32.xlu0 %v931_v39 }
 0x21b   : > { %v1738_v41 = vpop.f32.mrf.mxu0 }
 0x21c   : > { %v1097_v42 = vsel %vm595_vm4, -10000.0, %v1096_v40 }
 0x21d   : > { %v1098_v43 = vsel %vm513_vm2, %v1097_v42, -inf }
 0x21e   : > { %1099 = vmax.xlane.f32.xlu1 %v1098_v43 }
 0x22f   : > { %775 = vrot.lane.b32.xlu1 %v1991_v8, %s1872_s14 }
 0x29b   : > { %v599_v44 = vpop.xlane.xlu1 %598 }
 0x29c   : > { %v600_v45 = vsub.f32 %v596_v27, %v599_v44 }
 0x29e   : > { %v601_v46 = vmul.f32 1.442695, %v600_v45 }
 0x29f   : > { %v766_v47 = vpop.xlane.xlu0 %765 }
 0x2a0   : > { %1826 = vpow2.f32 %v601_v46  ;;  %v767_v48 = vsub.f32 %v763_v32, %v766_v47  ;;  %v1328_v47 = vld [vmem:[%s2205_s8 + $0x18] sm:$0xff] }
 0x2a2   : > { %v768_v49 = vmul.f32 1.442695, %v767_v48  ;;  %v1327_v48 = vld [vmem:[%s2205_s8 + $0x10] sm:$0xff] }
 0x2a3   : > { %v933_v59 = vpop.xlane.xlu0 %932 }
 0x2a4   : > { %1828 = vpow2.f32 %v768_v49  ;;  %v934_v60 = vsub.f32 %v930_v37, %v933_v59  ;;  %v1325_v49 = vld [vmem:[%s2205_s8] sm:$0xff] }
 0x2a6   : > { %v935_v61 = vmul.f32 1.442695, %v934_v60 }
 0x2a7   : > { %v1100_v50 = vpop.xlane.xlu1 %1099 }
 0x2a8   : > { %v1101_v51 = vsub.f32 %v1097_v42, %v1100_v50 }
 0x2aa   : > { %v1102_v52 = vmul.f32 1.442695, %v1101_v51 }
 0x2ab   : > { %v776_v0 = vpop.permute.xlu1 %775 }
 0x2ac   : > { %1830 = vpow2.f32 %v1102_v52 }
 0x2ad   : > { %v1827_v53 = vpop.eup %1826  ;;  %1832 = vpow2.f32 %v935_v61  ;;  %v2107_v61 = vld [vmem:[%s2204_s7] ss:$0 sm:$0xff] }
 0x2ae   : > { %v603_v54 = vsel %vm513_vm2, %v1827_v53, 0.0 }
 0x2af   : > { %604 = vadd.xlane.f32.xlu0 %v603_v54 }
 0x2b1   : > { %v1829_v55 = vpop.eup %1828 }
 0x2b2   : > { %v770_v56 = vsel %vm513_vm2, %v1829_v55, 0.0 }
 0x2b3   : > { %771 = vadd.xlane.f32.xlu1 %v770_v56 }
 0x2b9   : > { %v1831_v57 = vpop.eup %1830 }
 0x2ba   : > { %v1104_v58 = vsel %vm513_vm2, %v1831_v57, 0.0  ;;  %v1833_v62 = vpop.eup %1832 }
 0x2bb   : > { %1105 = vadd.xlane.f32.xlu1 %v1104_v58  ;;  %v937_v63 = vsel %vm513_vm2, %v1833_v62, 0.0  ;;  %v2101_v58 = vld [vmem:[%s2203_s6] ss:$0 sm:$0xff] }
 0x2c5   : > { %608 = vrot.lane.b32.xlu0 %v1991_v8, %s1873_s15 }
 0x2cc   : > { %942 = vrot.lane.b32.xlu1 %v1991_v8, %s1874_s16 }
 0x2e4   : > { %938 = vadd.xlane.f32.xlu0 %v937_v63 }
 0x2fa   : > { %1109 = vrot.lane.b32.xlu0 %v1991_v8, %s1875_s17 }
 0x338   : > { %v605_v2 = vpop.xlane.xlu0 %604 }
 0x339   : > { %1834 = vrcp.f32 %v605_v2  ;;  %v1450_v2 = vld [vmem:[%s2207_s10 + $0x70] sm:$0xff] }
 0x33c   : > { %v609_v3 = vpop.permute.xlu0 %608  ;;  %v772_v4 = vpop.xlane.xlu1 %771 }
 0x33d   : > { %1836 = vrcp.f32 %v772_v4  ;;  %1710 = vmatpush3.msra.mxu1 %v609_v3  ;;  %v1449_v3 = vld [vmem:[%s2207_s10 + $0x68] sm:$0xff]  ;;  %v1448_v4 = vld [vmem:[%s2207_s10 + $0x60] sm:$0xff] }
 0x33e   : > { %1719 = vmatprep.subr.mxu1 %v1862_v1 }
 0x344   : > { %v1106_v7 = vpop.xlane.xlu1 %1105 }
 0x346   : > { %v1835_v6 = vpop.eup %1834 }
 0x347   : > { %v607_v9 = vmul.f32 %v1835_v6, %v1827_v53  ;;  %v1447_v6 = vld [vmem:[%s2207_s10 + $0x58] sm:$0xff] }
 0x348   : > { %v943_v11 = vpop.permute.xlu1 %942 }
 0x349   : > { %1712 = vmatmul.mubr.msk.f32.vlgmr.msra.gmra.mxu1 %vm513_vm2, %v607_v9  ;;  %v1445_v9 = vld [vmem:[%s2207_s10 + $0x48] sm:$0xff] }
 0x34a   : > { %v1837_v10 = vpop.eup %1836  ;;  %1720 = vmatpush3.msra.mxu1 %v776_v0  ;;  %1721 = vmatprep.mubr.msk.f32.mxu1 %vm1863_vm0, %v1862_v1  ;;  %v1451_v0 = vld [vmem:[%s2207_s10 + $0x78] sm:$0xff] }
 0x34b   : > { %1729 = vmatprep.subr.mxu1 %v1862_v1  ;;  %v774_v8 = vmul.f32 %v1837_v10, %v1829_v55  ;;  %1767 = vmatpush3.msra.mxu0 %v1451_v0  ;;  %v1444_v10 = vld [vmem:[%s2207_s10 + $0x40] sm:$0xff] }
 0x34c   : > { %1768 = vmatprep.subr.mxu0 %v1862_v1 }
 0x34d   : > { %1722 = vmatmul.mubr.msk.f32.vlgmr.msra.gmra.mxu1 %vm513_vm2, %v774_v8  ;;  %1769 = vmatpush3.msra.mxu0 %v1450_v2  ;;  %v1443_v8 = vld [vmem:[%s2207_s10 + $0x38] sm:$0xff] }
 0x34e   : > { %1730 = vmatpush3.msra.mxu1 %v943_v11  ;;  %1731 = vmatprep.mubr.msk.f32.mxu1 %vm1863_vm0, %v1862_v1  ;;  %v1442_v11 = vld [vmem:[%s2207_s10 + $0x30] sm:$0xff] }
 0x34f   : > { %1739 = vmatprep.subr.mxu1 %v1862_v1  ;;  %1770 = vmatprep.subr.mxu0 %v1862_v1 }
 0x350   : > { %1771 = vmatpush3.msra.mxu0 %v1449_v3 }
 0x351   : > { %1772 = vmatprep.subr.mxu0 %v1862_v1 }
 0x352   : > { %1773 = vmatpush3.msra.mxu0 %v1448_v4 }
 0x353   : > { %1774 = vmatprep.subr.mxu0 %v1862_v1 }
 0x354   : > { %1775 = vmatpush3.msra.mxu0 %v1447_v6 }
 0x355   : > { %1776 = vmatprep.subr.mxu0 %v1862_v1 }
 0x36d   : > { %v939_v12 = vpop.xlane.xlu0 %938 }
 0x36e   : > { %1838 = vrcp.f32 %v939_v12  ;;  %v1441_v12 = vld [vmem:[%s2207_s10 + $0x28] sm:$0xff] }
 0x36f   : > { %1840 = vrcp.f32 %v1106_v7  ;;  %v1446_v7 = vld [vmem:[%s2207_s10 + $0x50] sm:$0xff] }
 0x370   : > { %1777 = vmatpush3.msra.mxu0 %v1446_v7 }
 0x371   : > { %v1110_v16 = vpop.permute.xlu0 %1109  ;;  %1778 = vmatprep.subr.mxu0 %v1862_v1 }
 0x372   : > { %1779 = vmatpush3.msra.mxu0 %v1445_v9 }
 0x373   : > { %1780 = vmatprep.subr.mxu0 %v1862_v1 }
 0x374   : > { %1781 = vmatpush3.msra.mxu0 %v1444_v10 }
 0x375   : > { %1782 = vmatprep.subr.mxu0 %v1862_v1 }
 0x376   : > { %1783 = vmatpush3.msra.mxu0 %v1443_v8 }
 0x377   : > { %1784 = vmatprep.subr.mxu0 %v1862_v1 }
 0x378   : > { %1785 = vmatpush3.msra.mxu0 %v1442_v11 }
 0x379   : > { %1786 = vmatprep.subr.mxu0 %v1862_v1 }
 0x37a   : > { %1787 = vmatpush3.msra.mxu0 %v1441_v12 }
 0x37b   : > { %v1839_v13 = vpop.eup %1838  ;;  %1788 = vmatprep.subr.mxu0 %v1862_v1 }
 0x37c   : > { %v941_v14 = vmul.f32 %v1839_v13, %v1833_v62  ;;  %v1841_v15 = vpop.eup %1840  ;;  %v1440_v13 = vld [vmem:[%s2207_s10 + $0x20] sm:$0xff] }
 0x37d   : > { %v1108_v17 = vmul.f32 %v1841_v15, %v1831_v57  ;;  %1789 = vmatpush3.msra.mxu0 %v1440_v13  ;;  %v1438_v15 = vld [vmem:[%s2207_s10 + $0x10] sm:$0xff] }
 0x37e   : > { %1732 = vmatmul.mubr.msk.f32.vlgmr.msra.gmra.mxu1 %vm513_vm2, %v941_v14  ;;  %1790 = vmatprep.subr.mxu0 %v1862_v1  ;;  %v1439_v14 = vld [vmem:[%s2207_s10 + $0x18] sm:$0xff] }
 0x37f   : > { %1740 = vmatpush3.msra.mxu1 %v1110_v16  ;;  %1741 = vmatprep.mubr.msk.f32.mxu1 %vm1863_vm0, %v1862_v1  ;;  %v1437_v16 = vld [vmem:[%s2207_s10 + $0x8] sm:$0xff] }
 0x380   : > { %1744 = vmatprep.subr.mxu1 %v1862_v1  ;;  %1791 = vmatpush3.msra.mxu0 %v1439_v14 }
 0x381   : > { %1792 = vmatprep.subr.mxu0 %v1862_v1 }
 0x382   : > { %1742 = vmatmul.mubr.msk.f32.vlgmr.msra.gmra.mxu1 %vm513_vm2, %v1108_v17  ;;  %1793 = vmatpush3.msra.mxu0 %v1438_v15  ;;  %v1436_v17 = vld [vmem:[%s2207_s10] sm:$0xff] }
 0x383   : > { %1752 = vmatprep.mubr.msk.f32.mxu1 %vm1863_vm0, %v1862_v1  ;;  %1745 = vmatpush3.msra.mxu1 %v1205_v18  ;;  %v1640_v18 = vld [vmem:[%s2206_s9] ss:$0 sm:$0xff] }
 0x384   : > { %1746 = vmatprep.subr.mxu1 %v1862_v1  ;;  %1794 = vmatprep.subr.mxu0 %v1862_v1 }
 0x385   : > { %1747 = vmatpush3.msra.mxu1 %v1204_v23  ;;  %1795 = vmatpush3.msra.mxu0 %v1437_v16 }
 0x386   : > { %1748 = vmatprep.subr.mxu1 %v1862_v1  ;;  %1796 = vmatprep.subr.mxu0 %v1862_v1 }
 0x387   : > { %1749 = vmatpush3.msra.mxu1 %v1203_v24  ;;  %1797 = vmatpush3.msra.mxu0 %v1436_v17 }
 0x388   : > { %1750 = vmatprep.subr.mxu1 %v1862_v1 }
 0x389   : > { %1751 = vmatpush3.msra.mxu1 %v1202_v25 }
 0x38a   : > { %1755 = vmatprep.subr.mxu1 %v1862_v1 }
 0x409   : > { %v680_v19 = vpop.f32.mrf.mxu1 }
 0x40b   : > { %v1713_v20 = vpop.f32.mrf.mxu1 }
 0x40d   : > { %v847_v21 = vpop.f32.mrf.mxu1 }
 0x40e   : > { %1186 = vrot.lane.b32.xlu1 %v847_v21, %s1876_s20 }
 0x40f   : > { %v1723_v22 = vpop.f32.mrf.mxu1 }
 0x43e   : > { %v1014_v26 = vpop.f32.mrf.mxu1 }
 0x43f   : > { %1190 = vrot.lane.b32.xlu0 %v1014_v26, %s1877_s30 }
 0x440   : > { %v1733_v27 = vpop.f32.mrf.mxu1 }
 0x442   : > { %v1181_v28 = vpop.f32.mrf.mxu1 }
 0x443   : > { %1194 = vrot.lane.b32.xlu1 %v1181_v28, %s1878_s13 }
 0x444   : > { %v1743_v29 = vpop.f32.mrf.mxu1 }
 0x480   : > { %v1187_v30 = vpop.permute.xlu1 %1186 }
 0x481   : > { %v1197_v32 = vsel %vm513_vm2, %v680_v19, %v1187_v30 }
 0x4b1   : > { %v1191_v31 = vpop.permute.xlu0 %1190 }
 0x4b2   : > { %v1199_v33 = vsel %vm1198_vm5, %v1197_v32, %v1191_v31 }
 0x4b5   : > { %v1195_v34 = vpop.permute.xlu1 %1194 }
 0x4b6   : > { %v1201_v35 = vsel %vm1200_vm6, %v1199_v33, %v1195_v34 }
 0x4b7   : > { %1753 = vmatmul.mubr.msk.f32.vlgmr.msra.gmra.mxu1 %vm436_vm1, %v1201_v35 }
 0x4b8   : > { %1763 = vmatprep.mubr.msk.f32.mxu1 %vm1863_vm0, %v1862_v1  ;;  %1756 = vmatpush3.msra.mxu1 %v1328_v47 }
 0x4b9   : > { %1757 = vmatprep.subr.mxu1 %v1862_v1 }
 0x4ba   : > { %1758 = vmatpush3.msra.mxu1 %v1327_v48 }
 0x4bb   : > { %1759 = vmatprep.subr.mxu1 %v1862_v1 }
 0x577   : > { %v1282_v37 = vpop.f32.mrf.mxu1 }
 0x578   : > { %v1283_v38 = vadd.f32 %v1636_v36, %v1282_v37 }
 0x579   : > { %v1754_v39 = vpop.f32.mrf.mxu1 }
 0x57a   : > { %v1286_v40 = vadd.f32 %v1283_v38, %v1980_v5  ;;  %v1326_v5 = vld [vmem:[%s2205_s8 + $0x8] sm:$0xff] }
 0x57b   : > { %1760 = vmatpush3.msra.mxu1 %v1326_v5 }
 0x57c   : > { %v1289_v41 = vsel %vm436_vm1, %v1286_v40, 0.0  ;;  %1761 = vmatprep.subr.mxu1 %v1862_v1 }
 0x57d   : > { %1290 = vadd.xlane.f32.xlu0 %v1289_v41  ;;  %1762 = vmatpush3.msra.mxu1 %v1325_v49 }
 0x606   : > { %v1291_v42 = vpop.xlane.xlu0 %1290 }
 0x607   : > { %v1293_v43 = vmul.f32 0.03125, %v1291_v42 }
 0x609   : > { %v1294_v44 = vsub.f32 %v1286_v40, %v1293_v43 }
 0x60b   : > { %v1295_v45 = vmul.f32 %v1294_v44, %v1294_v44  ;;  %v1307_v59 = vmul.f32 %v2101_v58, %v1294_v44 }
 0x60d   : > { %v1296_v46 = vsel %vm436_vm1, %v1295_v45, 0.0 }
 0x60e   : > { %1297 = vadd.xlane.f32.xlu1 %v1296_v46  ;;  %v1642_v46 = vld [vmem:[%s2208_s11] ss:$0 sm:$0xff] }
 0x697   : > { %v1298_v50 = vpop.xlane.xlu1 %1297 }
 0x698   : > { %v1300_v51 = vmul.f32 0.032258064, %v1298_v50 }
 0x69a   : > { %1842 = vrsqrt.f32 %v1300_v51  ;;  %vm1310_vm7 = vcmp.eq.f32.partialorder %v1300_v51, inf  ;;  %v1313_v54 = vand.u32 2147483648, %v1300_v51  ;;  %vm1312_vm8 = vcmp.eq.f32.partialorder %v1300_v51, 0.0 }
 0x6a7   : > { %v1843_v52 = vpop.eup %1842 }
 0x6a8   : > { %v1309_v53 = vmul.f32 %v1843_v52, %v1300_v51 }
 0x6aa   : > { %v1311_v55 = vsel %vm1310_vm7, %v1300_v51, %v1309_v53 }
 0x6ab   : > { %v1314_v56 = vsel %vm1312_vm8, %v1313_v54, %v1311_v55 }
 0x6ac   : > { %v1315_v57 = vadd.f32 1e-06, %v1314_v56 }
 0x6ae   : > { %1844 = vrcp.f32 %v1315_v57 }
 0x6bb   : > { %v1845_v60 = vpop.eup %1844 }
 0x6bc   : > { %v1317_v62 = vmul.f32 %v1845_v60, %v1307_v59 }
 0x6be   : > { %v2110_v63 = vadd.f32 %v2107_v61, %v1317_v62 }
 0x6c0   : > { %1764 = vmatmul.mubr.msk.f32.vlgmr.msra.gmra.mxu1 %vm436_vm1, %v2110_v63 }
 0x780   : > { %v1405_v19 = vpop.f32.mrf.mxu1 }
 0x781   : > { %v1406_v20 = vadd.f32 %v1640_v18, %v1405_v19 }
 0x782   : > { %v1765_v21 = vpop.f32.mrf.mxu1 }
 0x783   : > { %v1410_v22 = vmul.f32 0.70710677, %v1406_v20  ;;  %v1409_v43 = vmul.f32 0.5, %v1406_v20 }
 0x785   : > { %v1411_v23 = vand.u32 2147483647, %v1410_v22  ;;  %vm1431_vm9 = vcmp.lt.f32.partialorder %v1410_v22, 0.0 }
 0x787   : > { %v1412_v24 = vmul.f32 0.3275911, %v1411_v23  ;;  %v1425_v26 = vmul.f32 %v1411_v23, %v1411_v23 }
 0x789   : > { %v1413_v25 = vadd.f32 1.0, %v1412_v24  ;;  %v1426_v27 = vsub.f32 0.0, %v1425_v26 }
 0x78b   : > { %1846 = vrcp.f32 %v1413_v25  ;;  %v1427_v30 = vmul.f32 1.442695, %v1426_v27 }
 0x78d   : > { %1848 = vpow2.f32 %v1427_v30 }
 0x798   : > { %v1847_v28 = vpop.eup %1846 }
 0x799   : > { %v1416_v29 = vmul.f32 1.0614054, %v1847_v28 }
 0x79a   : > { %v1849_v38 = vpop.eup %1848 }
 0x79b   : > { %v1417_v31 = vadd.f32 -1.4531521, %v1416_v29 }
 0x79d   : > { %v1418_v1 = vmul.f32 %v1847_v28, %v1417_v31 }
 0x79f   : > { %v1419_v32 = vadd.f32 1.4214138, %v1418_v1 }
 0x7a1   : > { %v1420_v33 = vmul.f32 %v1847_v28, %v1419_v32 }
 0x7a3   : > { %v1421_v34 = vadd.f32 -0.28449672, %v1420_v33 }
 0x7a5   : > { %v1422_v35 = vmul.f32 %v1847_v28, %v1421_v34 }
 0x7a7   : > { %v1423_v36 = vadd.f32 0.2548296, %v1422_v35 }
 0x7a9   : > { %v1424_v37 = vmul.f32 %v1847_v28, %v1423_v36 }
 0x7ab   : > { %v1429_v39 = vmul.f32 %v1849_v38, %v1424_v37 }
 0x7ad   : > { %v1430_v40 = vsub.f32 1.0, %v1429_v39 }
 0x7af   : > { %v1432_v41 = vsub.f32 0.0, %v1430_v40 }
 0x7b1   : > { %v1433_v42 = vsel %vm1431_vm9, %v1432_v41, %v1430_v40 }
 0x7b2   : > { %v1434_v44 = vadd.f32 1.0, %v1433_v42 }
 0x7b4   : > { %v1435_v45 = vmul.f32 %v1434_v44, %v1409_v43 }
 0x7b6   : > { %1799 = vmatmul.mubr.f32.vlgmr.msra.gmra.mxu0 %v1435_v45 }
 0x876   : > { %v1525_v47 = vpop.f32.mrf.mxu0 }
 0x877   : > { %v1526_v48 = vadd.f32 %v1642_v46, %v1525_v47 }
 0x878   : > { %v1800_v5 = vpop.f32.mrf.mxu0 }
 0x879   : > { %v1529_v49 = vadd.f32 %v1526_v48, %v2110_v63 }
 0x87b   : > { %v1530_v50 = vsel %vm436_vm1, %v1529_v49, 0.0 }
 0x87c   : > { %1531 = vadd.xlane.f32.xlu0 %v1530_v50 }
 0x905   : > { %v1532_v51 = vpop.xlane.xlu0 %1531 }
 0x906   : > { %v1533_v52 = vmul.f32 0.03125, %v1532_v51 }
 0x908   : > { %v1534_v53 = vsub.f32 %v1529_v49, %v1533_v52 }
 0x90a   : > { %v1535_v54 = vmul.f32 %v1534_v53, %v1534_v53  ;;  %v1540_v3 = vmul.f32 %v2101_v58, %v1534_v53 }
 0x90c   : > { %v1536_v55 = vsel %vm436_vm1, %v1535_v54, 0.0 }
 0x90d   : > { %1537 = vadd.xlane.f32.xlu0 %v1536_v55 }
 0x996   : > { %v1538_v56 = vpop.xlane.xlu0 %1537 }
 0x997   : > { %v1539_v57 = vmul.f32 0.032258064, %v1538_v56 }
 0x999   : > { %1850 = vrsqrt.f32 %v1539_v57  ;;  %vm1543_vm10 = vcmp.eq.f32.partialorder %v1539_v57, inf  ;;  %v1546_v62 = vand.u32 2147483648, %v1539_v57  ;;  %vm1545_vm11 = vcmp.eq.f32.partialorder %v1539_v57, 0.0 }
 0x9a6   : > { %v1851_v59 = vpop.eup %1850 }
 0x9a7   : > { %v1542_v60 = vmul.f32 %v1851_v59, %v1539_v57 }
 0x9a9   : > { %v1544_v0 = vsel %vm1543_vm10, %v1539_v57, %v1542_v60 }
 0x9aa   : > { %v1547_v63 = vsel %vm1545_vm11, %v1546_v62, %v1544_v0 }
 0x9ab   : > { %v1548_v2 = vadd.f32 1e-06, %v1547_v63 }
 0x9ad   : > { %1852 = vrcp.f32 %v1548_v2 }
 0x9ba   : > { %v1853_v4 = vpop.eup %1852 }
 0x9bb   : > { %v1550_v6 = vmul.f32 %v1853_v4, %v1540_v3 }
 0x9bd   : > { %v1551_v7 = vadd.f32 %v2107_v61, %v1550_v6 }
 0x9bf   : > { %1552 = vst.msk [vmem:[%s422_s23] sm:$0xff] %vm436_vm1, %v1551_v7 }
 0x9c0 PF: > { %s22_s21 = sadd.s32 1, %s1860_s21  }
 0x9c1   : > { %p19_p4 = scmp.ge.s32.totalorder %s22_s21, 4  }
 0x9c3   :  { %21 = sbr.rel (!%p19_p4) target bundleno = 1 (0x1), region = 101 }

// kernel: transformer_enc.11
= control target key start
LH: loop header
LB: loop body
LE: loop exit
PB: predicated region body
PF: predicated region fallthrough
CT: control target
= control target key end

     0   :  { %17 = vsyncpa [#allocation3], 0  ;;  %s2444_s0 = inlined_call_operand.vmem [shape: f32[2,8,32], index: 0, kind: input, shape index: {}]   ;;  %s2445_s1 = inlined_call_operand.vmem [shape: f32[2,1,8], index: 1, kind: input, shape index: {}]   ;;  %s2446_s2 = inlined_call_operand.vmem [shape: f32[32,96], index: 2, kind: input, shape index: {}]   ;;  %s2447_s3 = inlined_call_operand.vmem [shape: f32[1,96], index: 3, kind: input, shape index: {}]   ;;  %s2448_s4 = inlined_call_operand.vmem [shape: f32[32,32], index: 4, kind: input, shape index: {}]   ;;  %s2449_s5 = inlined_call_operand.vmem [shape: f32[1,32], index: 5, kind: input, shape index: {}]   ;;  %s2450_s6 = inlined_call_operand.vmem [shape: f32[1,32], index: 6, kind: input, shape index: {}]   ;;  %s2451_s7 = inlined_call_operand.hbm [shape: f32[1,32], index: 7, kind: input, shape index: {}]   ;;  %s2452_s8 = inlined_call_operand.vmem [shape: f32[32,128], index: 8, kind: input, shape index: {}]   ;;  %s2453_s9 = inlined_call_operand.hbm [shape: f32[1,128], index: 9, kind: input, shape index: {}]   ;;  %s2454_s10 = inlined_call_operand.vmem [shape: f32[128,32], index: 10, kind: input, shape index: {}]   ;;  %s2455_s11 = inlined_call_operand.hbm [shape: f32[1,32], index: 11, kind: input, shape index: {}]   ;;  %s2456_s12 = inlined_call_operand.vmem [shape: f32[2,8,32], index: 12, kind: output, shape index: {}]  }
   0x1   :  { %18 = vsyncpa [#allocation5], 0  ;;  %s2139_s21 = smov 0  }
   0x2 LB: > { %s2145_s22 = sadd.s32 4294967295, %s2052_s21   ;;  %p1686_p0 = scmp.ge.s32.totalorder %s2052_s21, 1  ;;  %s2052_s21 = sphi %s2139_s21, %s24_s21  }
   0x3   : > { %p317_p1 = scmp.lt.s32.totalorder %s2052_s21, 3  ;;  %p2457_p2 = scmp.eq.s32.totalorder %s2145_s22, 0 }
   0x4   : > { %s2054_s24 = smov [#allocation4]   ;;  %s2055_s26 = smov [#allocation2]  }
   0x5   : > { %p2150_p3 = pnand %p1686_p0, %p317_p1  ;;  %s359_s25 = sshll.u32 %s2054_s24, 4  ;;  %s360_s25 = int_to_ptr.vmem [resolvable:$true] %s359_s25 }
   0x6   : > { %s345_s27 = sshll.u32 %s2055_s26, 4  ;;  %s2056_s28 = smov [#allocation6]   ;;  %s346_s27 = int_to_ptr.vmem [resolvable:$true] %s345_s27 }
   0x7   : > { %p1888_p4 = pneg %p2150_p3  ;;  %s373_s29 = sshll.u32 %s2056_s28, 4  ;;  %s2162_s29 = int_to_ptr.vmem [resolvable:$true] %s373_s29 }
   0x8   : > { %s1971_s13 = scalar_lea.vmem %s360_s25, 16  ;;  %s1978_s14 = scalar_lea.vmem %s360_s25, 32 }
   0x9   : > { %p2158_p5 = pnand %p2457_p2, %p1888_p4  ;;  %p1972_p7 = scmp.ne.s32.totalorder %s360_s25, %s1971_s13 }
   0xa   : > { %p1979_p10 = scmp.lt.s32.totalorder %s360_s25, %s360_s25  ;;  %p1980_p11 = scmp.lt.s32.totalorder %s1978_s14, %s1971_s13 }
   0xb   : > { %p1962_p6 = pneg %p2158_p5 }
   0xc   : > { %p1981_p12 = por %p1980_p11, %p1979_p10 }
   0xd   : > { %p1974_p8 = pnand %p1972_p7, %p1962_p6 }
   0xf   : > { %p1975_p9 = pneg %p1974_p8 }
  0x11   : > { %p1982_p13 = pnand %p1981_p12, %p1975_p9 }
  0x13   : > { %1985 = shalt.err (!%p1982_p13)
}
  0x14   : > { %1894 = dma.hbm_to_vmem [thread:$0]  (!%p2158_p5), %s2453_s9, 16, %s360_s25, [#allocation5]  }
  0x15   : > { %s1997_s17 = scalar_lea.vmem %s346_s27, 16  ;;  %s2004_s18 = scalar_lea.vmem %s346_s27, 32 }
  0x16   : > { %p1998_p0 = scmp.ne.s32.totalorder %s346_s27, %s1997_s17  ;;  %p2005_p7 = scmp.lt.s32.totalorder %s346_s27, %s346_s27 }
  0x17   : > { %p2006_p8 = scmp.lt.s32.totalorder %s2004_s18, %s1997_s17 }
  0x18   : > { %p2000_p1 = pnand %p1998_p0, %p1962_p6 }
  0x19   : > { %p2007_p2 = por %p2006_p8, %p2005_p7 }
  0x1a   : > { %p2001_p4 = pneg %p2000_p1 }
  0x1c   : > { %p2008_p10 = pnand %p2007_p2, %p2001_p4 }
  0x1e   : > { %2011 = shalt.err (!%p2008_p10)
}
  0x1f   : > { %1891 = dma.hbm_to_vmem [thread:$0]  (!%p2158_p5), %s2451_s7, 16, %s346_s27, [#allocation3]  }
  0x20   : > { %s2023_s24 = scalar_lea.vmem %s2162_s29, 16  ;;  %s2030_s25 = scalar_lea.vmem %s2162_s29, 32 }
  0x21   : > { %p2024_p9 = scmp.ne.s32.totalorder %s2162_s29, %s2023_s24  ;;  %p2031_p2 = scmp.lt.s32.totalorder %s2162_s29, %s2162_s29 }
  0x22   : > { %p2032_p13 = scmp.lt.s32.totalorder %s2030_s25, %s2023_s24 }
  0x23   : > { %p2026_p11 = pnand %p2024_p9, %p1962_p6 }
  0x24   : > { %p2033_p0 = por %p2032_p13, %p2031_p2 }
  0x25   : > { %p2027_p12 = pneg %p2026_p11 }
  0x27   : > { %p2034_p1 = pnand %p2033_p0, %p2027_p12 }
  0x29   : > { %2037 = shalt.err (!%p2034_p1)
}
  0x2a   : > { %1897 = dma.hbm_to_vmem [thread:$0]  (!%p2158_p5), %s2455_s11, 16, %s2162_s29, [#allocation5]  }
  0x2b   : > { %399 = sbr.rel (%p2150_p3) target bundleno = 2539 (0x9eb), region = 68  ;;  %p2460_p6 = scmp.eq.s32.totalorder (!%p2150_p3), %s2145_s22, 0 }
  0x30   : > { %2043 = dma.done.wait (%p2460_p6), [#allocation3], 16   ;;  %p2461_p4 = pmov %p2460_p6 }
  0x32   : > { %2045 = vsyncadd (%p2461_p4), [#allocation3], 4294967280  ;;  %p2462_p7 = pmov %p2461_p4 }
  0x33   : > { %p2463_p8 = pmov %p2461_p4 }
  0x34   : > { %2047 = dma.done.wait (%p2462_p7), [#allocation5], 32  }
  0x35   : > { %2049 = vsyncadd (%p2463_p8), [#allocation5], 4294967264  ;;  %p450_p10 = scmp.lt.s32.totalorder %s2145_s22, 1  ;;  %v2057_v0 = vmov 0.0   ;;  %vm2058_vm0 = vmmov 0   ;;  %v466_v1 = vld [vmem:[%s2446_s2 + $0x18] sm:$0xff]  ;;  %v629_v17 = vlaneseq }
  0x36   : > { %1768 = vmatprep.subr.mxu1 %v2057_v0  ;;  %1776 = vmatprep.mubr.msk.f32.mxu1 %vm2058_vm0, %v2057_v0  ;;  %v465_v2 = vld [vmem:[%s2446_s2 + $0x10] sm:$0xff]  ;;  %v464_v3 = vld [vmem:[%s2446_s2 + $0x8] sm:$0xff]  ;;  %v463_v4 = vld [vmem:[%s2446_s2] sm:$0xff]  ;;  %vm474_vm1 = vcmask 261120   ;;  %s2059_s26 = smov 120   ;;  %s2060_s28 = smov 96  }
  0x37   : > { %s2465_s22 = smov (!%p450_p10, %s2145_s22), 1  ;;  %1789 = vmatprep.subr.mxu0 %v2057_v0  ;;  %1791 = vmatprep.mubr.msk.f32.mxu0 %vm2058_vm0, %v2057_v0  ;;  %v1697_v6 = vld [vmem:[%s2447_s3] ss:$0 sm:$0xff]  ;;  %s2061_s27 = smov 80   ;;  %vm551_vm2 = vcmask 64512   ;;  %v630_v19 = vshrl.u32 %v629_v17, 7 }
  0x38   : > { %s1695_s23 = sshll.u32 %s2465_s22, 3  ;;  %1769 = vmatpush3.msra.mxu1 %v466_v1  ;;  %s2062_s29 = smov 88   ;;  %v2066_v21 = vmov 0   ;;  %vm1236_vm5 = vcmask 130048   ;;  %vm1238_vm6 = vcmask 195584  }
  0x39   : > { %1770 = vmatprep.subr.mxu1 %v2057_v0  ;;  %s453_s18 = scalar_lea.vmem %s2444_s0, %s1695_s23  ;;  %s2063_s30 = smov 72   ;;  %v631_v20 = vsub.s32 0, %v630_v19 }
  0x3a   : > { %1771 = vmatpush3.msra.mxu1 %v465_v2  ;;  %v2236_v5 = vld [vmem:[%s453_s18] sm:$0xff]  ;;  %s2064_s13 = smov 112   ;;  %s2065_s14 = smov 104  }
  0x3b   : > { %1772 = vmatprep.subr.mxu1 %v2057_v0  ;;  %s456_s17 = scalar_lea.vmem %s2445_s1, %s2465_s22  ;;  %s2067_s18 = smov 56  }
  0x3c   : > { %1773 = vmatpush3.msra.mxu1 %v464_v3  ;;  %v462_v18 = vld [vmem:[%s456_s17] sm:$0x1]  ;;  %s2068_s19 = smov 64   ;;  %s2069_s20 = smov 48  }
  0x3d   : > { %1774 = vmatprep.subr.mxu1 %v2057_v0  ;;  %vm627_vm3 = vcmp.eq.f32.partialorder %v462_v18, 0.0  ;;  %s2070_s24 = smov 40   ;;  %v1243_v18 = vld [vmem:[%s2448_s4 + $0x18] sm:$0xff]  ;;  %s2072_s16 = smov 16  }
  0x3e   : > { %1775 = vmatpush3.msra.mxu1 %v463_v4  ;;  %v628_v22 = vsel %vm627_vm3, 1, %v2066_v21  ;;  %s2073_s17 = smov 24  }
  0x3f   : > { %1777 = vmatmul.mubr.msk.f32.vlgmr.msra.gmra.mxu1 %vm474_vm1, %v2236_v5  ;;  %1779 = vmatprep.subr.mxu1 %v2057_v0  ;;  %v632_v23 = vrot.slane %v628_v22, %v631_v20 }
  0x40   : > { %1781 = vmatprep.mubr.msk.f32.mxu1 %vm2058_vm0, %v2057_v0 }
  0x41   : > { %vm633_vm4 = vcmp.eq.s32.totalorder %v632_v23, 1  ;;  %v1242_v23 = vld [vmem:[%s2448_s4 + $0x10] sm:$0xff] }
  0xff   : > { %v544_v7 = vpop.f32.mrf.mxu1 }
 0x100   : > { %v2247_v8 = vadd.f32 %v1697_v6, %v544_v7 }
 0x101   : > { %v1778_v9 = vpop.f32.mrf.mxu1 }
 0x102   : > { %722 = vrot.lane.b32.xlu1 %v2247_v8, %s2059_s26  ;;  %549 = vrot.lane.b32.xlu0 %v2247_v8, %s2060_s28  ;;  %s2071_s28 = smov 8  }
 0x106   : > { %891 = vrot.lane.b32.xlu1 %v2247_v8, %s2061_s27  ;;  %724 = vrot.lane.b32.xlu0 %v2247_v8, %s2062_s29 }
 0x10a   : > { %1058 = vrot.lane.b32.xlu1 %v2247_v8, %s2063_s30  ;;  %889 = vrot.lane.b32.xlu0 %v2247_v8, %s2064_s13 }
 0x10e   : > { %1056 = vrot.lane.b32.xlu0 %v2247_v8, %s2065_s14 }
 0x174   : > { %v723_v10 = vpop.permute.xlu1 %722  ;;  %v550_v11 = vpop.permute.xlu0 %549 }
 0x175   : > { %1780 = vmatpush3.xpose.msk.msra.mxu1 %vm551_vm2, %v550_v11 }
 0x176   : > { %1784 = vmatprep.subr.mxu1 %v2057_v0 }
 0x178   : > { %1782 = vmatmul.mubr.msk.f32.vlgmr.msra.gmra.mxu1 %vm551_vm2, %v2247_v8  ;;  %v725_v12 = vpop.permute.xlu0 %724  ;;  %v892_v13 = vpop.permute.xlu1 %891 }
 0x179   : > { %1790 = vmatpush3.xpose.msk.msra.mxu0 %vm551_vm2, %v725_v12  ;;  %1786 = vmatprep.mubr.msk.f32.mxu1 %vm2058_vm0, %v2057_v0 }
 0x17a   : > { %1799 = vmatprep.subr.mxu0 %v2057_v0 }
 0x17c   : > { %1792 = vmatmul.mubr.msk.f32.vlgmr.msra.gmra.mxu0 %vm551_vm2, %v723_v10  ;;  %v890_v14 = vpop.permute.xlu0 %889  ;;  %v1059_v15 = vpop.permute.xlu1 %1058 }
 0x17d   : > { %1800 = vmatpush3.xpose.msk.msra.mxu0 %vm551_vm2, %v892_v13  ;;  %1801 = vmatprep.mubr.msk.f32.mxu0 %vm2058_vm0, %v2057_v0 }
 0x17e   : > { %1809 = vmatprep.subr.mxu0 %v2057_v0 }
 0x180   : > { %1802 = vmatmul.mubr.msk.f32.vlgmr.msra.gmra.mxu0 %vm551_vm2, %v890_v14  ;;  %v1057_v16 = vpop.permute.xlu0 %1056 }
 0x181   : > { %1810 = vmatpush3.xpose.msk.msra.mxu0 %vm551_vm2, %v1059_v15  ;;  %1811 = vmatprep.mubr.msk.f32.mxu0 %vm2058_vm0, %v2057_v0 }
 0x182   : > { %1841 = vmatprep.subr.mxu0 %v2057_v0 }
 0x184   : > { %1812 = vmatmul.mubr.msk.f32.vlgmr.msra.gmra.mxu0 %vm551_vm2, %v1057_v16 }
 0x185   : > { %1873 = vmatprep.mubr.msk.f32.mxu0 %vm2058_vm0, %v2057_v0 }
 0x238   : > { %v622_v24 = vpop.f32.mrf.mxu1 }
 0x239   : > { %v626_v25 = vmul.f32 0.35355338, %v622_v24  ;;  %v1241_v24 = vld [vmem:[%s2448_s4 + $0x8] sm:$0xff] }
 0x23a   : > { %v1783_v26 = vpop.f32.mrf.mxu1 }
 0x23b   : > { %v634_v27 = vsel %vm633_vm4, -10000.0, %v626_v25  ;;  %v1240_v25 = vld [vmem:[%s2448_s4] sm:$0xff] }
 0x23c   : > { %v796_v28 = vpop.f32.mrf.mxu0  ;;  %v635_v29 = vsel %vm551_vm2, %v634_v27, -inf }
 0x23d   : > { %v800_v30 = vmul.f32 0.35355338, %v796_v28  ;;  %636 = vmax.xlane.f32.xlu1 %v635_v29 }
 0x23e   : > { %v1793_v31 = vpop.f32.mrf.mxu0 }
 0x23f   : > { %v801_v32 = vsel %vm633_vm4, -10000.0, %v800_v30 }
 0x240   : > { %v963_v33 = vpop.f32.mrf.mxu0  ;;  %v802_v34 = vsel %vm551_vm2, %v801_v32, -inf }
 0x241   : > { %v967_v35 = vmul.f32 0.35355338, %v963_v33  ;;  %803 = vmax.xlane.f32.xlu0 %v802_v34 }
 0x242   : > { %v1803_v36 = vpop.f32.mrf.mxu0 }
 0x243   : > { %v968_v37 = vsel %vm633_vm4, -10000.0, %v967_v35  ;;  %v1711_v36 = vld [vmem:[%s2449_s5] ss:$0 sm:$0xff] }
 0x244   : > { %v1130_v38 = vpop.f32.mrf.mxu0  ;;  %v969_v39 = vsel %vm551_vm2, %v968_v37, -inf }
 0x245   : > { %v1134_v40 = vmul.f32 0.35355338, %v1130_v38  ;;  %970 = vmax.xlane.f32.xlu0 %v969_v39 }
 0x246   : > { %v1813_v41 = vpop.f32.mrf.mxu0 }
 0x247   : > { %v1135_v42 = vsel %vm633_vm4, -10000.0, %v1134_v40 }
 0x248   : > { %v1136_v43 = vsel %vm551_vm2, %v1135_v42, -inf }
 0x249   : > { %1137 = vmax.xlane.f32.xlu1 %v1136_v43 }
 0x25a   : > { %813 = vrot.lane.b32.xlu1 %v2247_v8, %s2067_s18 }
 0x2c6   : > { %v637_v44 = vpop.xlane.xlu1 %636 }
 0x2c7   : > { %v638_v45 = vsub.f32 %v634_v27, %v637_v44 }
 0x2c9   : > { %v639_v46 = vmul.f32 1.442695, %v638_v45 }
 0x2ca   : > { %v804_v47 = vpop.xlane.xlu0 %803 }
 0x2cb   : > { %1932 = vpow2.f32 %v639_v46  ;;  %v805_v48 = vsub.f32 %v801_v32, %v804_v47  ;;  %v1366_v47 = vld [vmem:[%s2452_s8 + $0x18] sm:$0xff] }
 0x2cd   : > { %v806_v49 = vmul.f32 1.442695, %v805_v48  ;;  %v1365_v48 = vld [vmem:[%s2452_s8 + $0x10] sm:$0xff] }
 0x2ce   : > { %v971_v59 = vpop.xlane.xlu0 %970 }
 0x2cf   : > { %1934 = vpow2.f32 %v806_v49  ;;  %v972_v60 = vsub.f32 %v968_v37, %v971_v59  ;;  %v1363_v49 = vld [vmem:[%s2452_s8] sm:$0xff] }
 0x2d1   : > { %v973_v61 = vmul.f32 1.442695, %v972_v60 }
 0x2d2   : > { %v1138_v50 = vpop.xlane.xlu1 %1137 }
 0x2d3   : > { %v1139_v51 = vsub.f32 %v1135_v42, %v1138_v50 }
 0x2d5   : > { %v1140_v52 = vmul.f32 1.442695, %v1139_v51 }
 0x2d6   : > { %v814_v1 = vpop.permute.xlu1 %813 }
 0x2d7   : > { %1936 = vpow2.f32 %v1140_v52 }
 0x2d8   : > { %v1933_v53 = vpop.eup %1932  ;;  %1938 = vpow2.f32 %v973_v61  ;;  %v2360_v61 = vld [vmem:[#allocation2] ss:$0 sm:$0xff] }
 0x2d9   : > { %v641_v54 = vsel %vm551_vm2, %v1933_v53, 0.0 }
 0x2da   : > { %642 = vadd.xlane.f32.xlu0 %v641_v54 }
 0x2dc   : > { %v1935_v55 = vpop.eup %1934 }
 0x2dd   : > { %v808_v56 = vsel %vm551_vm2, %v1935_v55, 0.0 }
 0x2de   : > { %809 = vadd.xlane.f32.xlu1 %v808_v56 }
 0x2e4   : > { %v1937_v57 = vpop.eup %1936 }
 0x2e5   : > { %v1142_v58 = vsel %vm551_vm2, %v1937_v57, 0.0  ;;  %v1939_v62 = vpop.eup %1938 }
 0x2e6   : > { %1143 = vadd.xlane.f32.xlu1 %v1142_v58  ;;  %v975_v63 = vsel %vm551_vm2, %v1939_v62, 0.0  ;;  %v2357_v58 = vld [vmem:[%s2450_s6] ss:$0 sm:$0xff] }
 0x2f0   : > { %646 = vrot.lane.b32.xlu0 %v2247_v8, %s2068_s19  ;;  %s460_s19 = scalar_lea.vmem %s2456_s12, %s1695_s23 }
 0x2f7   : > { %980 = vrot.lane.b32.xlu1 %v2247_v8, %s2069_s20 }
 0x30f   : > { %976 = vadd.xlane.f32.xlu0 %v975_v63 }
 0x325   : > { %1147 = vrot.lane.b32.xlu0 %v2247_v8, %s2070_s24 }
 0x363   : > { %v643_v2 = vpop.xlane.xlu0 %642 }
 0x364   : > { %1940 = vrcp.f32 %v643_v2  ;;  %v1488_v2 = vld [vmem:[%s2454_s10 + $0x70] sm:$0xff] }
 0x367   : > { %v647_v3 = vpop.permute.xlu0 %646  ;;  %v810_v4 = vpop.xlane.xlu1 %809 }
 0x368   : > { %1942 = vrcp.f32 %v810_v4  ;;  %1785 = vmatpush3.msra.mxu1 %v647_v3  ;;  %v1487_v3 = vld [vmem:[%s2454_s10 + $0x68] sm:$0xff]  ;;  %v1486_v4 = vld [vmem:[%s2454_s10 + $0x60] sm:$0xff] }
 0x369   : > { %1794 = vmatprep.subr.mxu1 %v2057_v0 }
 0x36f   : > { %v1144_v7 = vpop.xlane.xlu1 %1143 }
 0x371   : > { %v1941_v6 = vpop.eup %1940 }
 0x372   : > { %v645_v9 = vmul.f32 %v1941_v6, %v1933_v53  ;;  %v1485_v6 = vld [vmem:[%s2454_s10 + $0x58] sm:$0xff] }
 0x373   : > { %v981_v11 = vpop.permute.xlu1 %980 }
 0x374   : > { %1787 = vmatmul.mubr.msk.f32.vlgmr.msra.gmra.mxu1 %vm551_vm2, %v645_v9  ;;  %v1483_v9 = vld [vmem:[%s2454_s10 + $0x48] sm:$0xff] }
 0x375   : > { %v1943_v10 = vpop.eup %1942  ;;  %1795 = vmatpush3.msra.mxu1 %v814_v1  ;;  %1796 = vmatprep.mubr.msk.f32.mxu1 %vm2058_vm0, %v2057_v0  ;;  %v1489_v1 = vld [vmem:[%s2454_s10 + $0x78] sm:$0xff] }
 0x376   : > { %1804 = vmatprep.subr.mxu1 %v2057_v0  ;;  %v812_v8 = vmul.f32 %v1943_v10, %v1935_v55  ;;  %1842 = vmatpush3.msra.mxu0 %v1489_v1  ;;  %v1482_v10 = vld [vmem:[%s2454_s10 + $0x40] sm:$0xff] }
 0x377   : > { %1843 = vmatprep.subr.mxu0 %v2057_v0 }
 0x378   : > { %1797 = vmatmul.mubr.msk.f32.vlgmr.msra.gmra.mxu1 %vm551_vm2, %v812_v8  ;;  %1844 = vmatpush3.msra.mxu0 %v1488_v2  ;;  %v1481_v8 = vld [vmem:[%s2454_s10 + $0x38] sm:$0xff] }
 0x379   : > { %1805 = vmatpush3.msra.mxu1 %v981_v11  ;;  %1806 = vmatprep.mubr.msk.f32.mxu1 %vm2058_vm0, %v2057_v0  ;;  %v1480_v11 = vld [vmem:[%s2454_s10 + $0x30] sm:$0xff] }
 0x37a   : > { %1814 = vmatprep.subr.mxu1 %v2057_v0  ;;  %1845 = vmatprep.subr.mxu0 %v2057_v0 }
 0x37b   : > { %1846 = vmatpush3.msra.mxu0 %v1487_v3 }
 0x37c   : > { %1847 = vmatprep.subr.mxu0 %v2057_v0 }
 0x37d   : > { %1848 = vmatpush3.msra.mxu0 %v1486_v4 }
 0x37e   : > { %1849 = vmatprep.subr.mxu0 %v2057_v0 }
 0x37f   : > { %1850 = vmatpush3.msra.mxu0 %v1485_v6 }
 0x380   : > { %1851 = vmatprep.subr.mxu0 %v2057_v0 }
 0x398   : > { %v977_v12 = vpop.xlane.xlu0 %976 }
 0x399   : > { %1944 = vrcp.f32 %v977_v12  ;;  %v1479_v12 = vld [vmem:[%s2454_s10 + $0x28] sm:$0xff] }
 0x39a   : > { %1946 = vrcp.f32 %v1144_v7  ;;  %v1484_v7 = vld [vmem:[%s2454_s10 + $0x50] sm:$0xff] }
 0x39b   : > { %1852 = vmatpush3.msra.mxu0 %v1484_v7 }
 0x39c   : > { %v1148_v16 = vpop.permute.xlu0 %1147  ;;  %1853 = vmatprep.subr.mxu0 %v2057_v0 }
 0x39d   : > { %1854 = vmatpush3.msra.mxu0 %v1483_v9 }
 0x39e   : > { %1855 = vmatprep.subr.mxu0 %v2057_v0 }
 0x39f   : > { %1856 = vmatpush3.msra.mxu0 %v1482_v10 }
 0x3a0   : > { %1857 = vmatprep.subr.mxu0 %v2057_v0 }
 0x3a1   : > { %1858 = vmatpush3.msra.mxu0 %v1481_v8 }
 0x3a2   : > { %1859 = vmatprep.subr.mxu0 %v2057_v0 }
 0x3a3   : > { %1860 = vmatpush3.msra.mxu0 %v1480_v11 }
 0x3a4   : > { %1861 = vmatprep.subr.mxu0 %v2057_v0 }
 0x3a5   : > { %1862 = vmatpush3.msra.mxu0 %v1479_v12 }
 0x3a6   : > { %v1945_v13 = vpop.eup %1944  ;;  %1863 = vmatprep.subr.mxu0 %v2057_v0 }
 0x3a7   : > { %v979_v14 = vmul.f32 %v1945_v13, %v1939_v62  ;;  %v1947_v15 = vpop.eup %1946  ;;  %v1478_v13 = vld [vmem:[%s2454_s10 + $0x20] sm:$0xff] }
 0x3a8   : > { %v1146_v17 = vmul.f32 %v1947_v15, %v1937_v57  ;;  %1864 = vmatpush3.msra.mxu0 %v1478_v13  ;;  %v1476_v15 = vld [vmem:[%s2454_s10 + $0x10] sm:$0xff] }
 0x3a9   : > { %1807 = vmatmul.mubr.msk.f32.vlgmr.msra.gmra.mxu1 %vm551_vm2, %v979_v14  ;;  %1865 = vmatprep.subr.mxu0 %v2057_v0  ;;  %v1477_v14 = vld [vmem:[%s2454_s10 + $0x18] sm:$0xff] }
 0x3aa   : > { %1815 = vmatpush3.msra.mxu1 %v1148_v16  ;;  %1816 = vmatprep.mubr.msk.f32.mxu1 %vm2058_vm0, %v2057_v0  ;;  %v1475_v16 = vld [vmem:[%s2454_s10 + $0x8] sm:$0xff] }
 0x3ab   : > { %1819 = vmatprep.subr.mxu1 %v2057_v0  ;;  %1866 = vmatpush3.msra.mxu0 %v1477_v14 }
 0x3ac   : > { %1867 = vmatprep.subr.mxu0 %v2057_v0 }
 0x3ad   : > { %1817 = vmatmul.mubr.msk.f32.vlgmr.msra.gmra.mxu1 %vm551_vm2, %v1146_v17  ;;  %1868 = vmatpush3.msra.mxu0 %v1476_v15  ;;  %v1474_v17 = vld [vmem:[%s2454_s10] sm:$0xff] }
 0x3ae   : > { %1827 = vmatprep.mubr.msk.f32.mxu1 %vm2058_vm0, %v2057_v0  ;;  %1820 = vmatpush3.msra.mxu1 %v1243_v18  ;;  %v1715_v18 = vld [vmem:[#allocation4] ss:$0 sm:$0xff] }
 0x3af   : > { %1821 = vmatprep.subr.mxu1 %v2057_v0  ;;  %1869 = vmatprep.subr.mxu0 %v2057_v0 }
 0x3b0   : > { %1822 = vmatpush3.msra.mxu1 %v1242_v23  ;;  %1870 = vmatpush3.msra.mxu0 %v1475_v16 }
 0x3b1   : > { %1823 = vmatprep.subr.mxu1 %v2057_v0  ;;  %1871 = vmatprep.subr.mxu0 %v2057_v0 }
 0x3b2   : > { %1824 = vmatpush3.msra.mxu1 %v1241_v24  ;;  %1872 = vmatpush3.msra.mxu0 %v1474_v17 }
 0x3b3   : > { %1825 = vmatprep.subr.mxu1 %v2057_v0 }
 0x3b4   : > { %1826 = vmatpush3.msra.mxu1 %v1240_v25 }
 0x3b5   : > { %1830 = vmatprep.subr.mxu1 %v2057_v0 }
 0x434   : > { %v718_v19 = vpop.f32.mrf.mxu1 }
 0x436   : > { %v1788_v20 = vpop.f32.mrf.mxu1 }
 0x438   : > { %v885_v21 = vpop.f32.mrf.mxu1 }
 0x439   : > { %1224 = vrot.lane.b32.xlu1 %v885_v21, %s2071_s28 }
 0x43a   : > { %v1798_v22 = vpop.f32.mrf.mxu1 }
 0x469   : > { %v1052_v26 = vpop.f32.mrf.mxu1 }
 0x46a   : > { %1228 = vrot.lane.b32.xlu0 %v1052_v26, %s2072_s16 }
 0x46b   : > { %v1808_v27 = vpop.f32.mrf.mxu1 }
 0x46d   : > { %v1219_v28 = vpop.f32.mrf.mxu1 }
 0x46e   : > { %1232 = vrot.lane.b32.xlu1 %v1219_v28, %s2073_s17 }
 0x46f   : > { %v1818_v29 = vpop.f32.mrf.mxu1 }
 0x4ab   : > { %v1225_v30 = vpop.permute.xlu1 %1224 }
 0x4ac   : > { %v1235_v32 = vsel %vm551_vm2, %v718_v19, %v1225_v30 }
 0x4dc   : > { %v1229_v31 = vpop.permute.xlu0 %1228 }
 0x4dd   : > { %v1237_v33 = vsel %vm1236_vm5, %v1235_v32, %v1229_v31 }
 0x4e0   : > { %v1233_v34 = vpop.permute.xlu1 %1232 }
 0x4e1   : > { %v1239_v35 = vsel %vm1238_vm6, %v1237_v33, %v1233_v34 }
 0x4e2   : > { %1828 = vmatmul.mubr.msk.f32.vlgmr.msra.gmra.mxu1 %vm474_vm1, %v1239_v35 }
 0x4e3   : > { %1838 = vmatprep.mubr.msk.f32.mxu1 %vm2058_vm0, %v2057_v0  ;;  %1831 = vmatpush3.msra.mxu1 %v1366_v47 }
 0x4e4   : > { %1832 = vmatprep.subr.mxu1 %v2057_v0 }
 0x4e5   : > { %1833 = vmatpush3.msra.mxu1 %v1365_v48 }
 0x4e6   : > { %1834 = vmatprep.subr.mxu1 %v2057_v0 }
 0x5a2   : > { %v1320_v37 = vpop.f32.mrf.mxu1 }
 0x5a3   : > { %v1321_v38 = vadd.f32 %v1711_v36, %v1320_v37 }
 0x5a4   : > { %v1829_v39 = vpop.f32.mrf.mxu1 }
 0x5a5   : > { %v1324_v40 = vadd.f32 %v1321_v38, %v2236_v5  ;;  %v1364_v5 = vld [vmem:[%s2452_s8 + $0x8] sm:$0xff] }
 0x5a6   : > { %1835 = vmatpush3.msra.mxu1 %v1364_v5 }
 0x5a7   : > { %v1327_v41 = vsel %vm474_vm1, %v1324_v40, 0.0  ;;  %1836 = vmatprep.subr.mxu1 %v2057_v0 }
 0x5a8   : > { %1328 = vadd.xlane.f32.xlu0 %v1327_v41  ;;  %1837 = vmatpush3.msra.mxu1 %v1363_v49 }
 0x631   : > { %v1329_v42 = vpop.xlane.xlu0 %1328 }
 0x632   : > { %v1331_v43 = vmul.f32 0.03125, %v1329_v42 }
 0x634   : > { %v1332_v44 = vsub.f32 %v1324_v40, %v1331_v43 }
 0x636   : > { %v1333_v45 = vmul.f32 %v1332_v44, %v1332_v44  ;;  %v1345_v59 = vmul.f32 %v2357_v58, %v1332_v44 }
 0x638   : > { %v1334_v46 = vsel %vm474_vm1, %v1333_v45, 0.0 }
 0x639   : > { %1335 = vadd.xlane.f32.xlu1 %v1334_v46  ;;  %v1717_v46 = vld [vmem:[#allocation6] ss:$0 sm:$0xff] }
 0x6c2   : > { %v1336_v50 = vpop.xlane.xlu1 %1335 }
 0x6c3   : > { %v1338_v51 = vmul.f32 0.032258064, %v1336_v50 }
 0x6c5   : > { %1948 = vrsqrt.f32 %v1338_v51  ;;  %vm1348_vm7 = vcmp.eq.f32.partialorder %v1338_v51, inf  ;;  %v1351_v54 = vand.u32 2147483648, %v1338_v51  ;;  %vm1350_vm8 = vcmp.eq.f32.partialorder %v1338_v51, 0.0 }
 0x6d2   : > { %v1949_v52 = vpop.eup %1948 }
 0x6d3   : > { %v1347_v53 = vmul.f32 %v1949_v52, %v1338_v51 }
 0x6d5   : > { %v1349_v55 = vsel %vm1348_vm7, %v1338_v51, %v1347_v53 }
 0x6d6   : > { %v1352_v56 = vsel %vm1350_vm8, %v1351_v54, %v1349_v55 }
 0x6d7   : > { %v1353_v57 = vadd.f32 1e-06, %v1352_v56 }
 0x6d9   : > { %1950 = vrcp.f32 %v1353_v57 }
 0x6e6   : > { %v1951_v60 = vpop.eup %1950 }
 0x6e7   : > { %v1355_v62 = vmul.f32 %v1951_v60, %v1345_v59 }
 0x6e9   : > { %v2363_v63 = vadd.f32 %v2360_v61, %v1355_v62 }
 0x6eb   : > { %1839 = vmatmul.mubr.msk.f32.vlgmr.msra.gmra.mxu1 %vm474_vm1, %v2363_v63 }
 0x7ab   : > { %v1443_v19 = vpop.f32.mrf.mxu1 }
 0x7ac   : > { %v1444_v20 = vadd.f32 %v1715_v18, %v1443_v19 }
 0x7ad   : > { %v1840_v21 = vpop.f32.mrf.mxu1 }
 0x7ae   : > { %v1448_v22 = vmul.f32 0.70710677, %v1444_v20  ;;  %v1447_v43 = vmul.f32 0.5, %v1444_v20 }
 0x7b0   : > { %v1449_v23 = vand.u32 2147483647, %v1448_v22  ;;  %vm1469_vm9 = vcmp.lt.f32.partialorder %v1448_v22, 0.0 }
 0x7b2   : > { %v1450_v24 = vmul.f32 0.3275911, %v1449_v23  ;;  %v1463_v26 = vmul.f32 %v1449_v23, %v1449_v23 }
 0x7b4   : > { %v1451_v25 = vadd.f32 1.0, %v1450_v24  ;;  %v1464_v27 = vsub.f32 0.0, %v1463_v26 }
 0x7b6   : > { %1952 = vrcp.f32 %v1451_v25  ;;  %v1465_v30 = vmul.f32 1.442695, %v1464_v27 }
 0x7b8   : > { %1954 = vpow2.f32 %v1465_v30 }
 0x7c3   : > { %v1953_v28 = vpop.eup %1952 }
 0x7c4   : > { %v1454_v29 = vmul.f32 1.0614054, %v1953_v28 }
 0x7c5   : > { %v1955_v38 = vpop.eup %1954 }
 0x7c6   : > { %v1455_v31 = vadd.f32 -1.4531521, %v1454_v29 }
 0x7c8   : > { %v1456_v32 = vmul.f32 %v1953_v28, %v1455_v31 }
 0x7ca   : > { %v1457_v33 = vadd.f32 1.4214138, %v1456_v32 }
 0x7cc   : > { %v1458_v0 = vmul.f32 %v1953_v28, %v1457_v33 }
 0x7ce   : > { %v1459_v34 = vadd.f32 -0.28449672, %v1458_v0 }
 0x7d0   : > { %v1460_v35 = vmul.f32 %v1953_v28, %v1459_v34 }
 0x7d2   : > { %v1461_v36 = vadd.f32 0.2548296, %v1460_v35 }
 0x7d4   : > { %v1462_v37 = vmul.f32 %v1953_v28, %v1461_v36 }
 0x7d6   : > { %v1467_v39 = vmul.f32 %v1955_v38, %v1462_v37 }
 0x7d8   : > { %v1468_v40 = vsub.f32 1.0, %v1467_v39 }
 0x7da   : > { %v1470_v41 = vsub.f32 0.0, %v1468_v40 }
 0x7dc   : > { %v1471_v42 = vsel %vm1469_vm9, %v1470_v41, %v1468_v40 }
 0x7dd   : > { %v1472_v44 = vadd.f32 1.0, %v1471_v42 }
 0x7df   : > { %v1473_v45 = vmul.f32 %v1472_v44, %v1447_v43 }
 0x7e1   : > { %1874 = vmatmul.mubr.f32.vlgmr.msra.gmra.mxu0 %v1473_v45 }
 0x8a1   : > { %v1563_v47 = vpop.f32.mrf.mxu0 }
 0x8a2   : > { %v1564_v48 = vadd.f32 %v1717_v46, %v1563_v47 }
 0x8a3   : > { %v1875_v5 = vpop.f32.mrf.mxu0 }
 0x8a4   : > { %v1567_v49 = vadd.f32 %v1564_v48, %v2363_v63 }
 0x8a6   : > { %v1568_v50 = vsel %vm474_vm1, %v1567_v49, 0.0 }
 0x8a7   : > { %1569 = vadd.xlane.f32.xlu0 %v1568_v50 }
 0x930   : > { %v1570_v51 = vpop.xlane.xlu0 %1569 }
 0x931   : > { %v1571_v52 = vmul.f32 0.03125, %v1570_v51 }
 0x933   : > { %v1572_v53 = vsub.f32 %v1567_v49, %v1571_v52 }
 0x935   : > { %v1573_v54 = vmul.f32 %v1572_v53, %v1572_v53  ;;  %v1578_v3 = vmul.f32 %v2357_v58, %v1572_v53 }
 0x937   : > { %v1574_v55 = vsel %vm474_vm1, %v1573_v54, 0.0 }
 0x938   : > { %1575 = vadd.xlane.f32.xlu0 %v1574_v55 }
 0x9c1   : > { %v1576_v56 = vpop.xlane.xlu0 %1575 }
 0x9c2   : > { %v1577_v57 = vmul.f32 0.032258064, %v1576_v56 }
 0x9c4   : > { %1956 = vrsqrt.f32 %v1577_v57  ;;  %vm1581_vm10 = vcmp.eq.f32.partialorder %v1577_v57, inf  ;;  %v1584_v62 = vand.u32 2147483648, %v1577_v57  ;;  %vm1583_vm11 = vcmp.eq.f32.partialorder %v1577_v57, 0.0 }
 0x9d1   : > { %v1957_v59 = vpop.eup %1956 }
 0x9d2   : > { %v1580_v60 = vmul.f32 %v1957_v59, %v1577_v57 }
 0x9d4   : > { %v1582_v1 = vsel %vm1581_vm10, %v1577_v57, %v1580_v60 }
 0x9d5   : > { %v1585_v63 = vsel %vm1583_vm11, %v1584_v62, %v1582_v1 }
 0x9d6   : > { %v1586_v2 = vadd.f32 1e-06, %v1585_v63 }
 0x9d8   : > { %1958 = vrcp.f32 %v1586_v2 }
 0x9e5   : > { %v1959_v4 = vpop.eup %1958 }
 0x9e6   : > { %v1588_v6 = vmul.f32 %v1959_v4, %v1578_v3 }
 0x9e8   : > { %v1589_v7 = vadd.f32 %v2360_v61, %v1588_v6 }
 0x9ea   : > { %1590 = vst.msk [vmem:[%s460_s19] sm:$0xff] %vm474_vm1, %v1589_v7 }
 0x9eb PF: > { %s24_s21 = sadd.s32 1, %s2052_s21  }
 0x9ec   : > { %p21_p3 = scmp.ge.s32.totalorder %s24_s21, 4  }
 0x9ee   :  { %23 = sbr.rel (!%p21_p3) target bundleno = 2 (0x2), region = 114 }
 0x9f3   :  { %1610 = vsyncpa [#allocation3], 1 }
 0x9f4   :  { %1612 = vsyncpa [#allocation3 + $0x1], 1 }
 0x9f5   :  { %1613 = vsyncpa [#allocation5], 1 }

// kernel: transformer_enc.15
= control target key start
LH: loop header
LB: loop body
LE: loop exit
PB: predicated region body
PF: predicated region fallthrough
CT: control target
= control target key end

     0   :  { %10 = vsyncpa [#allocation4], 0  ;;  %s824_s18 = smov 0   ;;  %s946_s0 = inlined_call_operand.vmem [shape: f32[2,1024], index: 0, kind: input, shape index: {}]   ;;  %s947_s1 = inlined_call_operand.vmem [shape: f32[1024,32], index: 1, kind: input, shape index: {}]   ;;  %s948_s2 = inlined_call_operand.vmem [shape: f32[1,32], index: 2, kind: input, shape index: {}]   ;;  %s949_s3 = inlined_call_operand.vmem [shape: f32[32,2], index: 3, kind: input, shape index: {}]   ;;  %s950_s4 = inlined_call_operand.vmem [shape: f32[1,2], index: 4, kind: input, shape index: {}]   ;;  %s951_s5 = inlined_call_operand.hbm [shape: f32[2,2], index: 5, kind: output, shape index: {}]  }
   0x1 LB: > { %s830_s19 = sadd.s32 4294967295, %s787_s18   ;;  %p633_p0 = scmp.ge.s32.totalorder %s787_s18, 1  ;;  %s787_s18 = sphi %s824_s18, %s16_s18  }
   0x2   : > { %p195_p1 = scmp.lt.s32.totalorder %s787_s18, 3 }
   0x4   : > { %p196_p2 = pnand %p633_p0, %p195_p1 }
   0x5   : > { %s634_s20 = sshll.u32 (!%p196_p2), %s830_s19, 2  ;;  %s636_s21 = sshll.u32 (!%p196_p2), %s830_s19, 6 }
   0x6   : > { %199 = sbr.rel (%p196_p2) target bundleno = 479 (0x1df), region = 40  ;;  %p224_p3 = scmp.lt.s32.totalorder (!%p196_p2), %s634_s20, 7 }
   0x7   : > { %p230_p4 = scmp.lt.s32.totalorder (!%p196_p2), %s636_s21, 127  ;;  %p638_p5 = scmp.ne.s32.totalorder (!%p196_p2), %s830_s19, 0 }
   0xb   : > { %s953_s20 = smov (!%p224_p3, %s634_s20), 7  ;;  %s955_s21 = smov (!%p230_p4, %s636_s21), 127 }
   0xc   : > { %s635_s22 = sshll.u32 %s953_s20, 1  ;;  %s637_s26 = sshll.u32 %s955_s21, 3 }
   0xd   : > { %s839_s25 = scalar_lea.vmem %s946_s0, %s635_s22  ;;  %s844_s29 = scalar_lea.vmem %s947_s1, %s637_s26 }
   0xe   : > { %238 = sbr.rel (%p638_p5) target bundleno = 21 (0x15), region = 44 }
  0x13   : > { %vm239_vm0 = vcmask 254976   ;;  %v789_v0 = vmov 0.0  }
  0x14   : > { %240 = vst.msk [vmem:[#allocation2] sm:$0x3] %vm239_vm0, %v789_v0 }
  0x15 PF: > { %v274_v1 = vld [vmem:[%s844_s29 + $0xf8] sm:$0xff]  ;;  %v273_v5 = vld [vmem:[%s844_s29 + $0xf0] sm:$0xff]  ;;  %v272_v9 = vld [vmem:[%s844_s29 + $0xe8] sm:$0xff]  ;;  %v790_v31 = vmov 1983009808   ;;  %v312_v33 = vlaneseq  ;;  %vm470_vm1 = vcmask 254976  }
  0x16   : > { %v306_v2 = vld [vmem:[%s844_s29 + $0x1f8] sm:$0xff]  ;;  %647 = vmatprep.subr.mxu0 %v274_v1  ;;  %v305_v6 = vld [vmem:[%s844_s29 + $0x1f0] sm:$0xff]  ;;  %v304_v10 = vld [vmem:[%s844_s29 + $0x1e8] sm:$0xff]  ;;  %v310_v32 = vunpack.c.l.s4 %v790_v31  ;;  %p639_p6 = scmp.ne.s32.totalorder %s830_s19, 1 }
  0x17   : > { %v258_v3 = vld [vmem:[%s844_s29 + $0x78] sm:$0xff]  ;;  %682 = vmatprep.subr.mxu1 %v306_v2  ;;  %v257_v7 = vld [vmem:[%s844_s29 + $0x70] sm:$0xff]  ;;  %v256_v11 = vld [vmem:[%s844_s29 + $0x68] sm:$0xff]  ;;  %v313_v43 = vshrl.u32 %v312_v33, 7 }
  0x18   : > { %v290_v4 = vld [vmem:[%s844_s29 + $0x178] sm:$0xff]  ;;  %648 = vmatpush3.msra.mxu0 %v258_v3  ;;  %v289_v8 = vld [vmem:[%s844_s29 + $0x170] sm:$0xff]  ;;  %v288_v12 = vld [vmem:[%s844_s29 + $0x168] sm:$0xff]  ;;  %v311_v42 = vunpack.c.0.s8 %v310_v32 }
  0x19   : > { %683 = vmatpush3.msra.mxu1 %v290_v4  ;;  %649 = vmatprep.subr.mxu0 %v273_v5  ;;  %v271_v13 = vld [vmem:[%s844_s29 + $0xe0] sm:$0xff]  ;;  %v270_v17 = vld [vmem:[%s844_s29 + $0xd8] sm:$0xff]  ;;  %v269_v21 = vld [vmem:[%s844_s29 + $0xd0] sm:$0xff] }
  0x1a   : > { %684 = vmatprep.subr.mxu1 %v305_v6  ;;  %650 = vmatpush3.msra.mxu0 %v257_v7  ;;  %v303_v14 = vld [vmem:[%s844_s29 + $0x1e0] sm:$0xff]  ;;  %v302_v18 = vld [vmem:[%s844_s29 + $0x1d8] sm:$0xff]  ;;  %v301_v22 = vld [vmem:[%s844_s29 + $0x1d0] sm:$0xff]  ;;  %v314_v52 = vsub.s32 %v311_v42, %v313_v43 }
  0x1b   : > { %685 = vmatpush3.msra.mxu1 %v289_v8  ;;  %651 = vmatprep.subr.mxu0 %v272_v9  ;;  %v255_v15 = vld [vmem:[%s844_s29 + $0x60] sm:$0xff]  ;;  %v254_v19 = vld [vmem:[%s844_s29 + $0x58] sm:$0xff]  ;;  %v253_v23 = vld [vmem:[%s844_s29 + $0x50] sm:$0xff] }
  0x1c   : > { %686 = vmatprep.subr.mxu1 %v304_v10  ;;  %v287_v16 = vld [vmem:[%s844_s29 + $0x160] sm:$0xff]  ;;  %652 = vmatpush3.msra.mxu0 %v256_v11  ;;  %v286_v20 = vld [vmem:[%s844_s29 + $0x158] sm:$0xff]  ;;  %v285_v24 = vld [vmem:[%s844_s29 + $0x150] sm:$0xff] }
  0x1d   : > { %687 = vmatpush3.msra.mxu1 %v288_v12  ;;  %653 = vmatprep.subr.mxu0 %v271_v13  ;;  %v268_v25 = vld [vmem:[%s844_s29 + $0xc8] sm:$0xff]  ;;  %v267_v29 = vld [vmem:[%s844_s29 + $0xc0] sm:$0xff]  ;;  %v266_v36 = vld [vmem:[%s844_s29 + $0xb8] sm:$0xff] }
  0x1e   : > { %688 = vmatprep.subr.mxu1 %v303_v14  ;;  %654 = vmatpush3.msra.mxu0 %v255_v15  ;;  %v300_v26 = vld [vmem:[%s844_s29 + $0x1c8] sm:$0xff]  ;;  %v299_v30 = vld [vmem:[%s844_s29 + $0x1c0] sm:$0xff]  ;;  %v298_v37 = vld [vmem:[%s844_s29 + $0x1b8] sm:$0xff] }
  0x1f   : > { %689 = vmatpush3.msra.mxu1 %v287_v16  ;;  %655 = vmatprep.subr.mxu0 %v270_v17  ;;  %v252_v27 = vld [vmem:[%s844_s29 + $0x48] sm:$0xff]  ;;  %v251_v34 = vld [vmem:[%s844_s29 + $0x40] sm:$0xff]  ;;  %v250_v38 = vld [vmem:[%s844_s29 + $0x38] sm:$0xff] }
  0x20   : > { %690 = vmatprep.subr.mxu1 %v302_v18  ;;  %656 = vmatpush3.msra.mxu0 %v254_v19  ;;  %v284_v28 = vld [vmem:[%s844_s29 + $0x148] sm:$0xff]  ;;  %v283_v35 = vld [vmem:[%s844_s29 + $0x140] sm:$0xff]  ;;  %v282_v39 = vld [vmem:[%s844_s29 + $0x138] sm:$0xff] }
  0x21   : > { %691 = vmatpush3.msra.mxu1 %v286_v20  ;;  %657 = vmatprep.subr.mxu0 %v269_v21  ;;  %v265_v40 = vld [vmem:[%s844_s29 + $0xb0] sm:$0xff]  ;;  %v264_v46 = vld [vmem:[%s844_s29 + $0xa8] sm:$0xff]  ;;  %v263_v50 = vld [vmem:[%s844_s29 + $0xa0] sm:$0xff] }
  0x22   : > { %692 = vmatprep.subr.mxu1 %v301_v22  ;;  %658 = vmatpush3.msra.mxu0 %v253_v23  ;;  %v297_v41 = vld [vmem:[%s844_s29 + $0x1b0] sm:$0xff]  ;;  %v296_v47 = vld [vmem:[%s844_s29 + $0x1a8] sm:$0xff]  ;;  %v295_v51 = vld [vmem:[%s844_s29 + $0x1a0] sm:$0xff] }
  0x23   : > { %693 = vmatpush3.msra.mxu1 %v285_v24  ;;  %659 = vmatprep.subr.mxu0 %v268_v25  ;;  %v249_v44 = vld [vmem:[%s844_s29 + $0x30] sm:$0xff]  ;;  %v248_v48 = vld [vmem:[%s844_s29 + $0x28] sm:$0xff]  ;;  %v247_v53 = vld [vmem:[%s844_s29 + $0x20] sm:$0xff] }
  0x24   : > { %694 = vmatprep.subr.mxu1 %v300_v26  ;;  %660 = vmatpush3.msra.mxu0 %v252_v27  ;;  %v281_v45 = vld [vmem:[%s844_s29 + $0x130] sm:$0xff]  ;;  %v280_v49 = vld [vmem:[%s844_s29 + $0x128] sm:$0xff]  ;;  %v279_v54 = vld [vmem:[%s844_s29 + $0x120] sm:$0xff] }
  0x25   : > { %695 = vmatpush3.msra.mxu1 %v284_v28  ;;  %661 = vmatprep.subr.mxu0 %v267_v29  ;;  %v242_v55 = vld [vmem:[%s839_s25] sm:$0xff]  ;;  %v262_v56 = vld [vmem:[%s844_s29 + $0x98] sm:$0xff]  ;;  %v261_v61 = vld [vmem:[%s844_s29 + $0x90] sm:$0xff] }
  0x26   : > { %696 = vmatprep.subr.mxu1 %v299_v30  ;;  %662 = vmatpush3.msra.mxu0 %v251_v34  ;;  %v294_v57 = vld [vmem:[%s844_s29 + $0x198] sm:$0xff]  ;;  %v308_v58 = vcombine.high %v242_v55, %v242_v55  ;;  %v293_v62 = vld [vmem:[%s844_s29 + $0x190] sm:$0xff]  ;;  %v315_v63 = vrot.slane %v242_v55, %v314_v52  ;;  %v260_v3 = vld [vmem:[%s844_s29 + $0x88] sm:$0xff] }
  0x27   : > { %697 = vmatpush3.msra.mxu1 %v283_v35  ;;  %663 = vmatprep.subr.mxu0 %v266_v36  ;;  %v246_v59 = vld [vmem:[%s844_s29 + $0x18] sm:$0xff]  ;;  %v245_v0 = vld [vmem:[%s844_s29 + $0x10] sm:$0xff]  ;;  %v292_v4 = vld [vmem:[%s844_s29 + $0x188] sm:$0xff] }
  0x28   : > { %698 = vmatprep.subr.mxu1 %v298_v37  ;;  %664 = vmatpush3.msra.mxu0 %v250_v38  ;;  %v278_v60 = vld [vmem:[%s844_s29 + $0x118] sm:$0xff]  ;;  %v277_v1 = vld [vmem:[%s844_s29 + $0x110] sm:$0xff]  ;;  %v322_v2 = vrot.slane %v308_v58, %v314_v52  ;;  %v244_v5 = vld [vmem:[%s844_s29 + $0x8] sm:$0xff]  ;;  %v323_v9 = vcombine.high %v315_v63, %v315_v63 }
  0x29   : > { %699 = vmatpush3.msra.mxu1 %v282_v39  ;;  %665 = vmatprep.subr.mxu0 %v265_v40  ;;  %v276_v6 = vld [vmem:[%s844_s29 + $0x108] sm:$0xff]  ;;  %v259_v7 = vld [vmem:[%s844_s29 + $0x80] sm:$0xff] }
  0x2a   : > { %700 = vmatprep.subr.mxu1 %v297_v41  ;;  %666 = vmatpush3.msra.mxu0 %v249_v44  ;;  %v291_v8 = vld [vmem:[%s844_s29 + $0x180] sm:$0xff]  ;;  %v324_v11 = vcombine.high %v322_v2, %v322_v2 }
  0x2b   : > { %701 = vmatpush3.msra.mxu1 %v281_v45  ;;  %667 = vmatprep.subr.mxu0 %v264_v46  ;;  %v243_v10 = vld [vmem:[%s844_s29] sm:$0xff] }
  0x2c   : > { %702 = vmatprep.subr.mxu1 %v296_v47  ;;  %668 = vmatpush3.msra.mxu0 %v248_v48  ;;  %v275_v12 = vld [vmem:[%s844_s29 + $0x100] sm:$0xff] }
  0x2d   : > { %703 = vmatpush3.msra.mxu1 %v280_v49  ;;  %669 = vmatprep.subr.mxu0 %v263_v50  ;;  %v241_v19 = vld [vmem:[#allocation2] sm:$0x3] }
  0x2e   : > { %704 = vmatprep.subr.mxu1 %v295_v51  ;;  %670 = vmatpush3.msra.mxu0 %v247_v53 }
  0x2f   : > { %705 = vmatpush3.msra.mxu1 %v279_v54  ;;  %671 = vmatprep.subr.mxu0 %v262_v56 }
  0x30   : > { %706 = vmatprep.subr.mxu1 %v294_v57  ;;  %672 = vmatpush3.msra.mxu0 %v246_v59 }
  0x31   : > { %707 = vmatpush3.msra.mxu1 %v278_v60  ;;  %673 = vmatprep.subr.mxu0 %v261_v61 }
  0x32   : > { %708 = vmatprep.subr.mxu1 %v293_v62  ;;  %674 = vmatpush3.msra.mxu0 %v245_v0 }
  0x33   : > { %709 = vmatpush3.msra.mxu1 %v277_v1  ;;  %675 = vmatprep.subr.mxu0 %v260_v3 }
  0x34   : > { %710 = vmatprep.subr.mxu1 %v292_v4  ;;  %676 = vmatpush3.msra.mxu0 %v244_v5 }
  0x35   : > { %711 = vmatpush3.msra.mxu1 %v276_v6  ;;  %677 = vmatprep.subr.mxu0 %v259_v7 }
  0x36   : > { %712 = vmatprep.subr.mxu1 %v291_v8  ;;  %678 = vmatpush3.msra.mxu0 %v243_v10 }
  0x37   : > { %393 = vmatprep.mubr.f32.mxu0 %v323_v9  ;;  %713 = vmatpush3.msra.mxu1 %v275_v12 }
  0x38   : > { %463 = vmatprep.mubr.f32.mxu1 %v324_v11  ;;  %394 = vmatmul.mubr.f32.vlgmr.msra.gmra.mxu0 %v315_v63 }
  0x39   : > { %464 = vmatmul.mubr.f32.vlgmr.msra.gmra.mxu1 %v322_v2 }
  0xf8   : > { %v679_v13 = vpop.f32.mrf.mxu0 }
  0xf9   : > { %v714_v14 = vpop.f32.mrf.mxu1 }
  0xfa   : > { %v680_v15 = vpop.f32.mrf.mxu0 }
  0xfb   : > { %v715_v16 = vpop.f32.mrf.mxu1  ;;  %v681_v17 = vadd.f32 %v680_v15, %v679_v13 }
  0xfc   : > { %v716_v18 = vadd.f32 %v715_v16, %v714_v14 }
  0xfe   : > { %v466_v20 = vadd.f32 %v716_v18, %v681_v17  ;;  %475 = sbr.rel (%p639_p6) target bundleno = 464 (0x1d0), region = 48 }
 0x100   : > { %v469_v21 = vadd.f32 %v466_v20, %v241_v19 }
 0x102   : > { %471 = vst.msk [vmem:[#allocation2] sm:$0x3] %vm470_vm1, %v469_v21 }
 0x103   : > { %v488_v22 = vld [vmem:[%s949_s3 + $0x18] sm:$0xff]  ;;  %v791_v23 = vmov 0.0   ;;  %v487_v24 = vld [vmem:[%s949_s3 + $0x10] sm:$0xff]  ;;  %vm792_vm2 = vmmov 0   ;;  %v640_v26 = vld [vmem:[%s948_s2] ss:$0 sm:$0xff] }
 0x104   : > { %722 = vmatprep.subr.mxu0 %v791_v23  ;;  %730 = vmatprep.mubr.msk.f32.mxu0 %vm792_vm2, %v791_v23  ;;  %v486_v27 = vld [vmem:[%s949_s3 + $0x8] sm:$0xff]  ;;  %v485_v28 = vld [vmem:[%s949_s3] sm:$0xff]  ;;  %vm496_vm3 = vcmask 261120   ;;  %vm570_vm4 = vcmask 9216  }
 0x105   : > { %723 = vmatpush3.msra.mxu0 %v488_v22  ;;  %v641_v30 = vld [vmem:[%s950_s4] ss:$0 sm:$0xff] }
 0x106   : > { %724 = vmatprep.subr.mxu0 %v791_v23 }
 0x107   : > { %725 = vmatpush3.msra.mxu0 %v487_v24 }
 0x108   : > { %726 = vmatprep.subr.mxu0 %v791_v23 }
 0x109   : > { %v476_v25 = vld [vmem:[#allocation2] sm:$0x3]  ;;  %727 = vmatpush3.msra.mxu0 %v486_v27 }
 0x10a   : > { %v484_v29 = vadd.f32 %v640_v26, %v476_v25  ;;  %728 = vmatprep.subr.mxu0 %v791_v23 }
 0x10b   : > { %729 = vmatpush3.msra.mxu0 %v485_v28 }
 0x10c   : > { %731 = vmatmul.mubr.msk.f32.vlgmr.msra.gmra.mxu0 %vm496_vm3, %v484_v29 }
 0x1cc   : > { %v566_v31 = vpop.f32.mrf.mxu0 }
 0x1cd   : > { %v567_v32 = vadd.f32 %v641_v30, %v566_v31 }
 0x1ce   : > { %v732_v33 = vpop.f32.mrf.mxu0 }
 0x1cf   : > { %571 = vst.msk [vmem:[#allocation3] sm:$0x3] %vm570_vm4, %v567_v32 }
 0x1d0 PF: > { %p737_p7 = scmp.eq.s32.totalorder %s830_s19, 1  ;;  %s793_s17 = smov [#allocation3]  }
 0x1d1   : > { %s579_s20 = sshll.u32 %s793_s17, 4  ;;  %s580_s20 = int_to_ptr.vmem [resolvable:$true] %s579_s20 }
 0x1d2   : > { %s753_s21 = scalar_lea.vmem %s580_s20, 32  ;;  %p760_p11 = scmp.lt.s32.totalorder %s580_s20, %s580_s20 }
 0x1d3   : > { %p754_p8 = scmp.ne.s32.totalorder %s580_s20, %s753_s21  ;;  %p761_p12 = scmp.lt.s32.totalorder %s753_s21, %s753_s21 }
 0x1d5   : > { %p755_p9 = pnand %p754_p8, %p737_p7  ;;  %p762_p13 = por %p761_p12, %p760_p11 }
 0x1d7   : > { %p756_p10 = pneg %p755_p9 }
 0x1d9   : > { %p763_p0 = pnand %p762_p13, %p756_p10 }
 0x1db   : > { %766 = shalt.err (!%p763_p0)
}
 0x1dc   : > { %734 = dma.vmem_to_hbm [thread:$0]  (%p737_p7), %s580_s20, 32, %s951_s5, [#allocation4]  }
 0x1dd   : > { %782 = dma.done.wait (%p737_p7), [#allocation4], 32  }
 0x1de   : > { %784 = vsyncadd (%p737_p7), [#allocation4], 4294967264 }
 0x1df PF: > { %s16_s18 = sadd.s32 1, %s787_s18  }
 0x1e0   : > { %p13_p1 = scmp.ge.s32.totalorder %s16_s18, 4  }
 0x1e2   :  { %15 = sbr.rel (!%p13_p1) target bundleno = 1 (0x1), region = 78 }
 0x1e7   :  { %592 = vsyncpa [#allocation4], 1 }
 0x1e8   :  { %594 = vsyncpa [#allocation4 + $0x1], 1 }

// kernel: transformer_enc.13
= control target key start
LH: loop header
LB: loop body
LE: loop exit
PB: predicated region body
PF: predicated region fallthrough
CT: control target
= control target key end

     0   :  { %17 = vsyncpa [#allocation3], 0  ;;  %s3627_s0 = inlined_call_operand.vmem [shape: f32[2,8,128], index: 0, kind: input, shape index: {}]   ;;  %s3628_s1 = inlined_call_operand.vmem [shape: f32[2,1,8], index: 1, kind: input, shape index: {}]   ;;  %s3629_s2 = inlined_call_operand.vmem [shape: f32[128,384], index: 2, kind: input, shape index: {}]   ;;  %s3630_s3 = inlined_call_operand.vmem [shape: f32[1,384], index: 3, kind: input, shape index: {}]   ;;  %s3631_s4 = inlined_call_operand.vmem [shape: f32[128,128], index: 4, kind: input, shape index: {}]   ;;  %s3632_s5 = inlined_call_operand.hbm [shape: f32[1,128], index: 5, kind: input, shape index: {}]   ;;  %s3633_s6 = inlined_call_operand.hbm [shape: f32[1,128], index: 6, kind: input, shape index: {}]   ;;  %s3634_s7 = inlined_call_operand.hbm [shape: f32[1,128], index: 7, kind: input, shape index: {}]   ;;  %s3635_s8 = inlined_call_operand.vmem [shape: f32[128,512], index: 8, kind: input, shape index: {}]   ;;  %s3636_s9 = inlined_call_operand.vmem [shape: f32[1,512], index: 9, kind: input, shape index: {}]   ;;  %s3637_s10 = inlined_call_operand.vmem [shape: f32[512,128], index: 10, kind: input, shape index: {}]   ;;  %s3638_s11 = inlined_call_operand.hbm [shape: f32[1,128], index: 11, kind: input, shape index: {}]   ;;  %s3639_s12 = inlined_call_operand.vmem [shape: f32[2,8,128], index: 12, kind: output, shape index: {}]  }
   0x1   :  { %18 = vsyncpa [#allocation5], 0 }
   0x2   :  { %19 = vsyncpa [#allocation8], 0  ;;  %s2731_s21 = smov 0  }
   0x3 LB: > { %s2737_s22 = sadd.s32 4294967295, %s2654_s21   ;;  %p2176_p0 = scmp.ge.s32.totalorder %s2654_s21, 1  ;;  %s2654_s21 = sphi %s2731_s21, %s25_s21  }
   0x4   : > { %p318_p1 = scmp.lt.s32.totalorder %s2654_s21, 3  ;;  %p3640_p2 = scmp.eq.s32.totalorder %s2737_s22, 0 }
   0x5   : > { %s2656_s23 = smov [#allocation4]   ;;  %s2657_s26 = smov [#allocation2]  }
   0x6   : > { %s351_s24 = sshll.u32 %s2656_s23, 4  ;;  %p2742_p3 = pnand %p2176_p0, %p318_p1  ;;  %s352_s24 = int_to_ptr.vmem [resolvable:$true] %s351_s24 }
   0x7   : > { %s340_s27 = sshll.u32 %s2657_s26, 4  ;;  %s2658_s28 = smov [#allocation6]   ;;  %s341_s27 = int_to_ptr.vmem [resolvable:$true] %s340_s27 }
   0x8   : > { %p2453_p4 = pneg %p2742_p3  ;;  %s362_s29 = sshll.u32 %s2658_s28, 4  ;;  %s2754_s29 = int_to_ptr.vmem [resolvable:$true] %s362_s29 }
   0x9   : > { %s2659_s13 = smov [#allocation7]   ;;  %s2543_s15 = scalar_lea.vmem %s352_s24, 16 }
   0xa   : > { %p2750_p5 = pnand %p3640_p2, %p2453_p4  ;;  %s382_s14 = sshll.u32 %s2659_s13, 4  ;;  %s2756_s14 = int_to_ptr.vmem [resolvable:$true] %s382_s14 }
   0xb   : > { %p2544_p7 = scmp.ne.s32.totalorder %s352_s24, %s2543_s15  ;;  %s2550_s16 = scalar_lea.vmem %s352_s24, 32 }
   0xc   : > { %p2534_p6 = pneg %p2750_p5  ;;  %p2551_p10 = scmp.lt.s32.totalorder %s352_s24, %s352_s24 }
   0xd   : > { %p2552_p11 = scmp.lt.s32.totalorder %s2550_s16, %s2543_s15 }
   0xe   : > { %p2546_p8 = pnand %p2544_p7, %p2534_p6 }
   0xf   : > { %p2553_p12 = por %p2552_p11, %p2551_p10 }
  0x10   : > { %p2547_p9 = pneg %p2546_p8 }
  0x12   : > { %p2554_p13 = pnand %p2553_p12, %p2547_p9 }
  0x14   : > { %2557 = shalt.err (!%p2554_p13)
}
  0x15   : > { %2459 = dma.hbm_to_vmem [thread:$0]  (!%p2750_p5), %s3633_s6, 16, %s352_s24, [#allocation5]  }
  0x16   : > { %s2569_s19 = scalar_lea.vmem %s341_s27, 16  ;;  %s2576_s20 = scalar_lea.vmem %s341_s27, 32 }
  0x17   : > { %p2570_p0 = scmp.ne.s32.totalorder %s341_s27, %s2569_s19  ;;  %p2577_p7 = scmp.lt.s32.totalorder %s341_s27, %s341_s27 }
  0x18   : > { %p2578_p8 = scmp.lt.s32.totalorder %s2576_s20, %s2569_s19 }
  0x19   : > { %p2572_p1 = pnand %p2570_p0, %p2534_p6 }
  0x1a   : > { %p2579_p2 = por %p2578_p8, %p2577_p7 }
  0x1b   : > { %p2573_p4 = pneg %p2572_p1 }
  0x1d   : > { %p2580_p10 = pnand %p2579_p2, %p2573_p4 }
  0x1f   : > { %2583 = shalt.err (!%p2580_p10)
}
  0x20   : > { %2456 = dma.hbm_to_vmem [thread:$0]  (!%p2750_p5), %s3632_s5, 16, %s341_s27, [#allocation3]  }
  0x21   : > { %s2595_s24 = scalar_lea.vmem %s2754_s29, 16  ;;  %s2602_s28 = scalar_lea.vmem %s2754_s29, 32 }
  0x22   : > { %p2596_p9 = scmp.ne.s32.totalorder %s2754_s29, %s2595_s24  ;;  %p2603_p2 = scmp.lt.s32.totalorder %s2754_s29, %s2754_s29 }
  0x23   : > { %p2604_p13 = scmp.lt.s32.totalorder %s2602_s28, %s2595_s24 }
  0x24   : > { %p2598_p11 = pnand %p2596_p9, %p2534_p6 }
  0x25   : > { %p2605_p0 = por %p2604_p13, %p2603_p2 }
  0x26   : > { %p2599_p12 = pneg %p2598_p11 }
  0x28   : > { %p2606_p1 = pnand %p2605_p0, %p2599_p12 }
  0x2a   : > { %2609 = shalt.err (!%p2606_p1)
}
  0x2b   : > { %2462 = dma.hbm_to_vmem [thread:$0]  (!%p2750_p5), %s3634_s7, 16, %s2754_s29, [#allocation5]  }
  0x2c   : > { %s2621_s27 = scalar_lea.vmem %s2756_s14, 16  ;;  %s2628_s16 = scalar_lea.vmem %s2756_s14, 32 }
  0x2d   : > { %p2622_p4 = scmp.ne.s32.totalorder %s2756_s14, %s2621_s27  ;;  %p2629_p10 = scmp.lt.s32.totalorder %s2756_s14, %s2756_s14 }
  0x2e   : > { %p2630_p9 = scmp.lt.s32.totalorder %s2628_s16, %s2621_s27 }
  0x2f   : > { %p2624_p7 = pnand %p2622_p4, %p2534_p6 }
  0x30   : > { %p2631_p11 = por %p2630_p9, %p2629_p10 }
  0x31   : > { %p2625_p8 = pneg %p2624_p7 }
  0x33   : > { %p2632_p12 = pnand %p2631_p11, %p2625_p8 }
  0x35   : > { %2635 = shalt.err (!%p2632_p12)
}
  0x36   : > { %2465 = dma.hbm_to_vmem [thread:$0]  (!%p2750_p5), %s3638_s11, 16, %s2756_s14, [#allocation8]  }
  0x37   : > { %408 = sbr.rel (%p2742_p3) target bundleno = 3949 (0xf6d), region = 68  ;;  %p3643_p6 = scmp.eq.s32.totalorder (!%p2742_p3), %s2737_s22, 0 }
  0x3c   : > { %2641 = dma.done.wait (%p3643_p6), [#allocation3], 16   ;;  %p3644_p2 = pmov %p3643_p6 }
  0x3e   : > { %2643 = vsyncadd (%p3644_p2), [#allocation3], 4294967280  ;;  %p3645_p13 = pmov %p3644_p2 }
  0x3f   : > { %p3646_p0 = pmov %p3644_p2 }
  0x40   : > { %2645 = dma.done.wait (%p3645_p13), [#allocation5], 32  }
  0x41   : > { %2647 = vsyncadd (%p3646_p0), [#allocation5], 4294967264  ;;  %p3647_p1 = pmov %p3646_p0 }
  0x42   : > { %p3648_p5 = pmov %p3646_p0 }
  0x43   : > { %2649 = dma.done.wait (%p3647_p1), [#allocation8], 16  }
  0x44   : > { %2651 = vsyncadd (%p3648_p5), [#allocation8], 4294967280  ;;  %v2660_v0 = vmov 0.0   ;;  %v522_v1 = vld [vmem:[%s3629_s2 + $0x170] sm:$0xff]  ;;  %v521_v2 = vld [vmem:[%s3629_s2 + $0x168] sm:$0xff]  ;;  %p463_p3 = scmp.lt.s32.totalorder %s2737_s22, 1  ;;  %v526_v50 = vlaneseq }
  0x45   : > { %605 = vmatprep.mubr.f32.mxu0 %v2660_v0  ;;  %2327 = vmatprep.subr.mxu1 %v2660_v0  ;;  %v519_v3 = vld [vmem:[%s3629_s2 + $0x158] sm:$0xff]  ;;  %v518_v4 = vld [vmem:[%s3629_s2 + $0x150] sm:$0xff]  ;;  %v516_v5 = vld [vmem:[%s3629_s2 + $0x140] sm:$0xff]  ;;  %vm2661_vm0 = vmmov 0   ;;  %vm682_vm1 = vcmask 261120   ;;  %s2662_s24 = smov 96  }
  0x46   : > { %541 = vmatprep.subr.mxu0 %v522_v1  ;;  %v515_v6 = vld [vmem:[%s3629_s2 + $0x138] sm:$0xff]  ;;  %v513_v7 = vld [vmem:[%s3629_s2 + $0x128] sm:$0xff]  ;;  %v512_v8 = vld [vmem:[%s3629_s2 + $0x120] sm:$0xff]  ;;  %s3652_s22 = smov (!%p463_p3, %s2737_s22), 1  ;;  %2359 = vmatprep.mubr.msk.f32.mxu1 %vm2661_vm0, %v2660_v0  ;;  %v3003_v51 = vshrl.u32 %v526_v50, 7  ;;  %vm768_vm4 = vcmask 64512  }
  0x47   : > { %542 = vmatpush1.msra.mxu0 %v521_v2  ;;  %v510_v9 = vld [vmem:[%s3629_s2 + $0x110] sm:$0xff]  ;;  %v509_v10 = vld [vmem:[%s3629_s2 + $0x108] sm:$0xff]  ;;  %v507_v11 = vld [vmem:[%s3629_s2 + $0xf8] sm:$0xff]  ;;  %s2187_s23 = sshll.u32 %s3652_s22, 3  ;;  %s469_s15 = scalar_lea.vmem %s3628_s1, %s3652_s22  ;;  %vm1368_vm5 = vcmask 523264   ;;  %vm1370_vm6 = vcmask 785408  }
  0x48   : > { %543 = vmatprep.subr.mxu0 %v519_v3  ;;  %v506_v12 = vld [vmem:[%s3629_s2 + $0xf0] sm:$0xff]  ;;  %v504_v13 = vld [vmem:[%s3629_s2 + $0xe0] sm:$0xff]  ;;  %v503_v14 = vld [vmem:[%s3629_s2 + $0xd8] sm:$0xff]  ;;  %s466_s29 = scalar_lea.vmem %s3627_s0, %s2187_s23  ;;  %v532_v52 = vsub.s32 1, %v3003_v51  ;;  %v3010_v54 = vsub.s32 0, %v3003_v51  ;;  %v536_v61 = vsub.s32 2, %v3003_v51  ;;  %s473_s26 = scalar_lea.vmem %s3639_s12, %s2187_s23 }
  0x49   : > { %544 = vmatpush1.msra.mxu0 %v518_v4  ;;  %v523_v15 = vld [vmem:[%s3629_s2 + $0x178] sm:$0xff]  ;;  %v520_v16 = vld [vmem:[%s3629_s2 + $0x160] sm:$0xff]  ;;  %v501_v17 = vld [vmem:[%s3629_s2 + $0xc8] sm:$0xff]  ;;  %v2663_v4 = vmov 0   ;;  %s2664_s27 = smov 64   ;;  %s2665_s16 = smov 32  }
  0x4a   : > { %545 = vmatprep.subr.mxu0 %v516_v5  ;;  %2328 = vmatpush3.msra.mxu1 %v523_v15  ;;  %v500_v18 = vld [vmem:[%s3629_s2 + $0xc0] sm:$0xff]  ;;  %v517_v19 = vld [vmem:[%s3629_s2 + $0x148] sm:$0xff]  ;;  %v498_v20 = vld [vmem:[%s3629_s2 + $0xb0] sm:$0xff] }
  0x4b   : > { %546 = vmatpush1.msra.mxu0 %v515_v6  ;;  %2329 = vmatprep.subr.mxu1 %v2660_v0  ;;  %v497_v21 = vld [vmem:[%s3629_s2 + $0xa8] sm:$0xff]  ;;  %v514_v22 = vld [vmem:[%s3629_s2 + $0x130] sm:$0xff]  ;;  %v495_v23 = vld [vmem:[%s3629_s2 + $0x98] sm:$0xff] }
  0x4c   : > { %547 = vmatprep.subr.mxu0 %v513_v7  ;;  %2330 = vmatpush3.msra.mxu1 %v520_v16  ;;  %v494_v24 = vld [vmem:[%s3629_s2 + $0x90] sm:$0xff]  ;;  %v511_v25 = vld [vmem:[%s3629_s2 + $0x118] sm:$0xff]  ;;  %v492_v26 = vld [vmem:[%s3629_s2 + $0x80] sm:$0xff] }
  0x4d   : > { %548 = vmatpush1.msra.mxu0 %v512_v8  ;;  %2331 = vmatprep.subr.mxu1 %v2660_v0  ;;  %v491_v27 = vld [vmem:[%s3629_s2 + $0x78] sm:$0xff]  ;;  %v508_v28 = vld [vmem:[%s3629_s2 + $0x100] sm:$0xff]  ;;  %v489_v29 = vld [vmem:[%s3629_s2 + $0x68] sm:$0xff] }
  0x4e   : > { %549 = vmatprep.subr.mxu0 %v510_v9  ;;  %2332 = vmatpush3.msra.mxu1 %v517_v19  ;;  %v488_v30 = vld [vmem:[%s3629_s2 + $0x60] sm:$0xff]  ;;  %v505_v31 = vld [vmem:[%s3629_s2 + $0xe8] sm:$0xff]  ;;  %v486_v32 = vld [vmem:[%s3629_s2 + $0x50] sm:$0xff] }
  0x4f   : > { %550 = vmatpush1.msra.mxu0 %v509_v10  ;;  %2333 = vmatprep.subr.mxu1 %v2660_v0  ;;  %v485_v33 = vld [vmem:[%s3629_s2 + $0x48] sm:$0xff]  ;;  %v502_v34 = vld [vmem:[%s3629_s2 + $0xd0] sm:$0xff]  ;;  %v483_v35 = vld [vmem:[%s3629_s2 + $0x38] sm:$0xff] }
  0x50   : > { %551 = vmatprep.subr.mxu0 %v507_v11  ;;  %2334 = vmatpush3.msra.mxu1 %v514_v22  ;;  %v482_v36 = vld [vmem:[%s3629_s2 + $0x30] sm:$0xff]  ;;  %v499_v37 = vld [vmem:[%s3629_s2 + $0xb8] sm:$0xff]  ;;  %v480_v38 = vld [vmem:[%s3629_s2 + $0x20] sm:$0xff] }
  0x51   : > { %552 = vmatpush1.msra.mxu0 %v506_v12  ;;  %2335 = vmatprep.subr.mxu1 %v2660_v0  ;;  %v479_v39 = vld [vmem:[%s3629_s2 + $0x18] sm:$0xff]  ;;  %v496_v40 = vld [vmem:[%s3629_s2 + $0xa0] sm:$0xff]  ;;  %v477_v41 = vld [vmem:[%s3629_s2 + $0x8] sm:$0xff] }
  0x52   : > { %553 = vmatprep.subr.mxu0 %v504_v13  ;;  %2336 = vmatpush3.msra.mxu1 %v511_v25  ;;  %v476_v42 = vld [vmem:[%s3629_s2] sm:$0xff]  ;;  %v493_v43 = vld [vmem:[%s3629_s2 + $0x88] sm:$0xff]  ;;  %v490_v45 = vld [vmem:[%s3629_s2 + $0x70] sm:$0xff] }
  0x53   : > { %554 = vmatpush1.msra.mxu0 %v503_v14  ;;  %2337 = vmatprep.subr.mxu1 %v2660_v0  ;;  %v2970_v44 = vld [vmem:[%s466_s29] sm:$0xff]  ;;  %v487_v46 = vld [vmem:[%s3629_s2 + $0x58] sm:$0xff]  ;;  %v481_v48 = vld [vmem:[%s3629_s2 + $0x28] sm:$0xff] }
  0x54   : > { %555 = vmatprep.subr.mxu0 %v501_v17  ;;  %2338 = vmatpush3.msra.mxu1 %v508_v28  ;;  %v484_v47 = vld [vmem:[%s3629_s2 + $0x40] sm:$0xff]  ;;  %v478_v49 = vld [vmem:[%s3629_s2 + $0x10] sm:$0xff] }
  0x55   : > { %556 = vmatpush1.msra.mxu0 %v500_v18  ;;  %2339 = vmatprep.subr.mxu1 %v2660_v0  ;;  %v524_v53 = vld [vmem:[%s3630_s3] sm:$0x7] }
  0x56   : > { %557 = vmatprep.subr.mxu0 %v498_v20  ;;  %2340 = vmatpush3.msra.mxu1 %v505_v31  ;;  %v533_v55 = vrot.slane %v524_v53, %v532_v52  ;;  %v529_v57 = vrot.slane %v524_v53, %v3010_v54  ;;  %v537_v62 = vrot.slane %v524_v53, %v536_v61  ;;  %v475_v3 = vld [vmem:[%s469_s15] sm:$0x1] }
  0x57   : > { %558 = vmatpush1.msra.mxu0 %v497_v21  ;;  %2341 = vmatprep.subr.mxu1 %v2660_v0  ;;  %vm760_vm2 = vcmp.eq.f32.partialorder %v475_v3, 0.0 }
  0x58   : > { %559 = vmatprep.subr.mxu0 %v495_v23  ;;  %2342 = vmatpush3.msra.mxu1 %v502_v34  ;;  %v761_v5 = vsel %vm760_vm2, 1, %v2663_v4 }
  0x59   : > { %560 = vmatpush1.msra.mxu0 %v494_v24  ;;  %2343 = vmatprep.subr.mxu1 %v2660_v0  ;;  %v765_v6 = vrot.slane %v761_v5, %v3010_v54 }
  0x5a   : > { %561 = vmatprep.subr.mxu0 %v492_v26  ;;  %2344 = vmatpush3.msra.mxu1 %v499_v37 }
  0x5b   : > { %562 = vmatpush1.msra.mxu0 %v491_v27  ;;  %2345 = vmatprep.subr.mxu1 %v2660_v0  ;;  %vm3042_vm3 = vcmp.eq.s32.totalorder %v765_v6, 1 }
  0x5c   : > { %563 = vmatprep.subr.mxu0 %v489_v29  ;;  %2346 = vmatpush3.msra.mxu1 %v496_v40 }
  0x5d   : > { %564 = vmatpush1.msra.mxu0 %v488_v30  ;;  %2347 = vmatprep.subr.mxu1 %v2660_v0 }
  0x5e   : > { %565 = vmatprep.subr.mxu0 %v486_v32  ;;  %2348 = vmatpush3.msra.mxu1 %v493_v43 }
  0x5f   : > { %566 = vmatpush1.msra.mxu0 %v485_v33  ;;  %2349 = vmatprep.subr.mxu1 %v2660_v0 }
  0x60   : > { %567 = vmatprep.subr.mxu0 %v483_v35  ;;  %2350 = vmatpush3.msra.mxu1 %v490_v45 }
  0x61   : > { %568 = vmatpush1.msra.mxu0 %v482_v36  ;;  %2351 = vmatprep.subr.mxu1 %v2660_v0 }
  0x62   : > { %569 = vmatprep.subr.mxu0 %v480_v38  ;;  %2352 = vmatpush3.msra.mxu1 %v487_v46 }
  0x63   : > { %570 = vmatpush1.msra.mxu0 %v479_v39  ;;  %2353 = vmatprep.subr.mxu1 %v2660_v0 }
  0x64   : > { %571 = vmatprep.subr.mxu0 %v477_v41  ;;  %2354 = vmatpush3.msra.mxu1 %v484_v47 }
  0x65   : > { %572 = vmatpush1.msra.mxu0 %v476_v42  ;;  %2355 = vmatprep.subr.mxu1 %v2660_v0 }
  0x66   : > { %606 = vmatmul.mubr.f32.vlgmr.msra.gmra.mxu0 %v2970_v44  ;;  %2402 = vmatprep.subr.mxu0 %v2660_v0 }
  0x67   : > { %2356 = vmatpush3.msra.mxu1 %v481_v48  ;;  %2434 = vmatprep.mubr.msk.f32.mxu0 %vm2661_vm0, %v2660_v0 }
  0x68   : > { %2357 = vmatprep.subr.mxu1 %v2660_v0 }
  0x69   : > { %2358 = vmatpush3.msra.mxu1 %v478_v49 }
  0x6a   : > { %2360 = vmatmul.mubr.f32.vlgmr.msra.gmra.mxu1 %v2970_v44  ;;  %2362 = vmatprep.subr.mxu1 %v2660_v0 }
  0x6b   : > { %2364 = vmatprep.mubr.msk.f32.mxu1 %vm2661_vm0, %v2660_v0 }
 0x126   : > { %v607_v56 = vpop.f32.mrf.mxu0 }
 0x127   : > { %v3021_v60 = vadd.f32 %v607_v56, %v529_v57 }
 0x128   : > { %v609_v58 = vpop.f32.mrf.mxu0 }
 0x129   : > { %v3015_v59 = vadd.f32 %v609_v58, %v533_v55 }
 0x12a   : > { %v678_v63 = vpop.f32.mrf.mxu1 }
 0x12b   : > { %855 = vrot.lane.b32.xlu1 %v3015_v59, %s2662_s24  ;;  %2363 = vmatpush3.xpose.msk.msra.mxu1 %vm682_vm1, %v3015_v59  ;;  %v3033_v1 = vadd.f32 %v678_v63, %v537_v62 }
 0x12c   : > { %2367 = vmatprep.subr.mxu1 %v2660_v0  ;;  %v2361_v2 = vpop.f32.mrf.mxu1 }
 0x12e   : > { %2365 = vmatmul.mubr.msk.f32.vlgmr.msra.gmra.mxu1 %vm682_vm1, %v3021_v60 }
 0x12f   : > { %853 = vrot.lane.b32.xlu1 %v3021_v60, %s2662_s24  ;;  %2369 = vmatprep.mubr.msk.f32.mxu1 %vm2661_vm0, %v2660_v0 }
 0x130   : > { %2368 = vmatpush3.msra.mxu1 %v3033_v1 }
 0x131   : > { %2372 = vmatprep.subr.mxu1 %v2660_v0 }
 0x19d   : > { %v856_v20 = vpop.permute.xlu1 %855 }
 0x1a1   : > { %v854_v22 = vpop.permute.xlu1 %853 }
 0x1ee   : > { %v755_v7 = vpop.f32.mrf.mxu1 }
 0x1ef   : > { %v759_v9 = vmul.f32 0.17677669, %v755_v7 }
 0x1f0   : > { %v2366_v10 = vpop.f32.mrf.mxu1 }
 0x1f1   : > { %v767_v11 = vsel %vm3042_vm3, -10000.0, %v759_v9 }
 0x1f2   : > { %v769_v12 = vsel %vm768_vm4, %v767_v11, -inf }
 0x1f3   : > { %770 = vmax.xlane.f32.xlu0 %v769_v12 }
 0x27c   : > { %v771_v13 = vpop.xlane.xlu0 %770 }
 0x27d   : > { %v772_v14 = vsub.f32 %v767_v11, %v771_v13 }
 0x27f   : > { %v773_v15 = vmul.f32 1.442695, %v772_v14 }
 0x281   : > { %2492 = vpow2.f32 %v773_v15 }
 0x28e   : > { %v2493_v16 = vpop.eup %2492 }
 0x28f   : > { %v775_v17 = vsel %vm768_vm4, %v2493_v16, 0.0 }
 0x290   : > { %776 = vadd.xlane.f32.xlu0 %v775_v17 }
 0x319   : > { %v777_v18 = vpop.xlane.xlu0 %776 }
 0x31a   : > { %2494 = vrcp.f32 %v777_v18  ;;  %v1386_v18 = vld [vmem:[%s3631_s4 + $0x70] sm:$0xff] }
 0x327   : > { %v2495_v19 = vpop.eup %2494 }
 0x328   : > { %v779_v21 = vmul.f32 %v2495_v19, %v2493_v16  ;;  %v1385_v19 = vld [vmem:[%s3631_s4 + $0x68] sm:$0xff] }
 0x32a   : > { %2370 = vmatmul.mubr.msk.f32.vlgmr.msra.gmra.mxu1 %vm768_vm4, %v779_v21  ;;  %v1383_v21 = vld [vmem:[%s3631_s4 + $0x58] sm:$0xff] }
 0x32b   : > { %2373 = vmatpush3.xpose.msk.msra.mxu1 %vm682_vm1, %v856_v20  ;;  %2374 = vmatprep.mubr.msk.f32.mxu1 %vm2661_vm0, %v2660_v0  ;;  %v1384_v20 = vld [vmem:[%s3631_s4 + $0x60] sm:$0xff] }
 0x32c   : > { %2377 = vmatprep.subr.mxu1 %v2660_v0 }
 0x32e   : > { %2375 = vmatmul.mubr.msk.f32.vlgmr.msra.gmra.mxu1 %vm682_vm1, %v854_v22  ;;  %v1382_v22 = vld [vmem:[%s3631_s4 + $0x50] sm:$0xff] }
 0x32f   : > { %2379 = vmatprep.mubr.msk.f32.mxu1 %vm2661_vm0, %v2660_v0 }
 0x3ea   : > { %v3058_v23 = vpop.f32.mrf.mxu1 }
 0x3ec   : > { %v2371_v24 = vpop.f32.mrf.mxu1 }
 0x3ed   : > { %v1381_v24 = vld [vmem:[%s3631_s4 + $0x48] sm:$0xff] }
 0x3ee   : > { %v927_v25 = vpop.f32.mrf.mxu1 }
 0x3ef   : > { %v931_v26 = vmul.f32 0.17677669, %v927_v25  ;;  %v1380_v25 = vld [vmem:[%s3631_s4 + $0x40] sm:$0xff] }
 0x3f0   : > { %v2376_v27 = vpop.f32.mrf.mxu1 }
 0x3f1   : > { %v932_v28 = vsel %vm3042_vm3, -10000.0, %v931_v26  ;;  %v1379_v26 = vld [vmem:[%s3631_s4 + $0x38] sm:$0xff]  ;;  %v1378_v27 = vld [vmem:[%s3631_s4 + $0x30] sm:$0xff] }
 0x3f2   : > { %v933_v29 = vsel %vm768_vm4, %v932_v28, -inf }
 0x3f3   : > { %934 = vmax.xlane.f32.xlu0 %v933_v29  ;;  %v1376_v29 = vld [vmem:[%s3631_s4 + $0x20] sm:$0xff] }
 0x409   : > { %945 = vrot.lane.b32.xlu0 %v3033_v1, %s2662_s24 }
 0x40d   : > { %1023 = vrot.lane.b32.xlu0 %v3015_v59, %s2664_s27 }
 0x411   : > { %1021 = vrot.lane.b32.xlu0 %v3021_v60, %s2664_s27 }
 0x47c   : > { %v935_v30 = vpop.xlane.xlu0 %934 }
 0x47d   : > { %v936_v31 = vsub.f32 %v932_v28, %v935_v30  ;;  %v1377_v28 = vld [vmem:[%s3631_s4 + $0x28] sm:$0xff]  ;;  %v1375_v30 = vld [vmem:[%s3631_s4 + $0x18] sm:$0xff] }
 0x47f   : > { %v937_v32 = vmul.f32 1.442695, %v936_v31  ;;  %v1374_v31 = vld [vmem:[%s3631_s4 + $0x10] sm:$0xff] }
 0x480   : > { %v946_v33 = vpop.permute.xlu0 %945 }
 0x481   : > { %2496 = vpow2.f32 %v937_v32  ;;  %2378 = vmatpush3.msra.mxu1 %v946_v33  ;;  %v1373_v32 = vld [vmem:[%s3631_s4 + $0x8] sm:$0xff]  ;;  %v1372_v33 = vld [vmem:[%s3631_s4] sm:$0xff] }
 0x482   : > { %2382 = vmatprep.subr.mxu1 %v2660_v0 }
 0x484   : > { %v1024_v38 = vpop.permute.xlu0 %1023 }
 0x488   : > { %v1022_v40 = vpop.permute.xlu0 %1021 }
 0x48e   : > { %v2497_v34 = vpop.eup %2496 }
 0x48f   : > { %v939_v35 = vsel %vm768_vm4, %v2497_v34, 0.0 }
 0x490   : > { %940 = vadd.xlane.f32.xlu1 %v939_v35 }
 0x4a1   : > { %1112 = vrot.lane.b32.xlu1 %v3033_v1, %s2664_s27 }
 0x4a5   : > { %1190 = vrot.lane.b32.xlu1 %v3015_v59, %s2665_s16 }
 0x519   : > { %v941_v36 = vpop.xlane.xlu1 %940 }
 0x51a   : > { %2498 = vrcp.f32 %v941_v36 }
 0x51d   : > { %v1113_v41 = vpop.permute.xlu1 %1112 }
 0x521   : > { %v1191_v58 = vpop.permute.xlu1 %1190 }
 0x527   : > { %v2499_v37 = vpop.eup %2498 }
 0x528   : > { %v943_v39 = vmul.f32 %v2499_v37, %v2497_v34 }
 0x52a   : > { %2380 = vmatmul.mubr.msk.f32.vlgmr.msra.gmra.mxu1 %vm768_vm4, %v943_v39 }
 0x52b   : > { %2383 = vmatpush3.xpose.msk.msra.mxu1 %vm682_vm1, %v1024_v38  ;;  %2384 = vmatprep.mubr.msk.f32.mxu1 %vm2661_vm0, %v2660_v0 }
 0x52c   : > { %2387 = vmatprep.subr.mxu1 %v2660_v0 }
 0x52e   : > { %2385 = vmatmul.mubr.msk.f32.vlgmr.msra.gmra.mxu1 %vm682_vm1, %v1022_v40 }
 0x52f   : > { %2388 = vmatpush3.msra.mxu1 %v1113_v41  ;;  %2389 = vmatprep.mubr.msk.f32.mxu1 %vm2661_vm0, %v2660_v0 }
 0x530   : > { %2392 = vmatprep.subr.mxu1 %v2660_v0 }
 0x5ea   : > { %v1017_v42 = vpop.f32.mrf.mxu1 }
 0x5ec   : > { %v2381_v43 = vpop.f32.mrf.mxu1 }
 0x5ee   : > { %v1095_v45 = vpop.f32.mrf.mxu1 }
 0x5ef   : > { %v1099_v46 = vmul.f32 0.17677669, %v1095_v45 }
 0x5f0   : > { %v2386_v47 = vpop.f32.mrf.mxu1 }
 0x5f1   : > { %v1100_v48 = vsel %vm3042_vm3, -10000.0, %v1099_v46 }
 0x5f2   : > { %v1101_v49 = vsel %vm768_vm4, %v1100_v48, -inf }
 0x5f3   : > { %1102 = vmax.xlane.f32.xlu0 %v1101_v49 }
 0x67c   : > { %v1103_v50 = vpop.xlane.xlu0 %1102 }
 0x67d   : > { %v1104_v53 = vsub.f32 %v1100_v48, %v1103_v50 }
 0x67f   : > { %v1105_v55 = vmul.f32 1.442695, %v1104_v53  ;;  %v1563_v53 = vld [vmem:[%s3635_s8 + $0x1e8] sm:$0xff] }
 0x681   : > { %2500 = vpow2.f32 %v1105_v55  ;;  %v1564_v55 = vld [vmem:[%s3635_s8 + $0x1f0] sm:$0xff] }
 0x68e   : > { %v2501_v56 = vpop.eup %2500 }
 0x68f   : > { %v1107_v57 = vsel %vm768_vm4, %v2501_v56, 0.0 }
 0x690   : > { %1108 = vadd.xlane.f32.xlu1 %v1107_v57  ;;  %v1561_v57 = vld [vmem:[%s3635_s8 + $0x1d8] sm:$0xff] }
 0x6a1   : > { %1188 = vrot.lane.b32.xlu1 %v3021_v60, %s2665_s16 }
 0x719   : > { %v1109_v59 = vpop.xlane.xlu1 %1108 }
 0x71a   : > { %2502 = vrcp.f32 %v1109_v59  ;;  %v1560_v59 = vld [vmem:[%s3635_s8 + $0x1d0] sm:$0xff] }
 0x71d   : > { %v1189_v2 = vpop.permute.xlu1 %1188 }
 0x727   : > { %v2503_v62 = vpop.eup %2502 }
 0x728   : > { %v1111_v63 = vmul.f32 %v2503_v62, %v2501_v56  ;;  %v1559_v56 = vld [vmem:[%s3635_s8 + $0x1c8] sm:$0xff] }
 0x729   : > { %v1555_v62 = vld [vmem:[%s3635_s8 + $0x1a8] sm:$0xff] }
 0x72a   : > { %2390 = vmatmul.mubr.msk.f32.vlgmr.msra.gmra.mxu1 %vm768_vm4, %v1111_v63  ;;  %v1557_v63 = vld [vmem:[%s3635_s8 + $0x1b8] sm:$0xff] }
 0x72b   : > { %2393 = vmatpush3.xpose.msk.msra.mxu1 %vm682_vm1, %v1191_v58  ;;  %2394 = vmatprep.mubr.msk.f32.mxu1 %vm2661_vm0, %v2660_v0  ;;  %v1558_v58 = vld [vmem:[%s3635_s8 + $0x1c0] sm:$0xff] }
 0x72c   : > { %2397 = vmatprep.subr.mxu1 %v2660_v0 }
 0x72e   : > { %2395 = vmatmul.mubr.msk.f32.vlgmr.msra.gmra.mxu1 %vm682_vm1, %v1189_v2  ;;  %v1554_v2 = vld [vmem:[%s3635_s8 + $0x1a0] sm:$0xff] }
 0x72f   : > { %2399 = vmatprep.mubr.msk.f32.mxu1 %vm2661_vm0, %v2660_v0 }
 0x7ea   : > { %v1184_v60 = vpop.f32.mrf.mxu1 }
 0x7ec   : > { %v2391_v3 = vpop.f32.mrf.mxu1 }
 0x7ed   : > { %v1551_v3 = vld [vmem:[%s3635_s8 + $0x188] sm:$0xff] }
 0x7ee   : > { %v1262_v4 = vpop.f32.mrf.mxu1 }
 0x7ef   : > { %v1266_v5 = vmul.f32 0.17677669, %v1262_v4  ;;  %v1553_v4 = vld [vmem:[%s3635_s8 + $0x198] sm:$0xff] }
 0x7f0   : > { %v2396_v6 = vpop.f32.mrf.mxu1 }
 0x7f1   : > { %v1267_v7 = vsel %vm3042_vm3, -10000.0, %v1266_v5  ;;  %v1550_v5 = vld [vmem:[%s3635_s8 + $0x180] sm:$0xff]  ;;  %v1552_v6 = vld [vmem:[%s3635_s8 + $0x190] sm:$0xff] }
 0x7f2   : > { %v1268_v9 = vsel %vm768_vm4, %v1267_v7, -inf }
 0x7f3   : > { %1269 = vmax.xlane.f32.xlu0 %v1268_v9  ;;  %v1549_v9 = vld [vmem:[%s3635_s8 + $0x178] sm:$0xff] }
 0x809   : > { %1279 = vrot.lane.b32.xlu0 %v3033_v1, %s2665_s16  ;;  %v1387_v1 = vld [vmem:[%s3631_s4 + $0x78] sm:$0xff] }
 0x80a   : > { %2403 = vmatpush3.msra.mxu0 %v1387_v1  ;;  %v1540_v1 = vld [vmem:[%s3635_s8 + $0x130] sm:$0xff] }
 0x80b   : > { %2404 = vmatprep.subr.mxu0 %v2660_v0 }
 0x80c   : > { %2405 = vmatpush3.msra.mxu0 %v1386_v18  ;;  %v1535_v18 = vld [vmem:[%s3635_s8 + $0x108] sm:$0xff] }
 0x80d   : > { %1356 = vrot.lane.b32.xlu0 %v1017_v42, %s2665_s16  ;;  %2406 = vmatprep.subr.mxu0 %v2660_v0  ;;  %v2201_v42 = vld [vmem:[#allocation2] ss:$0 sm:$0xff] }
 0x80e   : > { %2407 = vmatpush3.msra.mxu0 %v1385_v19  ;;  %v1537_v19 = vld [vmem:[%s3635_s8 + $0x118] sm:$0xff] }
 0x80f   : > { %2408 = vmatprep.subr.mxu0 %v2660_v0 }
 0x810   : > { %2409 = vmatpush3.msra.mxu0 %v1384_v20  ;;  %v1534_v20 = vld [vmem:[%s3635_s8 + $0x100] sm:$0xff] }
 0x811   : > { %1360 = vrot.lane.b32.xlu0 %v1184_v60, %s2664_s27  ;;  %2410 = vmatprep.subr.mxu0 %v2660_v0  ;;  %v1556_v60 = vld [vmem:[%s3635_s8 + $0x1b0] sm:$0xff] }
 0x812   : > { %2411 = vmatpush3.msra.mxu0 %v1383_v21  ;;  %v1536_v21 = vld [vmem:[%s3635_s8 + $0x110] sm:$0xff] }
 0x813   : > { %2412 = vmatprep.subr.mxu0 %v2660_v0 }
 0x814   : > { %2413 = vmatpush3.msra.mxu0 %v1382_v22  ;;  %v1531_v22 = vld [vmem:[%s3635_s8 + $0xe8] sm:$0xff] }
 0x815   : > { %2414 = vmatprep.subr.mxu0 %v2660_v0 }
 0x816   : > { %2415 = vmatpush3.msra.mxu0 %v1381_v24  ;;  %v1533_v24 = vld [vmem:[%s3635_s8 + $0xf8] sm:$0xff] }
 0x817   : > { %2416 = vmatprep.subr.mxu0 %v2660_v0 }
 0x818   : > { %2417 = vmatpush3.msra.mxu0 %v1380_v25  ;;  %v1530_v25 = vld [vmem:[%s3635_s8 + $0xe0] sm:$0xff] }
 0x819   : > { %2418 = vmatprep.subr.mxu0 %v2660_v0 }
 0x81a   : > { %2419 = vmatpush3.msra.mxu0 %v1379_v26  ;;  %v1532_v26 = vld [vmem:[%s3635_s8 + $0xf0] sm:$0xff] }
 0x81b   : > { %2420 = vmatprep.subr.mxu0 %v2660_v0 }
 0x81c   : > { %2421 = vmatpush3.msra.mxu0 %v1378_v27  ;;  %v1527_v27 = vld [vmem:[%s3635_s8 + $0xc8] sm:$0xff] }
 0x81d   : > { %2422 = vmatprep.subr.mxu0 %v2660_v0 }
 0x81e   : > { %2423 = vmatpush3.msra.mxu0 %v1377_v28  ;;  %v1529_v28 = vld [vmem:[%s3635_s8 + $0xd8] sm:$0xff] }
 0x81f   : > { %2424 = vmatprep.subr.mxu0 %v2660_v0 }
 0x820   : > { %2425 = vmatpush3.msra.mxu0 %v1376_v29  ;;  %v1526_v29 = vld [vmem:[%s3635_s8 + $0xc0] sm:$0xff] }
 0x821   : > { %2426 = vmatprep.subr.mxu0 %v2660_v0 }
 0x822   : > { %2427 = vmatpush3.msra.mxu0 %v1375_v30  ;;  %v1528_v30 = vld [vmem:[%s3635_s8 + $0xd0] sm:$0xff] }
 0x823   : > { %2428 = vmatprep.subr.mxu0 %v2660_v0 }
 0x824   : > { %2429 = vmatpush3.msra.mxu0 %v1374_v31  ;;  %v1523_v31 = vld [vmem:[%s3635_s8 + $0xa8] sm:$0xff] }
 0x825   : > { %2430 = vmatprep.subr.mxu0 %v2660_v0 }
 0x826   : > { %2431 = vmatpush3.msra.mxu0 %v1373_v32  ;;  %v1525_v32 = vld [vmem:[%s3635_s8 + $0xb8] sm:$0xff] }
 0x827   : > { %2432 = vmatprep.subr.mxu0 %v2660_v0 }
 0x828   : > { %2433 = vmatpush3.msra.mxu0 %v1372_v33  ;;  %v1522_v33 = vld [vmem:[%s3635_s8 + $0xa0] sm:$0xff] }
 0x87c   : > { %v1270_v10 = vpop.xlane.xlu0 %1269 }
 0x87d   : > { %v1271_v11 = vsub.f32 %v1267_v7, %v1270_v10  ;;  %v1547_v7 = vld [vmem:[%s3635_s8 + $0x168] sm:$0xff]  ;;  %v1546_v10 = vld [vmem:[%s3635_s8 + $0x160] sm:$0xff] }
 0x87f   : > { %v1272_v12 = vmul.f32 1.442695, %v1271_v11  ;;  %v1548_v11 = vld [vmem:[%s3635_s8 + $0x170] sm:$0xff] }
 0x880   : > { %v1280_v13 = vpop.permute.xlu0 %1279 }
 0x881   : > { %2504 = vpow2.f32 %v1272_v12  ;;  %2398 = vmatpush3.msra.mxu1 %v1280_v13  ;;  %v1543_v12 = vld [vmem:[%s3635_s8 + $0x148] sm:$0xff]  ;;  %v1545_v13 = vld [vmem:[%s3635_s8 + $0x158] sm:$0xff] }
 0x882   : > { %1588 = vmatprep.subr.mxu1 %v1563_v53  ;;  %v1508_v53 = vld [vmem:[%s3635_s8 + $0x30] sm:$0xff] }
 0x884   : > { %v1357_v36 = vpop.permute.xlu0 %1356 }
 0x885   : > { %v1367_v38 = vsel %vm682_vm1, %v3058_v23, %v1357_v36  ;;  %v1521_v36 = vld [vmem:[%s3635_s8 + $0x98] sm:$0xff] }
 0x888   : > { %v1361_v37 = vpop.permute.xlu0 %1360 }
 0x889   : > { %v1369_v39 = vsel %vm1368_vm5, %v1367_v38, %v1361_v37  ;;  %v1518_v37 = vld [vmem:[%s3635_s8 + $0x80] sm:$0xff]  ;;  %v1520_v38 = vld [vmem:[%s3635_s8 + $0x90] sm:$0xff] }
 0x88e   : > { %v2505_v14 = vpop.eup %2504 }
 0x88f   : > { %v1274_v8 = vsel %vm768_vm4, %v2505_v14, 0.0 }
 0x890   : > { %1275 = vadd.xlane.f32.xlu1 %v1274_v8  ;;  %v1544_v8 = vld [vmem:[%s3635_s8 + $0x150] sm:$0xff] }
 0x919   : > { %v1276_v15 = vpop.xlane.xlu1 %1275 }
 0x91a   : > { %2506 = vrcp.f32 %v1276_v15  ;;  %v1539_v15 = vld [vmem:[%s3635_s8 + $0x128] sm:$0xff] }
 0x927   : > { %v2507_v16 = vpop.eup %2506 }
 0x928   : > { %v1278_v17 = vmul.f32 %v2507_v16, %v2505_v14  ;;  %v1542_v14 = vld [vmem:[%s3635_s8 + $0x140] sm:$0xff]  ;;  %v1541_v16 = vld [vmem:[%s3635_s8 + $0x138] sm:$0xff] }
 0x92a   : > { %2400 = vmatmul.mubr.msk.f32.vlgmr.msra.gmra.mxu1 %vm768_vm4, %v1278_v17  ;;  %v1538_v17 = vld [vmem:[%s3635_s8 + $0x120] sm:$0xff] }
 0x92b   : > { %1652 = vmatprep.mubr.f32.mxu1 %v2660_v0 }
 0x9ea   : > { %v1351_v34 = vpop.f32.mrf.mxu1 }
 0x9eb   : > { %1364 = vrot.lane.b32.xlu0 %v1351_v34, %s2662_s24  ;;  %v1524_v34 = vld [vmem:[%s3635_s8 + $0xb0] sm:$0xff] }
 0x9ec   : > { %v2401_v35 = vpop.f32.mrf.mxu1 }
 0x9ed   : > { %v1519_v35 = vld [vmem:[%s3635_s8 + $0x88] sm:$0xff] }
 0xa5d   : > { %v1365_v40 = vpop.permute.xlu0 %1364 }
 0xa5e   : > { %v1371_v41 = vsel %vm1370_vm6, %v1369_v39, %v1365_v40  ;;  %v1515_v39 = vld [vmem:[%s3635_s8 + $0x68] sm:$0xff]  ;;  %v1517_v40 = vld [vmem:[%s3635_s8 + $0x78] sm:$0xff] }
 0xa5f   : > { %2435 = vmatmul.mubr.f32.vlgmr.msra.gmra.mxu0 %v1371_v41  ;;  %v1514_v41 = vld [vmem:[%s3635_s8 + $0x60] sm:$0xff] }
 0xa60   : > { %1723 = vmatprep.mubr.f32.mxu0 %v2660_v0  ;;  %v1565_v0 = vld [vmem:[%s3635_s8 + $0x1f8] sm:$0xff] }
 0xa61   : > { %1659 = vmatprep.subr.mxu0 %v1565_v0  ;;  %v1503_v0 = vld [vmem:[%s3635_s8 + $0x8] sm:$0xff] }
 0xa62   : > { %1660 = vmatpush1.msra.mxu0 %v1564_v55  ;;  %v1502_v55 = vld [vmem:[%s3635_s8] sm:$0xff] }
 0xa63   : > { %1661 = vmatprep.subr.mxu0 %v1561_v57 }
 0xa64   : > { %1662 = vmatpush1.msra.mxu0 %v1560_v59 }
 0xa65   : > { %1663 = vmatprep.subr.mxu0 %v1557_v63 }
 0xa66   : > { %1664 = vmatpush1.msra.mxu0 %v1556_v60 }
 0xa67   : > { %1665 = vmatprep.subr.mxu0 %v1553_v4  ;;  %v3372_v4 = vld [vmem:[#allocation4] ss:$0 sm:$0xff] }
 0xa68   : > { %1666 = vmatpush1.msra.mxu0 %v1552_v6 }
 0xa69   : > { %1667 = vmatprep.subr.mxu0 %v1549_v9 }
 0xa6a   : > { %1668 = vmatpush1.msra.mxu0 %v1548_v11  ;;  %v1869_v11 = vld [vmem:[%s3637_s10 + $0xf8] sm:$0xff] }
 0xa6b   : > { %1669 = vmatprep.subr.mxu0 %v1545_v13  ;;  %v1885_v13 = vld [vmem:[%s3637_s10 + $0x178] sm:$0xff] }
 0xa6c   : > { %1670 = vmatpush1.msra.mxu0 %v1544_v8  ;;  %v1900_v8 = vld [vmem:[%s3637_s10 + $0x1f0] sm:$0xff] }
 0xa6d   : > { %1671 = vmatprep.subr.mxu0 %v1541_v16  ;;  %v1884_v16 = vld [vmem:[%s3637_s10 + $0x170] sm:$0xff] }
 0xa6e   : > { %1672 = vmatpush1.msra.mxu0 %v1540_v1  ;;  %v1899_v1 = vld [vmem:[%s3637_s10 + $0x1e8] sm:$0xff] }
 0xa6f   : > { %1673 = vmatprep.subr.mxu0 %v1537_v19  ;;  %v1883_v19 = vld [vmem:[%s3637_s10 + $0x168] sm:$0xff] }
 0xa70   : > { %1674 = vmatpush1.msra.mxu0 %v1536_v21  ;;  %v1898_v21 = vld [vmem:[%s3637_s10 + $0x1e0] sm:$0xff] }
 0xa71   : > { %1675 = vmatprep.subr.mxu0 %v1533_v24  ;;  %v1882_v24 = vld [vmem:[%s3637_s10 + $0x160] sm:$0xff] }
 0xa72   : > { %1676 = vmatpush1.msra.mxu0 %v1532_v26  ;;  %v1897_v26 = vld [vmem:[%s3637_s10 + $0x1d8] sm:$0xff] }
 0xa73   : > { %1677 = vmatprep.subr.mxu0 %v1529_v28  ;;  %v1881_v28 = vld [vmem:[%s3637_s10 + $0x158] sm:$0xff] }
 0xa74   : > { %1678 = vmatpush1.msra.mxu0 %v1528_v30  ;;  %v1896_v30 = vld [vmem:[%s3637_s10 + $0x1d0] sm:$0xff] }
 0xa75   : > { %1679 = vmatprep.subr.mxu0 %v1525_v32  ;;  %v1880_v32 = vld [vmem:[%s3637_s10 + $0x150] sm:$0xff] }
 0xa76   : > { %1680 = vmatpush1.msra.mxu0 %v1524_v34  ;;  %v1895_v34 = vld [vmem:[%s3637_s10 + $0x1c8] sm:$0xff] }
 0xa77   : > { %1681 = vmatprep.subr.mxu0 %v1521_v36  ;;  %v1879_v36 = vld [vmem:[%s3637_s10 + $0x148] sm:$0xff] }
 0xa78   : > { %1682 = vmatpush1.msra.mxu0 %v1520_v38  ;;  %v1894_v38 = vld [vmem:[%s3637_s10 + $0x1c0] sm:$0xff] }
 0xa79   : > { %1683 = vmatprep.subr.mxu0 %v1517_v40  ;;  %v1878_v40 = vld [vmem:[%s3637_s10 + $0x140] sm:$0xff] }
 0xb1f   : > { %v1461_v43 = vpop.f32.mrf.mxu0 }
 0xb20   : > { %v1462_v45 = vadd.f32 %v2201_v42, %v1461_v43  ;;  %v1516_v42 = vld [vmem:[%s3635_s8 + $0x70] sm:$0xff]  ;;  %v1511_v43 = vld [vmem:[%s3635_s8 + $0x48] sm:$0xff] }
 0xb21   : > { %v2436_v46 = vpop.f32.mrf.mxu0  ;;  %1684 = vmatpush1.msra.mxu0 %v1516_v42  ;;  %v1893_v42 = vld [vmem:[%s3637_s10 + $0x1b8] sm:$0xff] }
 0xb22   : > { %v1465_v47 = vadd.f32 %v1462_v45, %v2970_v44  ;;  %v1562_v44 = vld [vmem:[%s3635_s8 + $0x1e0] sm:$0xff]  ;;  %v1513_v45 = vld [vmem:[%s3635_s8 + $0x58] sm:$0xff] }
 0xb23   : > { %1589 = vmatpush1.msra.mxu1 %v1562_v44  ;;  %v1510_v46 = vld [vmem:[%s3635_s8 + $0x40] sm:$0xff]  ;;  %1685 = vmatprep.subr.mxu0 %v1513_v45  ;;  %v1505_v44 = vld [vmem:[%s3635_s8 + $0x18] sm:$0xff] }
 0xb24   : > { %1468 = vadd.xlane.f32.xlu1 %v1465_v47  ;;  %1590 = vmatprep.subr.mxu1 %v1559_v56  ;;  %v1504_v56 = vld [vmem:[%s3635_s8 + $0x10] sm:$0xff]  ;;  %v1877_v45 = vld [vmem:[%s3637_s10 + $0x138] sm:$0xff] }
 0xb25   : > { %1591 = vmatpush1.msra.mxu1 %v1558_v58 }
 0xb26   : > { %1592 = vmatprep.subr.mxu1 %v1555_v62 }
 0xb27   : > { %1593 = vmatpush1.msra.mxu1 %v1554_v2 }
 0xb28   : > { %1594 = vmatprep.subr.mxu1 %v1551_v3 }
 0xb29   : > { %1595 = vmatpush1.msra.mxu1 %v1550_v5 }
 0xb2a   : > { %1596 = vmatprep.subr.mxu1 %v1547_v7  ;;  %v3376_v7 = vld [vmem:[#allocation6] ss:$0 sm:$0xff] }
 0xb2b   : > { %1597 = vmatpush1.msra.mxu1 %v1546_v10 }
 0xb2c   : > { %1598 = vmatprep.subr.mxu1 %v1543_v12  ;;  %v1901_v12 = vld [vmem:[%s3637_s10 + $0x1f8] sm:$0xff] }
 0xb2d   : > { %1599 = vmatpush1.msra.mxu1 %v1542_v14  ;;  %v1868_v14 = vld [vmem:[%s3637_s10 + $0xf0] sm:$0xff] }
 0xb2e   : > { %1600 = vmatprep.subr.mxu1 %v1539_v15  ;;  %v1852_v15 = vld [vmem:[%s3637_s10 + $0x70] sm:$0xff] }
 0xb2f   : > { %1601 = vmatpush1.msra.mxu1 %v1538_v17  ;;  %v1867_v17 = vld [vmem:[%s3637_s10 + $0xe8] sm:$0xff] }
 0xb30   : > { %1602 = vmatprep.subr.mxu1 %v1535_v18  ;;  %v1851_v18 = vld [vmem:[%s3637_s10 + $0x68] sm:$0xff] }
 0xb31   : > { %1603 = vmatpush1.msra.mxu1 %v1534_v20  ;;  %v1866_v20 = vld [vmem:[%s3637_s10 + $0xe0] sm:$0xff] }
 0xb32   : > { %1604 = vmatprep.subr.mxu1 %v1531_v22  ;;  %v1850_v22 = vld [vmem:[%s3637_s10 + $0x60] sm:$0xff] }
 0xb33   : > { %1605 = vmatpush1.msra.mxu1 %v1530_v25  ;;  %v1865_v25 = vld [vmem:[%s3637_s10 + $0xd8] sm:$0xff] }
 0xb34   : > { %1606 = vmatprep.subr.mxu1 %v1527_v27  ;;  %v1849_v27 = vld [vmem:[%s3637_s10 + $0x58] sm:$0xff] }
 0xb35   : > { %1607 = vmatpush1.msra.mxu1 %v1526_v29  ;;  %v1864_v29 = vld [vmem:[%s3637_s10 + $0xd0] sm:$0xff] }
 0xb36   : > { %1608 = vmatprep.subr.mxu1 %v1523_v31  ;;  %v1848_v31 = vld [vmem:[%s3637_s10 + $0x50] sm:$0xff] }
 0xb37   : > { %1609 = vmatpush1.msra.mxu1 %v1522_v33  ;;  %v1863_v33 = vld [vmem:[%s3637_s10 + $0xc8] sm:$0xff] }
 0xb38   : > { %1610 = vmatprep.subr.mxu1 %v1519_v35  ;;  %v1847_v35 = vld [vmem:[%s3637_s10 + $0x48] sm:$0xff] }
 0xb39   : > { %1611 = vmatpush1.msra.mxu1 %v1518_v37  ;;  %v1862_v37 = vld [vmem:[%s3637_s10 + $0xc0] sm:$0xff] }
 0xb3a   : > { %1612 = vmatprep.subr.mxu1 %v1515_v39  ;;  %v1846_v39 = vld [vmem:[%s3637_s10 + $0x40] sm:$0xff] }
 0xb3b   : > { %1613 = vmatpush1.msra.mxu1 %v1514_v41  ;;  %v1861_v41 = vld [vmem:[%s3637_s10 + $0xb8] sm:$0xff] }
 0xb3c   : > { %1614 = vmatprep.subr.mxu1 %v1511_v43  ;;  %v1845_v43 = vld [vmem:[%s3637_s10 + $0x38] sm:$0xff] }
 0xb3d   : > { %1615 = vmatpush1.msra.mxu1 %v1510_v46  ;;  %v1860_v46 = vld [vmem:[%s3637_s10 + $0xb0] sm:$0xff] }
 0xbad   : > { %v1469_v48 = vpop.xlane.xlu1 %1468 }
 0xbae   : > { %v1471_v49 = vmul.f32 0.0078125, %v1469_v48  ;;  %v1507_v48 = vld [vmem:[%s3635_s8 + $0x28] sm:$0xff] }
 0xbaf   : > { %1616 = vmatprep.subr.mxu1 %v1507_v48  ;;  %v1844_v48 = vld [vmem:[%s3637_s10 + $0x30] sm:$0xff] }
 0xbb0   : > { %v3176_v50 = vsub.f32 %v1465_v47, %v1471_v49  ;;  %v1512_v47 = vld [vmem:[%s3635_s8 + $0x50] sm:$0xff]  ;;  %v1509_v49 = vld [vmem:[%s3635_s8 + $0x38] sm:$0xff] }
 0xbb1   : > { %1686 = vmatpush1.msra.mxu0 %v1512_v47  ;;  %v1892_v47 = vld [vmem:[%s3637_s10 + $0x1b0] sm:$0xff] }
 0xbb2   : > { %v1473_v23 = vmul.f32 %v3176_v50, %v3176_v50  ;;  %1687 = vmatprep.subr.mxu0 %v1509_v49  ;;  %v1484_v5 = vmul.f32 %v3372_v4, %v3176_v50  ;;  %v1853_v50 = vld [vmem:[%s3637_s10 + $0x78] sm:$0xff]  ;;  %v1876_v49 = vld [vmem:[%s3637_s10 + $0x130] sm:$0xff] }
 0xbb3   : > { %1688 = vmatpush1.msra.mxu0 %v1508_v53  ;;  %v1891_v53 = vld [vmem:[%s3637_s10 + $0x1a8] sm:$0xff] }
 0xbb4   : > { %1474 = vadd.xlane.f32.xlu0 %v1473_v23  ;;  %v1506_v23 = vld [vmem:[%s3635_s8 + $0x20] sm:$0xff]  ;;  %1689 = vmatprep.subr.mxu0 %v1505_v44  ;;  %v1875_v44 = vld [vmem:[%s3637_s10 + $0x128] sm:$0xff] }
 0xbb5   : > { %1617 = vmatpush1.msra.mxu1 %v1506_v23  ;;  %1690 = vmatpush1.msra.mxu0 %v1504_v56  ;;  %v1859_v23 = vld [vmem:[%s3637_s10 + $0xa8] sm:$0xff]  ;;  %v1890_v56 = vld [vmem:[%s3637_s10 + $0x1a0] sm:$0xff] }
 0xbb6   : > { %1618 = vmatprep.subr.mxu1 %v1503_v0  ;;  %2292 = vmatprep.subr.mxu0 %v1901_v12  ;;  %v1843_v0 = vld [vmem:[%s3637_s10 + $0x28] sm:$0xff] }
 0xbb7   : > { %1619 = vmatpush1.msra.mxu1 %v1502_v55  ;;  %v1858_v55 = vld [vmem:[%s3637_s10 + $0xa0] sm:$0xff]  ;;  %v1839_v12 = vld [vmem:[%s3637_s10 + $0x8] sm:$0xff] }
 0xbb8   : > { %2257 = vmatprep.subr.mxu1 %v1869_v11  ;;  %v1887_v11 = vld [vmem:[%s3637_s10 + $0x188] sm:$0xff] }
 0xc3d   : > { %v1475_v57 = vpop.xlane.xlu0 %1474 }
 0xc3e   : > { %v1477_v58 = vmul.f32 0.007874016, %v1475_v57  ;;  %v1842_v57 = vld [vmem:[%s3637_s10 + $0x20] sm:$0xff] }
 0xc40   : > { %2508 = vrsqrt.f32 %v1477_v58  ;;  %vm1487_vm7 = vcmp.eq.f32.partialorder %v1477_v58, inf  ;;  %v1490_v63 = vand.u32 2147483648, %v1477_v58  ;;  %vm1489_vm8 = vcmp.eq.f32.partialorder %v1477_v58, 0.0 }
 0xc4d   : > { %v2509_v59 = vpop.eup %2508 }
 0xc4e   : > { %v1486_v62 = vmul.f32 %v2509_v59, %v1477_v58  ;;  %v1857_v59 = vld [vmem:[%s3637_s10 + $0x98] sm:$0xff] }
 0xc50   : > { %v1488_v2 = vsel %vm1487_vm7, %v1477_v58, %v1486_v62  ;;  %v1874_v58 = vld [vmem:[%s3637_s10 + $0x120] sm:$0xff]  ;;  %v1889_v62 = vld [vmem:[%s3637_s10 + $0x198] sm:$0xff] }
 0xc51   : > { %v1491_v60 = vsel %vm1489_vm8, %v1490_v63, %v1488_v2  ;;  %v1841_v63 = vld [vmem:[%s3637_s10 + $0x18] sm:$0xff] }
 0xc52   : > { %v1492_v3 = vadd.f32 1e-06, %v1491_v60  ;;  %v1873_v2 = vld [vmem:[%s3637_s10 + $0x118] sm:$0xff]  ;;  %v1856_v60 = vld [vmem:[%s3637_s10 + $0x90] sm:$0xff] }
 0xc54   : > { %2510 = vrcp.f32 %v1492_v3  ;;  %v1888_v3 = vld [vmem:[%s3637_s10 + $0x190] sm:$0xff] }
 0xc61   : > { %v2511_v6 = vpop.eup %2510 }
 0xc62   : > { %v1494_v9 = vmul.f32 %v2511_v6, %v1484_v5  ;;  %v1840_v5 = vld [vmem:[%s3637_s10 + $0x10] sm:$0xff] }
 0xc63   : > { %v1872_v6 = vld [vmem:[%s3637_s10 + $0x110] sm:$0xff] }
 0xc64   : > { %v3379_v10 = vadd.f32 %v3376_v7, %v1494_v9  ;;  %v1855_v9 = vld [vmem:[%s3637_s10 + $0x88] sm:$0xff] }
 0xc66   : > { %1653 = vmatmul.mubr.f32.vlgmr.msra.gmra.mxu1 %v3379_v10  ;;  %1724 = vmatmul.mubr.f32.vlgmr.msra.gmra.mxu0 %v3379_v10 }
 0xc67   : > { %2258 = vmatpush3.msra.mxu1 %v1853_v50  ;;  %2293 = vmatpush3.msra.mxu0 %v1885_v13  ;;  %v1871_v50 = vld [vmem:[%s3637_s10 + $0x108] sm:$0xff]  ;;  %v1854_v13 = vld [vmem:[%s3637_s10 + $0x80] sm:$0xff] }
 0xc68   : > { %2259 = vmatprep.subr.mxu1 %v1868_v14  ;;  %2294 = vmatprep.subr.mxu0 %v1900_v8  ;;  %v1886_v14 = vld [vmem:[%s3637_s10 + $0x180] sm:$0xff] }
 0xc69   : > { %2260 = vmatpush3.msra.mxu1 %v1852_v15  ;;  %2295 = vmatpush3.msra.mxu0 %v1884_v16  ;;  %v1838_v8 = vld [vmem:[%s3637_s10] sm:$0xff] }
 0xc6a   : > { %2261 = vmatprep.subr.mxu1 %v1867_v17  ;;  %2296 = vmatprep.subr.mxu0 %v1899_v1  ;;  %v1870_v15 = vld [vmem:[%s3637_s10 + $0x100] sm:$0xff]  ;;  %v1582_v17 = vsub.s32 3, %v3003_v51 }
 0xc6b   : > { %2262 = vmatpush3.msra.mxu1 %v1851_v18  ;;  %2297 = vmatpush3.msra.mxu0 %v1883_v19  ;;  %v1566_v16 = vld [vmem:[%s3636_s9] sm:$0xf] }
 0xc6c   : > { %2263 = vmatprep.subr.mxu1 %v1866_v20  ;;  %2298 = vmatprep.subr.mxu0 %v1898_v21  ;;  %v1571_v1 = vrot.slane %v1566_v16, %v3010_v54  ;;  %v1579_v18 = vrot.slane %v1566_v16, %v536_v61  ;;  %v1575_v21 = vrot.slane %v1566_v16, %v532_v52 }
 0xc6d   : > { %2264 = vmatpush3.msra.mxu1 %v1850_v22  ;;  %2299 = vmatpush3.msra.mxu0 %v1882_v24  ;;  %v1583_v22 = vrot.slane %v1566_v16, %v1582_v17 }
 0xc6e   : > { %2265 = vmatprep.subr.mxu1 %v1865_v25  ;;  %2300 = vmatprep.subr.mxu0 %v1897_v26 }
 0xc6f   : > { %2266 = vmatpush3.msra.mxu1 %v1849_v27  ;;  %2301 = vmatpush3.msra.mxu0 %v1881_v28 }
 0xc70   : > { %2267 = vmatprep.subr.mxu1 %v1864_v29  ;;  %2302 = vmatprep.subr.mxu0 %v1896_v30 }
 0xc71   : > { %2268 = vmatpush3.msra.mxu1 %v1848_v31  ;;  %2303 = vmatpush3.msra.mxu0 %v1880_v32 }
 0xc72   : > { %2269 = vmatprep.subr.mxu1 %v1863_v33  ;;  %2304 = vmatprep.subr.mxu0 %v1895_v34 }
 0xc73   : > { %2270 = vmatpush3.msra.mxu1 %v1847_v35  ;;  %2305 = vmatpush3.msra.mxu0 %v1879_v36 }
 0xc74   : > { %2271 = vmatprep.subr.mxu1 %v1862_v37  ;;  %2306 = vmatprep.subr.mxu0 %v1894_v38 }
 0xc75   : > { %2272 = vmatpush3.msra.mxu1 %v1846_v39  ;;  %2307 = vmatpush3.msra.mxu0 %v1878_v40 }
 0xc76   : > { %2273 = vmatprep.subr.mxu1 %v1861_v41  ;;  %2308 = vmatprep.subr.mxu0 %v1893_v42 }
 0xc77   : > { %2274 = vmatpush3.msra.mxu1 %v1845_v43  ;;  %2309 = vmatpush3.msra.mxu0 %v1877_v45 }
 0xc78   : > { %2275 = vmatprep.subr.mxu1 %v1860_v46  ;;  %2310 = vmatprep.subr.mxu0 %v1892_v47 }
 0xc79   : > { %2276 = vmatpush3.msra.mxu1 %v1844_v48  ;;  %2311 = vmatpush3.msra.mxu0 %v1876_v49 }
 0xc7a   : > { %2277 = vmatprep.subr.mxu1 %v1859_v23  ;;  %2312 = vmatprep.subr.mxu0 %v1891_v53 }
 0xc7b   : > { %2278 = vmatpush3.msra.mxu1 %v1843_v0  ;;  %2313 = vmatpush3.msra.mxu0 %v1875_v44 }
 0xc7c   : > { %2279 = vmatprep.subr.mxu1 %v1858_v55  ;;  %2314 = vmatprep.subr.mxu0 %v1890_v56 }
 0xc7d   : > { %2280 = vmatpush3.msra.mxu1 %v1842_v57  ;;  %2315 = vmatpush3.msra.mxu0 %v1874_v58 }
 0xc7e   : > { %2281 = vmatprep.subr.mxu1 %v1857_v59  ;;  %2316 = vmatprep.subr.mxu0 %v1889_v62 }
 0xc7f   : > { %2282 = vmatpush3.msra.mxu1 %v1841_v63  ;;  %2317 = vmatpush3.msra.mxu0 %v1873_v2 }
 0xc80   : > { %2283 = vmatprep.subr.mxu1 %v1856_v60  ;;  %2318 = vmatprep.subr.mxu0 %v1888_v3 }
 0xc81   : > { %2284 = vmatpush3.msra.mxu1 %v1840_v5  ;;  %2319 = vmatpush3.msra.mxu0 %v1872_v6 }
 0xc82   : > { %2285 = vmatprep.subr.mxu1 %v1855_v9  ;;  %2320 = vmatprep.subr.mxu0 %v1887_v11 }
 0xc83   : > { %2286 = vmatpush3.msra.mxu1 %v1839_v12  ;;  %2321 = vmatpush3.msra.mxu0 %v1871_v50 }
 0xc84   : > { %2287 = vmatprep.subr.mxu1 %v1854_v13  ;;  %2322 = vmatprep.subr.mxu0 %v1886_v14 }
 0xc85   : > { %2288 = vmatpush3.msra.mxu1 %v1838_v8  ;;  %2323 = vmatpush3.msra.mxu0 %v1870_v15 }
 0xd26   : > { %v1654_v19 = vpop.f32.mrf.mxu1  ;;  %v1725_v20 = vpop.f32.mrf.mxu0 }
 0xd27   : > { %v3584_v24 = vadd.f32 %v1654_v19, %v1571_v1  ;;  %v3586_v25 = vadd.f32 %v1725_v20, %v1579_v18 }
 0xd28   : > { %v1656_v26 = vpop.f32.mrf.mxu1  ;;  %v1727_v27 = vpop.f32.mrf.mxu0 }
 0xd29   : > { %v3589_v28 = vmul.f32 0.70710677, %v3584_v24  ;;  %v3592_v54 = vmul.f32 0.70710677, %v3586_v25  ;;  %v3594_v29 = vadd.f32 %v1656_v26, %v1575_v21  ;;  %v3596_v61 = vadd.f32 %v1727_v27, %v1583_v22 }
 0xd2b   : > { %v1738_v51 = vand.u32 2147483647, %v3589_v28  ;;  %v1740_v52 = vand.u32 2147483647, %v3592_v54  ;;  %v3601_v30 = vmul.f32 0.70710677, %v3594_v29 }
 0xd2c   : > { %v3604_v31 = vmul.f32 0.70710677, %v3596_v61  ;;  %vm1818_vm9 = vcmp.lt.f32.partialorder %v3589_v28, 0.0  ;;  %vm1820_vm10 = vcmp.lt.f32.partialorder %v3592_v54, 0.0  ;;  %v1730_v28 = vmul.f32 0.5, %v3584_v24 }
 0xd2d   : > { %v1742_v32 = vmul.f32 0.3275911, %v1738_v51  ;;  %v1744_v33 = vmul.f32 0.3275911, %v1740_v52  ;;  %v1739_v34 = vand.u32 2147483647, %v3601_v30  ;;  %v1794_v42 = vmul.f32 %v1738_v51, %v1738_v51 }
 0xd2e   : > { %v1741_v35 = vand.u32 2147483647, %v3604_v31  ;;  %v1796_v43 = vmul.f32 %v1740_v52, %v1740_v52  ;;  %vm1819_vm11 = vcmp.lt.f32.partialorder %v3601_v30, 0.0  ;;  %vm1821_vm12 = vcmp.lt.f32.partialorder %v3604_v31, 0.0 }
 0xd2f   : > { %v1746_v36 = vadd.f32 1.0, %v1742_v32  ;;  %v1748_v37 = vadd.f32 1.0, %v1744_v33  ;;  %v1743_v38 = vmul.f32 0.3275911, %v1739_v34  ;;  %v1798_v45 = vsub.f32 0.0, %v1794_v42 }
 0xd30   : > { %v1745_v39 = vmul.f32 0.3275911, %v1741_v35  ;;  %v1795_v46 = vmul.f32 %v1739_v34, %v1739_v34  ;;  %v1800_v47 = vsub.f32 0.0, %v1796_v43  ;;  %v1797_v48 = vmul.f32 %v1741_v35, %v1741_v35 }
 0xd31   : > { %2512 = vrcp.f32 %v1746_v36  ;;  %v1747_v40 = vadd.f32 1.0, %v1743_v38  ;;  %v1802_v0 = vmul.f32 1.442695, %v1798_v45 }
 0xd32   : > { %2514 = vrcp.f32 %v1748_v37  ;;  %v1749_v41 = vadd.f32 1.0, %v1745_v39  ;;  %v1799_v44 = vsub.f32 0.0, %v1795_v46  ;;  %v1806_v56 = vmul.f32 1.442695, %v1800_v47 }
 0xd33   : > { %2516 = vrcp.f32 %v1747_v40  ;;  %v1801_v57 = vsub.f32 0.0, %v1797_v48 }
 0xd34   : > { %2518 = vrcp.f32 %v1749_v41  ;;  %v1804_v2 = vmul.f32 1.442695, %v1799_v44 }
 0xd35   : > { %2520 = vpow2.f32 %v1802_v0  ;;  %v1808_v6 = vmul.f32 1.442695, %v1801_v57 }
 0xd36   : > { %2522 = vpow2.f32 %v1806_v56 }
 0xd37   : > { %2524 = vpow2.f32 %v1804_v2 }
 0xd38   : > { %2526 = vpow2.f32 %v1808_v6 }
 0xd3e   : > { %v2513_v49 = vpop.eup %2512 }
 0xd3f   : > { %v2515_v23 = vpop.eup %2514  ;;  %v1758_v53 = vmul.f32 1.0614054, %v2513_v49 }
 0xd40   : > { %v1760_v55 = vmul.f32 1.0614054, %v2515_v23  ;;  %v2517_v59 = vpop.eup %2516 }
 0xd41   : > { %v1762_v58 = vadd.f32 -1.4531521, %v1758_v53  ;;  %v1759_v60 = vmul.f32 1.0614054, %v2517_v59  ;;  %v2519_v3 = vpop.eup %2518 }
 0xd42   : > { %v1764_v62 = vadd.f32 -1.4531521, %v1760_v55  ;;  %v1761_v12 = vmul.f32 1.0614054, %v2519_v3  ;;  %v2521_v35 = vpop.eup %2520 }
 0xd43   : > { %v1766_v63 = vmul.f32 %v2513_v49, %v1762_v58  ;;  %v1763_v11 = vadd.f32 -1.4531521, %v1759_v60  ;;  %v2523_v37 = vpop.eup %2522  ;;  %v1731_v60 = vmul.f32 0.5, %v3594_v29 }
 0xd44   : > { %v1768_v5 = vmul.f32 %v2515_v23, %v1764_v62  ;;  %v1765_v8 = vadd.f32 -1.4531521, %v1761_v12  ;;  %v2525_v46 = vpop.eup %2524 }
 0xd45   : > { %v1770_v9 = vadd.f32 1.4214138, %v1766_v63  ;;  %v1767_v14 = vmul.f32 %v2517_v59, %v1763_v11  ;;  %v2527_v44 = vpop.eup %2526 }
 0xd46   : > { %v1772_v50 = vadd.f32 1.4214138, %v1768_v5  ;;  %v1769_v1 = vmul.f32 %v2519_v3, %v1765_v8 }
 0xd47   : > { %v1774_v13 = vmul.f32 %v2513_v49, %v1770_v9  ;;  %v1771_v17 = vadd.f32 1.4214138, %v1767_v14  ;;  %v1733_v9 = vmul.f32 0.5, %v3596_v61  ;;  %v2204_v14 = vld [vmem:[#allocation7] ss:$0 sm:$0xff] }
 0xd48   : > { %v1776_v15 = vmul.f32 %v2515_v23, %v1772_v50  ;;  %v1773_v21 = vadd.f32 1.4214138, %v1769_v1  ;;  %v1732_v50 = vmul.f32 0.5, %v3586_v25 }
 0xd49   : > { %v1778_v16 = vadd.f32 -0.28449672, %v1774_v13  ;;  %v1775_v20 = vmul.f32 %v2517_v59, %v1771_v17 }
 0xd4a   : > { %v1780_v18 = vadd.f32 -0.28449672, %v1776_v15  ;;  %v1777_v51 = vmul.f32 %v2519_v3, %v1773_v21 }
 0xd4b   : > { %v1782_v19 = vmul.f32 %v2513_v49, %v1778_v16  ;;  %v1779_v27 = vadd.f32 -0.28449672, %v1775_v20 }
 0xd4c   : > { %v1784_v22 = vmul.f32 %v2515_v23, %v1780_v18  ;;  %v1781_v34 = vadd.f32 -0.28449672, %v1777_v51 }
 0xd4d   : > { %v1786_v26 = vadd.f32 0.2548296, %v1782_v19  ;;  %v1783_v33 = vmul.f32 %v2517_v59, %v1779_v27 }
 0xd4e   : > { %v1788_v52 = vadd.f32 0.2548296, %v1784_v22  ;;  %v1785_v40 = vmul.f32 %v2519_v3, %v1781_v34 }
 0xd4f   : > { %v1790_v32 = vmul.f32 %v2513_v49, %v1786_v26  ;;  %v1787_v39 = vadd.f32 0.2548296, %v1783_v33 }
 0xd50   : > { %v1792_v36 = vmul.f32 %v2515_v23, %v1788_v52  ;;  %v1789_v45 = vadd.f32 0.2548296, %v1785_v40 }
 0xd51   : > { %v1810_v38 = vmul.f32 %v2521_v35, %v1790_v32  ;;  %v1791_v43 = vmul.f32 %v2517_v59, %v1787_v39 }
 0xd52   : > { %v1812_v41 = vmul.f32 %v2523_v37, %v1792_v36  ;;  %v1793_v0 = vmul.f32 %v2519_v3, %v1789_v45 }
 0xd53   : > { %v1814_v42 = vsub.f32 1.0, %v1810_v38  ;;  %v1811_v53 = vmul.f32 %v2525_v46, %v1791_v43 }
 0xd54   : > { %v1816_v47 = vsub.f32 1.0, %v1812_v41  ;;  %v1813_v56 = vmul.f32 %v2527_v44, %v1793_v0 }
 0xd55   : > { %v1822_v48 = vsub.f32 0.0, %v1814_v42  ;;  %v1815_v49 = vsub.f32 1.0, %v1811_v53 }
 0xd56   : > { %v1824_v55 = vsub.f32 0.0, %v1816_v47  ;;  %v1817_v58 = vsub.f32 1.0, %v1813_v56 }
 0xd57   : > { %v1826_v23 = vsel %vm1818_vm9, %v1822_v48, %v1814_v42  ;;  %v1823_v57 = vsub.f32 0.0, %v1815_v49 }
 0xd58   : > { %v1828_v62 = vsel %vm1820_vm10, %v1824_v55, %v1816_v47  ;;  %v1830_v59 = vadd.f32 1.0, %v1826_v23  ;;  %v1825_v2 = vsub.f32 0.0, %v1817_v58 }
 0xd59   : > { %v1827_v63 = vsel %vm1819_vm11, %v1823_v57, %v1815_v49  ;;  %v1832_v5 = vadd.f32 1.0, %v1828_v62 }
 0xd5a   : > { %v1831_v3 = vadd.f32 1.0, %v1827_v63  ;;  %v1829_v6 = vsel %vm1821_vm12, %v1825_v2, %v1817_v58  ;;  %v1834_v12 = vmul.f32 %v1830_v59, %v1730_v28 }
 0xd5b   : > { %v1833_v11 = vadd.f32 1.0, %v1829_v6  ;;  %v1836_v13 = vmul.f32 %v1832_v5, %v1732_v50 }
 0xd5c   : > { %v1835_v54 = vmul.f32 %v1831_v3, %v1731_v60 }
 0xd5d   : > { %v1837_v30 = vmul.f32 %v1833_v11, %v1733_v9 }
 0xd5e   : > { %1973 = vmatprep.mubr.f32.mxu1 %v1835_v54 }
 0xd5f   : > { %1974 = vmatmul.mubr.f32.vlgmr.msra.gmra.mxu1 %v1834_v12  ;;  %2043 = vmatprep.mubr.f32.mxu0 %v1837_v30 }
 0xd60   : > { %2044 = vmatmul.mubr.f32.vlgmr.msra.gmra.mxu0 %v1836_v13 }
 0xe1f   : > { %v2289_v29 = vpop.f32.mrf.mxu1 }
 0xe20   : > { %v2324_v31 = vpop.f32.mrf.mxu0 }
 0xe21   : > { %v2290_v8 = vpop.f32.mrf.mxu1 }
 0xe22   : > { %v2291_v24 = vadd.f32 %v2290_v8, %v2289_v29  ;;  %v2325_v15 = vpop.f32.mrf.mxu0 }
 0xe23   : > { %v2326_v17 = vadd.f32 %v2325_v15, %v2324_v31 }
 0xe24   : > { %v1976_v16 = vadd.f32 %v2291_v24, %v2204_v14 }
 0xe26   : > { %v2046_v61 = vadd.f32 %v2326_v17, %v1976_v16 }
 0xe28   : > { %v2049_v1 = vadd.f32 %v2046_v61, %v3379_v10 }
 0xe2a   : > { %2050 = vadd.xlane.f32.xlu1 %v2049_v1 }
 0xeb3   : > { %v2051_v18 = vpop.xlane.xlu1 %2050 }
 0xeb4   : > { %v2052_v25 = vmul.f32 0.0078125, %v2051_v18 }
 0xeb6   : > { %v2053_v19 = vsub.f32 %v2049_v1, %v2052_v25 }
 0xeb8   : > { %v2054_v20 = vmul.f32 %v2053_v19, %v2053_v19  ;;  %v2058_v10 = vmul.f32 %v3372_v4, %v2053_v19 }
 0xeba   : > { %2055 = vadd.xlane.f32.xlu1 %v2054_v20 }
 0xf43   : > { %v2056_v21 = vpop.xlane.xlu1 %2055 }
 0xf44   : > { %v2057_v22 = vmul.f32 0.007874016, %v2056_v21 }
 0xf46   : > { %2528 = vrsqrt.f32 %v2057_v22  ;;  %vm2061_vm13 = vcmp.eq.f32.partialorder %v2057_v22, inf  ;;  %v2064_v51 = vand.u32 2147483648, %v2057_v22  ;;  %vm2063_vm14 = vcmp.eq.f32.partialorder %v2057_v22, 0.0 }
 0xf53   : > { %v2529_v26 = vpop.eup %2528 }
 0xf54   : > { %v2060_v27 = vmul.f32 %v2529_v26, %v2057_v22 }
 0xf56   : > { %v2062_v52 = vsel %vm2061_vm13, %v2057_v22, %v2060_v27 }
 0xf57   : > { %v2065_v32 = vsel %vm2063_vm14, %v2064_v51, %v2062_v52 }
 0xf58   : > { %v2066_v33 = vadd.f32 1e-06, %v2065_v32 }
 0xf5a   : > { %2530 = vrcp.f32 %v2066_v33 }
 0xf67   : > { %v2531_v34 = vpop.eup %2530 }
 0xf68   : > { %v2068_v35 = vmul.f32 %v2531_v34, %v2058_v10 }
 0xf6a   : > { %v2069_v36 = vadd.f32 %v3376_v7, %v2068_v35 }
 0xf6c   : > { %2070 = vst [vmem:[%s473_s26] sm:$0xff] %v2069_v36 }
 0xf6d PF: > { %s25_s21 = sadd.s32 1, %s2654_s21  }
 0xf6e   : > { %p22_p4 = scmp.ge.s32.totalorder %s25_s21, 4  }
 0xf70   :  { %24 = sbr.rel (!%p22_p4) target bundleno = 3 (0x3), region = 118 }
 0xf75   :  { %2090 = vsyncpa [#allocation3], 1 }
 0xf76   :  { %2092 = vsyncpa [#allocation3 + $0x1], 1 }
 0xf77   :  { %2093 = vsyncpa [#allocation5], 1 }
 0xf78   :  { %2094 = vsyncpa [#allocation8], 1 }

// kernel: transformer_enc.14
= control target key start
LH: loop header
LB: loop body
LE: loop exit
PB: predicated region body
PF: predicated region fallthrough
CT: control target
= control target key end

     0   :  { %s2470_s21 = smov 0   ;;  %s3305_s0 = inlined_call_operand.vmem [shape: f32[2,8,128], index: 0, kind: input, shape index: {}]   ;;  %s3306_s1 = inlined_call_operand.vmem [shape: f32[2,1,8], index: 1, kind: input, shape index: {}]   ;;  %s3307_s2 = inlined_call_operand.vmem [shape: f32[128,384], index: 2, kind: input, shape index: {}]   ;;  %s3308_s3 = inlined_call_operand.vmem [shape: f32[1,384], index: 3, kind: input, shape index: {}]   ;;  %s3309_s4 = inlined_call_operand.vmem [shape: f32[128,128], index: 4, kind: input, shape index: {}]   ;;  %s3310_s5 = inlined_call_operand.vmem [shape: f32[1,128], index: 5, kind: input, shape index: {}]   ;;  %s3311_s6 = inlined_call_operand.vmem [shape: f32[1,128], index: 6, kind: input, shape index: {}]   ;;  %s3312_s7 = inlined_call_operand.vmem [shape: f32[1,128], index: 7, kind: input, shape index: {}]   ;;  %s3313_s8 = inlined_call_operand.vmem [shape: f32[128,512], index: 8, kind: input, shape index: {}]   ;;  %s3314_s9 = inlined_call_operand.vmem [shape: f32[1,512], index: 9, kind: input, shape index: {}]   ;;  %s3315_s10 = inlined_call_operand.vmem [shape: f32[512,128], index: 10, kind: input, shape index: {}]   ;;  %s3316_s11 = inlined_call_operand.vmem [shape: f32[1,128], index: 11, kind: input, shape index: {}]   ;;  %s3317_s12 = inlined_call_operand.vmem [shape: f32[2,8,128], index: 12, kind: output, shape index: {}]  }
   0x1 LB: > { %s2082_s22 = sadd.s32 4294967295, %s2397_s21   ;;  %p2086_p0 = scmp.ge.s32.totalorder %s2397_s21, 1  ;;  %s2397_s21 = sphi %s2470_s21, %s22_s21  }
   0x2   : > { %p369_p1 = scmp.lt.s32.totalorder %s2397_s21, 3 }
   0x4   : > { %p370_p2 = pnand %p2086_p0, %p369_p1 }
   0x5   : > { %p2553_p3 = scmp.lt.s32.totalorder (!%p370_p2), %s2082_s22, 1  ;;  %s2401_s14 = smov (!%p370_p2), 96  }
   0x6   : > { %373 = sbr.rel (%p370_p2) target bundleno = 3891 (0xf33), region = 68  ;;  %s2403_s18 = smov (!%p370_p2), 64  }
   0x7   : > { %s2404_s20 = smov (!%p370_p2), 32  }
   0xb   : > { %v471_v0 = vld [vmem:[%s3307_s2 + $0x170] sm:$0xff]  ;;  %v470_v1 = vld [vmem:[%s3307_s2 + $0x168] sm:$0xff]  ;;  %v468_v2 = vld [vmem:[%s3307_s2 + $0x158] sm:$0xff]  ;;  %v2399_v4 = vmov 0.0   ;;  %s3322_s22 = smov (!%p2553_p3, %s2082_s22), 1  ;;  %vm2400_vm0 = vmmov 0   ;;  %v475_v50 = vlaneseq }
   0xc   : > { %490 = vmatprep.subr.mxu0 %v471_v0  ;;  %v467_v3 = vld [vmem:[%s3307_s2 + $0x150] sm:$0xff]  ;;  %554 = vmatprep.mubr.f32.mxu0 %v2399_v4  ;;  %v465_v5 = vld [vmem:[%s3307_s2 + $0x140] sm:$0xff]  ;;  %v464_v6 = vld [vmem:[%s3307_s2 + $0x138] sm:$0xff]  ;;  %s2087_s30 = sshll.u32 %s3322_s22, 3  ;;  %vm631_vm1 = vcmask 261120   ;;  %s418_s17 = scalar_lea.vmem %s3306_s1, %s3322_s22  ;;  %vm717_vm4 = vcmask 64512  }
   0xd   : > { %491 = vmatpush1.msra.mxu0 %v470_v1  ;;  %2227 = vmatprep.subr.mxu1 %v2399_v4  ;;  %v462_v7 = vld [vmem:[%s3307_s2 + $0x128] sm:$0xff]  ;;  %v461_v8 = vld [vmem:[%s3307_s2 + $0x120] sm:$0xff]  ;;  %v459_v9 = vld [vmem:[%s3307_s2 + $0x110] sm:$0xff]  ;;  %s415_s25 = scalar_lea.vmem %s3305_s0, %s2087_s30  ;;  %v2669_v51 = vshrl.u32 %v475_v50, 7  ;;  %vm1317_vm5 = vcmask 523264   ;;  %vm1319_vm6 = vcmask 785408   ;;  %s422_s19 = scalar_lea.vmem %s3317_s12, %s2087_s30 }
   0xe   : > { %492 = vmatprep.subr.mxu0 %v468_v2  ;;  %v458_v10 = vld [vmem:[%s3307_s2 + $0x108] sm:$0xff]  ;;  %v456_v11 = vld [vmem:[%s3307_s2 + $0xf8] sm:$0xff]  ;;  %v455_v12 = vld [vmem:[%s3307_s2 + $0xf0] sm:$0xff]  ;;  %2259 = vmatprep.mubr.msk.f32.mxu1 %vm2400_vm0, %v2399_v4 }
   0xf   : > { %493 = vmatpush1.msra.mxu0 %v467_v3  ;;  %v453_v13 = vld [vmem:[%s3307_s2 + $0xe0] sm:$0xff]  ;;  %v452_v14 = vld [vmem:[%s3307_s2 + $0xd8] sm:$0xff]  ;;  %v450_v17 = vld [vmem:[%s3307_s2 + $0xc8] sm:$0xff]  ;;  %v481_v52 = vsub.s32 1, %v2669_v51  ;;  %v2676_v54 = vsub.s32 0, %v2669_v51  ;;  %v485_v61 = vsub.s32 2, %v2669_v51 }
  0x10   : > { %494 = vmatprep.subr.mxu0 %v465_v5  ;;  %v472_v15 = vld [vmem:[%s3307_s2 + $0x178] sm:$0xff]  ;;  %v469_v16 = vld [vmem:[%s3307_s2 + $0x160] sm:$0xff]  ;;  %v466_v19 = vld [vmem:[%s3307_s2 + $0x148] sm:$0xff]  ;;  %v2402_v3 = vmov 0  }
  0x11   : > { %495 = vmatpush1.msra.mxu0 %v464_v6  ;;  %2228 = vmatpush3.msra.mxu1 %v472_v15  ;;  %v449_v18 = vld [vmem:[%s3307_s2 + $0xc0] sm:$0xff]  ;;  %v447_v20 = vld [vmem:[%s3307_s2 + $0xb0] sm:$0xff]  ;;  %v446_v21 = vld [vmem:[%s3307_s2 + $0xa8] sm:$0xff] }
  0x12   : > { %496 = vmatprep.subr.mxu0 %v462_v7  ;;  %2229 = vmatprep.subr.mxu1 %v2399_v4  ;;  %v463_v22 = vld [vmem:[%s3307_s2 + $0x130] sm:$0xff]  ;;  %v444_v23 = vld [vmem:[%s3307_s2 + $0x98] sm:$0xff]  ;;  %v441_v26 = vld [vmem:[%s3307_s2 + $0x80] sm:$0xff] }
  0x13   : > { %497 = vmatpush1.msra.mxu0 %v461_v8  ;;  %2230 = vmatpush3.msra.mxu1 %v469_v16  ;;  %v443_v24 = vld [vmem:[%s3307_s2 + $0x90] sm:$0xff]  ;;  %v460_v25 = vld [vmem:[%s3307_s2 + $0x118] sm:$0xff]  ;;  %v457_v28 = vld [vmem:[%s3307_s2 + $0x100] sm:$0xff] }
  0x14   : > { %498 = vmatprep.subr.mxu0 %v459_v9  ;;  %2231 = vmatprep.subr.mxu1 %v2399_v4  ;;  %v440_v27 = vld [vmem:[%s3307_s2 + $0x78] sm:$0xff]  ;;  %v438_v29 = vld [vmem:[%s3307_s2 + $0x68] sm:$0xff]  ;;  %v437_v30 = vld [vmem:[%s3307_s2 + $0x60] sm:$0xff] }
  0x15   : > { %499 = vmatpush1.msra.mxu0 %v458_v10  ;;  %2232 = vmatpush3.msra.mxu1 %v466_v19  ;;  %v454_v31 = vld [vmem:[%s3307_s2 + $0xe8] sm:$0xff]  ;;  %v435_v32 = vld [vmem:[%s3307_s2 + $0x50] sm:$0xff]  ;;  %v432_v35 = vld [vmem:[%s3307_s2 + $0x38] sm:$0xff] }
  0x16   : > { %500 = vmatprep.subr.mxu0 %v456_v11  ;;  %2233 = vmatprep.subr.mxu1 %v2399_v4  ;;  %v434_v33 = vld [vmem:[%s3307_s2 + $0x48] sm:$0xff]  ;;  %v451_v34 = vld [vmem:[%s3307_s2 + $0xd0] sm:$0xff]  ;;  %v448_v37 = vld [vmem:[%s3307_s2 + $0xb8] sm:$0xff] }
  0x17   : > { %501 = vmatpush1.msra.mxu0 %v455_v12  ;;  %2234 = vmatpush3.msra.mxu1 %v463_v22  ;;  %v431_v36 = vld [vmem:[%s3307_s2 + $0x30] sm:$0xff]  ;;  %v429_v38 = vld [vmem:[%s3307_s2 + $0x20] sm:$0xff]  ;;  %v428_v39 = vld [vmem:[%s3307_s2 + $0x18] sm:$0xff] }
  0x18   : > { %502 = vmatprep.subr.mxu0 %v453_v13  ;;  %2235 = vmatprep.subr.mxu1 %v2399_v4  ;;  %v445_v40 = vld [vmem:[%s3307_s2 + $0xa0] sm:$0xff]  ;;  %v426_v41 = vld [vmem:[%s3307_s2 + $0x8] sm:$0xff]  ;;  %v439_v45 = vld [vmem:[%s3307_s2 + $0x70] sm:$0xff] }
  0x19   : > { %503 = vmatpush1.msra.mxu0 %v452_v14  ;;  %2236 = vmatpush3.msra.mxu1 %v460_v25  ;;  %v425_v42 = vld [vmem:[%s3307_s2] sm:$0xff]  ;;  %v442_v43 = vld [vmem:[%s3307_s2 + $0x88] sm:$0xff]  ;;  %v436_v46 = vld [vmem:[%s3307_s2 + $0x58] sm:$0xff] }
  0x1a   : > { %504 = vmatprep.subr.mxu0 %v450_v17  ;;  %2237 = vmatprep.subr.mxu1 %v2399_v4  ;;  %v2636_v44 = vld [vmem:[%s415_s25] sm:$0xff]  ;;  %v430_v48 = vld [vmem:[%s3307_s2 + $0x28] sm:$0xff]  ;;  %v427_v49 = vld [vmem:[%s3307_s2 + $0x10] sm:$0xff] }
  0x1b   : > { %505 = vmatpush1.msra.mxu0 %v449_v18  ;;  %2238 = vmatpush3.msra.mxu1 %v457_v28  ;;  %v433_v47 = vld [vmem:[%s3307_s2 + $0x40] sm:$0xff] }
  0x1c   : > { %506 = vmatprep.subr.mxu0 %v447_v20  ;;  %2239 = vmatprep.subr.mxu1 %v2399_v4  ;;  %v473_v53 = vld [vmem:[%s3308_s3] sm:$0x7] }
  0x1d   : > { %507 = vmatpush1.msra.mxu0 %v446_v21  ;;  %2240 = vmatpush3.msra.mxu1 %v454_v31  ;;  %v482_v55 = vrot.slane %v473_v53, %v481_v52  ;;  %v478_v57 = vrot.slane %v473_v53, %v2676_v54  ;;  %v486_v62 = vrot.slane %v473_v53, %v485_v61  ;;  %v424_v2 = vld [vmem:[%s418_s17] sm:$0x1] }
  0x1e   : > { %508 = vmatprep.subr.mxu0 %v444_v23  ;;  %2241 = vmatprep.subr.mxu1 %v2399_v4  ;;  %vm709_vm2 = vcmp.eq.f32.partialorder %v424_v2, 0.0 }
  0x1f   : > { %509 = vmatpush1.msra.mxu0 %v443_v24  ;;  %2242 = vmatpush3.msra.mxu1 %v451_v34  ;;  %v710_v5 = vsel %vm709_vm2, 1, %v2402_v3 }
  0x20   : > { %510 = vmatprep.subr.mxu0 %v441_v26  ;;  %2243 = vmatprep.subr.mxu1 %v2399_v4  ;;  %v714_v6 = vrot.slane %v710_v5, %v2676_v54 }
  0x21   : > { %511 = vmatpush1.msra.mxu0 %v440_v27  ;;  %2244 = vmatpush3.msra.mxu1 %v448_v37 }
  0x22   : > { %512 = vmatprep.subr.mxu0 %v438_v29  ;;  %2245 = vmatprep.subr.mxu1 %v2399_v4  ;;  %vm2708_vm3 = vcmp.eq.s32.totalorder %v714_v6, 1 }
  0x23   : > { %513 = vmatpush1.msra.mxu0 %v437_v30  ;;  %2246 = vmatpush3.msra.mxu1 %v445_v40 }
  0x24   : > { %514 = vmatprep.subr.mxu0 %v435_v32  ;;  %2247 = vmatprep.subr.mxu1 %v2399_v4 }
  0x25   : > { %515 = vmatpush1.msra.mxu0 %v434_v33  ;;  %2248 = vmatpush3.msra.mxu1 %v442_v43 }
  0x26   : > { %516 = vmatprep.subr.mxu0 %v432_v35  ;;  %2249 = vmatprep.subr.mxu1 %v2399_v4 }
  0x27   : > { %517 = vmatpush1.msra.mxu0 %v431_v36  ;;  %2250 = vmatpush3.msra.mxu1 %v439_v45 }
  0x28   : > { %518 = vmatprep.subr.mxu0 %v429_v38  ;;  %2251 = vmatprep.subr.mxu1 %v2399_v4 }
  0x29   : > { %519 = vmatpush1.msra.mxu0 %v428_v39  ;;  %2252 = vmatpush3.msra.mxu1 %v436_v46 }
  0x2a   : > { %520 = vmatprep.subr.mxu0 %v426_v41  ;;  %2253 = vmatprep.subr.mxu1 %v2399_v4 }
  0x2b   : > { %521 = vmatpush1.msra.mxu0 %v425_v42  ;;  %2254 = vmatpush3.msra.mxu1 %v433_v47 }
  0x2c   : > { %555 = vmatmul.mubr.f32.vlgmr.msra.gmra.mxu0 %v2636_v44  ;;  %2302 = vmatprep.subr.mxu0 %v2399_v4 }
  0x2d   : > { %2255 = vmatprep.subr.mxu1 %v2399_v4  ;;  %2334 = vmatprep.mubr.msk.f32.mxu0 %vm2400_vm0, %v2399_v4 }
  0x2e   : > { %2256 = vmatpush3.msra.mxu1 %v430_v48 }
  0x2f   : > { %2257 = vmatprep.subr.mxu1 %v2399_v4 }
  0x30   : > { %2258 = vmatpush3.msra.mxu1 %v427_v49 }
  0x31   : > { %2260 = vmatmul.mubr.f32.vlgmr.msra.gmra.mxu1 %v2636_v44  ;;  %2262 = vmatprep.subr.mxu1 %v2399_v4 }
  0x32   : > { %2264 = vmatprep.mubr.msk.f32.mxu1 %vm2400_vm0, %v2399_v4 }
  0xec   : > { %v556_v56 = vpop.f32.mrf.mxu0 }
  0xed   : > { %v2687_v60 = vadd.f32 %v556_v56, %v478_v57 }
  0xee   : > { %v558_v58 = vpop.f32.mrf.mxu0 }
  0xef   : > { %v2681_v59 = vadd.f32 %v558_v58, %v482_v55 }
  0xf1   : > { %804 = vrot.lane.b32.xlu1 %v2681_v59, %s2401_s14  ;;  %2263 = vmatpush3.xpose.msk.msra.mxu1 %vm631_vm1, %v2681_v59  ;;  %v627_v63 = vpop.f32.mrf.mxu1 }
  0xf2   : > { %2267 = vmatprep.subr.mxu1 %v2399_v4  ;;  %v2699_v0 = vadd.f32 %v627_v63, %v486_v62 }
  0xf3   : > { %v2261_v1 = vpop.f32.mrf.mxu1 }
  0xf4   : > { %2265 = vmatmul.mubr.msk.f32.vlgmr.msra.gmra.mxu1 %vm631_vm1, %v2687_v60 }
  0xf5   : > { %802 = vrot.lane.b32.xlu1 %v2687_v60, %s2401_s14  ;;  %2269 = vmatprep.mubr.msk.f32.mxu1 %vm2400_vm0, %v2399_v4 }
  0xf6   : > { %2268 = vmatpush3.msra.mxu1 %v2699_v0 }
  0xf7   : > { %2272 = vmatprep.subr.mxu1 %v2399_v4 }
 0x163   : > { %v805_v20 = vpop.permute.xlu1 %804 }
 0x167   : > { %v803_v22 = vpop.permute.xlu1 %802 }
 0x1b4   : > { %v704_v7 = vpop.f32.mrf.mxu1 }
 0x1b5   : > { %v708_v9 = vmul.f32 0.17677669, %v704_v7 }
 0x1b6   : > { %v2266_v10 = vpop.f32.mrf.mxu1 }
 0x1b7   : > { %v716_v11 = vsel %vm2708_vm3, -10000.0, %v708_v9 }
 0x1b8   : > { %v718_v12 = vsel %vm717_vm4, %v716_v11, -inf }
 0x1b9   : > { %719 = vmax.xlane.f32.xlu0 %v718_v12 }
 0x242   : > { %v720_v13 = vpop.xlane.xlu0 %719 }
 0x243   : > { %v721_v14 = vsub.f32 %v716_v11, %v720_v13 }
 0x245   : > { %v722_v15 = vmul.f32 1.442695, %v721_v14 }
 0x247   : > { %2351 = vpow2.f32 %v722_v15 }
 0x254   : > { %v2352_v16 = vpop.eup %2351 }
 0x255   : > { %v724_v17 = vsel %vm717_vm4, %v2352_v16, 0.0 }
 0x256   : > { %725 = vadd.xlane.f32.xlu0 %v724_v17 }
 0x2df   : > { %v726_v18 = vpop.xlane.xlu0 %725 }
 0x2e0   : > { %2353 = vrcp.f32 %v726_v18  ;;  %v1335_v18 = vld [vmem:[%s3309_s4 + $0x70] sm:$0xff] }
 0x2ed   : > { %v2354_v19 = vpop.eup %2353 }
 0x2ee   : > { %v728_v21 = vmul.f32 %v2354_v19, %v2352_v16  ;;  %v1334_v19 = vld [vmem:[%s3309_s4 + $0x68] sm:$0xff] }
 0x2f0   : > { %2270 = vmatmul.mubr.msk.f32.vlgmr.msra.gmra.mxu1 %vm717_vm4, %v728_v21  ;;  %v1332_v21 = vld [vmem:[%s3309_s4 + $0x58] sm:$0xff] }
 0x2f1   : > { %2273 = vmatpush3.xpose.msk.msra.mxu1 %vm631_vm1, %v805_v20  ;;  %2274 = vmatprep.mubr.msk.f32.mxu1 %vm2400_vm0, %v2399_v4  ;;  %v1333_v20 = vld [vmem:[%s3309_s4 + $0x60] sm:$0xff] }
 0x2f2   : > { %2277 = vmatprep.subr.mxu1 %v2399_v4 }
 0x2f4   : > { %2275 = vmatmul.mubr.msk.f32.vlgmr.msra.gmra.mxu1 %vm631_vm1, %v803_v22  ;;  %v1331_v22 = vld [vmem:[%s3309_s4 + $0x50] sm:$0xff] }
 0x2f5   : > { %2279 = vmatprep.mubr.msk.f32.mxu1 %vm2400_vm0, %v2399_v4 }
 0x3b0   : > { %v2724_v23 = vpop.f32.mrf.mxu1 }
 0x3b2   : > { %v2271_v24 = vpop.f32.mrf.mxu1 }
 0x3b3   : > { %v1330_v24 = vld [vmem:[%s3309_s4 + $0x48] sm:$0xff] }
 0x3b4   : > { %v876_v25 = vpop.f32.mrf.mxu1 }
 0x3b5   : > { %v880_v26 = vmul.f32 0.17677669, %v876_v25  ;;  %v1329_v25 = vld [vmem:[%s3309_s4 + $0x40] sm:$0xff] }
 0x3b6   : > { %v2276_v27 = vpop.f32.mrf.mxu1 }
 0x3b7   : > { %v881_v28 = vsel %vm2708_vm3, -10000.0, %v880_v26  ;;  %v1328_v26 = vld [vmem:[%s3309_s4 + $0x38] sm:$0xff]  ;;  %v1327_v27 = vld [vmem:[%s3309_s4 + $0x30] sm:$0xff] }
 0x3b8   : > { %v882_v29 = vsel %vm717_vm4, %v881_v28, -inf }
 0x3b9   : > { %883 = vmax.xlane.f32.xlu0 %v882_v29  ;;  %v1325_v29 = vld [vmem:[%s3309_s4 + $0x20] sm:$0xff] }
 0x3cf   : > { %894 = vrot.lane.b32.xlu0 %v2699_v0, %s2401_s14 }
 0x3d3   : > { %972 = vrot.lane.b32.xlu0 %v2681_v59, %s2403_s18 }
 0x3d7   : > { %970 = vrot.lane.b32.xlu0 %v2687_v60, %s2403_s18 }
 0x442   : > { %v884_v30 = vpop.xlane.xlu0 %883 }
 0x443   : > { %v885_v31 = vsub.f32 %v881_v28, %v884_v30  ;;  %v1326_v28 = vld [vmem:[%s3309_s4 + $0x28] sm:$0xff]  ;;  %v1324_v30 = vld [vmem:[%s3309_s4 + $0x18] sm:$0xff] }
 0x445   : > { %v886_v32 = vmul.f32 1.442695, %v885_v31  ;;  %v1323_v31 = vld [vmem:[%s3309_s4 + $0x10] sm:$0xff] }
 0x446   : > { %v895_v33 = vpop.permute.xlu0 %894 }
 0x447   : > { %2355 = vpow2.f32 %v886_v32  ;;  %2278 = vmatpush3.msra.mxu1 %v895_v33  ;;  %v1322_v32 = vld [vmem:[%s3309_s4 + $0x8] sm:$0xff]  ;;  %v1321_v33 = vld [vmem:[%s3309_s4] sm:$0xff] }
 0x448   : > { %2282 = vmatprep.subr.mxu1 %v2399_v4 }
 0x44a   : > { %v973_v38 = vpop.permute.xlu0 %972 }
 0x44e   : > { %v971_v40 = vpop.permute.xlu0 %970 }
 0x454   : > { %v2356_v34 = vpop.eup %2355 }
 0x455   : > { %v888_v35 = vsel %vm717_vm4, %v2356_v34, 0.0 }
 0x456   : > { %889 = vadd.xlane.f32.xlu1 %v888_v35 }
 0x467   : > { %1061 = vrot.lane.b32.xlu1 %v2699_v0, %s2403_s18 }
 0x46b   : > { %1139 = vrot.lane.b32.xlu1 %v2681_v59, %s2404_s20 }
 0x4df   : > { %v890_v36 = vpop.xlane.xlu1 %889 }
 0x4e0   : > { %2357 = vrcp.f32 %v890_v36 }
 0x4e3   : > { %v1062_v41 = vpop.permute.xlu1 %1061 }
 0x4e7   : > { %v1140_v58 = vpop.permute.xlu1 %1139 }
 0x4ed   : > { %v2358_v37 = vpop.eup %2357 }
 0x4ee   : > { %v892_v39 = vmul.f32 %v2358_v37, %v2356_v34 }
 0x4f0   : > { %2280 = vmatmul.mubr.msk.f32.vlgmr.msra.gmra.mxu1 %vm717_vm4, %v892_v39 }
 0x4f1   : > { %2283 = vmatpush3.xpose.msk.msra.mxu1 %vm631_vm1, %v973_v38  ;;  %2284 = vmatprep.mubr.msk.f32.mxu1 %vm2400_vm0, %v2399_v4 }
 0x4f2   : > { %2287 = vmatprep.subr.mxu1 %v2399_v4 }
 0x4f4   : > { %2285 = vmatmul.mubr.msk.f32.vlgmr.msra.gmra.mxu1 %vm631_vm1, %v971_v40 }
 0x4f5   : > { %2288 = vmatpush3.msra.mxu1 %v1062_v41  ;;  %2289 = vmatprep.mubr.msk.f32.mxu1 %vm2400_vm0, %v2399_v4 }
 0x4f6   : > { %2292 = vmatprep.subr.mxu1 %v2399_v4 }
 0x5b0   : > { %v966_v42 = vpop.f32.mrf.mxu1 }
 0x5b2   : > { %v2281_v43 = vpop.f32.mrf.mxu1 }
 0x5b4   : > { %v1044_v45 = vpop.f32.mrf.mxu1 }
 0x5b5   : > { %v1048_v46 = vmul.f32 0.17677669, %v1044_v45 }
 0x5b6   : > { %v2286_v47 = vpop.f32.mrf.mxu1 }
 0x5b7   : > { %v1049_v48 = vsel %vm2708_vm3, -10000.0, %v1048_v46 }
 0x5b8   : > { %v1050_v49 = vsel %vm717_vm4, %v1049_v48, -inf }
 0x5b9   : > { %1051 = vmax.xlane.f32.xlu0 %v1050_v49 }
 0x642   : > { %v1052_v50 = vpop.xlane.xlu0 %1051 }
 0x643   : > { %v1053_v53 = vsub.f32 %v1049_v48, %v1052_v50 }
 0x645   : > { %v1054_v55 = vmul.f32 1.442695, %v1053_v53  ;;  %v1514_v53 = vld [vmem:[%s3313_s8 + $0x1f8] sm:$0xff] }
 0x647   : > { %2359 = vpow2.f32 %v1054_v55  ;;  %v1513_v55 = vld [vmem:[%s3313_s8 + $0x1f0] sm:$0xff] }
 0x654   : > { %v2360_v56 = vpop.eup %2359 }
 0x655   : > { %v1056_v57 = vsel %vm717_vm4, %v2360_v56, 0.0 }
 0x656   : > { %1057 = vadd.xlane.f32.xlu1 %v1056_v57  ;;  %v1510_v57 = vld [vmem:[%s3313_s8 + $0x1d8] sm:$0xff] }
 0x667   : > { %1137 = vrot.lane.b32.xlu1 %v2687_v60, %s2404_s20 }
 0x6df   : > { %v1058_v59 = vpop.xlane.xlu1 %1057 }
 0x6e0   : > { %2361 = vrcp.f32 %v1058_v59  ;;  %v1509_v59 = vld [vmem:[%s3313_s8 + $0x1d0] sm:$0xff] }
 0x6e3   : > { %v1138_v1 = vpop.permute.xlu1 %1137 }
 0x6ed   : > { %v2362_v62 = vpop.eup %2361 }
 0x6ee   : > { %v1060_v63 = vmul.f32 %v2362_v62, %v2360_v56  ;;  %v1508_v56 = vld [vmem:[%s3313_s8 + $0x1c8] sm:$0xff] }
 0x6ef   : > { %v1504_v62 = vld [vmem:[%s3313_s8 + $0x1a8] sm:$0xff] }
 0x6f0   : > { %2290 = vmatmul.mubr.msk.f32.vlgmr.msra.gmra.mxu1 %vm717_vm4, %v1060_v63  ;;  %v1506_v63 = vld [vmem:[%s3313_s8 + $0x1b8] sm:$0xff] }
 0x6f1   : > { %2293 = vmatpush3.xpose.msk.msra.mxu1 %vm631_vm1, %v1140_v58  ;;  %2294 = vmatprep.mubr.msk.f32.mxu1 %vm2400_vm0, %v2399_v4  ;;  %v1507_v58 = vld [vmem:[%s3313_s8 + $0x1c0] sm:$0xff] }
 0x6f2   : > { %2297 = vmatprep.subr.mxu1 %v2399_v4 }
 0x6f4   : > { %2295 = vmatmul.mubr.msk.f32.vlgmr.msra.gmra.mxu1 %vm631_vm1, %v1138_v1  ;;  %v1503_v1 = vld [vmem:[%s3313_s8 + $0x1a0] sm:$0xff] }
 0x6f5   : > { %2299 = vmatprep.mubr.msk.f32.mxu1 %vm2400_vm0, %v2399_v4 }
 0x7b0   : > { %v1133_v60 = vpop.f32.mrf.mxu1 }
 0x7b2   : > { %v2291_v2 = vpop.f32.mrf.mxu1 }
 0x7b3   : > { %v1500_v2 = vld [vmem:[%s3313_s8 + $0x188] sm:$0xff] }
 0x7b4   : > { %v1211_v3 = vpop.f32.mrf.mxu1 }
 0x7b5   : > { %v1215_v5 = vmul.f32 0.17677669, %v1211_v3  ;;  %v1502_v3 = vld [vmem:[%s3313_s8 + $0x198] sm:$0xff] }
 0x7b6   : > { %v2296_v6 = vpop.f32.mrf.mxu1 }
 0x7b7   : > { %v1216_v7 = vsel %vm2708_vm3, -10000.0, %v1215_v5  ;;  %v1499_v5 = vld [vmem:[%s3313_s8 + $0x180] sm:$0xff]  ;;  %v1501_v6 = vld [vmem:[%s3313_s8 + $0x190] sm:$0xff] }
 0x7b8   : > { %v1217_v9 = vsel %vm717_vm4, %v1216_v7, -inf }
 0x7b9   : > { %1218 = vmax.xlane.f32.xlu0 %v1217_v9  ;;  %v1498_v9 = vld [vmem:[%s3313_s8 + $0x178] sm:$0xff] }
 0x7cf   : > { %1228 = vrot.lane.b32.xlu0 %v2699_v0, %s2404_s20  ;;  %v1336_v0 = vld [vmem:[%s3309_s4 + $0x78] sm:$0xff] }
 0x7d0   : > { %2303 = vmatpush3.msra.mxu0 %v1336_v0  ;;  %v1489_v0 = vld [vmem:[%s3313_s8 + $0x130] sm:$0xff] }
 0x7d1   : > { %2304 = vmatprep.subr.mxu0 %v2399_v4 }
 0x7d2   : > { %2305 = vmatpush3.msra.mxu0 %v1335_v18  ;;  %v1484_v18 = vld [vmem:[%s3313_s8 + $0x108] sm:$0xff] }
 0x7d3   : > { %1305 = vrot.lane.b32.xlu0 %v966_v42, %s2404_s20  ;;  %2306 = vmatprep.subr.mxu0 %v2399_v4  ;;  %v2101_v42 = vld [vmem:[%s3310_s5] ss:$0 sm:$0xff] }
 0x7d4   : > { %2307 = vmatpush3.msra.mxu0 %v1334_v19  ;;  %v1486_v19 = vld [vmem:[%s3313_s8 + $0x118] sm:$0xff] }
 0x7d5   : > { %2308 = vmatprep.subr.mxu0 %v2399_v4 }
 0x7d6   : > { %2309 = vmatpush3.msra.mxu0 %v1333_v20  ;;  %v1483_v20 = vld [vmem:[%s3313_s8 + $0x100] sm:$0xff] }
 0x7d7   : > { %1309 = vrot.lane.b32.xlu0 %v1133_v60, %s2403_s18  ;;  %2310 = vmatprep.subr.mxu0 %v2399_v4  ;;  %v1505_v60 = vld [vmem:[%s3313_s8 + $0x1b0] sm:$0xff] }
 0x7d8   : > { %2311 = vmatpush3.msra.mxu0 %v1332_v21  ;;  %v1485_v21 = vld [vmem:[%s3313_s8 + $0x110] sm:$0xff] }
 0x7d9   : > { %2312 = vmatprep.subr.mxu0 %v2399_v4 }
 0x7da   : > { %2313 = vmatpush3.msra.mxu0 %v1331_v22  ;;  %v1480_v22 = vld [vmem:[%s3313_s8 + $0xe8] sm:$0xff] }
 0x7db   : > { %2314 = vmatprep.subr.mxu0 %v2399_v4 }
 0x7dc   : > { %2315 = vmatpush3.msra.mxu0 %v1330_v24  ;;  %v1482_v24 = vld [vmem:[%s3313_s8 + $0xf8] sm:$0xff] }
 0x7dd   : > { %2316 = vmatprep.subr.mxu0 %v2399_v4 }
 0x7de   : > { %2317 = vmatpush3.msra.mxu0 %v1329_v25  ;;  %v1479_v25 = vld [vmem:[%s3313_s8 + $0xe0] sm:$0xff] }
 0x7df   : > { %2318 = vmatprep.subr.mxu0 %v2399_v4 }
 0x7e0   : > { %2319 = vmatpush3.msra.mxu0 %v1328_v26  ;;  %v1481_v26 = vld [vmem:[%s3313_s8 + $0xf0] sm:$0xff] }
 0x7e1   : > { %2320 = vmatprep.subr.mxu0 %v2399_v4 }
 0x7e2   : > { %2321 = vmatpush3.msra.mxu0 %v1327_v27  ;;  %v1476_v27 = vld [vmem:[%s3313_s8 + $0xc8] sm:$0xff] }
 0x7e3   : > { %2322 = vmatprep.subr.mxu0 %v2399_v4 }
 0x7e4   : > { %2323 = vmatpush3.msra.mxu0 %v1326_v28  ;;  %v1478_v28 = vld [vmem:[%s3313_s8 + $0xd8] sm:$0xff] }
 0x7e5   : > { %2324 = vmatprep.subr.mxu0 %v2399_v4 }
 0x7e6   : > { %2325 = vmatpush3.msra.mxu0 %v1325_v29  ;;  %v1475_v29 = vld [vmem:[%s3313_s8 + $0xc0] sm:$0xff] }
 0x7e7   : > { %2326 = vmatprep.subr.mxu0 %v2399_v4 }
 0x7e8   : > { %2327 = vmatpush3.msra.mxu0 %v1324_v30  ;;  %v1477_v30 = vld [vmem:[%s3313_s8 + $0xd0] sm:$0xff] }
 0x7e9   : > { %2328 = vmatprep.subr.mxu0 %v2399_v4 }
 0x7ea   : > { %2329 = vmatpush3.msra.mxu0 %v1323_v31  ;;  %v1472_v31 = vld [vmem:[%s3313_s8 + $0xa8] sm:$0xff] }
 0x7eb   : > { %2330 = vmatprep.subr.mxu0 %v2399_v4 }
 0x7ec   : > { %2331 = vmatpush3.msra.mxu0 %v1322_v32  ;;  %v1474_v32 = vld [vmem:[%s3313_s8 + $0xb8] sm:$0xff] }
 0x7ed   : > { %2332 = vmatprep.subr.mxu0 %v2399_v4 }
 0x7ee   : > { %2333 = vmatpush3.msra.mxu0 %v1321_v33  ;;  %v1471_v33 = vld [vmem:[%s3313_s8 + $0xa0] sm:$0xff] }
 0x7ef   : > { %1608 = vmatprep.subr.mxu0 %v1514_v53  ;;  %v1452_v53 = vld [vmem:[%s3313_s8 + $0x8] sm:$0xff] }
 0x842   : > { %v1219_v10 = vpop.xlane.xlu0 %1218 }
 0x843   : > { %v1220_v11 = vsub.f32 %v1216_v7, %v1219_v10  ;;  %v1496_v7 = vld [vmem:[%s3313_s8 + $0x168] sm:$0xff]  ;;  %v1495_v10 = vld [vmem:[%s3313_s8 + $0x160] sm:$0xff] }
 0x845   : > { %v1221_v12 = vmul.f32 1.442695, %v1220_v11  ;;  %v1497_v11 = vld [vmem:[%s3313_s8 + $0x170] sm:$0xff] }
 0x846   : > { %v1229_v13 = vpop.permute.xlu0 %1228 }
 0x847   : > { %2363 = vpow2.f32 %v1221_v12  ;;  %2298 = vmatpush3.msra.mxu1 %v1229_v13  ;;  %v1492_v12 = vld [vmem:[%s3313_s8 + $0x148] sm:$0xff]  ;;  %v1494_v13 = vld [vmem:[%s3313_s8 + $0x158] sm:$0xff] }
 0x84a   : > { %v1306_v36 = vpop.permute.xlu0 %1305 }
 0x84b   : > { %v1316_v38 = vsel %vm631_vm1, %v2724_v23, %v1306_v36  ;;  %v1470_v36 = vld [vmem:[%s3313_s8 + $0x98] sm:$0xff] }
 0x84e   : > { %v1310_v37 = vpop.permute.xlu0 %1309 }
 0x84f   : > { %v1318_v39 = vsel %vm1317_vm5, %v1316_v38, %v1310_v37  ;;  %v1467_v37 = vld [vmem:[%s3313_s8 + $0x80] sm:$0xff]  ;;  %v1469_v38 = vld [vmem:[%s3313_s8 + $0x90] sm:$0xff] }
 0x854   : > { %v2364_v14 = vpop.eup %2363 }
 0x855   : > { %v1223_v8 = vsel %vm717_vm4, %v2364_v14, 0.0 }
 0x856   : > { %1224 = vadd.xlane.f32.xlu1 %v1223_v8  ;;  %v1493_v8 = vld [vmem:[%s3313_s8 + $0x150] sm:$0xff] }
 0x8df   : > { %v1225_v15 = vpop.xlane.xlu1 %1224 }
 0x8e0   : > { %2365 = vrcp.f32 %v1225_v15  ;;  %v1488_v15 = vld [vmem:[%s3313_s8 + $0x128] sm:$0xff] }
 0x8ed   : > { %v2366_v16 = vpop.eup %2365 }
 0x8ee   : > { %v1227_v17 = vmul.f32 %v2366_v16, %v2364_v14  ;;  %v1491_v14 = vld [vmem:[%s3313_s8 + $0x140] sm:$0xff]  ;;  %v1490_v16 = vld [vmem:[%s3313_s8 + $0x138] sm:$0xff] }
 0x8f0   : > { %2300 = vmatmul.mubr.msk.f32.vlgmr.msra.gmra.mxu1 %vm717_vm4, %v1227_v17  ;;  %v1487_v17 = vld [vmem:[%s3313_s8 + $0x120] sm:$0xff] }
 0x8f1   : > { %1601 = vmatprep.mubr.f32.mxu1 %v2399_v4 }
 0x9b0   : > { %v1300_v34 = vpop.f32.mrf.mxu1 }
 0x9b1   : > { %1313 = vrot.lane.b32.xlu0 %v1300_v34, %s2401_s14  ;;  %v1473_v34 = vld [vmem:[%s3313_s8 + $0xb0] sm:$0xff] }
 0x9b2   : > { %v2301_v35 = vpop.f32.mrf.mxu1 }
 0x9b3   : > { %v1468_v35 = vld [vmem:[%s3313_s8 + $0x88] sm:$0xff] }
 0xa23   : > { %v1314_v40 = vpop.permute.xlu0 %1313 }
 0xa24   : > { %v1320_v41 = vsel %vm1319_vm6, %v1318_v39, %v1314_v40  ;;  %v1464_v39 = vld [vmem:[%s3313_s8 + $0x68] sm:$0xff]  ;;  %v1466_v40 = vld [vmem:[%s3313_s8 + $0x78] sm:$0xff] }
 0xa25   : > { %2335 = vmatmul.mubr.f32.vlgmr.msra.gmra.mxu0 %v1320_v41  ;;  %v1463_v41 = vld [vmem:[%s3313_s8 + $0x60] sm:$0xff] }
 0xa26   : > { %1672 = vmatprep.mubr.f32.mxu0 %v2399_v4  ;;  %v1512_v4 = vld [vmem:[%s3313_s8 + $0x1e8] sm:$0xff]  ;;  %1609 = vmatpush1.msra.mxu0 %v1513_v55  ;;  %v1451_v55 = vld [vmem:[%s3313_s8] sm:$0xff] }
 0xa27   : > { %1537 = vmatprep.subr.mxu1 %v1512_v4  ;;  %1610 = vmatprep.subr.mxu0 %v1510_v57  ;;  %v1457_v4 = vld [vmem:[%s3313_s8 + $0x30] sm:$0xff] }
 0xa28   : > { %1611 = vmatpush1.msra.mxu0 %v1509_v59 }
 0xa29   : > { %1612 = vmatprep.subr.mxu0 %v1506_v63 }
 0xa2a   : > { %1613 = vmatpush1.msra.mxu0 %v1505_v60 }
 0xa2b   : > { %1614 = vmatprep.subr.mxu0 %v1502_v3  ;;  %v3044_v3 = vld [vmem:[%s3311_s6] ss:$0 sm:$0xff] }
 0xa2c   : > { %1615 = vmatpush1.msra.mxu0 %v1501_v6 }
 0xa2d   : > { %1616 = vmatprep.subr.mxu0 %v1498_v9 }
 0xa2e   : > { %1617 = vmatpush1.msra.mxu0 %v1497_v11  ;;  %v1818_v11 = vld [vmem:[%s3315_s10 + $0xf8] sm:$0xff] }
 0xa2f   : > { %1618 = vmatprep.subr.mxu0 %v1494_v13  ;;  %v1834_v13 = vld [vmem:[%s3315_s10 + $0x178] sm:$0xff] }
 0xa30   : > { %1619 = vmatpush1.msra.mxu0 %v1493_v8  ;;  %v1849_v8 = vld [vmem:[%s3315_s10 + $0x1f0] sm:$0xff] }
 0xa31   : > { %1620 = vmatprep.subr.mxu0 %v1490_v16  ;;  %v1833_v16 = vld [vmem:[%s3315_s10 + $0x170] sm:$0xff] }
 0xa32   : > { %1621 = vmatpush1.msra.mxu0 %v1489_v0  ;;  %v1848_v0 = vld [vmem:[%s3315_s10 + $0x1e8] sm:$0xff] }
 0xa33   : > { %1622 = vmatprep.subr.mxu0 %v1486_v19  ;;  %v1832_v19 = vld [vmem:[%s3315_s10 + $0x168] sm:$0xff] }
 0xa34   : > { %1623 = vmatpush1.msra.mxu0 %v1485_v21  ;;  %v1847_v21 = vld [vmem:[%s3315_s10 + $0x1e0] sm:$0xff] }
 0xa35   : > { %1624 = vmatprep.subr.mxu0 %v1482_v24  ;;  %v1831_v24 = vld [vmem:[%s3315_s10 + $0x160] sm:$0xff] }
 0xa36   : > { %1625 = vmatpush1.msra.mxu0 %v1481_v26  ;;  %v1846_v26 = vld [vmem:[%s3315_s10 + $0x1d8] sm:$0xff] }
 0xa37   : > { %1626 = vmatprep.subr.mxu0 %v1478_v28  ;;  %v1830_v28 = vld [vmem:[%s3315_s10 + $0x158] sm:$0xff] }
 0xa38   : > { %1627 = vmatpush1.msra.mxu0 %v1477_v30  ;;  %v1845_v30 = vld [vmem:[%s3315_s10 + $0x1d0] sm:$0xff] }
 0xa39   : > { %1628 = vmatprep.subr.mxu0 %v1474_v32  ;;  %v1829_v32 = vld [vmem:[%s3315_s10 + $0x150] sm:$0xff] }
 0xa3a   : > { %1629 = vmatpush1.msra.mxu0 %v1473_v34  ;;  %v1844_v34 = vld [vmem:[%s3315_s10 + $0x1c8] sm:$0xff] }
 0xa3b   : > { %1630 = vmatprep.subr.mxu0 %v1470_v36  ;;  %v1828_v36 = vld [vmem:[%s3315_s10 + $0x148] sm:$0xff] }
 0xa3c   : > { %1631 = vmatpush1.msra.mxu0 %v1469_v38  ;;  %v1843_v38 = vld [vmem:[%s3315_s10 + $0x1c0] sm:$0xff] }
 0xa3d   : > { %1632 = vmatprep.subr.mxu0 %v1466_v40  ;;  %v1827_v40 = vld [vmem:[%s3315_s10 + $0x140] sm:$0xff] }
 0xae5   : > { %v1410_v43 = vpop.f32.mrf.mxu0 }
 0xae6   : > { %v1411_v45 = vadd.f32 %v2101_v42, %v1410_v43  ;;  %v1465_v42 = vld [vmem:[%s3313_s8 + $0x70] sm:$0xff]  ;;  %v1460_v43 = vld [vmem:[%s3313_s8 + $0x48] sm:$0xff] }
 0xae7   : > { %v2336_v46 = vpop.f32.mrf.mxu0  ;;  %1633 = vmatpush1.msra.mxu0 %v1465_v42  ;;  %v1842_v42 = vld [vmem:[%s3315_s10 + $0x1b8] sm:$0xff] }
 0xae8   : > { %v1414_v47 = vadd.f32 %v1411_v45, %v2636_v44  ;;  %v1511_v44 = vld [vmem:[%s3313_s8 + $0x1e0] sm:$0xff]  ;;  %v1462_v45 = vld [vmem:[%s3313_s8 + $0x58] sm:$0xff] }
 0xae9   : > { %1538 = vmatpush1.msra.mxu1 %v1511_v44  ;;  %v1459_v46 = vld [vmem:[%s3313_s8 + $0x40] sm:$0xff]  ;;  %1634 = vmatprep.subr.mxu0 %v1462_v45  ;;  %v1454_v44 = vld [vmem:[%s3313_s8 + $0x18] sm:$0xff] }
 0xaea   : > { %1417 = vadd.xlane.f32.xlu1 %v1414_v47  ;;  %1539 = vmatprep.subr.mxu1 %v1508_v56  ;;  %v1453_v56 = vld [vmem:[%s3313_s8 + $0x10] sm:$0xff]  ;;  %v1826_v45 = vld [vmem:[%s3315_s10 + $0x138] sm:$0xff] }
 0xaeb   : > { %1540 = vmatpush1.msra.mxu1 %v1507_v58 }
 0xaec   : > { %1541 = vmatprep.subr.mxu1 %v1504_v62 }
 0xaed   : > { %1542 = vmatpush1.msra.mxu1 %v1503_v1 }
 0xaee   : > { %1543 = vmatprep.subr.mxu1 %v1500_v2 }
 0xaef   : > { %1544 = vmatpush1.msra.mxu1 %v1499_v5 }
 0xaf0   : > { %1545 = vmatprep.subr.mxu1 %v1496_v7  ;;  %v3051_v7 = vld [vmem:[%s3312_s7] ss:$0 sm:$0xff] }
 0xaf1   : > { %1546 = vmatpush1.msra.mxu1 %v1495_v10 }
 0xaf2   : > { %1547 = vmatprep.subr.mxu1 %v1492_v12  ;;  %v1802_v12 = vld [vmem:[%s3315_s10 + $0x78] sm:$0xff] }
 0xaf3   : > { %1548 = vmatpush1.msra.mxu1 %v1491_v14  ;;  %v1817_v14 = vld [vmem:[%s3315_s10 + $0xf0] sm:$0xff] }
 0xaf4   : > { %1549 = vmatprep.subr.mxu1 %v1488_v15  ;;  %v1801_v15 = vld [vmem:[%s3315_s10 + $0x70] sm:$0xff] }
 0xaf5   : > { %1550 = vmatpush1.msra.mxu1 %v1487_v17  ;;  %v1816_v17 = vld [vmem:[%s3315_s10 + $0xe8] sm:$0xff] }
 0xaf6   : > { %1551 = vmatprep.subr.mxu1 %v1484_v18  ;;  %v1800_v18 = vld [vmem:[%s3315_s10 + $0x68] sm:$0xff] }
 0xaf7   : > { %1552 = vmatpush1.msra.mxu1 %v1483_v20  ;;  %v1815_v20 = vld [vmem:[%s3315_s10 + $0xe0] sm:$0xff] }
 0xaf8   : > { %1553 = vmatprep.subr.mxu1 %v1480_v22  ;;  %v1799_v22 = vld [vmem:[%s3315_s10 + $0x60] sm:$0xff] }
 0xaf9   : > { %1554 = vmatpush1.msra.mxu1 %v1479_v25  ;;  %v1814_v25 = vld [vmem:[%s3315_s10 + $0xd8] sm:$0xff] }
 0xafa   : > { %1555 = vmatprep.subr.mxu1 %v1476_v27  ;;  %v1798_v27 = vld [vmem:[%s3315_s10 + $0x58] sm:$0xff] }
 0xafb   : > { %1556 = vmatpush1.msra.mxu1 %v1475_v29  ;;  %v1813_v29 = vld [vmem:[%s3315_s10 + $0xd0] sm:$0xff] }
 0xafc   : > { %1557 = vmatprep.subr.mxu1 %v1472_v31  ;;  %v1797_v31 = vld [vmem:[%s3315_s10 + $0x50] sm:$0xff] }
 0xafd   : > { %1558 = vmatpush1.msra.mxu1 %v1471_v33  ;;  %v1812_v33 = vld [vmem:[%s3315_s10 + $0xc8] sm:$0xff] }
 0xafe   : > { %1559 = vmatprep.subr.mxu1 %v1468_v35  ;;  %v1796_v35 = vld [vmem:[%s3315_s10 + $0x48] sm:$0xff] }
 0xaff   : > { %1560 = vmatpush1.msra.mxu1 %v1467_v37  ;;  %v1811_v37 = vld [vmem:[%s3315_s10 + $0xc0] sm:$0xff] }
 0xb00   : > { %1561 = vmatprep.subr.mxu1 %v1464_v39  ;;  %v1795_v39 = vld [vmem:[%s3315_s10 + $0x40] sm:$0xff] }
 0xb01   : > { %1562 = vmatpush1.msra.mxu1 %v1463_v41  ;;  %v1810_v41 = vld [vmem:[%s3315_s10 + $0xb8] sm:$0xff] }
 0xb02   : > { %1563 = vmatprep.subr.mxu1 %v1460_v43  ;;  %v1794_v43 = vld [vmem:[%s3315_s10 + $0x38] sm:$0xff] }
 0xb03   : > { %1564 = vmatpush1.msra.mxu1 %v1459_v46  ;;  %v1809_v46 = vld [vmem:[%s3315_s10 + $0xb0] sm:$0xff] }
 0xb73   : > { %v1418_v48 = vpop.xlane.xlu1 %1417 }
 0xb74   : > { %v1420_v49 = vmul.f32 0.0078125, %v1418_v48  ;;  %v1456_v48 = vld [vmem:[%s3313_s8 + $0x28] sm:$0xff] }
 0xb75   : > { %1565 = vmatprep.subr.mxu1 %v1456_v48  ;;  %v1793_v48 = vld [vmem:[%s3315_s10 + $0x30] sm:$0xff] }
 0xb76   : > { %v2845_v50 = vsub.f32 %v1414_v47, %v1420_v49  ;;  %v1461_v47 = vld [vmem:[%s3313_s8 + $0x50] sm:$0xff]  ;;  %v1458_v49 = vld [vmem:[%s3313_s8 + $0x38] sm:$0xff] }
 0xb77   : > { %1635 = vmatpush1.msra.mxu0 %v1461_v47  ;;  %v1841_v47 = vld [vmem:[%s3315_s10 + $0x1b0] sm:$0xff] }
 0xb78   : > { %v1422_v23 = vmul.f32 %v2845_v50, %v2845_v50  ;;  %1636 = vmatprep.subr.mxu0 %v1458_v49  ;;  %v1433_v5 = vmul.f32 %v3044_v3, %v2845_v50  ;;  %v1850_v50 = vld [vmem:[%s3315_s10 + $0x1f8] sm:$0xff]  ;;  %v1825_v49 = vld [vmem:[%s3315_s10 + $0x130] sm:$0xff] }
 0xb79   : > { %1637 = vmatpush1.msra.mxu0 %v1457_v4  ;;  %v1840_v4 = vld [vmem:[%s3315_s10 + $0x1a8] sm:$0xff] }
 0xb7a   : > { %1423 = vadd.xlane.f32.xlu0 %v1422_v23  ;;  %v1455_v23 = vld [vmem:[%s3313_s8 + $0x20] sm:$0xff]  ;;  %1638 = vmatprep.subr.mxu0 %v1454_v44  ;;  %v1824_v44 = vld [vmem:[%s3315_s10 + $0x128] sm:$0xff] }
 0xb7b   : > { %1566 = vmatpush1.msra.mxu1 %v1455_v23  ;;  %1639 = vmatpush1.msra.mxu0 %v1453_v56  ;;  %v1808_v23 = vld [vmem:[%s3315_s10 + $0xa8] sm:$0xff]  ;;  %v1839_v56 = vld [vmem:[%s3315_s10 + $0x1a0] sm:$0xff] }
 0xb7c   : > { %1567 = vmatprep.subr.mxu1 %v1452_v53  ;;  %2192 = vmatprep.subr.mxu0 %v1850_v50  ;;  %v1792_v53 = vld [vmem:[%s3315_s10 + $0x28] sm:$0xff] }
 0xb7d   : > { %1568 = vmatpush1.msra.mxu1 %v1451_v55  ;;  %v1807_v55 = vld [vmem:[%s3315_s10 + $0xa0] sm:$0xff]  ;;  %v1788_v50 = vld [vmem:[%s3315_s10 + $0x8] sm:$0xff] }
 0xb7e   : > { %2157 = vmatprep.subr.mxu1 %v1818_v11  ;;  %v1836_v11 = vld [vmem:[%s3315_s10 + $0x188] sm:$0xff] }
 0xc03   : > { %v1424_v57 = vpop.xlane.xlu0 %1423 }
 0xc04   : > { %v1426_v58 = vmul.f32 0.007874016, %v1424_v57  ;;  %v1791_v57 = vld [vmem:[%s3315_s10 + $0x20] sm:$0xff] }
 0xc06   : > { %2367 = vrsqrt.f32 %v1426_v58  ;;  %vm1436_vm7 = vcmp.eq.f32.partialorder %v1426_v58, inf  ;;  %v1439_v63 = vand.u32 2147483648, %v1426_v58  ;;  %vm1438_vm8 = vcmp.eq.f32.partialorder %v1426_v58, 0.0 }
 0xc13   : > { %v2368_v59 = vpop.eup %2367 }
 0xc14   : > { %v1435_v62 = vmul.f32 %v2368_v59, %v1426_v58  ;;  %v1806_v59 = vld [vmem:[%s3315_s10 + $0x98] sm:$0xff] }
 0xc16   : > { %v1437_v1 = vsel %vm1436_vm7, %v1426_v58, %v1435_v62  ;;  %v1823_v58 = vld [vmem:[%s3315_s10 + $0x120] sm:$0xff]  ;;  %v1838_v62 = vld [vmem:[%s3315_s10 + $0x198] sm:$0xff] }
 0xc17   : > { %v1440_v60 = vsel %vm1438_vm8, %v1439_v63, %v1437_v1  ;;  %v1790_v63 = vld [vmem:[%s3315_s10 + $0x18] sm:$0xff] }
 0xc18   : > { %v1441_v2 = vadd.f32 1e-06, %v1440_v60  ;;  %v1822_v1 = vld [vmem:[%s3315_s10 + $0x118] sm:$0xff]  ;;  %v1805_v60 = vld [vmem:[%s3315_s10 + $0x90] sm:$0xff] }
 0xc1a   : > { %2369 = vrcp.f32 %v1441_v2  ;;  %v1837_v2 = vld [vmem:[%s3315_s10 + $0x190] sm:$0xff] }
 0xc27   : > { %v2370_v6 = vpop.eup %2369 }
 0xc28   : > { %v1443_v9 = vmul.f32 %v2370_v6, %v1433_v5  ;;  %v1789_v5 = vld [vmem:[%s3315_s10 + $0x10] sm:$0xff] }
 0xc29   : > { %v1821_v6 = vld [vmem:[%s3315_s10 + $0x110] sm:$0xff] }
 0xc2a   : > { %v3054_v10 = vadd.f32 %v3051_v7, %v1443_v9  ;;  %v1804_v9 = vld [vmem:[%s3315_s10 + $0x88] sm:$0xff] }
 0xc2c   : > { %1602 = vmatmul.mubr.f32.vlgmr.msra.gmra.mxu1 %v3054_v10  ;;  %1673 = vmatmul.mubr.f32.vlgmr.msra.gmra.mxu0 %v3054_v10 }
 0xc2d   : > { %2158 = vmatpush3.msra.mxu1 %v1802_v12  ;;  %2193 = vmatpush3.msra.mxu0 %v1834_v13  ;;  %v1820_v12 = vld [vmem:[%s3315_s10 + $0x108] sm:$0xff]  ;;  %v1803_v13 = vld [vmem:[%s3315_s10 + $0x80] sm:$0xff] }
 0xc2e   : > { %2159 = vmatprep.subr.mxu1 %v1817_v14  ;;  %2194 = vmatprep.subr.mxu0 %v1849_v8  ;;  %v1835_v14 = vld [vmem:[%s3315_s10 + $0x180] sm:$0xff] }
 0xc2f   : > { %2160 = vmatpush3.msra.mxu1 %v1801_v15  ;;  %2195 = vmatpush3.msra.mxu0 %v1833_v16  ;;  %v1787_v8 = vld [vmem:[%s3315_s10] sm:$0xff] }
 0xc30   : > { %2161 = vmatprep.subr.mxu1 %v1816_v17  ;;  %2196 = vmatprep.subr.mxu0 %v1848_v0  ;;  %v1819_v15 = vld [vmem:[%s3315_s10 + $0x100] sm:$0xff]  ;;  %v1531_v17 = vsub.s32 3, %v2669_v51 }
 0xc31   : > { %2162 = vmatpush3.msra.mxu1 %v1800_v18  ;;  %2197 = vmatpush3.msra.mxu0 %v1832_v19  ;;  %v1515_v16 = vld [vmem:[%s3314_s9] sm:$0xf] }
 0xc32   : > { %2163 = vmatprep.subr.mxu1 %v1815_v20  ;;  %2198 = vmatprep.subr.mxu0 %v1847_v21  ;;  %v1520_v0 = vrot.slane %v1515_v16, %v2676_v54  ;;  %v1528_v18 = vrot.slane %v1515_v16, %v485_v61  ;;  %v1524_v21 = vrot.slane %v1515_v16, %v481_v52 }
 0xc33   : > { %2164 = vmatpush3.msra.mxu1 %v1799_v22  ;;  %2199 = vmatpush3.msra.mxu0 %v1831_v24  ;;  %v1532_v22 = vrot.slane %v1515_v16, %v1531_v17 }
 0xc34   : > { %2165 = vmatprep.subr.mxu1 %v1814_v25  ;;  %2200 = vmatprep.subr.mxu0 %v1846_v26 }
 0xc35   : > { %2166 = vmatpush3.msra.mxu1 %v1798_v27  ;;  %2201 = vmatpush3.msra.mxu0 %v1830_v28 }
 0xc36   : > { %2167 = vmatprep.subr.mxu1 %v1813_v29  ;;  %2202 = vmatprep.subr.mxu0 %v1845_v30 }
 0xc37   : > { %2168 = vmatpush3.msra.mxu1 %v1797_v31  ;;  %2203 = vmatpush3.msra.mxu0 %v1829_v32 }
 0xc38   : > { %2169 = vmatprep.subr.mxu1 %v1812_v33  ;;  %2204 = vmatprep.subr.mxu0 %v1844_v34 }
 0xc39   : > { %2170 = vmatpush3.msra.mxu1 %v1796_v35  ;;  %2205 = vmatpush3.msra.mxu0 %v1828_v36 }
 0xc3a   : > { %2171 = vmatprep.subr.mxu1 %v1811_v37  ;;  %2206 = vmatprep.subr.mxu0 %v1843_v38 }
 0xc3b   : > { %2172 = vmatpush3.msra.mxu1 %v1795_v39  ;;  %2207 = vmatpush3.msra.mxu0 %v1827_v40 }
 0xc3c   : > { %2173 = vmatprep.subr.mxu1 %v1810_v41  ;;  %2208 = vmatprep.subr.mxu0 %v1842_v42 }
 0xc3d   : > { %2174 = vmatpush3.msra.mxu1 %v1794_v43  ;;  %2209 = vmatpush3.msra.mxu0 %v1826_v45 }
 0xc3e   : > { %2175 = vmatprep.subr.mxu1 %v1809_v46  ;;  %2210 = vmatprep.subr.mxu0 %v1841_v47 }
 0xc3f   : > { %2176 = vmatpush3.msra.mxu1 %v1793_v48  ;;  %2211 = vmatpush3.msra.mxu0 %v1825_v49 }
 0xc40   : > { %2177 = vmatprep.subr.mxu1 %v1808_v23  ;;  %2212 = vmatprep.subr.mxu0 %v1840_v4 }
 0xc41   : > { %2178 = vmatpush3.msra.mxu1 %v1792_v53  ;;  %2213 = vmatpush3.msra.mxu0 %v1824_v44 }
 0xc42   : > { %2179 = vmatprep.subr.mxu1 %v1807_v55  ;;  %2214 = vmatprep.subr.mxu0 %v1839_v56 }
 0xc43   : > { %2180 = vmatpush3.msra.mxu1 %v1791_v57  ;;  %2215 = vmatpush3.msra.mxu0 %v1823_v58 }
 0xc44   : > { %2181 = vmatprep.subr.mxu1 %v1806_v59  ;;  %2216 = vmatprep.subr.mxu0 %v1838_v62 }
 0xc45   : > { %2182 = vmatpush3.msra.mxu1 %v1790_v63  ;;  %2217 = vmatpush3.msra.mxu0 %v1822_v1 }
 0xc46   : > { %2183 = vmatprep.subr.mxu1 %v1805_v60  ;;  %2218 = vmatprep.subr.mxu0 %v1837_v2 }
 0xc47   : > { %2184 = vmatpush3.msra.mxu1 %v1789_v5  ;;  %2219 = vmatpush3.msra.mxu0 %v1821_v6 }
 0xc48   : > { %2185 = vmatprep.subr.mxu1 %v1804_v9  ;;  %2220 = vmatprep.subr.mxu0 %v1836_v11 }
 0xc49   : > { %2186 = vmatpush3.msra.mxu1 %v1788_v50  ;;  %2221 = vmatpush3.msra.mxu0 %v1820_v12 }
 0xc4a   : > { %2187 = vmatprep.subr.mxu1 %v1803_v13  ;;  %2222 = vmatprep.subr.mxu0 %v1835_v14 }
 0xc4b   : > { %2188 = vmatpush3.msra.mxu1 %v1787_v8  ;;  %2223 = vmatpush3.msra.mxu0 %v1819_v15 }
 0xcec   : > { %v1603_v19 = vpop.f32.mrf.mxu1  ;;  %v1674_v20 = vpop.f32.mrf.mxu0 }
 0xced   : > { %v3259_v24 = vadd.f32 %v1603_v19, %v1520_v0  ;;  %v3261_v25 = vadd.f32 %v1674_v20, %v1528_v18 }
 0xcee   : > { %v1605_v26 = vpop.f32.mrf.mxu1  ;;  %v1676_v27 = vpop.f32.mrf.mxu0 }
 0xcef   : > { %v3264_v28 = vmul.f32 0.70710677, %v3259_v24  ;;  %v3267_v54 = vmul.f32 0.70710677, %v3261_v25  ;;  %v3269_v29 = vadd.f32 %v1605_v26, %v1524_v21  ;;  %v3271_v61 = vadd.f32 %v1676_v27, %v1532_v22 }
 0xcf1   : > { %v1687_v51 = vand.u32 2147483647, %v3264_v28  ;;  %v1689_v52 = vand.u32 2147483647, %v3267_v54  ;;  %v3276_v30 = vmul.f32 0.70710677, %v3269_v29 }
 0xcf2   : > { %v3279_v31 = vmul.f32 0.70710677, %v3271_v61  ;;  %vm1767_vm9 = vcmp.lt.f32.partialorder %v3264_v28, 0.0  ;;  %vm1769_vm10 = vcmp.lt.f32.partialorder %v3267_v54, 0.0  ;;  %v1679_v28 = vmul.f32 0.5, %v3259_v24 }
 0xcf3   : > { %v1691_v32 = vmul.f32 0.3275911, %v1687_v51  ;;  %v1693_v33 = vmul.f32 0.3275911, %v1689_v52  ;;  %v1688_v34 = vand.u32 2147483647, %v3276_v30  ;;  %v1743_v42 = vmul.f32 %v1687_v51, %v1687_v51 }
 0xcf4   : > { %v1690_v35 = vand.u32 2147483647, %v3279_v31  ;;  %v1745_v43 = vmul.f32 %v1689_v52, %v1689_v52  ;;  %vm1768_vm11 = vcmp.lt.f32.partialorder %v3276_v30, 0.0  ;;  %vm1770_vm12 = vcmp.lt.f32.partialorder %v3279_v31, 0.0  ;;  %v2104_v24 = vld [vmem:[%s3316_s11] ss:$0 sm:$0xff] }
 0xcf5   : > { %v1695_v36 = vadd.f32 1.0, %v1691_v32  ;;  %v1697_v37 = vadd.f32 1.0, %v1693_v33  ;;  %v1692_v38 = vmul.f32 0.3275911, %v1688_v34  ;;  %v1747_v45 = vsub.f32 0.0, %v1743_v42 }
 0xcf6   : > { %v1694_v39 = vmul.f32 0.3275911, %v1690_v35  ;;  %v1744_v46 = vmul.f32 %v1688_v34, %v1688_v34  ;;  %v1749_v47 = vsub.f32 0.0, %v1745_v43  ;;  %v1746_v48 = vmul.f32 %v1690_v35, %v1690_v35 }
 0xcf7   : > { %2371 = vrcp.f32 %v1695_v36  ;;  %v1696_v40 = vadd.f32 1.0, %v1692_v38  ;;  %v1751_v53 = vmul.f32 1.442695, %v1747_v45 }
 0xcf8   : > { %2373 = vrcp.f32 %v1697_v37  ;;  %v1698_v41 = vadd.f32 1.0, %v1694_v39  ;;  %v1748_v44 = vsub.f32 0.0, %v1744_v46  ;;  %v1755_v56 = vmul.f32 1.442695, %v1749_v47 }
 0xcf9   : > { %2375 = vrcp.f32 %v1696_v40  ;;  %v1750_v57 = vsub.f32 0.0, %v1746_v48 }
 0xcfa   : > { %2377 = vrcp.f32 %v1698_v41  ;;  %v1753_v1 = vmul.f32 1.442695, %v1748_v44 }
 0xcfb   : > { %2379 = vpow2.f32 %v1751_v53  ;;  %v1757_v6 = vmul.f32 1.442695, %v1750_v57 }
 0xcfc   : > { %2381 = vpow2.f32 %v1755_v56 }
 0xcfd   : > { %2383 = vpow2.f32 %v1753_v1 }
 0xcfe   : > { %2385 = vpow2.f32 %v1757_v6 }
 0xd04   : > { %v2372_v49 = vpop.eup %2371 }
 0xd05   : > { %v2374_v23 = vpop.eup %2373  ;;  %v1707_v4 = vmul.f32 1.0614054, %v2372_v49 }
 0xd06   : > { %v1709_v55 = vmul.f32 1.0614054, %v2374_v23  ;;  %v2376_v59 = vpop.eup %2375 }
 0xd07   : > { %v1711_v58 = vadd.f32 -1.4531521, %v1707_v4  ;;  %v1708_v60 = vmul.f32 1.0614054, %v2376_v59  ;;  %v2378_v2 = vpop.eup %2377 }
 0xd08   : > { %v1713_v62 = vadd.f32 -1.4531521, %v1709_v55  ;;  %v1710_v50 = vmul.f32 1.0614054, %v2378_v2  ;;  %v2380_v35 = vpop.eup %2379 }
 0xd09   : > { %v1715_v63 = vmul.f32 %v2372_v49, %v1711_v58  ;;  %v1712_v11 = vadd.f32 -1.4531521, %v1708_v60  ;;  %v2382_v37 = vpop.eup %2381  ;;  %v1680_v60 = vmul.f32 0.5, %v3269_v29 }
 0xd0a   : > { %v1717_v5 = vmul.f32 %v2374_v23, %v1713_v62  ;;  %v1714_v8 = vadd.f32 -1.4531521, %v1710_v50  ;;  %v2384_v46 = vpop.eup %2383 }
 0xd0b   : > { %v1719_v9 = vadd.f32 1.4214138, %v1715_v63  ;;  %v1716_v14 = vmul.f32 %v2376_v59, %v1712_v11  ;;  %v2386_v44 = vpop.eup %2385 }
 0xd0c   : > { %v1721_v12 = vadd.f32 1.4214138, %v1717_v5  ;;  %v1718_v0 = vmul.f32 %v2378_v2, %v1714_v8 }
 0xd0d   : > { %v1723_v13 = vmul.f32 %v2372_v49, %v1719_v9  ;;  %v1720_v17 = vadd.f32 1.4214138, %v1716_v14  ;;  %v1682_v9 = vmul.f32 0.5, %v3271_v61 }
 0xd0e   : > { %v1725_v15 = vmul.f32 %v2374_v23, %v1721_v12  ;;  %v1722_v21 = vadd.f32 1.4214138, %v1718_v0  ;;  %v1681_v12 = vmul.f32 0.5, %v3261_v25 }
 0xd0f   : > { %v1727_v16 = vadd.f32 -0.28449672, %v1723_v13  ;;  %v1724_v20 = vmul.f32 %v2376_v59, %v1720_v17 }
 0xd10   : > { %v1729_v18 = vadd.f32 -0.28449672, %v1725_v15  ;;  %v1726_v51 = vmul.f32 %v2378_v2, %v1722_v21 }
 0xd11   : > { %v1731_v19 = vmul.f32 %v2372_v49, %v1727_v16  ;;  %v1728_v27 = vadd.f32 -0.28449672, %v1724_v20 }
 0xd12   : > { %v1733_v22 = vmul.f32 %v2374_v23, %v1729_v18  ;;  %v1730_v34 = vadd.f32 -0.28449672, %v1726_v51 }
 0xd13   : > { %v1735_v26 = vadd.f32 0.2548296, %v1731_v19  ;;  %v1732_v33 = vmul.f32 %v2376_v59, %v1728_v27 }
 0xd14   : > { %v1737_v52 = vadd.f32 0.2548296, %v1733_v22  ;;  %v1734_v40 = vmul.f32 %v2378_v2, %v1730_v34 }
 0xd15   : > { %v1739_v32 = vmul.f32 %v2372_v49, %v1735_v26  ;;  %v1736_v39 = vadd.f32 0.2548296, %v1732_v33 }
 0xd16   : > { %v1741_v36 = vmul.f32 %v2374_v23, %v1737_v52  ;;  %v1738_v45 = vadd.f32 0.2548296, %v1734_v40 }
 0xd17   : > { %v1759_v38 = vmul.f32 %v2380_v35, %v1739_v32  ;;  %v1740_v43 = vmul.f32 %v2376_v59, %v1736_v39 }
 0xd18   : > { %v1761_v41 = vmul.f32 %v2382_v37, %v1741_v36  ;;  %v1742_v53 = vmul.f32 %v2378_v2, %v1738_v45 }
 0xd19   : > { %v1763_v42 = vsub.f32 1.0, %v1759_v38  ;;  %v1760_v4 = vmul.f32 %v2384_v46, %v1740_v43 }
 0xd1a   : > { %v1765_v47 = vsub.f32 1.0, %v1761_v41  ;;  %v1762_v56 = vmul.f32 %v2386_v44, %v1742_v53 }
 0xd1b   : > { %v1771_v48 = vsub.f32 0.0, %v1763_v42  ;;  %v1764_v49 = vsub.f32 1.0, %v1760_v4 }
 0xd1c   : > { %v1773_v55 = vsub.f32 0.0, %v1765_v47  ;;  %v1766_v58 = vsub.f32 1.0, %v1762_v56 }
 0xd1d   : > { %v1775_v23 = vsel %vm1767_vm9, %v1771_v48, %v1763_v42  ;;  %v1772_v57 = vsub.f32 0.0, %v1764_v49 }
 0xd1e   : > { %v1777_v62 = vsel %vm1769_vm10, %v1773_v55, %v1765_v47  ;;  %v1779_v59 = vadd.f32 1.0, %v1775_v23  ;;  %v1774_v1 = vsub.f32 0.0, %v1766_v58 }
 0xd1f   : > { %v1776_v63 = vsel %vm1768_vm11, %v1772_v57, %v1764_v49  ;;  %v1781_v5 = vadd.f32 1.0, %v1777_v62 }
 0xd20   : > { %v1780_v2 = vadd.f32 1.0, %v1776_v63  ;;  %v1778_v6 = vsel %vm1770_vm12, %v1774_v1, %v1766_v58  ;;  %v1783_v50 = vmul.f32 %v1779_v59, %v1679_v28 }
 0xd21   : > { %v1782_v11 = vadd.f32 1.0, %v1778_v6  ;;  %v1785_v13 = vmul.f32 %v1781_v5, %v1681_v12 }
 0xd22   : > { %v1784_v54 = vmul.f32 %v1780_v2, %v1680_v60 }
 0xd23   : > { %v1786_v30 = vmul.f32 %v1782_v11, %v1682_v9 }
 0xd24   : > { %1922 = vmatprep.mubr.f32.mxu1 %v1784_v54 }
 0xd25   : > { %1923 = vmatmul.mubr.f32.vlgmr.msra.gmra.mxu1 %v1783_v50  ;;  %1992 = vmatprep.mubr.f32.mxu0 %v1786_v30 }
 0xd26   : > { %1993 = vmatmul.mubr.f32.vlgmr.msra.gmra.mxu0 %v1785_v13 }
 0xde5   : > { %v2189_v29 = vpop.f32.mrf.mxu1 }
 0xde6   : > { %v2224_v31 = vpop.f32.mrf.mxu0 }
 0xde7   : > { %v2190_v14 = vpop.f32.mrf.mxu1 }
 0xde8   : > { %v2191_v8 = vadd.f32 %v2190_v14, %v2189_v29  ;;  %v2225_v61 = vpop.f32.mrf.mxu0 }
 0xde9   : > { %v2226_v16 = vadd.f32 %v2225_v61, %v2224_v31 }
 0xdea   : > { %v1925_v15 = vadd.f32 %v2191_v8, %v2104_v24 }
 0xdec   : > { %v1995_v17 = vadd.f32 %v2226_v16, %v1925_v15 }
 0xdee   : > { %v1998_v25 = vadd.f32 %v1995_v17, %v3054_v10 }
 0xdf0   : > { %1999 = vadd.xlane.f32.xlu1 %v1998_v25 }
 0xe79   : > { %v2000_v0 = vpop.xlane.xlu1 %1999 }
 0xe7a   : > { %v2001_v18 = vmul.f32 0.0078125, %v2000_v0 }
 0xe7c   : > { %v2002_v19 = vsub.f32 %v1998_v25, %v2001_v18 }
 0xe7e   : > { %v2003_v20 = vmul.f32 %v2002_v19, %v2002_v19  ;;  %v2007_v10 = vmul.f32 %v3044_v3, %v2002_v19 }
 0xe80   : > { %2004 = vadd.xlane.f32.xlu1 %v2003_v20 }
 0xf09   : > { %v2005_v21 = vpop.xlane.xlu1 %2004 }
 0xf0a   : > { %v2006_v22 = vmul.f32 0.007874016, %v2005_v21 }
 0xf0c   : > { %2387 = vrsqrt.f32 %v2006_v22  ;;  %vm2010_vm13 = vcmp.eq.f32.partialorder %v2006_v22, inf  ;;  %v2013_v51 = vand.u32 2147483648, %v2006_v22  ;;  %vm2012_vm14 = vcmp.eq.f32.partialorder %v2006_v22, 0.0 }
 0xf19   : > { %v2388_v26 = vpop.eup %2387 }
 0xf1a   : > { %v2009_v27 = vmul.f32 %v2388_v26, %v2006_v22 }
 0xf1c   : > { %v2011_v52 = vsel %vm2010_vm13, %v2006_v22, %v2009_v27 }
 0xf1d   : > { %v2014_v32 = vsel %vm2012_vm14, %v2013_v51, %v2011_v52 }
 0xf1e   : > { %v2015_v33 = vadd.f32 1e-06, %v2014_v32 }
 0xf20   : > { %2389 = vrcp.f32 %v2015_v33 }
 0xf2d   : > { %v2390_v34 = vpop.eup %2389 }
 0xf2e   : > { %v2017_v35 = vmul.f32 %v2390_v34, %v2007_v10 }
 0xf30   : > { %v2018_v36 = vadd.f32 %v3051_v7, %v2017_v35 }
 0xf32   : > { %2019 = vst [vmem:[%s422_s19] sm:$0xff] %v2018_v36 }
 0xf33 PF: > { %s22_s21 = sadd.s32 1, %s2397_s21  }
 0xf34   : > { %p19_p4 = scmp.ge.s32.totalorder %s22_s21, 4  }
 0xf36   :  { %21 = sbr.rel (!%p19_p4) target bundleno = 1 (0x1), region = 101 }

</bundles_post_ra>
